<compile_context>
chip_gen: v7x
topology: tpu7x:2x2x1
jax: 0.10.0
libtpu: 0.0.40
codegen_flags: <defaults>
</compile_context>

<pallas_src>
import functools

import jax
import jax.numpy as jnp
from jax.experimental import pallas as pl
from jax.experimental.pallas import tpu as pltpu

_NEG_BIG = -1.0e30  # bf16-representable stand-in for -inf in the max-pool pad


def _round_up(v, m):
    return (v + m - 1) // m * m


# ------------------------------ Pallas kernel -------------------------------

def _inception_kernel(xpf_ref, mask_ref, wcat_ref, bcat_ref,
                      w23_ref, b23_ref, w4_ref, b4_ref,
                      out_ref,
                      t23s_ref, xps_ref,
                      *, Wp, Mp, G, c2030):
    """One batch image per grid step.  Spatial dims are flattened: row
    p = i*Wp + j of the zero-padded (and width-padded-to-8) image."""
    x = xpf_ref[...]                     # (Mp, Cin) bf16, zero-padded image
    m = mask_ref[...] > 0.0              # (Mp, 1)  True on interior pixels
    L = t23s_ref.shape[0]

    # --- zero only the guard bands; interior is fully rewritten below -------
    zg23 = jnp.zeros((G, t23s_ref.shape[-1]), t23s_ref.dtype)
    zgx = jnp.zeros((G, xps_ref.shape[-1]), xps_ref.dtype)
    t23s_ref[0:G, :] = zg23
    t23s_ref[G + Mp:L, :] = zg23
    xps_ref[0:G, :] = zgx
    xps_ref[G + Mp:L, :] = zgx
    # NOTE: zero (not -BIG) guard rows only affect output rows in the cropped
    # padding ring, so the max-pool of interior pixels is unaffected.

    # --- fused 1x1 convolutions: [W2_1 | W3_1 | W1] in one MXU pass ---------
    u = jnp.dot(x, wcat_ref[...], preferred_element_type=jnp.float32)
    u = jnp.maximum(u + bcat_ref[...], 0.0)            # (Mp, c20+c30+c1) f32

    # --- stage halo'd operands for the 9 shifted taps (bf16 scratch) --------
    # conv input: ring rows must be exactly 0; pool input: ring rows = -BIG.
    t23s_ref[G:G + Mp, :] = jnp.where(m, u[:, :c2030], 0.0
                                      ).astype(t23s_ref.dtype)
    xps_ref[G:G + Mp, :] = jnp.where(m, x, jnp.asarray(_NEG_BIG, x.dtype))

    cin = x.shape[-1]
    acc23 = jnp.zeros((Mp, w23_ref.shape[-1]), jnp.float32)
    pooled = jnp.full((Mp, cin), _NEG_BIG, x.dtype)

    # --- 9 shifted taps: fused (b2|b3) 3x3 conv + 3x3 maxpool ---------------
    for di in range(3):
        for dj in range(3):
            o = di * 3 + dj
            s = G + (di - 1) * Wp + (dj - 1)            # static row offset
            acc23 = acc23 + jnp.dot(t23s_ref[s:s + Mp, :], w23_ref[o],
                                    preferred_element_type=jnp.float32)
            pooled = jnp.maximum(pooled, xps_ref[s:s + Mp, :])

    b23 = jnp.maximum(acc23 + b23_ref[...], 0.0)        # [b2 | b3]
    # kill the -BIG sentinels on the (cropped) ring rows before the dot
    pooled = jnp.where(m, pooled, jnp.zeros((), pooled.dtype))
    b4 = jnp.dot(pooled, w4_ref[...], preferred_element_type=jnp.float32)
    b4 = jnp.maximum(b4 + b4_ref[...], 0.0)
    b1 = u[:, c2030:]

    # --- single full-width lane-dense store (concat stays in vregs/VMEM) ----
    out_ref[...] = jnp.concatenate([b1, b23, b4], axis=-1).astype(out_ref.dtype)


# ------------------------------ weight prep ---------------------------------

def _w1x1(w):      # torch (Cout, Cin, 1, 1) -> (Cin, Cout)
    cout, cin = w.shape[0], w.shape[1]
    return w.reshape(cout, cin).T


def _w3x3(w):      # torch (Cout, Cin, 3, 3) -> (9, Cin, Cout), tap = kh*3+kw
    cout, cin = w.shape[0], w.shape[1]
    return jnp.transpose(w, (2, 3, 1, 0)).reshape(9, cin, cout)


def _vmem_limit_bytes(Mp, L, Cin, ccat, c2030, c2131, c4, ctot):
    """Rough per-step VMEM footprint (double-buffered I/O blocks, resident
    weights, halo scratch) -> v7x-friendly limit, capped at 32 MiB."""
    lane = lambda c: _round_up(c, 128)
    est = (
        2 * _round_up(Mp, 16) * lane(Cin) * 2           # xpf block (bf16) x2
        + 2 * _round_up(Mp, 8) * lane(ctot) * 4         # out block (f32)  x2
        + _round_up(Mp, 8) * lane(1) * 4                # mask (resident)
        + _round_up(Cin, 16) * lane(ccat) * 2           # wcat
        + 9 * _round_up(c2030, 16) * lane(c2131) * 2    # fused 3x3 weights
        + _round_up(Cin, 16) * lane(c4) * 2             # w4
        + _round_up(L, 16) * lane(c2030) * 2            # conv halo scratch
        + _round_up(L, 16) * lane(Cin) * 2              # pool halo scratch
    )
    return int(min(32 * 2 ** 20, max(8 * 2 ** 20, 2 * est)))


# ------------------------------ forward pass --------------------------------

def inception_forward(x_nchw, p):
    """Pallas implementation of GoogleNetInception.forward.  In/out NCHW."""
    x = jnp.transpose(x_nchw, (0, 2, 3, 1)).astype(jnp.float32)   # NHWC
    N, H, W, Cin = x.shape
    Hp = H + 2
    Wp = _round_up(W + 2, 8)        # width padded to sublanes (aligned taps)
    Mp = Hp * Wp
    G = _round_up(Wp + 1, 8)        # halo guard rows, sublane-rounded
    L = Mp + 2 * G

    c1 = p["b1_w"].shape[0]
    c20, c21 = p["b2_1_w"].shape[0], p["b2_2_w"].shape[0]
    c30, c31 = p["b3_1_w"].shape[0], p["b3_2_w"].shape[0]
    c4 = p["b4_w"].shape[0]
    c2030, c2131 = c20 + c30, c21 + c31
    ccat = c2030 + c1
    ctot = c1 + c2131 + c4

    # one cheap zero-pad + flatten pass over x (serves conv, pool, 1x1 alike)
    xpf = jnp.pad(x, ((0, 0), (1, 1), (1, Wp - W - 1), (0, 0)))
    xpf = xpf.reshape(N, Mp, Cin).astype(jnp.bfloat16)

    idx = jnp.arange(Mp)
    r, c = idx // Wp, idx % Wp
    mask = (((r >= 1) & (r <= H) & (c >= 1) & (c <= W))
            .astype(jnp.float32).reshape(Mp, 1))

    # fused 1x1 weights, ordered [b2_1 | b3_1 | b1] (3x3 slice lane-aligned)
    wcat = jnp.concatenate(
        [_w1x1(p["b2_1_w"]), _w1x1(p["b3_1_w"]), _w1x1(p["b1_w"])],
        axis=1).astype(jnp.bfloat16)
    bcat = jnp.concatenate(
        [p["b2_1_b"], p["b3_1_b"], p["b1_b"]]).reshape(1, ccat)
    bcat = bcat.astype(jnp.float32)

    # block-diagonal per-tap weights: branches 2 and 3 fused into one 3x3 conv
    w22 = _w3x3(p["b2_2_w"])                   # (9, c20, c21)
    w32 = _w3x3(p["b3_2_w"])                   # (9, c30, c31)
    w23 = jnp.zeros((9, c2030, c2131), jnp.float32)
    w23 = w23.at[:, :c20, :c21].set(w22).at[:, c20:, c21:].set(w32)
    w23 = w23.astype(jnp.bfloat16)
    b23 = jnp.concatenate([p["b2_2_b"], p["b3_2_b"]]).reshape(1, c2131)
    b23 = b23.astype(jnp.float32)

    w4 = _w1x1(p["b4_w"]).astype(jnp.bfloat16)
    b4 = p["b4_b"].reshape(1, c4).astype(jnp.float32)

    kernel = functools.partial(_inception_kernel,
                               Wp=Wp, Mp=Mp, G=G, c2030=c2030)

    out_flat = pl.pallas_call(
        kernel,
        out_shape=jax.ShapeDtypeStruct((N, Mp, ctot), jnp.float32),
        grid_spec=pltpu.PrefetchScalarGridSpec(
            num_scalar_prefetch=0,
            grid=(N,),
            in_specs=[
                pl.BlockSpec((None, Mp, Cin), lambda n: (n, 0, 0)),
                pl.BlockSpec((Mp, 1), lambda n: (0, 0)),
                pl.BlockSpec((Cin, ccat), lambda n: (0, 0)),
                pl.BlockSpec((1, ccat), lambda n: (0, 0)),
                pl.BlockSpec((9, c2030, c2131), lambda n: (0, 0, 0)),
                pl.BlockSpec((1, c2131), lambda n: (0, 0)),
                pl.BlockSpec((Cin, c4), lambda n: (0, 0)),
                pl.BlockSpec((1, c4), lambda n: (0, 0)),
            ],
            out_specs=pl.BlockSpec((None, Mp, ctot), lambda n: (n, 0, 0)),
            scratch_shapes=[
                pltpu.VMEM((L, c2030), jnp.bfloat16),   # fused b2|b3 halo
                pltpu.VMEM((L, Cin), jnp.bfloat16),     # max-pool halo
            ]),
        compiler_params=pltpu.CompilerParams(
            dimension_semantics=("parallel",),
            vmem_limit_bytes=_vmem_limit_bytes(
                Mp, L, Cin, ccat, c2030, c2131, c4, ctot)),
    )(xpf, mask, wcat, bcat, w23, b23, w4, b4)

    # drop the padding ring, back to NCHW (the branch concat already happened
    # inside the kernel via a single full-width store).
    out = out_flat.reshape(N, Hp, Wp, ctot)[:, 1:H + 1, 1:W + 1, :]
    return jnp.transpose(out, (0, 3, 1, 2))


# ------------------------------ params / reference --------------------------

def init_params(key, in_c, c1, c2, c3, c4):
    ks = jax.random.split(key, 12)

    def w(k, shape):
        return (0.1 * jax.random.normal(k, shape)).astype(jnp.float32)

    return {
        "b1_w": w(ks[0], (c1, in_c, 1, 1)),   "b1_b": w(ks[1], (c1,)),
        "b2_1_w": w(ks[2], (c2[0], in_c, 1, 1)), "b2_1_b": w(ks[3], (c2[0],)),
        "b2_2_w": w(ks[4], (c2[1], c2[0], 3, 3)), "b2_2_b": w(ks[5], (c2[1],)),
        "b3_1_w": w(ks[6], (c3[0], in_c, 1, 1)), "b3_1_b": w(ks[7], (c3[0],)),
        "b3_2_w": w(ks[8], (c3[1], c3[0], 3, 3)), "b3_2_b": w(ks[9], (c3[1],)),
        "b4_w": w(ks[10], (c4, in_c, 1, 1)),  "b4_b": w(ks[11], (c4,)),
    }


def _ref_forward(x_nchw, p):
    x = jnp.transpose(x_nchw, (0, 2, 3, 1))

    def conv(inp, w, b, pad):
        hwio = jnp.transpose(w, (2, 3, 1, 0))
        y = jax.lax.conv_general_dilated(
            inp, hwio, window_strides=(1, 1), padding=pad,
            dimension_numbers=("NHWC", "HWIO", "NHWC"))
        return y + b

    relu = lambda v: jnp.maximum(v, 0.0)
    b1 = relu(conv(x, p["b1_w"], p["b1_b"], "VALID"))
    b2 = relu(conv(relu(conv(x, p["b2_1_w"], p["b2_1_b"], "VALID")),
                   p["b2_2_w"], p["b2_2_b"], [(1, 1), (1, 1)]))
    b3 = relu(conv(relu(conv(x, p["b3_1_w"], p["b3_1_b"], "VALID")),
                   p["b3_2_w"], p["b3_2_b"], [(1, 1), (1, 1)]))
    pooled = jax.lax.reduce_window(
        x, -jnp.inf, jax.lax.max, (1, 3, 3, 1), (1, 1, 1, 1),
        [(0, 0), (1, 1), (1, 1), (0, 0)])
    b4 = relu(conv(pooled, p["b4_w"], p["b4_b"], "VALID"))
    out = jnp.concatenate([b1, b2, b3, b4], axis=-1)
    return jnp.transpose(out, (0, 3, 1, 2))


# ----------------------------------- main ------------------------------------

if __name__ == "__main__":
    key = jax.random.PRNGKey(0)
    k_x, k_p = jax.random.split(key)

    # small shapes: N=2, Cin=4, H=W=16; c1=4, c2=(4,8), c3=(4,8), c4=4
    x = jax.random.normal(k_x, (2, 4, 16, 16), dtype=jnp.float32)
    params = init_params(k_p, in_c=4, c1=4, c2=(4, 8), c3=(4, 8), c4=4)

    fwd = jax.jit(inception_forward)
    out = jax.block_until_ready(fwd(x, params))
    assert out.shape == (2, 4 + 8 + 8 + 4, 16, 16), out.shape

    ref = jax.block_until_ready(_ref_forward(x, params))
    err = float(jnp.max(jnp.abs(out - ref)))
    # bf16 matmul inputs (f32 accumulation) vs the f32 reference -> a few 1e-3
    assert jnp.allclose(out, ref, rtol=3e-2, atol=3e-2), err

    print("KERNEL_OK")
</pallas_src>

<mosaic_0001>
module attributes {stable_mosaic.version = 11 : i64} {
  func.func @_inception_kernel(%arg0: i32, %arg1: memref<1x432x4xbf16, #tpu.memory_space<vmem>>, %arg2: memref<432x1xf32, #tpu.memory_space<vmem>>, %arg3: memref<4x12xbf16, #tpu.memory_space<vmem>>, %arg4: memref<1x12xf32, #tpu.memory_space<vmem>>, %arg5: memref<9x8x16xbf16, #tpu.memory_space<vmem>>, %arg6: memref<1x16xf32, #tpu.memory_space<vmem>>, %arg7: memref<4x4xbf16, #tpu.memory_space<vmem>>, %arg8: memref<1x4xf32, #tpu.memory_space<vmem>>, %arg9: memref<1x432x24xf32, #tpu.memory_space<vmem>>, %arg10: memref<496x8xbf16, #tpu.memory_space<vmem>>, %arg11: memref<496x4xbf16, #tpu.memory_space<vmem>>) attributes {dimension_semantics = [#tpu.dimension_semantics<parallel>], iteration_bounds = array<i64: 2>, scalar_prefetch = 0 : i64, scratch_operands = 2 : i64, tpu.core_type = #tpu.core_type<tc>, window_params = [{transform_indices = @transform_0, window_bounds = array<i64: 1, 432, 4>}, {pipeline_mode = #tpu.pipeline_mode<synchronous>, transform_indices = @transform_1, window_bounds = array<i64: 432, 1>}, {pipeline_mode = #tpu.pipeline_mode<synchronous>, transform_indices = @transform_2, window_bounds = array<i64: 4, 12>}, {pipeline_mode = #tpu.pipeline_mode<synchronous>, transform_indices = @transform_3, window_bounds = array<i64: 1, 12>}, {pipeline_mode = #tpu.pipeline_mode<synchronous>, transform_indices = @transform_4, window_bounds = array<i64: 9, 8, 16>}, {pipeline_mode = #tpu.pipeline_mode<synchronous>, transform_indices = @transform_5, window_bounds = array<i64: 1, 16>}, {pipeline_mode = #tpu.pipeline_mode<synchronous>, transform_indices = @transform_6, window_bounds = array<i64: 4, 4>}, {pipeline_mode = #tpu.pipeline_mode<synchronous>, transform_indices = @transform_7, window_bounds = array<i64: 1, 4>}, {transform_indices = @transform_8, window_bounds = array<i64: 1, 432, 24>}]} {
    %c0 = arith.constant 0 : index
    %c0_0 = arith.constant 0 : index
    %c0_1 = arith.constant 0 : index
    %0 = vector.load %arg1[%c0, %c0_0, %c0_1] : memref<1x432x4xbf16, #tpu.memory_space<vmem>>, vector<1x432x4xbf16>
    %1 = vector.shape_cast %0 : vector<1x432x4xbf16> to vector<432x4xbf16>
    %c0_2 = arith.constant 0 : index
    %c0_3 = arith.constant 0 : index
    %2 = vector.load %arg2[%c0_2, %c0_3] : memref<432x1xf32, #tpu.memory_space<vmem>>, vector<432x1xf32>
    %cst = arith.constant 0.000000e+00 : f32
    %3 = vector.broadcast %cst : f32 to vector<432x1xf32>
    %4 = arith.cmpf ogt, %2, %3 : vector<432x1xf32>
    %cst_4 = arith.constant 0.000000e+00 : bf16
    %5 = vector.broadcast %cst_4 : bf16 to vector<32x8xbf16>
    %cst_5 = arith.constant 0.000000e+00 : bf16
    %6 = vector.broadcast %cst_5 : bf16 to vector<32x4xbf16>
    %c0_6 = arith.constant 0 : index
    %c0_7 = arith.constant 0 : index
    %7 = vector.load %arg10[%c0_6, %c0_7] : memref<496x8xbf16, #tpu.memory_space<vmem>>, vector<32x8xbf16>
    tpu.vector_store %arg10[%c0_6, %c0_7], %5 {strides = array<i32>} : memref<496x8xbf16, #tpu.memory_space<vmem>>, vector<32x8xbf16>,
    %c464 = arith.constant 464 : index
    %c0_8 = arith.constant 0 : index
    %8 = vector.load %arg10[%c464, %c0_8] : memref<496x8xbf16, #tpu.memory_space<vmem>>, vector<32x8xbf16>
    tpu.vector_store %arg10[%c464, %c0_8], %5 {strides = array<i32>} : memref<496x8xbf16, #tpu.memory_space<vmem>>, vector<32x8xbf16>,
    %c0_9 = arith.constant 0 : index
    %c0_10 = arith.constant 0 : index
    %9 = vector.load %arg11[%c0_9, %c0_10] : memref<496x4xbf16, #tpu.memory_space<vmem>>, vector<32x4xbf16>
    tpu.vector_store %arg11[%c0_9, %c0_10], %6 {strides = array<i32>} : memref<496x4xbf16, #tpu.memory_space<vmem>>, vector<32x4xbf16>,
    %c464_11 = arith.constant 464 : index
    %c0_12 = arith.constant 0 : index
    %10 = vector.load %arg11[%c464_11, %c0_12] : memref<496x4xbf16, #tpu.memory_space<vmem>>, vector<32x4xbf16>
    tpu.vector_store %arg11[%c464_11, %c0_12], %6 {strides = array<i32>} : memref<496x4xbf16, #tpu.memory_space<vmem>>, vector<32x4xbf16>,
    %c0_13 = arith.constant 0 : index
    %c0_14 = arith.constant 0 : index
    %11 = vector.load %arg3[%c0_13, %c0_14] : memref<4x12xbf16, #tpu.memory_space<vmem>>, vector<4x12xbf16>
    %cst_15 = arith.constant dense<0.000000e+00> : vector<432x12xf32>
    %12 = tpu.matmul %1, %11, %cst_15 {dimension_numbers = #tpu.dot_dimension_numbers<[1], [0], [0], [1], [0, 0, 1, 1], [], []>} : vector<432x4xbf16>, vector<4x12xbf16>, vector<432x12xf32> -> vector<432x12xf32>
    %c0_16 = arith.constant 0 : index
    %c0_17 = arith.constant 0 : index
    %13 = vector.load %arg4[%c0_16, %c0_17] : memref<1x12xf32, #tpu.memory_space<vmem>>, vector<1x12xf32>
    %14 = vector.broadcast %13 : vector<1x12xf32> to vector<432x12xf32>
    %15 = arith.addf %12, %14 : vector<432x12xf32>
    %cst_18 = arith.constant 0.000000e+00 : f32
    %16 = vector.broadcast %cst_18 : f32 to vector<432x12xf32>
    %17 = arith.maximumf %15, %16 : vector<432x12xf32>
    %18 = vector.extract_strided_slice %17 {offsets = [0, 0], sizes = [432, 8], strides = [1, 1]} : vector<432x12xf32> to vector<432x8xf32>
    %cst_19 = arith.constant 0.000000e+00 : f32
    %19 = vector.shape_cast %4 : vector<432x1xi1> to vector<432x1xi1>
    %20 = vector.broadcast %19 : vector<432x1xi1> to vector<432x8xi1>
    %21 = vector.broadcast %cst_19 : f32 to vector<432x8xf32>
    %22 = arith.select %20, %18, %21 : vector<432x8xi1>, vector<432x8xf32>
    %23 = arith.truncf %22 : vector<432x8xf32> to vector<432x8xbf16>
    %c32 = arith.constant 32 : index
    %c0_20 = arith.constant 0 : index
    %24 = vector.load %arg10[%c32, %c0_20] : memref<496x8xbf16, #tpu.memory_space<vmem>>, vector<432x8xbf16>
    tpu.vector_store %arg10[%c32, %c0_20], %23 {strides = array<i32>} : memref<496x8xbf16, #tpu.memory_space<vmem>>, vector<432x8xbf16>,
    %cst_21 = arith.constant -1.000260e+30 : bf16
    %25 = vector.shape_cast %4 : vector<432x1xi1> to vector<432x1xi1>
    %26 = vector.broadcast %25 : vector<432x1xi1> to vector<432x4xi1>
    %27 = vector.broadcast %cst_21 : bf16 to vector<432x4xbf16>
    %28 = arith.select %26, %1, %27 : vector<432x4xi1>, vector<432x4xbf16>
    %c32_22 = arith.constant 32 : index
    %c0_23 = arith.constant 0 : index
    %29 = vector.load %arg11[%c32_22, %c0_23] : memref<496x4xbf16, #tpu.memory_space<vmem>>, vector<432x4xbf16>
    tpu.vector_store %arg11[%c32_22, %c0_23], %28 {strides = array<i32>} : memref<496x4xbf16, #tpu.memory_space<vmem>>, vector<432x4xbf16>,
    %cst_24 = arith.constant 0.000000e+00 : f32
    %30 = vector.broadcast %cst_24 : f32 to vector<432x16xf32>
    %cst_25 = arith.constant -1.000260e+30 : bf16
    %31 = vector.broadcast %cst_25 : bf16 to vector<432x4xbf16>
    %c7 = arith.constant 7 : index
    %c0_26 = arith.constant 0 : index
    %32 = vector.load %arg10[%c7, %c0_26] : memref<496x8xbf16, #tpu.memory_space<vmem>>, vector<432x8xbf16>
    %c0_27 = arith.constant 0 : index
    %c0_28 = arith.constant 0 : index
    %c0_29 = arith.constant 0 : index
    %33 = vector.load %arg5[%c0_27, %c0_28, %c0_29] : memref<9x8x16xbf16, #tpu.memory_space<vmem>>, vector<1x8x16xbf16>
    %34 = vector.shape_cast %33 : vector<1x8x16xbf16> to vector<8x16xbf16>
    %cst_30 = arith.constant dense<0.000000e+00> : vector<432x16xf32>
    %35 = tpu.matmul %32, %34, %cst_30 {dimension_numbers = #tpu.dot_dimension_numbers<[1], [0], [0], [1], [0, 0, 1, 1], [], []>} : vector<432x8xbf16>, vector<8x16xbf16>, vector<432x16xf32> -> vector<432x16xf32>
    %36 = arith.addf %30, %35 : vector<432x16xf32>
    %c7_31 = arith.constant 7 : index
    %c0_32 = arith.constant 0 : index
    %37 = vector.load %arg11[%c7_31, %c0_32] : memref<496x4xbf16, #tpu.memory_space<vmem>>, vector<432x4xbf16>
    %38 = arith.maximumf %31, %37 : vector<432x4xbf16>
    %c8 = arith.constant 8 : index
    %c0_33 = arith.constant 0 : index
    %39 = vector.load %arg10[%c8, %c0_33] : memref<496x8xbf16, #tpu.memory_space<vmem>>, vector<432x8xbf16>
    %c1 = arith.constant 1 : index
    %c0_34 = arith.constant 0 : index
    %c0_35 = arith.constant 0 : index
    %40 = vector.load %arg5[%c1, %c0_34, %c0_35] : memref<9x8x16xbf16, #tpu.memory_space<vmem>>, vector<1x8x16xbf16>
    %41 = vector.shape_cast %40 : vector<1x8x16xbf16> to vector<8x16xbf16>
    %cst_36 = arith.constant dense<0.000000e+00> : vector<432x16xf32>
    %42 = tpu.matmul %39, %41, %cst_36 {dimension_numbers = #tpu.dot_dimension_numbers<[1], [0], [0], [1], [0, 0, 1, 1], [], []>} : vector<432x8xbf16>, vector<8x16xbf16>, vector<432x16xf32> -> vector<432x16xf32>
    %43 = arith.addf %36, %42 : vector<432x16xf32>
    %c8_37 = arith.constant 8 : index
    %c0_38 = arith.constant 0 : index
    %44 = vector.load %arg11[%c8_37, %c0_38] : memref<496x4xbf16, #tpu.memory_space<vmem>>, vector<432x4xbf16>
    %45 = arith.maximumf %38, %44 : vector<432x4xbf16>
    %c9 = arith.constant 9 : index
    %c0_39 = arith.constant 0 : index
    %46 = vector.load %arg10[%c9, %c0_39] : memref<496x8xbf16, #tpu.memory_space<vmem>>, vector<432x8xbf16>
    %c2 = arith.constant 2 : index
    %c0_40 = arith.constant 0 : index
    %c0_41 = arith.constant 0 : index
    %47 = vector.load %arg5[%c2, %c0_40, %c0_41] : memref<9x8x16xbf16, #tpu.memory_space<vmem>>, vector<1x8x16xbf16>
    %48 = vector.shape_cast %47 : vector<1x8x16xbf16> to vector<8x16xbf16>
    %cst_42 = arith.constant dense<0.000000e+00> : vector<432x16xf32>
    %49 = tpu.matmul %46, %48, %cst_42 {dimension_numbers = #tpu.dot_dimension_numbers<[1], [0], [0], [1], [0, 0, 1, 1], [], []>} : vector<432x8xbf16>, vector<8x16xbf16>, vector<432x16xf32> -> vector<432x16xf32>
    %50 = arith.addf %43, %49 : vector<432x16xf32>
    %c9_43 = arith.constant 9 : index
    %c0_44 = arith.constant 0 : index
    %51 = vector.load %arg11[%c9_43, %c0_44] : memref<496x4xbf16, #tpu.memory_space<vmem>>, vector<432x4xbf16>
    %52 = arith.maximumf %45, %51 : vector<432x4xbf16>
    %c31 = arith.constant 31 : index
    %c0_45 = arith.constant 0 : index
    %53 = vector.load %arg10[%c31, %c0_45] : memref<496x8xbf16, #tpu.memory_space<vmem>>, vector<432x8xbf16>
    %c3 = arith.constant 3 : index
    %c0_46 = arith.constant 0 : index
    %c0_47 = arith.constant 0 : index
    %54 = vector.load %arg5[%c3, %c0_46, %c0_47] : memref<9x8x16xbf16, #tpu.memory_space<vmem>>, vector<1x8x16xbf16>
    %55 = vector.shape_cast %54 : vector<1x8x16xbf16> to vector<8x16xbf16>
    %cst_48 = arith.constant dense<0.000000e+00> : vector<432x16xf32>
    %56 = tpu.matmul %53, %55, %cst_48 {dimension_numbers = #tpu.dot_dimension_numbers<[1], [0], [0], [1], [0, 0, 1, 1], [], []>} : vector<432x8xbf16>, vector<8x16xbf16>, vector<432x16xf32> -> vector<432x16xf32>
    %57 = arith.addf %50, %56 : vector<432x16xf32>
    %c31_49 = arith.constant 31 : index
    %c0_50 = arith.constant 0 : index
    %58 = vector.load %arg11[%c31_49, %c0_50] : memref<496x4xbf16, #tpu.memory_space<vmem>>, vector<432x4xbf16>
    %59 = arith.maximumf %52, %58 : vector<432x4xbf16>
    %c32_51 = arith.constant 32 : index
    %c0_52 = arith.constant 0 : index
    %60 = vector.load %arg10[%c32_51, %c0_52] : memref<496x8xbf16, #tpu.memory_space<vmem>>, vector<432x8xbf16>
    %c4 = arith.constant 4 : index
    %c0_53 = arith.constant 0 : index
    %c0_54 = arith.constant 0 : index
    %61 = vector.load %arg5[%c4, %c0_53, %c0_54] : memref<9x8x16xbf16, #tpu.memory_space<vmem>>, vector<1x8x16xbf16>
    %62 = vector.shape_cast %61 : vector<1x8x16xbf16> to vector<8x16xbf16>
    %cst_55 = arith.constant dense<0.000000e+00> : vector<432x16xf32>
    %63 = tpu.matmul %60, %62, %cst_55 {dimension_numbers = #tpu.dot_dimension_numbers<[1], [0], [0], [1], [0, 0, 1, 1], [], []>} : vector<432x8xbf16>, vector<8x16xbf16>, vector<432x16xf32> -> vector<432x16xf32>
    %64 = arith.addf %57, %63 : vector<432x16xf32>
    %c32_56 = arith.constant 32 : index
    %c0_57 = arith.constant 0 : index
    %65 = vector.load %arg11[%c32_56, %c0_57] : memref<496x4xbf16, #tpu.memory_space<vmem>>, vector<432x4xbf16>
    %66 = arith.maximumf %59, %65 : vector<432x4xbf16>
    %c33 = arith.constant 33 : index
    %c0_58 = arith.constant 0 : index
    %67 = vector.load %arg10[%c33, %c0_58] : memref<496x8xbf16, #tpu.memory_space<vmem>>, vector<432x8xbf16>
    %c5 = arith.constant 5 : index
    %c0_59 = arith.constant 0 : index
    %c0_60 = arith.constant 0 : index
    %68 = vector.load %arg5[%c5, %c0_59, %c0_60] : memref<9x8x16xbf16, #tpu.memory_space<vmem>>, vector<1x8x16xbf16>
    %69 = vector.shape_cast %68 : vector<1x8x16xbf16> to vector<8x16xbf16>
    %cst_61 = arith.constant dense<0.000000e+00> : vector<432x16xf32>
    %70 = tpu.matmul %67, %69, %cst_61 {dimension_numbers = #tpu.dot_dimension_numbers<[1], [0], [0], [1], [0, 0, 1, 1], [], []>} : vector<432x8xbf16>, vector<8x16xbf16>, vector<432x16xf32> -> vector<432x16xf32>
    %71 = arith.addf %64, %70 : vector<432x16xf32>
    %c33_62 = arith.constant 33 : index
    %c0_63 = arith.constant 0 : index
    %72 = vector.load %arg11[%c33_62, %c0_63] : memref<496x4xbf16, #tpu.memory_space<vmem>>, vector<432x4xbf16>
    %73 = arith.maximumf %66, %72 : vector<432x4xbf16>
    %c55 = arith.constant 55 : index
    %c0_64 = arith.constant 0 : index
    %74 = vector.load %arg10[%c55, %c0_64] : memref<496x8xbf16, #tpu.memory_space<vmem>>, vector<432x8xbf16>
    %c6 = arith.constant 6 : index
    %c0_65 = arith.constant 0 : index
    %c0_66 = arith.constant 0 : index
    %75 = vector.load %arg5[%c6, %c0_65, %c0_66] : memref<9x8x16xbf16, #tpu.memory_space<vmem>>, vector<1x8x16xbf16>
    %76 = vector.shape_cast %75 : vector<1x8x16xbf16> to vector<8x16xbf16>
    %cst_67 = arith.constant dense<0.000000e+00> : vector<432x16xf32>
    %77 = tpu.matmul %74, %76, %cst_67 {dimension_numbers = #tpu.dot_dimension_numbers<[1], [0], [0], [1], [0, 0, 1, 1], [], []>} : vector<432x8xbf16>, vector<8x16xbf16>, vector<432x16xf32> -> vector<432x16xf32>
    %78 = arith.addf %71, %77 : vector<432x16xf32>
    %c55_68 = arith.constant 55 : index
    %c0_69 = arith.constant 0 : index
    %79 = vector.load %arg11[%c55_68, %c0_69] : memref<496x4xbf16, #tpu.memory_space<vmem>>, vector<432x4xbf16>
    %80 = arith.maximumf %73, %79 : vector<432x4xbf16>
    %c56 = arith.constant 56 : index
    %c0_70 = arith.constant 0 : index
    %81 = vector.load %arg10[%c56, %c0_70] : memref<496x8xbf16, #tpu.memory_space<vmem>>, vector<432x8xbf16>
    %c7_71 = arith.constant 7 : index
    %c0_72 = arith.constant 0 : index
    %c0_73 = arith.constant 0 : index
    %82 = vector.load %arg5[%c7_71, %c0_72, %c0_73] : memref<9x8x16xbf16, #tpu.memory_space<vmem>>, vector<1x8x16xbf16>
    %83 = vector.shape_cast %82 : vector<1x8x16xbf16> to vector<8x16xbf16>
    %cst_74 = arith.constant dense<0.000000e+00> : vector<432x16xf32>
    %84 = tpu.matmul %81, %83, %cst_74 {dimension_numbers = #tpu.dot_dimension_numbers<[1], [0], [0], [1], [0, 0, 1, 1], [], []>} : vector<432x8xbf16>, vector<8x16xbf16>, vector<432x16xf32> -> vector<432x16xf32>
    %85 = arith.addf %78, %84 : vector<432x16xf32>
    %c56_75 = arith.constant 56 : index
    %c0_76 = arith.constant 0 : index
    %86 = vector.load %arg11[%c56_75, %c0_76] : memref<496x4xbf16, #tpu.memory_space<vmem>>, vector<432x4xbf16>
    %87 = arith.maximumf %80, %86 : vector<432x4xbf16>
    %c57 = arith.constant 57 : index
    %c0_77 = arith.constant 0 : index
    %88 = vector.load %arg10[%c57, %c0_77] : memref<496x8xbf16, #tpu.memory_space<vmem>>, vector<432x8xbf16>
    %c8_78 = arith.constant 8 : index
    %c0_79 = arith.constant 0 : index
    %c0_80 = arith.constant 0 : index
    %89 = vector.load %arg5[%c8_78, %c0_79, %c0_80] : memref<9x8x16xbf16, #tpu.memory_space<vmem>>, vector<1x8x16xbf16>
    %90 = vector.shape_cast %89 : vector<1x8x16xbf16> to vector<8x16xbf16>
    %cst_81 = arith.constant dense<0.000000e+00> : vector<432x16xf32>
    %91 = tpu.matmul %88, %90, %cst_81 {dimension_numbers = #tpu.dot_dimension_numbers<[1], [0], [0], [1], [0, 0, 1, 1], [], []>} : vector<432x8xbf16>, vector<8x16xbf16>, vector<432x16xf32> -> vector<432x16xf32>
    %92 = arith.addf %85, %91 : vector<432x16xf32>
    %c57_82 = arith.constant 57 : index
    %c0_83 = arith.constant 0 : index
    %93 = vector.load %arg11[%c57_82, %c0_83] : memref<496x4xbf16, #tpu.memory_space<vmem>>, vector<432x4xbf16>
    %94 = arith.maximumf %87, %93 : vector<432x4xbf16>
    %c0_84 = arith.constant 0 : index
    %c0_85 = arith.constant 0 : index
    %95 = vector.load %arg6[%c0_84, %c0_85] : memref<1x16xf32, #tpu.memory_space<vmem>>, vector<1x16xf32>
    %96 = vector.broadcast %95 : vector<1x16xf32> to vector<432x16xf32>
    %97 = arith.addf %92, %96 : vector<432x16xf32>
    %cst_86 = arith.constant 0.000000e+00 : f32
    %98 = vector.broadcast %cst_86 : f32 to vector<432x16xf32>
    %99 = arith.maximumf %97, %98 : vector<432x16xf32>
    %cst_87 = arith.constant 0.000000e+00 : bf16
    %100 = vector.shape_cast %4 : vector<432x1xi1> to vector<432x1xi1>
    %101 = vector.broadcast %100 : vector<432x1xi1> to vector<432x4xi1>
    %102 = vector.broadcast %cst_87 : bf16 to vector<432x4xbf16>
    %103 = arith.select %101, %94, %102 : vector<432x4xi1>, vector<432x4xbf16>
    %c0_88 = arith.constant 0 : index
    %c0_89 = arith.constant 0 : index
    %104 = vector.load %arg7[%c0_88, %c0_89] : memref<4x4xbf16, #tpu.memory_space<vmem>>, vector<4x4xbf16>
    %cst_90 = arith.constant dense<0.000000e+00> : vector<432x4xf32>
    %105 = tpu.matmul %103, %104, %cst_90 {dimension_numbers = #tpu.dot_dimension_numbers<[1], [0], [0], [1], [0, 0, 1, 1], [], []>} : vector<432x4xbf16>, vector<4x4xbf16>, vector<432x4xf32> -> vector<432x4xf32>
    %c0_91 = arith.constant 0 : index
    %c0_92 = arith.constant 0 : index
    %106 = vector.load %arg8[%c0_91, %c0_92] : memref<1x4xf32, #tpu.memory_space<vmem>>, vector<1x4xf32>
    %107 = vector.broadcast %106 : vector<1x4xf32> to vector<432x4xf32>
    %108 = arith.addf %105, %107 : vector<432x4xf32>
    %cst_93 = arith.constant 0.000000e+00 : f32
    %109 = vector.broadcast %cst_93 : f32 to vector<432x4xf32>
    %110 = arith.maximumf %108, %109 : vector<432x4xf32>
    %111 = vector.extract_strided_slice %17 {offsets = [0, 8], sizes = [432, 4], strides = [1, 1]} : vector<432x12xf32> to vector<432x4xf32>
    %112 = tpu.concatenate %111, %99, %110 in 1 : vector<432x4xf32>, vector<432x16xf32>, vector<432x4xf32> -> vector<432x24xf32>
    %c0_94 = arith.constant 0 : index
    %c0_95 = arith.constant 0 : index
    %c0_96 = arith.constant 0 : index
    %113 = vector.load %arg9[%c0_94, %c0_95, %c0_96] : memref<1x432x24xf32, #tpu.memory_space<vmem>>, vector<1x432x24xf32>
    %114 = vector.shape_cast %113 : vector<1x432x24xf32> to vector<432x24xf32>
    %115 = vector.shape_cast %112 : vector<432x24xf32> to vector<1x432x24xf32>
    tpu.vector_store %arg9[%c0_94, %c0_95, %c0_96], %115 {strides = array<i32>} : memref<1x432x24xf32, #tpu.memory_space<vmem>>, vector<1x432x24xf32>,
    return
  }
  func.func @transform_0(%arg0: i32) -> (i32, i32, i32) {
    %c0_i32 = arith.constant 0 : i32
    %c0_i32_0 = arith.constant 0 : i32
    %c0_i32_1 = arith.constant 0 : i32
    return %arg0, %c0_i32, %c0_i32_0 : i32, i32, i32
  }
  func.func @transform_1(%arg0: i32) -> (i32, i32) {
    %c0_i32 = arith.constant 0 : i32
    %c0_i32_0 = arith.constant 0 : i32
    %c0_i32_1 = arith.constant 0 : i32
    return %c0_i32, %c0_i32_0 : i32, i32
  }
  func.func @transform_2(%arg0: i32) -> (i32, i32) {
    %c0_i32 = arith.constant 0 : i32
    %c0_i32_0 = arith.constant 0 : i32
    %c0_i32_1 = arith.constant 0 : i32
    return %c0_i32, %c0_i32_0 : i32, i32
  }
  func.func @transform_3(%arg0: i32) -> (i32, i32) {
    %c0_i32 = arith.constant 0 : i32
    %c0_i32_0 = arith.constant 0 : i32
    %c0_i32_1 = arith.constant 0 : i32
    return %c0_i32, %c0_i32_0 : i32, i32
  }
  func.func @transform_4(%arg0: i32) -> (i32, i32, i32) {
    %c0_i32 = arith.constant 0 : i32
    %c0_i32_0 = arith.constant 0 : i32
    %c0_i32_1 = arith.constant 0 : i32
    %c0_i32_2 = arith.constant 0 : i32
    return %c0_i32, %c0_i32_0, %c0_i32_1 : i32, i32, i32
  }
  func.func @transform_5(%arg0: i32) -> (i32, i32) {
    %c0_i32 = arith.constant 0 : i32
    %c0_i32_0 = arith.constant 0 : i32
    %c0_i32_1 = arith.constant 0 : i32
    return %c0_i32, %c0_i32_0 : i32, i32
  }
  func.func @transform_6(%arg0: i32) -> (i32, i32) {
    %c0_i32 = arith.constant 0 : i32
    %c0_i32_0 = arith.constant 0 : i32
    %c0_i32_1 = arith.constant 0 : i32
    return %c0_i32, %c0_i32_0 : i32, i32
  }
  func.func @transform_7(%arg0: i32) -> (i32, i32) {
    %c0_i32 = arith.constant 0 : i32
    %c0_i32_0 = arith.constant 0 : i32
    %c0_i32_1 = arith.constant 0 : i32
    return %c0_i32, %c0_i32_0 : i32, i32
  }
  func.func @transform_8(%arg0: i32) -> (i32, i32, i32) {
    %c0_i32 = arith.constant 0 : i32
    %c0_i32_0 = arith.constant 0 : i32
    %c0_i32_1 = arith.constant 0 : i32
    return %arg0, %c0_i32, %c0_i32_0 : i32, i32, i32
  }
}

</mosaic_0001>

<bundles_post_ra>
// kernel: inception_forward.1
= control target key start
LH: loop header
LB: loop body
LE: loop exit
PB: predicated region body
PF: predicated region fallthrough
CT: control target
= control target key end

     0   :  { %s12283_s27 = smov 0   ;;  %s19924_s0 = inlined_call_operand.vmem [shape: bf16[2,432,4], index: 0, kind: input, shape index: {}]   ;;  %s19925_s1 = inlined_call_operand.vmem [shape: f32[432,1], index: 1, kind: input, shape index: {}]   ;;  %s19926_s2 = inlined_call_operand.vmem [shape: bf16[4,12], index: 2, kind: input, shape index: {}]   ;;  %s19927_s3 = inlined_call_operand.vmem [shape: f32[1,12], index: 3, kind: input, shape index: {}]   ;;  %s19928_s4 = inlined_call_operand.vmem [shape: bf16[9,8,16], index: 4, kind: input, shape index: {}]   ;;  %s19929_s5 = inlined_call_operand.vmem [shape: f32[1,16], index: 5, kind: input, shape index: {}]   ;;  %s19930_s6 = inlined_call_operand.vmem [shape: bf16[4,4], index: 6, kind: input, shape index: {}]   ;;  %s19931_s7 = inlined_call_operand.vmem [shape: f32[1,4], index: 7, kind: input, shape index: {}]   ;;  %s19932_s8 = inlined_call_operand.vmem [shape: f32[2,432,24], index: 8, kind: output, shape index: {}]  }
   0x1 LB: > { %s10172_s28 = sadd.s32 4294967295, %s12229_s27   ;;  %p10176_p0 = scmp.ge.s32.totalorder %s12229_s27, 1  ;;  %s12229_s27 = sphi %s12283_s27, %s18_s27  }
   0x2   : > { %p262_p1 = scmp.lt.s32.totalorder %s12229_s27, 3 }
   0x4   : > { %p263_p2 = pnand %p10176_p0, %p262_p1 }
   0x6   : > { %266 = sbr.rel (%p263_p2) target bundleno = 1762 (0x6e2), region = 52 }
   0xd   : > { %v366_v0 = vld [vmem:[%s19925_s1 + $0x10] sm:$0xff]  ;;  %v364_v1 = vld [vmem:[%s19925_s1] sm:$0xff]  ;;  %v19958_v3 = vmov 0   ;;  %vm19933_vm2 = vcmask 1041408   ;;  %v367_v4 = vld [vmem:[%s19925_s1 + $0x18] sm:$0xff]  ;;  %v19953_v7 = vmov 0.0  }
   0xe   : > { %v482_v2 = vld [vmem:[%s19926_s2] sm:$0x3]  ;;  %12108 = vset.pattern.permute.xlu1 %v19958_v3  ;;  %12107 = vset.pattern.permute.xlu0 %v19958_v3  ;;  %vm420_vm0 = vcmp.gt.f32.partialorder %v366_v0, 0.0  ;;  %vm418_vm1 = vcmp.gt.f32.partialorder %v364_v1, 0.0  ;;  %v365_v9 = vld [vmem:[%s19925_s1 + $0x8] sm:$0xff]  ;;  %p296_p3 = scmp.lt.s32.totalorder %s10172_s28, 1 }
   0xf   : > { %v1015_v5 = vsel %vm420_vm0, 1, %v19958_v3  ;;  %v1013_v6 = vsel %vm418_vm1, 1, %v19958_v3  ;;  %10878 = vmatprep.subr.bf16.mxu0 %v19953_v7  ;;  %12088 = vmatprep.subr.bf16.mxu1 %v19953_v7  ;;  %v708_v8 = vsel %vm19933_vm2, %v482_v2, 0  ;;  %vm421_vm3 = vcmp.gt.f32.partialorder %v367_v4, 0.0  ;;  %v369_v10 = vld [vmem:[%s19925_s1 + $0x28] sm:$0xff]  ;;  %v368_v11 = vld [vmem:[%s19925_s1 + $0x20] sm:$0xff] }
  0x10   : > { %1074 = vperm.xlu1 %12108, %v1015_v5   ;;  %1068 = vperm.xlu0 %12107, %v1013_v6   ;;  %vm419_vm4 = vcmp.gt.f32.partialorder %v365_v9, 0.0  ;;  %vm477_vm5 = vcmask 31744   ;;  %v1016_v12 = vsel %vm421_vm3, 1, %v19958_v3  ;;  %s21473_s28 = smov (!%p296_p3, %s10172_s28), 1  ;;  %vm12233_vm6 = vmmov 0   ;;  %v371_v14 = vld [vmem:[%s19925_s1 + $0x38] sm:$0xff] }
  0x11   : > { %10879 = vmatpush3.bf16.msra.mxu0 %v708_v8  ;;  %12089 = vmatpush3.bf16.msra.mxu1 %v708_v8  ;;  %v1014_v13 = vsel %vm419_vm4, 1, %v19958_v3  ;;  %478 = vst.msk [vmem:[#allocation3] sm:$0xff] %vm477_vm5, %v19958_v3  ;;  %479 = vst.msk [vmem:[#allocation3 + $0x8] sm:$0xff] %vm477_vm5, %v19958_v3  ;;  %vm423_vm7 = vcmp.gt.f32.partialorder %v369_v10, 0.0  ;;  %vm422_vm8 = vcmp.gt.f32.partialorder %v368_v11, 0.0  ;;  %v370_v15 = vld [vmem:[%s19925_s1 + $0x30] sm:$0xff] }
  0x12   : > { %480 = vst.msk [vmem:[#allocation3 + $0xe8] sm:$0xff] %vm477_vm5, %v19958_v3  ;;  %481 = vst.msk [vmem:[#allocation3 + $0xf0] sm:$0xff] %vm477_vm5, %v19958_v3  ;;  %10880 = vmatprep.mubr.msk.bf16.mxu0 %vm12233_vm6, %v19953_v7  ;;  %10936 = vmatprep.mubr.msk.bf16.mxu1 %vm12233_vm6, %v19953_v7  ;;  %s12090_s25 = smul.u32 216, %s21473_s28  ;;  %v1018_v16 = vsel %vm423_vm7, 1, %v19958_v3  ;;  %v1017_v17 = vsel %vm422_vm8, 1, %v19958_v3  ;;  %vm425_vm9 = vcmp.gt.f32.partialorder %v371_v14, 0.0 }
  0x13   : > { %11098 = vmatprep.subr.bf16.mxu0 %v19953_v7  ;;  %10988 = vmatprep.subr.bf16.mxu1 %v19953_v7  ;;  %vm424_vm10 = vcmp.gt.f32.partialorder %v370_v15, 0.0  ;;  %v373_v18 = vld [vmem:[%s19925_s1 + $0x48] sm:$0xff]  ;;  %v372_v24 = vld [vmem:[%s19925_s1 + $0x40] sm:$0xff]  ;;  %v1020_v26 = vsel %vm425_vm9, 1, %v19958_v3  ;;  %v375_v30 = vld [vmem:[%s19925_s1 + $0x58] sm:$0xff]  ;;  %s12234_s12 = smov 120  }
  0x14   : > { %1077 = vperm.xlu1 %12108, %v1016_v12   ;;  %1071 = vperm.xlu0 %12107, %v1014_v13   ;;  %s12351_s30 = scalar_lea.vmem %s19924_s0, %s12090_s25  ;;  %v1019_v27 = vsel %vm424_vm10, 1, %v19958_v3  ;;  %vm427_vm11 = vcmp.gt.f32.partialorder %v373_v18, 0.0  ;;  %vm426_vm12 = vcmp.gt.f32.partialorder %v372_v24, 0.0  ;;  %v374_v33 = vld [vmem:[%s19925_s1 + $0x50] sm:$0xff]  ;;  %vm429_vm13 = vcmp.gt.f32.partialorder %v375_v30, 0.0  ;;  %v377_v38 = vld [vmem:[%s19925_s1 + $0x68] sm:$0xff] }
  0x15   : > { %v12359_v19 = vld [vmem:[%s12351_s30] sm:$0xf]  ;;  %v12362_v20 = vld [vmem:[%s12351_s30 + $0x4] sm:$0xf]  ;;  %v338_v21 = vld [vmem:[%s12351_s30 + $0x70] sm:$0xf] }
  0x16   : > { %v10180_v22 = vcombine.low %v12359_v19, %v12362_v20  ;;  %v339_v23 = vld [vmem:[%s12351_s30 + $0x74] sm:$0xf]  ;;  %v12378_v28 = vld [vmem:[%s12351_s30 + $0x8] sm:$0xf]  ;;  %v12381_v29 = vld [vmem:[%s12351_s30 + $0xc] sm:$0xf] }
  0x17   : > { %v10194_v25 = vcombine.low %v338_v21, %v339_v23  ;;  %v340_v31 = vld [vmem:[%s12351_s30 + $0x78] sm:$0xf]  ;;  %v341_v32 = vld [vmem:[%s12351_s30 + $0x7c] sm:$0xf]  ;;  %v10181_v34 = vcombine.low %v12378_v28, %v12381_v29  ;;  %v1022_v35 = vsel %vm427_vm11, 1, %v19958_v3  ;;  %v1021_v36 = vsel %vm426_vm12, 1, %v19958_v3 }
  0x18   : > { %1083 = vperm.xlu1 %12108, %v1018_v16   ;;  %1080 = vperm.xlu0 %12107, %v1017_v17   ;;  %v10195_v37 = vcombine.low %v340_v31, %v341_v32  ;;  %vm428_vm14 = vcmp.gt.f32.partialorder %v374_v33, 0.0  ;;  %v376_v39 = vld [vmem:[%s19925_s1 + $0x60] sm:$0xff]  ;;  %v1024_v40 = vsel %vm429_vm13, 1, %v19958_v3  ;;  %vm431_vm15 = vcmp.gt.f32.partialorder %v377_v38, 0.0  ;;  %v12410_v42 = vld [vmem:[%s12351_s30 + $0x10] sm:$0xf] }
  0x19   : > { %10881 = vmatmul.mubr.msk.bf16.vlgmr.msra.gmra.mrb[0].mxu0 %vm477_vm5, %v10180_v22  ;;  %10937 = vmatmul.mubr.msk.bf16.vlgmr.msra.gmra.mrb[0].mxu1 %vm477_vm5, %v10194_v25  ;;  %v1023_v41 = vsel %vm428_vm14, 1, %v19958_v3  ;;  %v12413_v43 = vld [vmem:[%s12351_s30 + $0x14] sm:$0xf]  ;;  %vm430_vm0 = vcmp.gt.f32.partialorder %v376_v39, 0.0  ;;  %v379_v44 = vld [vmem:[%s19925_s1 + $0x78] sm:$0xff]  ;;  %v1026_v49 = vsel %vm431_vm15, 1, %v19958_v3 }
  0x1a   : > { %10884 = vmatprep.mubr.msk.bf16.mxu0 %vm12233_vm6, %v19953_v7  ;;  %10940 = vmatprep.mubr.msk.bf16.mxu1 %vm12233_vm6, %v19953_v7  ;;  %v342_v45 = vld [vmem:[%s12351_s30 + $0x80] sm:$0xf]  ;;  %v343_v46 = vld [vmem:[%s12351_s30 + $0x84] sm:$0xf]  ;;  %v378_v47 = vld [vmem:[%s19925_s1 + $0x70] sm:$0xff]  ;;  %v10182_v48 = vcombine.low %v12410_v42, %v12413_v43  ;;  %v1025_v50 = vsel %vm430_vm0, 1, %v19958_v3 }
  0x1b   : > { %v10196_v51 = vcombine.low %v342_v45, %v343_v46  ;;  %vm433_vm1 = vcmp.gt.f32.partialorder %v379_v44, 0.0  ;;  %vm432_vm3 = vcmp.gt.f32.partialorder %v378_v47, 0.0  ;;  %v381_v52 = vld [vmem:[%s19925_s1 + $0x88] sm:$0xff]  ;;  %v380_v53 = vld [vmem:[%s19925_s1 + $0x80] sm:$0xff]  ;;  %v12439_v56 = vld [vmem:[%s12351_s30 + $0x18] sm:$0xf] }
  0x1c   : > { %1089 = vperm.xlu1 %12108, %v1020_v26   ;;  %1086 = vperm.xlu0 %12107, %v1019_v27   ;;  %v1028_v54 = vsel %vm433_vm1, 1, %v19958_v3  ;;  %v1027_v55 = vsel %vm432_vm3, 1, %v19958_v3  ;;  %v12445_v57 = vld [vmem:[%s12351_s30 + $0x1c] sm:$0xf]  ;;  %v344_v58 = vld [vmem:[%s12351_s30 + $0x88] sm:$0xf] }
  0x1d   : > { %vm435_vm4 = vcmp.gt.f32.partialorder %v381_v52, 0.0  ;;  %vm434_vm7 = vcmp.gt.f32.partialorder %v380_v53, 0.0  ;;  %v345_v59 = vld [vmem:[%s12351_s30 + $0x8c] sm:$0xf]  ;;  %v383_v60 = vld [vmem:[%s19925_s1 + $0x98] sm:$0xff]  ;;  %v382_v61 = vld [vmem:[%s19925_s1 + $0x90] sm:$0xff]  ;;  %v10183_v62 = vcombine.low %v12439_v56, %v12445_v57 }
  0x1e   : > { %v1030_v63 = vsel %vm435_vm4, 1, %v19958_v3  ;;  %v1029_v0 = vsel %vm434_vm7, 1, %v19958_v3  ;;  %v10197_v1 = vcombine.low %v344_v58, %v345_v59  ;;  %vm437_vm8 = vcmp.gt.f32.partialorder %v383_v60, 0.0  ;;  %v385_v2 = vld [vmem:[%s19925_s1 + $0xa8] sm:$0xff]  ;;  %v384_v4 = vld [vmem:[%s19925_s1 + $0xa0] sm:$0xff]  ;;  %v387_v12 = vld [vmem:[%s19925_s1 + $0xb8] sm:$0xff] }
  0x1f   : > { %vm436_vm9 = vcmp.gt.f32.partialorder %v382_v61, 0.0  ;;  %v1032_v5 = vsel %vm437_vm8, 1, %v19958_v3  ;;  %v12471_v8 = vld [vmem:[%s12351_s30 + $0x20] sm:$0xf]  ;;  %v12477_v9 = vld [vmem:[%s12351_s30 + $0x24] sm:$0xf] }
  0x20   : > { %1095 = vperm.xlu1 %12108, %v1022_v35   ;;  %1092 = vperm.xlu0 %12107, %v1021_v36   ;;  %v1031_v6 = vsel %vm436_vm9, 1, %v19958_v3  ;;  %v346_v10 = vld [vmem:[%s12351_s30 + $0x90] sm:$0xf]  ;;  %vm439_vm10 = vcmp.gt.f32.partialorder %v385_v2, 0.0  ;;  %vm438_vm11 = vcmp.gt.f32.partialorder %v384_v4, 0.0  ;;  %v10184_v14 = vcombine.low %v12471_v8, %v12477_v9  ;;  %v389_v18 = vld [vmem:[%s19925_s1 + $0xc8] sm:$0xff] }
  0x21   : > { %10885 = vmatmul.mubr.msk.bf16.gmra.mrb[4].mxu0 %vm477_vm5, %v10181_v34  ;;  %10941 = vmatmul.mubr.msk.bf16.gmra.mrb[4].mxu1 %vm477_vm5, %v10195_v37  ;;  %v347_v11 = vld [vmem:[%s12351_s30 + $0x94] sm:$0xf]  ;;  %v1034_v15 = vsel %vm439_vm10, 1, %v19958_v3  ;;  %v1033_v16 = vsel %vm438_vm11, 1, %v19958_v3  ;;  %vm441_vm12 = vcmp.gt.f32.partialorder %v387_v12, 0.0  ;;  %v388_v21 = vld [vmem:[%s19925_s1 + $0xc0] sm:$0xff] }
  0x22   : > { %10888 = vmatprep.mubr.msk.bf16.mxu0 %vm12233_vm6, %v19953_v7  ;;  %10944 = vmatprep.mubr.msk.bf16.mxu1 %vm12233_vm6, %v19953_v7  ;;  %v386_v13 = vld [vmem:[%s19925_s1 + $0xb0] sm:$0xff]  ;;  %v10198_v17 = vcombine.low %v346_v10, %v347_v11  ;;  %v1036_v22 = vsel %vm441_vm12, 1, %v19958_v3  ;;  %v12503_v24 = vld [vmem:[%s12351_s30 + $0x28] sm:$0xf]  ;;  %v12509_v25 = vld [vmem:[%s12351_s30 + $0x2c] sm:$0xf] }
  0x23   : > { %vm440_vm13 = vcmp.gt.f32.partialorder %v386_v13, 0.0  ;;  %v348_v26 = vld [vmem:[%s12351_s30 + $0x98] sm:$0xf]  ;;  %vm443_vm14 = vcmp.gt.f32.partialorder %v389_v18, 0.0  ;;  %vm442_vm15 = vcmp.gt.f32.partialorder %v388_v21, 0.0  ;;  %v390_v31 = vld [vmem:[%s19925_s1 + $0xd0] sm:$0xff]  ;;  %v10185_v32 = vcombine.low %v12503_v24, %v12509_v25 }
  0x24   : > { %1101 = vperm.xlu1 %12108, %v1024_v40   ;;  %1098 = vperm.xlu0 %12107, %v1023_v41   ;;  %v1035_v23 = vsel %vm440_vm13, 1, %v19958_v3  ;;  %v349_v27 = vld [vmem:[%s12351_s30 + $0x9c] sm:$0xf]  ;;  %v1038_v33 = vsel %vm443_vm14, 1, %v19958_v3  ;;  %v1037_v34 = vsel %vm442_vm15, 1, %v19958_v3  ;;  %vm1804_vm0 = vcmask 1043456  }
  0x25   : > { %v391_v30 = vld [vmem:[%s19925_s1 + $0xd8] sm:$0xff]  ;;  %v10199_v35 = vcombine.low %v348_v26, %v349_v27  ;;  %vm444_vm3 = vcmp.gt.f32.partialorder %v390_v31, 0.0  ;;  %v1716_v36 = vld [vmem:[%s19928_s4] sm:$0xf]  ;;  %v10261_v37 = vld [vmem:[%s19928_s4 + $0x4] sm:$0xf] }
  0x26   : > { %vm445_vm1 = vcmp.gt.f32.partialorder %v391_v30, 0.0  ;;  %v393_v38 = vld [vmem:[%s19925_s1 + $0xe8] sm:$0xff]  ;;  %v392_v39 = vld [vmem:[%s19925_s1 + $0xe0] sm:$0xff]  ;;  %v1943_v40 = vsel %vm1804_vm0, %v10261_v37, 0  ;;  %v2528_v41 = vsel %vm1804_vm0, %v1716_v36, 0  ;;  %v1039_v45 = vsel %vm444_vm3, 1, %v19958_v3 }
  0x27   : > { %v1040_v44 = vsel %vm445_vm1, 1, %v19958_v3  ;;  %v12543_v46 = vld [vmem:[%s12351_s30 + $0x30] sm:$0xf]  ;;  %10989 = vmatpush3.bf16.msra.mxu1 %v1943_v40  ;;  %v12549_v47 = vld [vmem:[%s12351_s30 + $0x34] sm:$0xf]  ;;  %vm447_vm4 = vcmp.gt.f32.partialorder %v393_v38, 0.0  ;;  %11099 = vmatpush3.bf16.msra.mxu0 %v2528_v41 }
  0x28   : > { %1107 = vperm.xlu1 %12108, %v1026_v49   ;;  %1104 = vperm.xlu0 %12107, %v1025_v50   ;;  %vm446_vm7 = vcmp.gt.f32.partialorder %v392_v39, 0.0  ;;  %v351_v49 = vld [vmem:[%s12351_s30 + $0xa4] sm:$0xf]  ;;  %v395_v50 = vld [vmem:[%s19925_s1 + $0xf8] sm:$0xff]  ;;  %v10186_v52 = vcombine.low %v12543_v46, %v12549_v47  ;;  %v1042_v53 = vsel %vm447_vm4, 1, %v19958_v3  ;;  %v397_v58 = vld [vmem:[%s19925_s1 + $0x108] sm:$0xff] }
  0x29   : > { %10889 = vmatmul.mubr.msk.bf16.gmra.mrb[8].mxu0 %vm477_vm5, %v10182_v48  ;;  %10945 = vmatmul.mubr.msk.bf16.gmra.mrb[8].mxu1 %vm477_vm5, %v10196_v51  ;;  %v350_v48 = vld [vmem:[%s12351_s30 + $0xa0] sm:$0xf]  ;;  %v394_v51 = vld [vmem:[%s19925_s1 + $0xf0] sm:$0xff]  ;;  %vm449_vm8 = vcmp.gt.f32.partialorder %v395_v50, 0.0  ;;  %vm451_vm10 = vcmp.gt.f32.partialorder %v397_v58, 0.0  ;;  %v399_v2 = vld [vmem:[%s19925_s1 + $0x118] sm:$0xff] }
  0x2a   : > { %10892 = vmatprep.mubr.msk.bf16.mxu0 %vm12233_vm6, %v19953_v7  ;;  %10948 = vmatprep.mubr.msk.bf16.mxu1 %vm12233_vm6, %v19953_v7  ;;  %vm448_vm9 = vcmp.gt.f32.partialorder %v394_v51, 0.0  ;;  %v396_v59 = vld [vmem:[%s19925_s1 + $0x100] sm:$0xff]  ;;  %v1044_v60 = vsel %vm449_vm8, 1, %v19958_v3  ;;  %v398_v4 = vld [vmem:[%s19925_s1 + $0x110] sm:$0xff]  ;;  %vm453_vm12 = vcmp.gt.f32.partialorder %v399_v2, 0.0  ;;  %v401_v12 = vld [vmem:[%s19925_s1 + $0x128] sm:$0xff] }
  0x2b   : > { %11208 = vmatprep.subr.bf16.mxu1 %v19953_v7  ;;  %11318 = vmatprep.subr.bf16.mxu0 %v19953_v7  ;;  %v1043_v61 = vsel %vm448_vm9, 1, %v19958_v3  ;;  %vm450_vm11 = vcmp.gt.f32.partialorder %v396_v59, 0.0  ;;  %vm452_vm13 = vcmp.gt.f32.partialorder %v398_v4, 0.0  ;;  %v400_v13 = vld [vmem:[%s19925_s1 + $0x120] sm:$0xff]  ;;  %v354_v18 = vld [vmem:[%s12351_s30 + $0xb0] sm:$0xf] }
  0x2c   : > { %1113 = vperm.xlu1 %12108, %v1028_v54   ;;  %1110 = vperm.xlu0 %12107, %v1027_v55   ;;  %v1041_v54 = vsel %vm446_vm7, 1, %v19958_v3  ;;  %v10200_v55 = vcombine.low %v350_v48, %v351_v49  ;;  %v1045_v10 = vsel %vm450_vm11, 1, %v19958_v3  ;;  %vm455_vm14 = vcmp.gt.f32.partialorder %v401_v12, 0.0  ;;  %v355_v21 = vld [vmem:[%s12351_s30 + $0xb4] sm:$0xf]  ;;  %v407_v40 = vld [vmem:[%s19925_s1 + $0x158] sm:$0xff] }
  0x2d   : > { %vm454_vm15 = vcmp.gt.f32.partialorder %v400_v13, 0.0  ;;  %v1050_v27 = vsel %vm455_vm14, 1, %v19958_v3  ;;  %v10202_v31 = vcombine.low %v354_v18, %v355_v21  ;;  %v12641_v36 = vld [vmem:[%s12351_s30 + $0x48] sm:$0xf]  ;;  %v12647_v37 = vld [vmem:[%s12351_s30 + $0x4c] sm:$0xf] }
  0x2e   : > { %v1049_v30 = vsel %vm454_vm15, 1, %v19958_v3  ;;  %v356_v38 = vld [vmem:[%s12351_s30 + $0xb8] sm:$0xf]  ;;  %v357_v39 = vld [vmem:[%s12351_s30 + $0xbc] sm:$0xf]  ;;  %v406_v41 = vld [vmem:[%s19925_s1 + $0x150] sm:$0xff] }
  0x2f   : > { %v10203_v49 = vcombine.low %v356_v38, %v357_v39  ;;  %vm461_vm8 = vcmp.gt.f32.partialorder %v407_v40, 0.0  ;;  %vm460_vm9 = vcmp.gt.f32.partialorder %v406_v41, 0.0  ;;  %v409_v50 = vld [vmem:[%s19925_s1 + $0x168] sm:$0xff]  ;;  %v408_v51 = vld [vmem:[%s19925_s1 + $0x160] sm:$0xff]  ;;  %v12705_v12 = vld [vmem:[%s12351_s30 + $0x58] sm:$0xf] }
  0x30   : > { %1119 = vperm.xlu1 %12108, %v1030_v63   ;;  %1116 = vperm.xlu0 %12107, %v1029_v0   ;;  %v12583_v63 = vld [vmem:[%s12351_s30 + $0x3c] sm:$0xf]  ;;  %v352_v0 = vld [vmem:[%s12351_s30 + $0xa8] sm:$0xf]  ;;  %v358_v58 = vld [vmem:[%s12351_s30 + $0xc0] sm:$0xf] }
  0x31   : > { %10893 = vmatmul.mubr.msk.bf16.gmra.mrb[12].mxu0 %vm477_vm5, %v10183_v62  ;;  %10949 = vmatmul.mubr.msk.bf16.gmra.mrb[12].mxu1 %vm477_vm5, %v10197_v1  ;;  %v12577_v62 = vld [vmem:[%s12351_s30 + $0x38] sm:$0xf]  ;;  %v353_v1 = vld [vmem:[%s12351_s30 + $0xac] sm:$0xf]  ;;  %vm462_vm11 = vcmp.gt.f32.partialorder %v408_v51, 0.0  ;;  %v414_v21 = vld [vmem:[%s19925_s1 + $0x190] sm:$0xff] }
  0x32   : > { %10896 = vmatprep.mubr.msk.bf16.mxu0 %vm12233_vm6, %v19953_v7  ;;  %10952 = vmatprep.mubr.msk.bf16.mxu1 %vm12233_vm6, %v19953_v7  ;;  %v10201_v11 = vcombine.low %v352_v0, %v353_v1  ;;  %v359_v59 = vld [vmem:[%s12351_s30 + $0xc4] sm:$0xf]  ;;  %v1057_v2 = vsel %vm462_vm11, 1, %v19958_v3  ;;  %v12711_v13 = vld [vmem:[%s12351_s30 + $0x5c] sm:$0xf]  ;;  %s12236_s14 = smov 4  }
  0x33   : > { %v10204_v4 = vcombine.low %v358_v58, %v359_v59  ;;  %v415_v18 = vld [vmem:[%s19925_s1 + $0x198] sm:$0xff]  ;;  %v362_v38 = vld [vmem:[%s12351_s30 + $0xd0] sm:$0xf]  ;;  %v363_v39 = vld [vmem:[%s12351_s30 + $0xd4] sm:$0xf]  ;;  %s12237_s15 = smov 20  }
  0x34   : > { %1125 = vperm.xlu1 %12108, %v1032_v5   ;;  %1122 = vperm.xlu0 %12107, %v1031_v6   ;;  %v10187_v5 = vcombine.low %v12577_v62, %v12583_v63  ;;  %v1046_v6 = vsel %vm451_vm10, 1, %v19958_v3  ;;  %vm463_vm10 = vcmp.gt.f32.partialorder %v409_v50, 0.0  ;;  %s12091_s16 = smul.u32 432, %s21473_s28 }
  0x35   : > { %v1058_v1 = vsel %vm463_vm10, 1, %v19958_v3 }
  0x36   : > { %s19521_s18 = scalar_lea.vmem %s19932_s8, %s12091_s16 }
  0x38   : > { %1131 = vperm.xlu1 %12108, %v1034_v15   ;;  %1128 = vperm.xlu0 %12107, %v1033_v16   ;;  %v1047_v15 = vsel %vm452_vm13, 1, %v19958_v3  ;;  %v12609_v16 = vld [vmem:[%s12351_s30 + $0x40] sm:$0xf] }
  0x39   : > { %10897 = vmatmul.mubr.msk.bf16.gmra.mrb[16].mxu0 %vm477_vm5, %v10184_v14  ;;  %10953 = vmatmul.mubr.msk.bf16.gmra.mrb[16].mxu1 %vm477_vm5, %v10198_v17  ;;  %v1048_v14 = vsel %vm453_vm12, 1, %v19958_v3  ;;  %v12615_v17 = vld [vmem:[%s12351_s30 + $0x44] sm:$0xf] }
  0x3a   : > { %10900 = vmatprep.mubr.msk.bf16.mxu0 %vm12233_vm6, %v19953_v7  ;;  %10956 = vmatprep.mubr.msk.bf16.mxu1 %vm12233_vm6, %v19953_v7  ;;  %v10188_v26 = vcombine.low %v12609_v16, %v12615_v17 }
  0x3c   : > { %1137 = vperm.xlu1 %12108, %v1036_v22   ;;  %1134 = vperm.xlu0 %12107, %v1035_v23   ;;  %v403_v22 = vld [vmem:[%s19925_s1 + $0x138] sm:$0xff]  ;;  %v402_v23 = vld [vmem:[%s19925_s1 + $0x130] sm:$0xff] }
  0x3d   : > { %vm457_vm1 = vcmp.gt.f32.partialorder %v403_v22, 0.0  ;;  %vm456_vm3 = vcmp.gt.f32.partialorder %v402_v23, 0.0  ;;  %v10191_v22 = vcombine.low %v12705_v12, %v12711_v13 }
  0x40   : > { %1143 = vperm.xlu1 %12108, %v1038_v33   ;;  %1140 = vperm.xlu0 %12107, %v1037_v34   ;;  %v404_v33 = vld [vmem:[%s19925_s1 + $0x140] sm:$0xff]  ;;  %v1052_v34 = vsel %vm457_vm1, 1, %v19958_v3  ;;  %vm469_vm1 = vcmp.gt.f32.partialorder %v415_v18, 0.0 }
  0x41   : > { %10901 = vmatmul.mubr.msk.bf16.gmra.mrb[20].mxu0 %vm477_vm5, %v10185_v32  ;;  %10957 = vmatmul.mubr.msk.bf16.gmra.mrb[20].mxu1 %vm477_vm5, %v10199_v35  ;;  %v405_v32 = vld [vmem:[%s19925_s1 + $0x148] sm:$0xff]  ;;  %v1051_v35 = vsel %vm456_vm3, 1, %v19958_v3  ;;  %vm458_vm7 = vcmp.gt.f32.partialorder %v404_v33, 0.0  ;;  %vm468_vm3 = vcmp.gt.f32.partialorder %v414_v21, 0.0 }
  0x42   : > { %10904 = vmatprep.mubr.msk.bf16.mxu0 %vm12233_vm6, %v19953_v7  ;;  %10960 = vmatprep.mubr.msk.bf16.mxu1 %vm12233_vm6, %v19953_v7  ;;  %vm459_vm4 = vcmp.gt.f32.partialorder %v405_v32, 0.0  ;;  %v1053_v48 = vsel %vm458_vm7, 1, %v19958_v3  ;;  %v1064_v32 = vsel %vm469_vm1, 1, %v19958_v3  ;;  %v1063_v33 = vsel %vm468_vm3, 1, %v19958_v3 }
  0x44   : > { %1149 = vperm.xlu1 %12108, %v1040_v44   ;;  %1146 = vperm.xlu0 %12107, %v1039_v45   ;;  %v10189_v44 = vcombine.low %v12641_v36, %v12647_v37  ;;  %v1054_v45 = vsel %vm459_vm4, 1, %v19958_v3 }
  0x48   : > { %1155 = vperm.xlu1 %12108, %v1042_v53   ;;  %1152 = vperm.xlu0 %12107, %v1041_v54   ;;  %v1055_v53 = vsel %vm460_vm9, 1, %v19958_v3  ;;  %v12673_v54 = vld [vmem:[%s12351_s30 + $0x50] sm:$0xf] }
  0x49   : > { %10905 = vmatmul.mubr.msk.bf16.gmra.mrb[24].mxu0 %vm477_vm5, %v10186_v52  ;;  %10961 = vmatmul.mubr.msk.bf16.gmra.mrb[24].mxu1 %vm477_vm5, %v10200_v55  ;;  %v1056_v52 = vsel %vm461_vm8, 1, %v19958_v3  ;;  %v12679_v55 = vld [vmem:[%s12351_s30 + $0x54] sm:$0xf]  ;;  %vm472_vm8 = vcmask 64512  }
  0x4a   : > { %10908 = vmatprep.mubr.msk.bf16.mxu0 %vm12233_vm6, %v19953_v7  ;;  %10964 = vmatprep.mubr.msk.bf16.mxu1 %vm12233_vm6, %v19953_v7  ;;  %v10190_v0 = vcombine.low %v12673_v54, %v12679_v55  ;;  %473 = vst.msk [vmem:[#allocation2] sm:$0xff] %vm472_vm8, %v19958_v3  ;;  %474 = vst.msk [vmem:[#allocation2 + $0x8] sm:$0xff] %vm472_vm8, %v19958_v3 }
  0x4b   : > { %475 = vst.msk [vmem:[#allocation2 + $0xe8] sm:$0xff] %vm472_vm8, %v19958_v3  ;;  %476 = vst.msk [vmem:[#allocation2 + $0xf0] sm:$0xff] %vm472_vm8, %v19958_v3 }
  0x4c   : > { %1161 = vperm.xlu1 %12108, %v1044_v60   ;;  %1158 = vperm.xlu0 %12107, %v1043_v61   ;;  %v411_v60 = vld [vmem:[%s19925_s1 + $0x178] sm:$0xff]  ;;  %v410_v61 = vld [vmem:[%s19925_s1 + $0x170] sm:$0xff] }
  0x4d   : > { %vm465_vm12 = vcmp.gt.f32.partialorder %v411_v60, 0.0  ;;  %vm464_vm13 = vcmp.gt.f32.partialorder %v410_v61, 0.0 }
  0x50   : > { %1167 = vperm.xlu1 %12108, %v1046_v6   ;;  %1164 = vperm.xlu0 %12107, %v1045_v10   ;;  %v412_v6 = vld [vmem:[%s19925_s1 + $0x180] sm:$0xff]  ;;  %v1060_v10 = vsel %vm465_vm12, 1, %v19958_v3 }
  0x51   : > { %10909 = vmatmul.mubr.msk.bf16.gmra.mrb[28].mxu0 %vm477_vm5, %v10187_v5  ;;  %10965 = vmatmul.mubr.msk.bf16.gmra.mrb[28].mxu1 %vm477_vm5, %v10201_v11  ;;  %v413_v5 = vld [vmem:[%s19925_s1 + $0x188] sm:$0xff]  ;;  %v1059_v11 = vsel %vm464_vm13, 1, %v19958_v3  ;;  %vm466_vm15 = vcmp.gt.f32.partialorder %v412_v6, 0.0 }
  0x52   : > { %10912 = vmatprep.mubr.msk.bf16.mxu0 %vm12233_vm6, %v19953_v7  ;;  %10968 = vmatprep.mubr.msk.bf16.mxu1 %vm12233_vm6, %v19953_v7  ;;  %vm467_vm14 = vcmp.gt.f32.partialorder %v413_v5, 0.0 }
  0x53   : > { %v1062_v23 = vsel %vm467_vm14, 1, %v19958_v3 }
  0x54   : > { %1173 = vperm.xlu1 %12108, %v1048_v14   ;;  %1170 = vperm.xlu0 %12107, %v1047_v15   ;;  %v360_v14 = vld [vmem:[%s12351_s30 + $0xc8] sm:$0xf]  ;;  %v361_v15 = vld [vmem:[%s12351_s30 + $0xcc] sm:$0xf] }
  0x58   : > { %1179 = vperm.xlu1 %12108, %v1050_v27   ;;  %1176 = vperm.xlu0 %12107, %v1049_v30   ;;  %v10205_v27 = vcombine.low %v360_v14, %v361_v15  ;;  %v417_v30 = vld [vmem:[%s19925_s1 + $0x1a8] sm:$0xff] }
  0x59   : > { %10913 = vmatmul.mubr.msk.bf16.gmra.mrb[32].mxu0 %vm477_vm5, %v10188_v26  ;;  %10969 = vmatmul.mubr.msk.bf16.gmra.mrb[32].mxu1 %vm477_vm5, %v10202_v31  ;;  %v1061_v26 = vsel %vm466_vm15, 1, %v19958_v3  ;;  %v416_v31 = vld [vmem:[%s19925_s1 + $0x1a0] sm:$0xff]  ;;  %vm471_vm4 = vcmp.gt.f32.partialorder %v417_v30, 0.0 }
  0x5a   : > { %10916 = vmatprep.mubr.msk.bf16.mxu0 %vm12233_vm6, %v19953_v7  ;;  %10972 = vmatprep.mubr.msk.bf16.mxu1 %vm12233_vm6, %v19953_v7  ;;  %vm470_vm7 = vcmp.gt.f32.partialorder %v416_v31, 0.0  ;;  %v1066_v41 = vsel %vm471_vm4, 1, %v19958_v3 }
  0x5c   : > { %1185 = vperm.xlu1 %12108, %v1052_v34   ;;  %1182 = vperm.xlu0 %12107, %v1051_v35   ;;  %v12740_v34 = vld [vmem:[%s12351_s30 + $0x60] sm:$0xf]  ;;  %v12743_v35 = vld [vmem:[%s12351_s30 + $0x64] sm:$0xf] }
  0x5d   : > { %v10192_v40 = vcombine.low %v12740_v34, %v12743_v35 }
  0x60   : > { %1191 = vperm.xlu1 %12108, %v1054_v45   ;;  %1188 = vperm.xlu0 %12107, %v1053_v48   ;;  %v10206_v45 = vcombine.low %v362_v38, %v363_v39  ;;  %v12758_v48 = vld [vmem:[%s12351_s30 + $0x68] sm:$0xf] }
  0x61   : > { %10917 = vmatmul.mubr.msk.bf16.gmra.mrb[36].mxu0 %vm477_vm5, %v10189_v44  ;;  %10973 = vmatmul.mubr.msk.bf16.gmra.mrb[36].mxu1 %vm477_vm5, %v10203_v49  ;;  %v1065_v44 = vsel %vm470_vm7, 1, %v19958_v3  ;;  %v12761_v49 = vld [vmem:[%s12351_s30 + $0x6c] sm:$0xf] }
  0x62   : > { %10920 = vmatprep.mubr.msk.bf16.mxu0 %vm12233_vm6, %v19953_v7  ;;  %10976 = vmatprep.mubr.msk.bf16.mxu1 %vm12233_vm6, %v19953_v7  ;;  %v10193_v50 = vcombine.low %v12758_v48, %v12761_v49 }
  0x64   : > { %1197 = vperm.xlu1 %12108, %v1056_v52   ;;  %1194 = vperm.xlu0 %12107, %v1055_v53  }
  0x68   : > { %1203 = vperm.xlu1 %12108, %v1058_v1   ;;  %1200 = vperm.xlu0 %12107, %v1057_v2  }
  0x69   : > { %10921 = vmatmul.mubr.msk.bf16.gmra.mrb[40].mxu0 %vm477_vm5, %v10190_v0  ;;  %10977 = vmatmul.mubr.msk.bf16.gmra.mrb[40].mxu1 %vm477_vm5, %v10204_v4 }
  0x6a   : > { %10924 = vmatprep.mubr.msk.bf16.mxu0 %vm12233_vm6, %v19953_v7  ;;  %10980 = vmatprep.mubr.msk.bf16.mxu1 %vm12233_vm6, %v19953_v7 }
  0x6c   : > { %1209 = vperm.xlu1 %12108, %v1060_v10   ;;  %1206 = vperm.xlu0 %12107, %v1059_v11  }
  0x70   : > { %1215 = vperm.xlu1 %12108, %v1062_v23   ;;  %1212 = vperm.xlu0 %12107, %v1061_v26  }
  0x71   : > { %10925 = vmatmul.mubr.msk.bf16.gmra.mrb[44].mxu0 %vm477_vm5, %v10191_v22  ;;  %10981 = vmatmul.mubr.msk.bf16.gmra.mrb[44].mxu1 %vm477_vm5, %v10205_v27 }
  0x72   : > { %10928 = vmatprep.mubr.msk.bf16.mxu0 %vm12233_vm6, %v19953_v7  ;;  %10984 = vmatprep.mubr.msk.bf16.mxu1 %vm12233_vm6, %v19953_v7 }
  0x74   : > { %1221 = vperm.xlu1 %12108, %v1064_v32   ;;  %1218 = vperm.xlu0 %12107, %v1063_v33  }
  0x78   : > { %1227 = vperm.xlu1 %12108, %v1066_v41   ;;  %1224 = vperm.xlu0 %12107, %v1065_v44  }
  0x79   : > { %10929 = vmatmul.mubr.msk.bf16.gmra.mrb[48].mxu0 %vm477_vm5, %v10192_v40  ;;  %10985 = vmatmul.mubr.msk.bf16.gmra.mrb[48].mxu1 %vm477_vm5, %v10206_v45 }
  0x7a   : > { %10932 = vmatprep.mubr.msk.bf16.mxu0 %vm12233_vm6, %v19953_v7  ;;  %10990 = vmatprep.mubr.msk.bf16.mxu1 %vm12233_vm6, %v19953_v7 }
  0x81   : > { %10933 = vmatmul.mubr.msk.bf16.gmra.mrb[52].mxu0 %vm477_vm5, %v10193_v50 }
  0x82   : > { %11100 = vmatprep.mubr.msk.bf16.mxu0 %vm12233_vm6, %v19953_v7 }
  0x8f   : > { %v12778_v51 = vpop.permute.xlu1 %1074  ;;  %v12780_v52 = vpop.permute.xlu0 %1068 }
  0x90   : > { %vm19965_vm9 = vcmp.eq.s32.totalorder %v12778_v51, 1  ;;  %vm1229_vm10 = vcmp.eq.s32.totalorder %v12780_v52, 1 }
  0x91   : > { %vm1393_vm11 = vmpackc.low %vm19965_vm9, %vm19965_vm9 }
  0x92   : > { %vm12790_vm12 = vmpackc.low %vm1229_vm10, %vm1229_vm10  ;;  %v1447_v60 = vsel %vm1393_vm11, %v12378_v28, 4048220490  ;;  %v8228_v61 = vsel %vm1393_vm11, 65537, %v19958_v3 }
  0x93   : > { %v12794_v58 = vpop.permute.xlu1 %1077  ;;  %v12796_v59 = vpop.permute.xlu0 %1071  ;;  %v1445_v0 = vsel %vm12790_vm12, %v12359_v19, 4048220490  ;;  %v8226_v1 = vsel %vm12790_vm12, 65537, %v19958_v3  ;;  %vm3063_vm12 = vsmask.f32 3328 }
  0x94   : > { %vm19964_vm13 = vcmp.eq.s32.totalorder %v12794_v58, 1  ;;  %vm1230_vm14 = vcmp.eq.s32.totalorder %v12796_v59, 1 }
  0x95   : > { %vm1394_vm15 = vmpackc.low %vm19964_vm13, %vm19964_vm13 }
  0x96   : > { %v1448_v28 = vsel %vm1394_vm15, %v12381_v29, 4048220490  ;;  %v8229_v2 = vsel %vm1394_vm15, 65537, %v19958_v3  ;;  %vm1392_vm1 = vmpackc.low %vm1230_vm14, %vm1230_vm14 }
  0x97   : > { %v10235_v4 = vcombine.low %v1447_v60, %v1448_v28  ;;  %v10514_v5 = vcombine.low %v8228_v61, %v8229_v2  ;;  %v1446_v19 = vsel %vm1392_vm1, %v12362_v20, 4048220490  ;;  %v8227_v6 = vsel %vm1392_vm1, 65537, %v19958_v3  ;;  %v12818_v10 = vpop.permute.xlu1 %1083  ;;  %v12820_v11 = vpop.permute.xlu0 %1080 }
  0x98   : > { %v10234_v14 = vcombine.low %v1445_v0, %v1446_v19  ;;  %v10513_v15 = vcombine.low %v8226_v1, %v8227_v6  ;;  %vm19943_vm3 = vcmp.eq.s32.totalorder %v12818_v10, 1  ;;  %vm19962_vm4 = vcmp.eq.s32.totalorder %v12820_v11, 1 }
  0x99   : > { %1662 = vst.msk [vmem:[#allocation3 + $0x18] sm:$0xff] %vm477_vm5, %v10235_v4  ;;  %v8370_v29 = vshrl.u32 %v10514_v5, 16  ;;  %v8373_v18 = vshll.u32 %v10514_v5, 16  ;;  %vm1396_vm7 = vmpackc.low %vm19943_vm3, %vm19943_vm3 }
  0x9a   : > { %1661 = vst.msk [vmem:[#allocation3 + $0x10] sm:$0xff] %vm477_vm5, %v10234_v14  ;;  %v8362_v20 = vshrl.u32 %v10513_v15, 16  ;;  %v8365_v21 = vshll.u32 %v10513_v15, 16  ;;  %v1450_v22 = vsel %vm1396_vm7, %v12413_v43, 4048220490  ;;  %v8231_v23 = vsel %vm1396_vm7, 65537, %v19958_v3  ;;  %vm1395_vm11 = vmpackc.low %vm19962_vm4, %vm19962_vm4 }
  0x9b   : > { %v8372_v26 = vrot.slane %v8370_v29, 4  ;;  %v8375_v27 = vrot.slane %v8373_v18, 5  ;;  %v1449_v30 = vsel %vm1395_vm11, %v12410_v42, 4048220490  ;;  %v8230_v31 = vsel %vm1395_vm11, 65537, %v19958_v3  ;;  %v12836_v32 = vpop.permute.xlu1 %1089  ;;  %v12838_v33 = vpop.permute.xlu0 %1086 }
  0x9c   : > { %v8364_v38 = vrot.slane %v8362_v20, 4  ;;  %v8367_v39 = vrot.slane %v8365_v21, 5  ;;  %v10236_v40 = vcombine.low %v1449_v30, %v1450_v22  ;;  %v10515_v43 = vcombine.low %v8230_v31, %v8231_v23 }
  0x9d   : > { %v8376_v41 = vor.u32 %v8375_v27, %v8372_v26  ;;  %vm19934_vm15 = vcmp.eq.s32.totalorder %v12836_v32, 1  ;;  %vm19935_vm1 = vcmp.eq.s32.totalorder %v12838_v33, 1 }
  0x9e   : > { %v12840_v44 = vor.u32 %v8367_v39, %v8364_v38  ;;  %1663 = vst.msk [vmem:[#allocation3 + $0x20] sm:$0xff] %vm477_vm5, %v10236_v40  ;;  %vm1398_vm7 = vmpackc.low %vm19934_vm15, %vm19934_vm15  ;;  %v8379_v61 = vshrl.u32 %v10515_v43, 16  ;;  %v8382_v0 = vshll.u32 %v10515_v43, 16 }
  0x9f   : > { %v12843_v45 = vpop.permute.xlu1 %1095  ;;  %v12845_v50 = vpop.permute.xlu0 %1092  ;;  %vm1397_vm11 = vmpackc.low %vm19935_vm1, %vm19935_vm1  ;;  %v1452_v1 = vsel %vm1398_vm7, %v12445_v57, 4048220490  ;;  %v8233_v28 = vsel %vm1398_vm7, 65537, %v19958_v3 }
  0xa0   : > { %20288 = vst [vmem:[#allocation4_spill] sm:$0xff] %v12840_v44  ;;  %v12849_v42 = vsel %vm3063_vm12, %v12840_v44, %v8376_v41  ;;  %v8381_v5 = vrot.slane %v8379_v61, 4  ;;  %v8384_v19 = vrot.slane %v8382_v0, 5  ;;  %v1451_v6 = vsel %vm1397_vm11, %v12439_v56, 4048220490 }
  0xa1   : > { %20289 = vst [vmem:[#allocation5_spill] sm:$0xff] %v12849_v42  ;;  %v10237_v14 = vcombine.low %v1451_v6, %v1452_v1  ;;  %v8232_v15 = vsel %vm1397_vm11, 65537, %v19958_v3  ;;  %vm19936_vm2 = vcmp.eq.s32.totalorder %v12843_v45, 1  ;;  %vm19937_vm7 = vcmp.eq.s32.totalorder %v12845_v50, 1 }
  0xa2   : > { %v8385_v29 = vor.u32 %v8384_v19, %v8381_v5  ;;  %v10516_v18 = vcombine.low %v8232_v15, %v8233_v28  ;;  %vm12875_vm15 = vmpackc.low %vm19936_vm2, %vm19936_vm2 }
  0xa3   : > { %v12856_v53 = vpop.permute.xlu1 %1101  ;;  %v12858_v60 = vpop.permute.xlu0 %1098  ;;  %1664 = vst.msk [vmem:[#allocation3 + $0x28] sm:$0xff] %vm477_vm5, %v10237_v14  ;;  %v1454_v56 = vsel %vm12875_vm15, %v12477_v9, 4048220490  ;;  %v8235_v20 = vsel %vm12875_vm15, 65537, %v19958_v3  ;;  %vm1399_vm11 = vmpackc.low %vm19937_vm7, %vm19937_vm7 }
  0xa4   : > { %20290 = vst [vmem:[#allocation6_spill] sm:$0xff] %v12856_v53  ;;  %20291 = vst [vmem:[#allocation7_spill] sm:$0xff] %v12858_v60  ;;  %vm19938_vm1 = vcmp.eq.s32.totalorder %v12856_v53, 1  ;;  %vm19941_vm2 = vcmp.eq.s32.totalorder %v12858_v60, 1  ;;  %v12897_v23 = vsel %vm3063_vm12, %v8376_v41, %v8385_v29  ;;  %v8388_v26 = vshrl.u32 %v10516_v18, 16 }
  0xa5   : > { %20298 = vst [vmem:[#allocation12_spill] sm:$0xff] %v12897_v23  ;;  %v8391_v27 = vshll.u32 %v10516_v18, 16  ;;  %v1453_v9 = vsel %vm1399_vm11, %v12471_v8, 4048220490  ;;  %vm12903_vm15 = vmpackc.low %vm19938_vm1, %vm19938_vm1  ;;  %v8234_v38 = vsel %vm1399_vm11, 65537, %v19958_v3 }
  0xa6   : > { %v10238_v31 = vcombine.low %v1453_v9, %v1454_v56  ;;  %v1456_v39 = vsel %vm12903_vm15, %v12509_v25, 4048220490  ;;  %vm1401_vm7 = vmpackc.low %vm19941_vm2, %vm19941_vm2  ;;  %v8390_v40 = vrot.slane %v8388_v26, 4  ;;  %v10517_v43 = vcombine.low %v8234_v38, %v8235_v20 }
  0xa7   : > { %v12865_v2 = vpop.permute.xlu1 %1107  ;;  %v12867_v4 = vpop.permute.xlu0 %1104  ;;  %v8393_v8 = vrot.slane %v8391_v27, 5  ;;  %v8237_v41 = vsel %vm12903_vm15, 65537, %v19958_v3  ;;  %v1455_v61 = vsel %vm1401_vm7, %v12503_v24, 4048220490  ;;  %v8236_v0 = vsel %vm1401_vm7, 65537, %v19958_v3 }
  0xa8   : > { %20292 = vst [vmem:[#allocation8_spill] sm:$0xff] %v12865_v2  ;;  %20293 = vst [vmem:[#allocation9_spill] sm:$0xff] %v12867_v4  ;;  %vm19939_vm11 = vcmp.eq.s32.totalorder %v12865_v2, 1  ;;  %vm19940_vm1 = vcmp.eq.s32.totalorder %v12867_v4, 1  ;;  %v8397_v5 = vshrl.u32 %v10517_v43, 16  ;;  %v8400_v19 = vshll.u32 %v10517_v43, 16 }
  0xa9   : > { %1665 = vst.msk [vmem:[#allocation3 + $0x30] sm:$0xff] %vm477_vm5, %v10238_v31  ;;  %v8394_v28 = vor.u32 %v8393_v8, %v8390_v40  ;;  %v10239_v6 = vcombine.low %v1455_v61, %v1456_v39  ;;  %vm12929_vm15 = vmpackc.low %vm19939_vm11, %vm19939_vm11  ;;  %v10518_v24 = vcombine.low %v8236_v0, %v8237_v41 }
  0xaa   : > { %v1458_v15 = vsel %vm12929_vm15, %v12549_v47, 4048220490  ;;  %vm1403_vm7 = vmpackc.low %vm19940_vm1, %vm19940_vm1  ;;  %v8399_v57 = vrot.slane %v8397_v5, 4  ;;  %v8402_v56 = vrot.slane %v8400_v19, 5  ;;  %v8239_v26 = vsel %vm12929_vm15, 65537, %v19958_v3 }
  0xab   : > { %v12892_v21 = vpop.permute.xlu1 %1113  ;;  %v12894_v22 = vpop.permute.xlu0 %1110  ;;  %v12940_v18 = vsel %vm3063_vm12, %v8385_v29, %v8394_v28  ;;  %1666 = vst.msk [vmem:[#allocation3 + $0x38] sm:$0xff] %vm477_vm5, %v10239_v6  ;;  %v1457_v20 = vsel %vm1403_vm7, %v12543_v46, 4048220490  ;;  %v8406_v30 = vshrl.u32 %v10518_v24, 16  ;;  %v8409_v29 = vshll.u32 %v10518_v24, 16 }
  0xac   : > { %20296 = vst [vmem:[#allocation10_spill] sm:$0xff] %v12892_v21  ;;  %20297 = vst [vmem:[#allocation11_spill] sm:$0xff] %v12894_v22  ;;  %vm19942_vm11 = vcmp.eq.s32.totalorder %v12892_v21, 1  ;;  %v8403_v9 = vor.u32 %v8402_v56, %v8399_v57  ;;  %v10240_v31 = vcombine.low %v1457_v20, %v1458_v15  ;;  %v8238_v38 = vsel %vm1403_vm7, 65537, %v19958_v3 }
  0xad   : > { %20305 = vst [vmem:[#allocation15_spill] sm:$0xff] %v12940_v18  ;;  %v8408_v46 = vrot.slane %v8406_v30, 4  ;;  %v8411_v40 = vrot.slane %v8409_v29, 5  ;;  %v10519_v8 = vcombine.low %v8238_v38, %v8239_v26  ;;  %vm12960_vm15 = vmpackc.low %vm19942_vm11, %vm19942_vm11  ;;  %vm19947_vm7 = vcmp.eq.s32.totalorder %v12894_v22, 1 }
  0xae   : > { %v12954_v39 = vsel %vm3063_vm12, %v8394_v28, %v8403_v9  ;;  %1667 = vst.msk [vmem:[#allocation3 + $0x40] sm:$0xff] %vm477_vm5, %v10240_v31  ;;  %v1460_v6 = vsel %vm12960_vm15, %v12583_v63, 4048220490  ;;  %v8241_v14 = vsel %vm12960_vm15, 65537, %v19958_v3  ;;  %vm1405_vm11 = vmpackc.low %vm19947_vm7, %vm19947_vm7 }
  0xaf   : > { %v12922_v25 = vpop.permute.xlu1 %1119  ;;  %v12924_v1 = vpop.permute.xlu0 %1116  ;;  %20308 = vst [vmem:[#allocation18_spill] sm:$0xff] %v12954_v39  ;;  %v8412_v0 = vor.u32 %v8411_v40, %v8408_v46  ;;  %v8415_v5 = vshrl.u32 %v10519_v8, 16  ;;  %v8418_v28 = vshll.u32 %v10519_v8, 16  ;;  %v1459_v20 = vsel %vm1405_vm11, %v12577_v62, 4048220490 }
  0xb0   : > { %20301 = vst [vmem:[#allocation13_spill] sm:$0xff] %v12922_v25  ;;  %20302 = vst [vmem:[#allocation14_spill] sm:$0xff] %v12924_v1  ;;  %vm19944_vm1 = vcmp.eq.s32.totalorder %v12922_v25, 1  ;;  %vm19945_vm2 = vcmp.eq.s32.totalorder %v12924_v1, 1  ;;  %v8240_v26 = vsel %vm1405_vm11, 65537, %v19958_v3  ;;  %v10241_v30 = vcombine.low %v1459_v20, %v1460_v6 }
  0xb1   : > { %v12972_v19 = vsel %vm3063_vm12, %v8403_v9, %v8412_v0  ;;  %v8417_v24 = vrot.slane %v8415_v5, 4  ;;  %v8420_v15 = vrot.slane %v8418_v28, 5  ;;  %vm12986_vm3 = vmpackc.low %vm19944_vm1, %vm19944_vm1  ;;  %v10520_v29 = vcombine.low %v8240_v26, %v8241_v14 }
  0xb2   : > { %20313 = vst [vmem:[#allocation21_spill] sm:$0xff] %v12972_v19  ;;  %vm1407_vm15 = vmpackc.low %vm19945_vm2, %vm19945_vm2  ;;  %v1462_v31 = vsel %vm12986_vm3, %v12615_v17, 4048220490  ;;  %v8243_v38 = vsel %vm12986_vm3, 65537, %v19958_v3 }
  0xb3   : > { %v12948_v47 = vpop.permute.xlu1 %1125  ;;  %v12950_v27 = vpop.permute.xlu0 %1122  ;;  %v8421_v9 = vor.u32 %v8420_v15, %v8417_v24  ;;  %1668 = vst.msk [vmem:[#allocation3 + $0x48] sm:$0xff] %vm477_vm5, %v10241_v30  ;;  %v8424_v62 = vshrl.u32 %v10520_v29, 16  ;;  %v8427_v40 = vshll.u32 %v10520_v29, 16  ;;  %v1461_v8 = vsel %vm1407_vm15, %v12609_v16, 4048220490 }
  0xb4   : > { %20306 = vst [vmem:[#allocation16_spill] sm:$0xff] %v12948_v47  ;;  %20307 = vst [vmem:[#allocation17_spill] sm:$0xff] %v12950_v27  ;;  %v10242_v28 = vcombine.low %v1461_v8, %v1462_v31  ;;  %v8242_v17 = vsel %vm1407_vm15, 65537, %v19958_v3  ;;  %vm19946_vm3 = vcmp.eq.s32.totalorder %v12948_v47, 1  ;;  %vm19951_vm1 = vcmp.eq.s32.totalorder %v12950_v27, 1 }
  0xb5   : > { %v13006_v46 = vsel %vm3063_vm12, %v8412_v0, %v8421_v9  ;;  %v8426_v6 = vrot.slane %v8424_v62, 4  ;;  %v8429_v14 = vrot.slane %v8427_v40, 5  ;;  %v10521_v24 = vcombine.low %v8242_v17, %v8243_v38  ;;  %vm13020_vm11 = vmpackc.low %vm19946_vm3, %vm19946_vm3  ;;  %v12151_v47 = vld [vmem:[%s12351_s30 + $0xa8] sm:$0xf] }
  0xb6   : > { %20318 = vst [vmem:[#allocation24_spill] sm:$0xff] %v13006_v46  ;;  %1669 = vst.msk [vmem:[#allocation3 + $0x50] sm:$0xff] %vm477_vm5, %v10242_v28  ;;  %v1464_v20 = vsel %vm13020_vm11, %v12647_v37, 4048220490  ;;  %v8245_v29 = vsel %vm13020_vm11, 65537, %v19958_v3 }
  0xb7   : > { %v12964_v41 = vpop.permute.xlu1 %1131  ;;  %v12966_v61 = vpop.permute.xlu0 %1128  ;;  %v8430_v16 = vor.u32 %v8429_v14, %v8426_v6  ;;  %v8433_v15 = vshrl.u32 %v10521_v24, 16  ;;  %v8436_v57 = vshll.u32 %v10521_v24, 16  ;;  %vm1409_vm3 = vmpackc.low %vm19951_vm1, %vm19951_vm1 }
  0xb8   : > { %20311 = vst [vmem:[#allocation19_spill] sm:$0xff] %v12964_v41  ;;  %20312 = vst [vmem:[#allocation20_spill] sm:$0xff] %v12966_v61  ;;  %vm19948_vm2 = vcmp.eq.s32.totalorder %v12964_v41, 1  ;;  %vm19950_vm15 = vcmp.eq.s32.totalorder %v12966_v61, 1  ;;  %v1463_v31 = vsel %vm1409_vm3, %v12641_v36, 4048220490 }
  0xb9   : > { %v8244_v38 = vsel %vm1409_vm3, 65537, %v19958_v3  ;;  %vm13045_vm7 = vmpackc.low %vm19948_vm2, %vm19948_vm2  ;;  %v13050_v62 = vsel %vm3063_vm12, %v8421_v9, %v8430_v16  ;;  %v8435_v40 = vrot.slane %v8433_v15, 4  ;;  %v8438_v8 = vrot.slane %v8436_v57, 5 }
  0xba   : > { %20327 = vst [vmem:[#allocation29_spill] sm:$0xff] %v13050_v62  ;;  %v10243_v28 = vcombine.low %v1463_v31, %v1464_v20  ;;  %vm1411_vm11 = vmpackc.low %vm19950_vm15, %vm19950_vm15  ;;  %v10522_v36 = vcombine.low %v8244_v38, %v8245_v29  ;;  %v1466_v17 = vsel %vm13045_vm7, %v12679_v55, 4048220490  ;;  %v8247_v6 = vsel %vm13045_vm7, 65537, %v19958_v3 }
  0xbb   : > { %v12990_v56 = vpop.permute.xlu1 %1137  ;;  %v12992_v63 = vpop.permute.xlu0 %1134  ;;  %v8439_v14 = vor.u32 %v8438_v8, %v8435_v40  ;;  %v1465_v15 = vsel %vm1411_vm11, %v12673_v54, 4048220490  ;;  %v8246_v57 = vsel %vm1411_vm11, 65537, %v19958_v3 }
  0xbc   : > { %20316 = vst [vmem:[#allocation22_spill] sm:$0xff] %v12990_v56  ;;  %20317 = vst [vmem:[#allocation23_spill] sm:$0xff] %v12992_v63  ;;  %vm19949_vm3 = vcmp.eq.s32.totalorder %v12990_v56, 1  ;;  %v8442_v24 = vshrl.u32 %v10522_v36, 16  ;;  %v8445_v0 = vshll.u32 %v10522_v36, 16  ;;  %v10244_v29 = vcombine.low %v1465_v15, %v1466_v17 }
  0xbd   : > { %1670 = vst.msk [vmem:[#allocation3 + $0x58] sm:$0xff] %vm477_vm5, %v10243_v28  ;;  %v13070_v55 = vsel %vm3063_vm12, %v8430_v16, %v8439_v14  ;;  %v10523_v31 = vcombine.low %v8246_v57, %v8247_v6  ;;  %vm13076_vm7 = vmpackc.low %vm19949_vm3, %vm19949_vm3  ;;  %vm19952_vm11 = vcmp.eq.s32.totalorder %v12992_v63, 1 }
  0xbe   : > { %20328 = vst [vmem:[#allocation30_spill] sm:$0xff] %v13070_v55  ;;  %v8444_v38 = vrot.slane %v8442_v24, 4  ;;  %v8447_v37 = vrot.slane %v8445_v0, 5  ;;  %1671 = vst.msk [vmem:[#allocation3 + $0x60] sm:$0xff] %vm477_vm5, %v10244_v29  ;;  %v1468_v6 = vsel %vm13076_vm7, %v12711_v13, 4048220490 }
  0xbf   : > { %v13010_v43 = vpop.permute.xlu1 %1143  ;;  %v13012_v5 = vpop.permute.xlu0 %1140  ;;  %v8451_v40 = vshrl.u32 %v10523_v31, 16  ;;  %v8454_v54 = vshll.u32 %v10523_v31, 16  ;;  %v8249_v24 = vsel %vm13076_vm7, 65537, %v19958_v3  ;;  %vm1413_vm3 = vmpackc.low %vm19952_vm11, %vm19952_vm11 }
  0xc0   : > { %20319 = vst [vmem:[#allocation25_spill] sm:$0xff] %v13010_v43  ;;  %20320 = vst [vmem:[#allocation26_spill] sm:$0xff] %v13012_v5  ;;  %v8448_v28 = vor.u32 %v8447_v37, %v8444_v38  ;;  %vm19956_vm2 = vcmp.eq.s32.totalorder %v13010_v43, 1  ;;  %vm19961_vm15 = vcmp.eq.s32.totalorder %v13012_v5, 1  ;;  %v1467_v29 = vsel %vm1413_vm3, %v12705_v12, 4048220490 }
  0xc1   : > { %v8453_v36 = vrot.slane %v8451_v40, 4  ;;  %v8456_v17 = vrot.slane %v8454_v54, 5  ;;  %vm13102_vm1 = vmpackc.low %vm19956_vm2, %vm19956_vm2  ;;  %v8248_v31 = vsel %vm1413_vm3, 65537, %v19958_v3 }
  0xc2   : > { %v13097_v15 = vsel %vm3063_vm12, %v8439_v14, %v8448_v28  ;;  %vm1415_vm11 = vmpackc.low %vm19961_vm15, %vm19961_vm15  ;;  %v10245_v14 = vcombine.low %v1467_v29, %v1468_v6  ;;  %v10524_v38 = vcombine.low %v8248_v31, %v8249_v24  ;;  %v1470_v37 = vsel %vm13102_vm1, %v12743_v35, 4048220490 }
  0xc3   : > { %v13033_v26 = vpop.permute.xlu1 %1149  ;;  %v13035_v30 = vpop.permute.xlu0 %1146  ;;  %20331 = vst [vmem:[#allocation31_spill] sm:$0xff] %v13097_v15  ;;  %v8457_v57 = vor.u32 %v8456_v17, %v8453_v36  ;;  %v8251_v8 = vsel %vm13102_vm1, 65537, %v19958_v3  ;;  %v1469_v12 = vsel %vm1415_vm11, %v12740_v34, 4048220490  ;;  %v8250_v54 = vsel %vm1415_vm11, 65537, %v19958_v3 }
  0xc4   : > { %20323 = vst [vmem:[#allocation27_spill] sm:$0xff] %v13033_v26  ;;  %20324 = vst [vmem:[#allocation28_spill] sm:$0xff] %v13035_v30  ;;  %vm19955_vm7 = vcmp.eq.s32.totalorder %v13033_v26, 1  ;;  %v8463_v17 = vshll.u32 %v10524_v38, 16  ;;  %v10246_v6 = vcombine.low %v1469_v12, %v1470_v37  ;;  %v10525_v13 = vcombine.low %v8250_v54, %v8251_v8 }
  0xc5   : > { %v13116_v40 = vsel %vm3063_vm12, %v8448_v28, %v8457_v57  ;;  %vm13126_vm3 = vmpackc.low %vm19955_vm7, %vm19955_vm7  ;;  %1672 = vst.msk [vmem:[#allocation3 + $0x68] sm:$0xff] %vm477_vm5, %v10245_v14  ;;  %v8460_v28 = vshrl.u32 %v10524_v38, 16  ;;  %vm19957_vm1 = vcmp.eq.s32.totalorder %v13035_v30, 1 }
  0xc6   : > { %20334 = vst [vmem:[#allocation32_spill] sm:$0xff] %v13116_v40  ;;  %v1472_v34 = vsel %vm13126_vm3, %v12761_v49, 4048220490  ;;  %v8253_v29 = vsel %vm13126_vm3, 65537, %v19958_v3  ;;  %v8465_v7 = vrot.slane %v8463_v17, 5  ;;  %1673 = vst.msk [vmem:[#allocation3 + $0x70] sm:$0xff] %vm477_vm5, %v10246_v6 }
  0xc7   : > { %v13063_v9 = vpop.permute.xlu1 %1155  ;;  %v13067_v20 = vpop.permute.xlu0 %1152  ;;  %v8462_v31 = vrot.slane %v8460_v28, 4  ;;  %v8469_v14 = vshrl.u32 %v10525_v13, 16  ;;  %v8472_v38 = vshll.u32 %v10525_v13, 16  ;;  %vm1417_vm7 = vmpackc.low %vm19957_vm1, %vm19957_vm1  ;;  %v12136_v6 = vld [vmem:[%s12351_s30 + $0x74] sm:$0xf] }
  0xc8   : > { %vm1258_vm11 = vcmp.eq.s32.totalorder %v13063_v9, 1  ;;  %vm1257_vm2 = vcmp.eq.s32.totalorder %v13067_v20, 1  ;;  %v1471_v37 = vsel %vm1417_vm7, %v12758_v48, 4048220490  ;;  %v8252_v8 = vsel %vm1417_vm7, 65537, %v19958_v3 }
  0xc9   : > { %v8466_v49 = vor.u32 %v8465_v7, %v8462_v31  ;;  %vm13153_vm3 = vmpackc.low %vm1258_vm11, %vm1258_vm11  ;;  %v8471_v54 = vrot.slane %v8469_v14, 4  ;;  %v8474_v36 = vrot.slane %v8472_v38, 5  ;;  %v10247_v28 = vcombine.low %v1471_v37, %v1472_v34  ;;  %v12137_v31 = vld [vmem:[%s12351_s30 + $0x70] sm:$0xf] }
  0xca   : > { %v10526_v17 = vcombine.low %v8252_v8, %v8253_v29  ;;  %vm1419_vm1 = vmpackc.low %vm1257_vm2, %vm1257_vm2  ;;  %v1474_v13 = vsel %vm13153_vm3, %v12136_v6, 4048220490  ;;  %v20340_v37 = vmov 0  }
  0xcb   : > { %v13082_v16 = vpop.permute.xlu1 %1161  ;;  %v13094_v0 = vpop.permute.xlu0 %1158  ;;  %v13163_v48 = vsel %vm3063_vm12, %v8457_v57, %v8466_v49  ;;  %v1473_v3 = vsel %vm1419_vm1, %v12137_v31, 4048220490  ;;  %1674 = vst.msk [vmem:[#allocation3 + $0x78] sm:$0xff] %vm477_vm5, %v10247_v28  ;;  %v8475_v34 = vor.u32 %v8474_v36, %v8471_v54  ;;  %v8255_v57 = vsel %vm13153_vm3, 65537, %v20340_v37 }
  0xcc   : > { %20339 = vst [vmem:[#allocation33_spill] sm:$0xff] %v13163_v48  ;;  %vm19963_vm7 = vcmp.eq.s32.totalorder %v13082_v16, 1  ;;  %v8478_v29 = vshrl.u32 %v10526_v17, 16  ;;  %v8481_v14 = vshll.u32 %v10526_v17, 16  ;;  %v10248_v38 = vcombine.low %v1473_v3, %v1474_v13  ;;  %v12138_v13 = vld [vmem:[%s12351_s30 + $0x7c] sm:$0xf] }
  0xcd   : > { %v8254_v8 = vsel %vm1419_vm1, 65537, %v20340_v37  ;;  %v13178_v6 = vsel %vm3063_vm12, %v8466_v49, %v8475_v34  ;;  %vm13184_vm15 = vmpackc.low %vm19963_vm7, %vm19963_vm7  ;;  %vm1259_vm1 = vcmp.eq.s32.totalorder %v13094_v0, 1 }
  0xce   : > { %20341 = vst [vmem:[#allocation34_spill] sm:$0xff] %v13178_v6  ;;  %1675 = vst.msk [vmem:[#allocation3 + $0x80] sm:$0xff] %vm477_vm5, %v10248_v38  ;;  %v8480_v3 = vrot.slane %v8478_v29, 4  ;;  %v8483_v36 = vrot.slane %v8481_v14, 5  ;;  %v10527_v12 = vcombine.low %v8254_v8, %v8255_v57  ;;  %v1476_v31 = vsel %vm13184_vm15, %v12138_v13, 4048220490 }
  0xcf   : > { %v13131_v35 = vpop.permute.xlu1 %1167  ;;  %v13133_v24 = vpop.permute.xlu0 %1164  ;;  %vm1421_vm4 = vmpackc.low %vm1259_vm1, %vm1259_vm1  ;;  %v12139_v38 = vld [vmem:[%s12351_s30 + $0x78] sm:$0xf]  ;;  %v12141_v8 = vld [vmem:[%s12351_s30 + $0x80] sm:$0xf] }
  0xd0   : > { %vm19966_vm3 = vcmp.eq.s32.totalorder %v13131_v35, 1  ;;  %v8484_v17 = vor.u32 %v8483_v36, %v8480_v3  ;;  %vm1261_vm7 = vcmp.eq.s32.totalorder %v13133_v24, 1  ;;  %v8487_v29 = vshrl.u32 %v10527_v12, 16 }
  0xd1   : > { %v8490_v14 = vshll.u32 %v10527_v12, 16  ;;  %v1475_v57 = vsel %vm1421_vm4, %v12139_v38, 4048220490  ;;  %vm13205_vm13 = vmpackc.low %vm19966_vm3, %vm19966_vm3  ;;  %v8257_v12 = vsel %vm13184_vm15, 65537, %v20340_v37 }
  0xd2   : > { %v13210_v3 = vsel %vm3063_vm12, %v8475_v34, %v8484_v17  ;;  %v8489_v36 = vrot.slane %v8487_v29, 4  ;;  %v10249_v38 = vcombine.low %v1475_v57, %v1476_v31  ;;  %vm13219_vm3 = vmpackc.low %vm1261_vm7, %vm1261_vm7  ;;  %v8256_v34 = vsel %vm1421_vm4, 65537, %v20340_v37 }
  0xd3   : > { %v13160_v7 = vpop.permute.xlu1 %1173  ;;  %v13169_v40 = vpop.permute.xlu0 %1170  ;;  %20346 = vst [vmem:[#allocation35_spill] sm:$0xff] %v13210_v3  ;;  %v8492_v13 = vrot.slane %v8490_v14, 5  ;;  %v12140_v3 = vld [vmem:[%s12351_s30 + $0x84] sm:$0xf]  ;;  %v8259_v14 = vsel %vm13205_vm13, 65537, %v20340_v37  ;;  %v10528_v48 = vcombine.low %v8256_v34, %v8257_v12 }
  0xd4   : > { %vm19978_vm9 = vcmp.eq.s32.totalorder %v13160_v7, 1  ;;  %v1478_v29 = vsel %vm13205_vm13, %v12140_v3, 4048220490  ;;  %vm19987_vm15 = vcmp.eq.s32.totalorder %v13169_v40, 1  ;;  %1676 = vst.msk [vmem:[#allocation3 + $0x88] sm:$0xff] %vm477_vm5, %v10249_v38 }
  0xd5   : > { %v8493_v31 = vor.u32 %v8492_v13, %v8489_v36  ;;  %vm13237_vm4 = vmpackc.low %vm19978_vm9, %vm19978_vm9  ;;  %v1477_v15 = vsel %vm13219_vm3, %v12141_v8, 4048220490  ;;  %v8258_v36 = vsel %vm13219_vm3, 65537, %v20340_v37  ;;  %v8496_v12 = vshrl.u32 %v10528_v48, 16  ;;  %v12142_v8 = vld [vmem:[%s12351_s30 + $0x8c] sm:$0xf] }
  0xd6   : > { %v10250_v38 = vcombine.low %v1477_v15, %v1478_v29  ;;  %v10529_v55 = vcombine.low %v8258_v36, %v8259_v14  ;;  %vm13255_vm13 = vmpackc.low %vm19987_vm15, %vm19987_vm15  ;;  %v8499_v34 = vshll.u32 %v10528_v48, 16  ;;  %v1480_v6 = vsel %vm13237_vm4, %v12142_v8, 4048220490  ;;  %v12143_v36 = vld [vmem:[%s12351_s30 + $0x88] sm:$0xf] }
  0xd7   : > { %v13188_v28 = vpop.permute.xlu1 %1179  ;;  %v13192_v49 = vpop.permute.xlu0 %1176  ;;  %v13250_v13 = vsel %vm3063_vm12, %v8484_v17, %v8493_v31  ;;  %v8261_v15 = vsel %vm13237_vm4, 65537, %v20340_v37  ;;  %v8498_v29 = vrot.slane %v8496_v12, 4  ;;  %v8260_v48 = vsel %vm13255_vm13, 65537, %v20340_v37 }
  0xd8   : > { %20353 = vst [vmem:[#allocation38_spill] sm:$0xff] %v13250_v13  ;;  %1677 = vst.msk [vmem:[#allocation3 + $0x90] sm:$0xff] %vm477_vm5, %v10250_v38  ;;  %v8505_v46 = vshrl.u32 %v10529_v55, 16  ;;  %v8508_v17 = vshll.u32 %v10529_v55, 16  ;;  %v8501_v14 = vrot.slane %v8499_v34, 5  ;;  %v10530_v55 = vcombine.low %v8260_v48, %v8261_v15 }
  0xd9   : > { %v1479_v13 = vsel %vm13255_vm13, %v12143_v36, 4048220490  ;;  %vm19979_vm3 = vcmp.eq.s32.totalorder %v13188_v28, 1  ;;  %vm19982_vm4 = vcmp.eq.s32.totalorder %v13192_v49, 1 }
  0xda   : > { %v8507_v8 = vrot.slane %v8505_v46, 4  ;;  %v8510_v38 = vrot.slane %v8508_v17, 5  ;;  %v10251_v39 = vcombine.low %v1479_v13, %v1480_v6  ;;  %v8502_v12 = vor.u32 %v8501_v14, %v8498_v29  ;;  %vm13286_vm13 = vmpackc.low %vm19979_vm3, %vm19979_vm3 }
  0xdb   : > { %v13231_v54 = vpop.permute.xlu1 %1185  ;;  %v13241_v3 = vpop.permute.xlu0 %1182  ;;  %v8514_v15 = vshrl.u32 %v10530_v55, 16  ;;  %v8517_v29 = vshll.u32 %v10530_v55, 16  ;;  %vm13298_vm9 = vmpackc.low %vm19982_vm4, %vm19982_vm4 }
  0xdc   : > { %20349 = vst [vmem:[#allocation36_spill] sm:$0xff] %v13231_v54  ;;  %20352 = vst [vmem:[#allocation37_spill] sm:$0xff] %v13241_v3  ;;  %v8511_v36 = vor.u32 %v8510_v38, %v8507_v8  ;;  %v13293_v17 = vsel %vm3063_vm12, %v8493_v31, %v8502_v12  ;;  %vm19986_vm3 = vcmp.eq.s32.totalorder %v13231_v54, 1  ;;  %v12144_v38 = vld [vmem:[%s12351_s30 + $0x94] sm:$0xf] }
  0xdd   : > { %1678 = vst.msk [vmem:[#allocation3 + $0x98] sm:$0xff] %vm477_vm5, %v10251_v39  ;;  %20360 = vst [vmem:[#allocation41_spill] sm:$0xff] %v13293_v17  ;;  %v1482_v31 = vsel %vm13286_vm13, %v12144_v38, 4048220490  ;;  %v8516_v55 = vrot.slane %v8514_v15, 4 }
  0xde   : > { %v13306_v8 = vsel %vm3063_vm12, %v8502_v12, %v8511_v36  ;;  %v12145_v17 = vld [vmem:[%s12351_s30 + $0x90] sm:$0xf]  ;;  %vm13320_vm4 = vmpackc.low %vm19986_vm3, %vm19986_vm3  ;;  %v1773_v54 = vld [vmem:[#allocation2] sm:$0xf0] }
  0xdf   : > { %v13272_v19 = vpop.permute.xlu1 %1191  ;;  %v13274_v18 = vpop.permute.xlu0 %1188  ;;  %20363 = vst [vmem:[#allocation42_spill] sm:$0xff] %v13306_v8  ;;  %v1481_v23 = vsel %vm13298_vm9, %v12145_v17, 4048220490 }
  0xe0   : > { %20356 = vst [vmem:[#allocation39_spill] sm:$0xff] %v13272_v19  ;;  %20357 = vst [vmem:[#allocation40_spill] sm:$0xff] %v13274_v18  ;;  %v10252_v15 = vcombine.low %v1481_v23, %v1482_v31  ;;  %vm19991_vm3 = vcmp.eq.s32.totalorder %v13272_v19, 1  ;;  %vm1269_vm15 = vcmp.eq.s32.totalorder %v13274_v18, 1 }
  0xe2   : > { %1679 = vst.msk [vmem:[#allocation3 + $0xa0] sm:$0xff] %vm477_vm5, %v10252_v15 }
  0xe3   : > { %v13328_v8 = vpop.permute.xlu1 %1197 }
  0xe4   : > { %20366 = vst [vmem:[#allocation43_spill] sm:$0xff] %v13328_v8 }
  0xec   : > { %v13276_v57 = vpop.f32.mrb[0].mxu0  ;;  %v13280_v34 = vpop.f32.mrb[0].mxu1 }
  0xed   : > { %v10882_v62 = vpop.f32.mrb[1].mxu0  ;;  %v10938_v13 = vpop.f32.mrb[1].mxu1 }
  0xee   : > { %v13290_v6 = vpop.f32.mrb[2].mxu0  ;;  %v13303_v14 = vpop.f32.mrb[2].mxu1  ;;  %v8519_v62 = vrot.slane %v8517_v29, 5  ;;  %v8263_v13 = vsel %vm13286_vm13, 65537, %v20340_v37  ;;  %v8262_v29 = vsel %vm13298_vm9, 65537, %v20340_v37  ;;  %vm19988_vm13 = vcmp.eq.s32.totalorder %v13241_v3, 1 }
  0xef   : > { %v10883_v48 = vpop.f32.mrb[3].mxu0  ;;  %v10531_v46 = vcombine.low %v8262_v29, %v8263_v13  ;;  %vm13342_vm9 = vmpackc.low %vm19988_vm13, %vm19988_vm13 }
  0xf0   : > { %v10939_v48 = vpop.f32.mrb[3].mxu1  ;;  %v8520_v38 = vor.u32 %v8519_v62, %v8516_v55  ;;  %v8265_v55 = vsel %vm13320_vm4, 65537, %v20340_v37  ;;  %vm13358_vm13 = vmpackc.low %vm19991_vm3, %vm19991_vm3  ;;  %vm20007_vm3 = vcmp.eq.s32.totalorder %v13328_v8, 1 }
  0xf1   : > { %v12146_v48 = vld [vmem:[%s12351_s30 + $0x9c] sm:$0xf]  ;;  %v8523_v29 = vshrl.u32 %v10531_v46, 16  ;;  %v8267_v41 = vsel %vm13358_vm13, 65537, %v20340_v37 }
  0xf2   : > { %v13333_v44 = vsel %vm3063_vm12, %v8511_v36, %v8520_v38  ;;  %v1484_v23 = vsel %vm13320_vm4, %v12146_v48, 4048220490  ;;  %v13348_v36 = vpop.permute.xlu0 %1194  ;;  %v8526_v48 = vshll.u32 %v10531_v46, 16  ;;  %vm13368_vm4 = vmpackc.low %vm1269_vm15, %vm1269_vm15  ;;  %v8264_v46 = vsel %vm13342_vm9, 65537, %v20340_v37 }
  0xf3   : > { %20367 = vst [vmem:[#allocation44_spill] sm:$0xff] %v13333_v44  ;;  %20370 = vst [vmem:[#allocation45_spill] sm:$0xff] %v13348_v36  ;;  %v12147_v44 = vld [vmem:[%s12351_s30 + $0x98] sm:$0xf]  ;;  %v8525_v5 = vrot.slane %v8523_v29, 4  ;;  %v10532_v63 = vcombine.low %v8264_v46, %v8265_v55  ;;  %v8266_v39 = vsel %vm13368_vm4, 65537, %v20340_v37  ;;  %v13400_v46 = vpop.permute.xlu1 %1203 }
  0xf4   : > { %v13330_v17 = vpop.f32.mrb[4].mxu0  ;;  %v13350_v31 = vpop.f32.mrb[4].mxu1  ;;  %v1483_v42 = vsel %vm13342_vm9, %v12147_v44, 4048220490  ;;  %v8528_v56 = vrot.slane %v8526_v48, 5  ;;  %vm13396_vm9 = vmpackc.low %vm20007_vm3, %vm20007_vm3  ;;  %20377 = vst [vmem:[#allocation46_spill] sm:$0xff] %v13400_v46 }
  0xf5   : > { %v10942_v13 = vpop.f32.mrb[5].mxu1  ;;  %v10886_v15 = vpop.f32.mrb[5].mxu0  ;;  %v8532_v29 = vshrl.u32 %v10532_v63, 16  ;;  %v8535_v48 = vshll.u32 %v10532_v63, 16 }
  0xf6   : > { %v13373_v26 = vpop.f32.mrb[6].mxu0  ;;  %v10253_v13 = vcombine.low %v1483_v42, %v1484_v23  ;;  %v12148_v15 = vld [vmem:[%s12351_s30 + $0xa4] sm:$0xf]  ;;  %v13381_v30 = vpop.f32.mrb[6].mxu1  ;;  %v12149_v42 = vld [vmem:[%s12351_s30 + $0xa0] sm:$0xf]  ;;  %v8529_v62 = vor.u32 %v8528_v56, %v8525_v5 }
  0xf7   : > { %v1486_v44 = vsel %vm13358_vm13, %v12148_v15, 4048220490  ;;  %v10887_v43 = vpop.f32.mrb[7].mxu0  ;;  %v1485_v23 = vsel %vm13368_vm4, %v12149_v42, 4048220490  ;;  %v10943_v55 = vpop.f32.mrb[7].mxu1  ;;  %v10533_v15 = vcombine.low %v8266_v39, %v8267_v41 }
  0xf8   : > { %1680 = vst.msk [vmem:[#allocation3 + $0xa8] sm:$0xff] %vm477_vm5, %v10253_v13  ;;  %v10254_v13 = vcombine.low %v1485_v23, %v1486_v44  ;;  %vm20013_vm13 = vcmp.eq.s32.totalorder %v13348_v36, 1  ;;  %v13403_v42 = vpop.permute.xlu0 %1200  ;;  %v13408_v61 = vsel %vm3063_vm12, %v8520_v38, %v8529_v62  ;;  %v12150_v55 = vld [vmem:[%s12351_s30 + $0xac] sm:$0xf]  ;;  %v8269_v41 = vsel %vm13396_vm9, 65537, %v20340_v37 }
  0xf9   : > { %20378 = vst [vmem:[#allocation47_spill] sm:$0xff] %v13403_v42  ;;  %20379 = vst [vmem:[#allocation48_spill] sm:$0xff] %v13408_v61  ;;  %v1488_v56 = vsel %vm13396_vm9, %v12150_v55, 4048220490  ;;  %v8534_v44 = vrot.slane %v8532_v29, 4  ;;  %v8537_v23 = vrot.slane %v8535_v48, 5 }
  0xfa   : > { %1681 = vst.msk [vmem:[#allocation3 + $0xb0] sm:$0xff] %vm477_vm5, %v10254_v13  ;;  %vm13420_vm4 = vmpackc.low %vm20013_vm13, %vm20013_vm13  ;;  %v8541_v39 = vshrl.u32 %v10533_v15, 16  ;;  %v8544_v55 = vshll.u32 %v10533_v15, 16  ;;  %vm20008_vm9 = vcmp.eq.s32.totalorder %v13400_v46, 1  ;;  %vm20011_vm3 = vcmp.eq.s32.totalorder %v13403_v42, 1 }
  0xfb   : > { %v1487_v43 = vsel %vm13420_vm4, %v12151_v47, 4048220490  ;;  %v8268_v27 = vsel %vm13420_vm4, 65537, %v20340_v37  ;;  %vm13444_vm4 = vmpackc.low %vm20008_vm9, %vm20008_vm9  ;;  %v12153_v47 = vld [vmem:[%s12351_s30 + $0xb0] sm:$0xf] }
  0xfc   : > { %v13405_v12 = vpop.f32.mrb[8].mxu0  ;;  %v13424_v5 = vpop.f32.mrb[8].mxu1  ;;  %v8543_v29 = vrot.slane %v8541_v39, 4  ;;  %v10255_v48 = vcombine.low %v1487_v43, %v1488_v56  ;;  %v8546_v15 = vrot.slane %v8544_v55, 5  ;;  %v8271_v39 = vsel %vm13444_vm4, 65537, %v20340_v37  ;;  %vm1435_vm9 = vmpackc.low %vm20011_vm3, %vm20011_vm3 }
  0xfd   : > { %v10890_v38 = vpop.f32.mrb[9].mxu0  ;;  %v10946_v13 = vpop.f32.mrb[9].mxu1  ;;  %v12154_v42 = vld [vmem:[%s12351_s30 + $0xbc] sm:$0xf] }
  0xfe   : > { %v13426_v61 = vpop.f32.mrb[10].mxu0  ;;  %v13435_v25 = vpop.f32.mrb[10].mxu1  ;;  %v8538_v38 = vor.u32 %v8537_v23, %v8534_v44  ;;  %v10534_v13 = vcombine.low %v8268_v27, %v8269_v41  ;;  %1682 = vst.msk [vmem:[#allocation3 + $0xb8] sm:$0xff] %vm477_vm5, %v10255_v48  ;;  %v8547_v63 = vor.u32 %v8546_v15, %v8543_v29 }
  0xff   : > { %v10891_v1 = vpop.f32.mrb[11].mxu0  ;;  %v10947_v8 = vpop.f32.mrb[11].mxu1 }
 0x100   : > { %v13438_v36 = vsel %vm3063_vm12, %v8529_v62, %v8538_v38  ;;  %v8550_v44 = vshrl.u32 %v10534_v13, 16  ;;  %v8553_v56 = vshll.u32 %v10534_v13, 16  ;;  %v13448_v23 = vpop.permute.xlu1 %1209  ;;  %v13451_v1 = vpop.permute.xlu0 %1206  ;;  %v13456_v8 = vsel %vm3063_vm12, %v8538_v38, %v8547_v63  ;;  %v12152_v62 = vld [vmem:[%s12351_s30 + $0xb4] sm:$0xf]  ;;  %v13472_v38 = vld [vmem:[%s19927_s3] ss:$0 sm:$0xff] }
 0x101   : > { %20382 = vst [vmem:[#allocation49_spill] sm:$0xff] %v13438_v36  ;;  %20385 = vst [vmem:[#allocation50_spill] sm:$0xff] %v13448_v23  ;;  %v1490_v41 = vsel %vm13444_vm4, %v12152_v62, 4048220490  ;;  %v1489_v62 = vsel %vm1435_vm9, %v12153_v47, 4048220490  ;;  %v860_v59 = vadd.f32 %v13472_v38, %v13303_v14  ;;  %v868_v20 = vadd.f32 %v13472_v38, %v13381_v30 }
 0x102   : > { %20386 = vst [vmem:[#allocation51_spill] sm:$0xff] %v13451_v1  ;;  %20387 = vst [vmem:[#allocation52_spill] sm:$0xff] %v13456_v8  ;;  %v8552_v29 = vrot.slane %v8550_v44, 4  ;;  %v8555_v48 = vrot.slane %v8553_v56, 5  ;;  %v8270_v8 = vsel %vm1435_vm9, 65537, %v20340_v37  ;;  %vm20020_vm4 = vcmp.eq.s32.totalorder %v13448_v23, 1 }
 0x103   : > { %v10256_v44 = vcombine.low %v1489_v62, %v1490_v41  ;;  %v10535_v56 = vcombine.low %v8270_v8, %v8271_v39  ;;  %vm13484_vm3 = vmpackc.low %vm20020_vm4, %vm20020_vm4  ;;  %vm1275_vm13 = vcmp.eq.s32.totalorder %v13451_v1, 1  ;;  %v745_v41 = vadd.f32 %v13472_v38, %v13276_v57 }
 0x104   : > { %v13453_v27 = vpop.f32.mrb[12].mxu0  ;;  %v13467_v55 = vpop.f32.mrb[12].mxu1  ;;  %v1492_v21 = vsel %vm13484_vm3, %v12154_v42, 4048220490  ;;  %vm1437_vm9 = vmpackc.low %vm1275_vm13, %vm1275_vm13  ;;  %v8273_v39 = vsel %vm13484_vm3, 65537, %v20340_v37  ;;  %v876_v0 = vadd.f32 %v13472_v38, %v13435_v25 }
 0x105   : > { %v10894_v43 = vpop.f32.mrb[13].mxu0  ;;  %v10950_v13 = vpop.f32.mrb[13].mxu1  ;;  %1683 = vst.msk [vmem:[#allocation3 + $0xc0] sm:$0xff] %vm477_vm5, %v10256_v44  ;;  %v8562_v62 = vshll.u32 %v10535_v56, 16  ;;  %v8272_v44 = vsel %vm1437_vm9, 65537, %v20340_v37 }
 0x106   : > { %v13474_v15 = vpop.f32.mrb[14].mxu0  ;;  %v13479_v36 = vpop.f32.mrb[14].mxu1  ;;  %v8556_v43 = vor.u32 %v8555_v48, %v8552_v29  ;;  %v748_v29 = vadd.f32 %v13472_v38, %v13290_v6  ;;  %v8559_v48 = vshrl.u32 %v10535_v56, 16  ;;  %v10536_v1 = vcombine.low %v8272_v44, %v8273_v39  ;;  %v12156_v44 = vld [vmem:[%s12351_s30 + $0xc4] sm:$0xf] }
 0x107   : > { %v10895_v13 = vpop.f32.mrb[15].mxu0  ;;  %v10951_v47 = vpop.f32.mrb[15].mxu1  ;;  %v8564_v46 = vrot.slane %v8562_v62, 5  ;;  %v959_v56 = vmax.f32 %v745_v41, 0.0 }
 0x108   : > { %v13496_v8 = vsel %vm3063_vm12, %v8547_v63, %v8556_v43  ;;  %v13506_v42 = vpop.permute.xlu1 %1215  ;;  %v12155_v13 = vld [vmem:[%s12351_s30 + $0xb8] sm:$0xf]  ;;  %v13509_v63 = vpop.permute.xlu0 %1212  ;;  %v8561_v57 = vrot.slane %v8559_v48, 4  ;;  %v960_v48 = vmax.f32 %v748_v29, 0.0  ;;  %v12157_v29 = vld [vmem:[%s12351_s30 + $0xc0] sm:$0xf] }
 0x109   : > { %20390 = vst [vmem:[#allocation53_spill] sm:$0xff] %v13496_v8  ;;  %20391 = vst [vmem:[#allocation54_spill] sm:$0xff] %v13506_v42  ;;  %v1491_v47 = vsel %vm1437_vm9, %v12155_v13, 4048220490  ;;  %vm20021_vm3 = vcmp.eq.s32.totalorder %v13506_v42, 1  ;;  %vm1277_vm9 = vcmp.eq.s32.totalorder %v13509_v63, 1  ;;  %9359 = vrot.lane.b32.xlu0 %v959_v56, %s12234_s12 }
 0x10a   : > { %20392 = vst [vmem:[#allocation55_spill] sm:$0xff] %v13509_v63  ;;  %v10257_v8 = vcombine.low %v1491_v47, %v1492_v21  ;;  %vm13521_vm4 = vmpackc.low %vm20021_vm3, %vm20021_vm3  ;;  %v8565_v13 = vor.u32 %v8564_v46, %v8561_v57  ;;  %v8568_v47 = vshrl.u32 %v10536_v1, 16  ;;  %9361 = vrot.lane.b32.xlu1 %v960_v48, %s12234_s12  ;;  %v1283_v4 = vsel %vm1229_vm10, %v959_v56, 0.0 }
 0x10b   : > { %vm1439_vm3 = vmpackc.low %vm1277_vm9, %vm1277_vm9  ;;  %v8275_v41 = vsel %vm13521_vm4, 65537, %v20340_v37 }
 0x10c   : > { %v13512_v23 = vpop.f32.mrb[16].mxu0  ;;  %v13515_v6 = vpop.f32.mrb[16].mxu1  ;;  %1684 = vst.msk [vmem:[#allocation3 + $0xc8] sm:$0xff] %vm477_vm5, %v10257_v8  ;;  %v1494_v8 = vsel %vm13521_vm4, %v12156_v44, 4048220490  ;;  %v8274_v57 = vsel %vm1439_vm3, 65537, %v20340_v37  ;;  %v13544_v46 = vsel %vm3063_vm12, %v8556_v43, %v8565_v13  ;;  %v13557_v43 = vadd.f32 %v13472_v38, %v13280_v34 }
 0x10d   : > { %v10898_v22 = vpop.f32.mrb[17].mxu0  ;;  %v10954_v39 = vpop.f32.mrb[17].mxu1  ;;  %20395 = vst [vmem:[#allocation56_spill] sm:$0xff] %v13544_v46  ;;  %v8570_v44 = vrot.slane %v8568_v47, 4  ;;  %v12159_v46 = vld [vmem:[%s12351_s30 + $0xc8] sm:$0xf] }
 0x10e   : > { %v13526_v62 = vpop.f32.mrb[18].mxu0  ;;  %v8571_v22 = vshll.u32 %v10536_v1, 16  ;;  %v13534_v42 = vpop.f32.mrb[18].mxu1  ;;  %v1493_v39 = vsel %vm1439_vm3, %v12157_v29, 4048220490  ;;  %v10537_v29 = vcombine.low %v8274_v57, %v8275_v41  ;;  %v1805_v41 = vrot.slane %v1773_v54, 4 }
 0x10f   : > { %v10899_v19 = vpop.f32.mrb[19].mxu0  ;;  %v10955_v1 = vpop.f32.mrb[19].mxu1 }
 0x110   : > { %v8573_v63 = vrot.slane %v8571_v22, 5  ;;  %v10258_v19 = vcombine.low %v1493_v39, %v1494_v8  ;;  %v13546_v18 = vpop.permute.xlu1 %1221  ;;  %v13548_v21 = vpop.permute.xlu0 %1218  ;;  %v1284_v1 = vsel %vm1230_vm14, %v960_v48, 0.0  ;;  %v1688_v22 = vld [vmem:[#allocation2] sm:$0xf8]  ;;  %v8577_v52 = vshrl.u32 %v10537_v29, 16 }
 0x111   : > { %20396 = vst [vmem:[#allocation57_spill] sm:$0xff] %v13546_v18  ;;  %20397 = vst [vmem:[#allocation58_spill] sm:$0xff] %v13548_v21  ;;  %v1337_v47 = vpack.c.bf16 %v1284_v1, %v1283_v4  ;;  %vm20039_vm4 = vcmp.eq.s32.totalorder %v13546_v18, 1  ;;  %v8580_v56 = vshll.u32 %v10537_v29, 16  ;;  %vm1279_vm14 = vcmp.eq.s32.totalorder %v13548_v21, 1  ;;  %v13573_v4 = vld [vmem:[#allocation2 + $0x8] sm:$0xff] }
 0x112   : > { %v8574_v2 = vor.u32 %v8573_v63, %v8570_v44  ;;  %1685 = vst.msk [vmem:[#allocation3 + $0xd0] sm:$0xff] %vm477_vm5, %v10258_v19  ;;  %vm13568_vm10 = vmpackc.low %vm20039_vm4, %vm20039_vm4  ;;  %v8579_v19 = vrot.slane %v8577_v52, 4  ;;  %v12158_v1 = vld [vmem:[%s12351_s30 + $0xcc] sm:$0xf]  ;;  %v2196_v52 = vshrl.u32 %v1688_v22, 16  ;;  %v20403_v53 = vrot.slane %v13573_v4, 4 }
 0x113   : > { %1364 = vst.msk [vmem:[#allocation2 + $0x10] sm:$0xff] %vm472_vm8, %v1337_v47  ;;  %vm13581_vm3 = vmpackc.low %vm1279_vm14, %vm1279_vm14  ;;  %v8582_v29 = vrot.slane %v8580_v56, 5 }
 0x114   : > { %v13560_v8 = vpop.f32.mrb[20].mxu0  ;;  %v13563_v63 = vsel %vm3063_vm12, %v8565_v13, %v8574_v2  ;;  %v13575_v34 = vpop.f32.mrb[20].mxu1  ;;  %v1495_v54 = vsel %vm13581_vm3, %v12159_v46, 4048220490  ;;  %v1807_v60 = vsel %vm1804_vm0, %v1805_v41, %v20403_v53  ;;  %v2199_v41 = vshll.u32 %v1688_v22, 16 }
 0x115   : > { %20398 = vst [vmem:[#allocation59_spill] sm:$0xff] %v13563_v63  ;;  %v10902_v48 = vpop.f32.mrb[21].mxu0  ;;  %v10958_v57 = vpop.f32.mrb[21].mxu1  ;;  %v8277_v63 = vsel %vm13568_vm10, 65537, %v20340_v37  ;;  %v8583_v39 = vor.u32 %v8582_v29, %v8579_v19  ;;  %10991 = vmatmul.mubr.msk.bf16.vlgmr.msra.gmra.mrb[52].mxu1 %vm472_vm8, %v1807_v60  ;;  %v20406_v19 = vmov 0.0  }
 0x116   : > { %v13586_v44 = vpop.f32.mrb[22].mxu0  ;;  %v1496_v48 = vsel %vm13568_vm10, %v12158_v1, 4048220490  ;;  %v13591_v47 = vpop.f32.mrb[22].mxu1  ;;  %v8276_v57 = vsel %vm13581_vm3, 65537, %v20340_v37  ;;  %v987_v1 = vmax.f32 %v13557_v43, 0.0  ;;  %10994 = vmatprep.mubr.msk.bf16.mxu1 %vm12233_vm6, %v20406_v19 }
 0x117   : > { %v10903_v56 = vpop.f32.mrb[23].mxu0  ;;  %v10259_v18 = vcombine.low %v1495_v54, %v1496_v48  ;;  %v10538_v21 = vcombine.low %v8276_v57, %v8277_v63  ;;  %v10959_v3 = vpop.f32.mrb[23].mxu1  ;;  %v13609_v46 = vsel %vm3063_vm12, %v8574_v2, %v8583_v39  ;;  %v2198_v43 = vrot.slane %v2196_v52, 3 }
 0x118   : > { %20404 = vst [vmem:[#allocation60_spill] sm:$0xff] %v13609_v46  ;;  %9415 = vrot.lane.b32.xlu0 %v987_v1, %s12234_s12  ;;  %v13614_v63 = vpop.permute.xlu1 %1227  ;;  %v20038_v2 = vshrl.u32 %v13573_v4, 16  ;;  %v988_v54 = vmax.f32 %v860_v59, 0.0  ;;  %v2201_v57 = vrot.slane %v2199_v41, 4  ;;  %v1311_v59 = vsel %vm1257_vm2, %v987_v1, 0.0  ;;  %v13649_v1 = vpop.permute.xlu0 %1224 }
 0x119   : > { %1686 = vst.msk [vmem:[#allocation3 + $0xd8] sm:$0xff] %vm477_vm5, %v10259_v18  ;;  %v8586_v13 = vshrl.u32 %v10538_v21, 16  ;;  %20405 = vst [vmem:[#allocation61_spill] sm:$0xff] %v13614_v63  ;;  %v8589_v3 = vshll.u32 %v10538_v21, 16  ;;  %v20037_v18 = vshll.u32 %v13573_v4, 16  ;;  %vm1282_vm10 = vcmp.eq.s32.totalorder %v13614_v63, 1 }
 0x11a   : > { %v2206_v52 = vrot.slane %v20038_v2, 3  ;;  %vm2194_vm3 = vsmask.f32 4352  ;;  %9417 = vrot.lane.b32.xlu1 %v988_v54, %s12234_s12  ;;  %vm13645_vm4 = vmpackc.low %vm1282_vm10, %vm1282_vm10  ;;  %20409 = vst [vmem:[#allocation62_spill] sm:$0xff] %v13649_v1  ;;  %vm1281_vm2 = vcmp.eq.s32.totalorder %v13649_v1, 1 }
 0x11b   : > { %v8588_v53 = vrot.slane %v8586_v13, 4  ;;  %v8591_v48 = vrot.slane %v8589_v3, 5  ;;  %v2209_v56 = vrot.slane %v20037_v18, 4  ;;  %v1312_v3 = vsel %vm1258_vm11, %v988_v54, 0.0  ;;  %vm13668_vm11 = vmpackc.low %vm1281_vm2, %vm1281_vm2 }
 0x11c   : > { %v13618_v14 = vpop.f32.mrb[24].mxu0  ;;  %v13622_v29 = vpop.f32.mrb[24].mxu1  ;;  %v1351_v2 = vpack.c.bf16 %v1312_v3, %v1311_v59 }
 0x11d   : > { %v10962_v60 = vpop.f32.mrb[25].mxu1  ;;  %v10906_v21 = vpop.f32.mrb[25].mxu0  ;;  %v13633_v46 = vor.u32 %v8591_v48, %v8588_v53  ;;  %v13640_v18 = vor.u32 %v2209_v56, %v2206_v52  ;;  %v12160_v53 = vld [vmem:[%s12351_s30 + $0xd4] sm:$0xf]  ;;  %v12161_v52 = vld [vmem:[%s12351_s30 + $0xd0] sm:$0xf] }
 0x11e   : > { %v13629_v22 = vpop.f32.mrb[26].mxu0  ;;  %v13631_v13 = vpop.f32.mrb[26].mxu1  ;;  %v2202_v21 = vor.u32 %v2201_v57, %v2198_v43  ;;  %1378 = vst.msk [vmem:[#allocation2 + $0x80] sm:$0xff] %vm472_vm8, %v1351_v2  ;;  %v1498_v48 = vsel %vm13645_vm4, %v12160_v53, 4048220490  ;;  %v756_v53 = vadd.f32 %v13472_v38, %v13373_v26  ;;  %v865_v26 = vadd.f32 %v13472_v38, %v13350_v31 }
 0x11f   : > { %v10907_v41 = vpop.f32.mrb[27].mxu0  ;;  %v10963_v60 = vpop.f32.mrb[27].mxu1  ;;  %v13653_v9 = vsel %vm3063_vm12, %v8583_v39, %v13633_v46  ;;  %v1497_v56 = vsel %vm13668_vm11, %v12161_v52, 4048220490  ;;  %v10316_v52 = vld [vmem:[%s19928_s4 + $0x8] sm:$0xf] }
 0x120   : > { %20410 = vst [vmem:[#allocation63_spill] sm:$0xff] %v13653_v9  ;;  %v2211_v43 = vsel %vm2194_vm3, %v2202_v21, %v13640_v18  ;;  %v10260_v41 = vcombine.low %v1497_v56, %v1498_v48  ;;  %v8278_v48 = vsel %vm13668_vm11, 65537, %v20340_v37  ;;  %v962_v9 = vmax.f32 %v756_v53, 0.0 }
 0x121   : > { %11101 = vmatmul.mubr.msk.bf16.vlgmr.msra.gmra.mrb[56].mxu0 %vm472_vm8, %v2211_v43  ;;  %v753_v43 = vadd.f32 %v13472_v38, %v13330_v17  ;;  %v3267_v17 = vsel %vm1804_vm0, %v10316_v52, 0  ;;  %vm20416_vm11 = vcmp.eq.s32.totalorder %v12794_v58, 1 }
 0x122   : > { %11104 = vmatprep.mubr.msk.bf16.mxu0 %vm12233_vm6, %v20406_v19  ;;  %1687 = vst.msk [vmem:[#allocation3 + $0xe0] sm:$0xff] %vm477_vm5, %v10260_v41  ;;  %11209 = vmatpush3.bf16.msra.mxu1 %v3267_v17  ;;  %v1286_v31 = vsel %vm20416_vm11, %v962_v9, 0.0  ;;  %vm20420_vm11 = vcmp.eq.s32.totalorder %v12818_v10, 1 }
 0x123   : > { %11428 = vmatprep.subr.bf16.mxu1 %v20406_v19  ;;  %9365 = vrot.lane.b32.xlu1 %v962_v9, %s12234_s12 }
 0x124   : > { %v13663_v54 = vpop.f32.mrb[28].mxu0  ;;  %v13674_v2 = vpop.f32.mrb[28].mxu1 }
 0x125   : > { %v10910_v57 = vpop.f32.mrb[29].mxu0  ;;  %v10966_v59 = vpop.f32.mrb[29].mxu1 }
 0x126   : > { %v13679_v3 = vpop.f32.mrb[30].mxu0  ;;  %v13681_v60 = vpop.f32.mrb[30].mxu1  ;;  %v8279_v57 = vsel %vm13645_vm4, 65537, %v20340_v37  ;;  %v10344_v37 = vld [vmem:[%s19928_s4 + $0xc] sm:$0xf]  ;;  %vm20415_vm4 = vcmp.eq.s32.totalorder %v12778_v51, 1 }
 0x127   : > { %v10911_v21 = vpop.f32.mrb[31].mxu0  ;;  %v10967_v59 = vpop.f32.mrb[31].mxu1  ;;  %v10539_v56 = vcombine.low %v8278_v48, %v8279_v57 }
 0x128   : > { %v961_v21 = vmax.f32 %v753_v43, 0.0  ;;  %v761_v43 = vadd.f32 %v13472_v38, %v13405_v12  ;;  %v764_v12 = vadd.f32 %v13472_v38, %v13426_v61  ;;  %v873_v61 = vadd.f32 %v13472_v38, %v13424_v5 }
 0x129   : > { %v8595_v59 = vshrl.u32 %v10539_v56, 16  ;;  %v8598_v41 = vshll.u32 %v10539_v56, 16  ;;  %v769_v5 = vadd.f32 %v13472_v38, %v13453_v27 }
 0x12a   : > { %9363 = vrot.lane.b32.xlu0 %v961_v21, %s12234_s12  ;;  %v1285_v30 = vsel %vm20415_vm4, %v961_v21, 0.0  ;;  %v989_v21 = vmax.f32 %v865_v26, 0.0  ;;  %vm20417_vm4 = vcmp.eq.s32.totalorder %v13082_v16, 1 }
 0x12b   : > { %v8597_v48 = vrot.slane %v8595_v59, 4  ;;  %v8600_v56 = vrot.slane %v8598_v41, 5  ;;  %v1338_v17 = vpack.c.bf16 %v1286_v31, %v1285_v30  ;;  %v963_v41 = vmax.f32 %v761_v43, 0.0 }
 0x12c   : > { %v13702_v63 = vpop.f32.mrb[32].mxu0  ;;  %v13707_v39 = vpop.f32.mrb[32].mxu1  ;;  %v20418_v31 = vrot.slane %v13573_v4, 4 }
 0x12d   : > { %20413 = vst [vmem:[#allocation64_spill] sm:$0xff] %v13702_v63  ;;  %20414 = vst [vmem:[#allocation65_spill] sm:$0xff] %v13707_v39  ;;  %v10914_v57 = vpop.f32.mrb[33].mxu0  ;;  %v10970_v53 = vpop.f32.mrb[33].mxu1  ;;  %v4046_v39 = vsel %vm1804_vm0, %v10344_v37, 0  ;;  %v990_v63 = vmax.f32 %v868_v20, 0.0  ;;  %v13728_v9 = vor.u32 %v8600_v56, %v8597_v48 }
 0x12e   : > { %v13718_v52 = vpop.f32.mrb[34].mxu0  ;;  %v13720_v57 = vld [vmem:[#allocation2 + $0x10] sm:$0xff]  ;;  %v13722_v1 = vpop.f32.mrb[34].mxu1  ;;  %1365 = vst.msk [vmem:[#allocation2 + $0x18] sm:$0xff] %vm472_vm8, %v1338_v17  ;;  %11319 = vmatpush3.bf16.msra.mxu0 %v4046_v39  ;;  %9419 = vrot.lane.b32.xlu0 %v989_v21, %s12234_s12  ;;  %v1313_v37 = vsel %vm1259_vm1, %v989_v21, 0.0  ;;  %vm20419_vm1 = vcmp.eq.s32.totalorder %v12820_v11, 1  ;;  %v772_v11 = vadd.f32 %v13472_v38, %v13474_v15 }
 0x12f   : > { %v10915_v51 = vpop.f32.mrb[35].mxu0  ;;  %v10971_v58 = vpop.f32.mrb[35].mxu1  ;;  %v1314_v59 = vsel %vm20417_vm4, %v990_v63, 0.0  ;;  %9421 = vrot.lane.b32.xlu1 %v990_v63, %s12234_s12  ;;  %v1808_v26 = vrot.slane %v13720_v57, 4  ;;  %11538 = vmatprep.subr.bf16.mxu0 %v20406_v19  ;;  %v13739_v20 = vsel %vm3063_vm12, %v13633_v46, %v13728_v9  ;;  %v964_v46 = vmax.f32 %v764_v12, 0.0 }
 0x130   : > { %v1352_v39 = vpack.c.bf16 %v1314_v59, %v1313_v37  ;;  %v20057_v56 = vshrl.u32 %v13720_v57, 16  ;;  %v1287_v21 = vsel %vm20419_vm1, %v963_v41, 0.0  ;;  %v20056_v58 = vshll.u32 %v13720_v57, 16 }
 0x131   : > { %v1809_v43 = vsel %vm1804_vm0, %v20418_v31, %v1808_v26  ;;  %v1288_v25 = vsel %vm20420_vm11, %v964_v46, 0.0  ;;  %v991_v12 = vmax.f32 %v873_v61, 0.0  ;;  %v881_v31 = vadd.f32 %v13472_v38, %v13467_v55 }
 0x132   : > { %9367 = vrot.lane.b32.xlu0 %v963_v41, %s12234_s12  ;;  %1379 = vst.msk [vmem:[#allocation2 + $0x88] sm:$0xff] %vm472_vm8, %v1352_v39  ;;  %10995 = vmatmul.mubr.msk.bf16.gmra.mrb[56].mxu1 %vm472_vm8, %v1809_v43  ;;  %v1339_v37 = vpack.c.bf16 %v1288_v25, %v1287_v21  ;;  %v2215_v39 = vrot.slane %v20057_v56, 3  ;;  %v2218_v10 = vrot.slane %v20056_v58, 4  ;;  %v992_v41 = vmax.f32 %v876_v0, 0.0 }
 0x133   : > { %9369 = vrot.lane.b32.xlu1 %v964_v46, %s12234_s12  ;;  %10998 = vmatprep.mubr.msk.bf16.mxu1 %vm12233_vm6, %v20406_v19  ;;  %v966_v46 = vmax.f32 %v772_v11, 0.0  ;;  %v1315_v15 = vsel %vm1261_vm7, %v991_v12, 0.0  ;;  %vm20421_vm4 = vcmp.eq.s32.totalorder %v13131_v35, 1  ;;  %vm20422_vm7 = vcmp.eq.s32.totalorder %v12838_v33, 1 }
 0x134   : > { %v13745_v16 = vpop.f32.mrb[36].mxu0  ;;  %v13747_v63 = vpop.f32.mrb[36].mxu1  ;;  %1366 = vst.msk [vmem:[#allocation2 + $0x20] sm:$0xff] %vm472_vm8, %v1339_v37  ;;  %v2219_v43 = vor.u32 %v2218_v10, %v2215_v39  ;;  %v1316_v21 = vsel %vm20421_vm4, %v992_v41, 0.0  ;;  %vm20423_vm1 = vcmp.eq.s32.totalorder %v12836_v32, 1  ;;  %v993_v33 = vmax.f32 %v881_v31, 0.0 }
 0x135   : > { %v10918_v30 = vpop.f32.mrb[37].mxu0  ;;  %v10974_v53 = vpop.f32.mrb[37].mxu1  ;;  %v13772_v27 = vld [vmem:[#allocation2 + $0x18] sm:$0xff]  ;;  %v1290_v35 = vsel %vm20423_vm1, %v966_v46, 0.0  ;;  %v777_v10 = vadd.f32 %v13472_v38, %v13512_v23  ;;  %v780_v31 = vadd.f32 %v13472_v38, %v13526_v62  ;;  %vm20424_vm11 = vcmp.eq.s32.totalorder %v13169_v40, 1 }
 0x136   : > { %v13753_v48 = vpop.f32.mrb[38].mxu0  ;;  %v13762_v17 = vpop.f32.mrb[38].mxu1  ;;  %9423 = vrot.lane.b32.xlu0 %v991_v12, %s12234_s12  ;;  %v1810_v61 = vrot.slane %v13772_v27, 4  ;;  %v965_v30 = vmax.f32 %v769_v5, 0.0  ;;  %v2220_v25 = vsel %vm2194_vm3, %v13640_v18, %v2219_v43  ;;  %v20055_v37 = vshrl.u32 %v13772_v27, 16 }
 0x137   : > { %v10919_v51 = vpop.f32.mrb[39].mxu0  ;;  %v10975_v59 = vpop.f32.mrb[39].mxu1  ;;  %9425 = vrot.lane.b32.xlu1 %v992_v41, %s12234_s12  ;;  %11105 = vmatmul.mubr.msk.bf16.gmra.mrb[60].mxu0 %vm472_vm8, %v2220_v25  ;;  %v20054_v32 = vshll.u32 %v13772_v27, 16  ;;  %vm20425_vm4 = vcmp.eq.s32.totalorder %v13160_v7, 1  ;;  %vm20427_vm1 = vcmp.eq.s32.totalorder %v12843_v45, 1  ;;  %v13875_v45 = vadd.f32 %v13472_v38, %v13591_v47 }
 0x138   : > { %v884_v51 = vadd.f32 %v13472_v38, %v13479_v36  ;;  %v1811_v0 = vsel %vm1804_vm0, %v1808_v26, %v1810_v61  ;;  %v1353_v59 = vpack.c.bf16 %v1316_v21, %v1315_v15  ;;  %v1289_v24 = vsel %vm20422_vm7, %v965_v30, 0.0  ;;  %11108 = vmatprep.mubr.msk.bf16.mxu0 %vm12233_vm6, %v20406_v19 }
 0x139   : > { %v1340_v26 = vpack.c.bf16 %v1290_v35, %v1289_v24  ;;  %v2224_v41 = vrot.slane %v20055_v37, 3  ;;  %v2227_v15 = vrot.slane %v20054_v32, 4  ;;  %v967_v24 = vmax.f32 %v777_v10, 0.0 }
 0x13a   : > { %9371 = vrot.lane.b32.xlu0 %v965_v30, %s12234_s12  ;;  %10999 = vmatmul.mubr.msk.bf16.gmra.mrb[60].mxu1 %vm472_vm8, %v1811_v0  ;;  %1380 = vst.msk [vmem:[#allocation2 + $0x90] sm:$0xff] %vm472_vm8, %v1353_v59  ;;  %v994_v30 = vmax.f32 %v884_v51, 0.0  ;;  %v889_v0 = vadd.f32 %v13472_v38, %v13515_v6  ;;  %v892_v59 = vadd.f32 %v13472_v38, %v13534_v42  ;;  %v968_v6 = vmax.f32 %v780_v31, 0.0 }
 0x13b   : > { %11002 = vmatprep.mubr.msk.bf16.mxu1 %vm12233_vm6, %v20406_v19  ;;  %9373 = vrot.lane.b32.xlu1 %v966_v46, %s12234_s12  ;;  %1367 = vst.msk [vmem:[#allocation2 + $0x28] sm:$0xff] %vm472_vm8, %v1340_v26  ;;  %v13828_v21 = vld [vmem:[#allocation2 + $0x20] sm:$0xff]  ;;  %v1317_v46 = vsel %vm20424_vm11, %v993_v33, 0.0  ;;  %v2228_v51 = vor.u32 %v2227_v15, %v2224_v41  ;;  %vm20426_vm7 = vcmp.eq.s32.totalorder %v12845_v50, 1  ;;  %v788_v31 = vadd.f32 %v13472_v38, %v13586_v44 }
 0x13c   : > { %v13785_v53 = vpop.f32.mrb[40].mxu0  ;;  %v13795_v5 = vpop.f32.mrb[40].mxu1  ;;  %v1318_v23 = vsel %vm20425_vm4, %v994_v30, 0.0  ;;  %v1812_v62 = vrot.slane %v13828_v21, 4  ;;  %v20051_v50 = vshrl.u32 %v13828_v21, 16  ;;  %v20050_v41 = vshll.u32 %v13828_v21, 16 }
 0x13d   : > { %v10922_v55 = vpop.f32.mrb[41].mxu0  ;;  %v10978_v36 = vpop.f32.mrb[41].mxu1  ;;  %v2229_v7 = vsel %vm2194_vm3, %v2219_v43, %v2228_v51  ;;  %v13857_v43 = vadd.f32 %v13472_v38, %v13575_v34  ;;  %vm20428_vm11 = vcmp.eq.s32.totalorder %v13192_v49, 1  ;;  %vm20429_vm4 = vcmp.eq.s32.totalorder %v13188_v28, 1  ;;  %v20430_v28 = vld [vmem:[#allocation7_spill] sm:$0xff] }
 0x13e   : > { %v13804_v12 = vpop.f32.mrb[42].mxu0  ;;  %v13809_v18 = vpop.f32.mrb[42].mxu1  ;;  %9427 = vrot.lane.b32.xlu0 %v993_v33, %s12234_s12  ;;  %v1354_v55 = vpack.c.bf16 %v1318_v23, %v1317_v46  ;;  %v1813_v42 = vsel %vm1804_vm0, %v1810_v61, %v1812_v62  ;;  %v785_v33 = vadd.f32 %v13472_v38, %v13560_v8  ;;  %v1292_v61 = vsel %vm20427_vm1, %v968_v6, 0.0 }
 0x13f   : > { %v10923_v39 = vpop.f32.mrb[43].mxu0  ;;  %v10979_v11 = vpop.f32.mrb[43].mxu1  ;;  %9429 = vrot.lane.b32.xlu1 %v994_v30, %s12234_s12  ;;  %11109 = vmatmul.mubr.msk.bf16.gmra.mrb[64].mxu0 %vm472_vm8, %v2229_v7  ;;  %v995_v8 = vmax.f32 %v889_v0, 0.0  ;;  %v996_v46 = vmax.f32 %v892_v59, 0.0  ;;  %v2233_v23 = vrot.slane %v20051_v50, 3  ;;  %v2236_v0 = vrot.slane %v20050_v41, 4 }
 0x140   : > { %1381 = vst.msk [vmem:[#allocation2 + $0x98] sm:$0xff] %vm472_vm8, %v1354_v55  ;;  %v1291_v39 = vsel %vm20426_vm7, %v967_v24, 0.0  ;;  %11112 = vmatprep.mubr.msk.bf16.mxu0 %vm12233_vm6, %v20406_v19  ;;  %v969_v47 = vmax.f32 %v785_v33, 0.0  ;;  %v970_v59 = vmax.f32 %v788_v31, 0.0  ;;  %vm20431_vm7 = vcmp.eq.s32.totalorder %v20430_v28, 1  ;;  %v20432_v33 = vld [vmem:[#allocation6_spill] sm:$0xff] }
 0x141   : > { %v1341_v15 = vpack.c.bf16 %v1292_v61, %v1291_v39  ;;  %v1319_v55 = vsel %vm20428_vm11, %v995_v8, 0.0  ;;  %v1320_v44 = vsel %vm20429_vm4, %v996_v46, 0.0  ;;  %v2237_v7 = vor.u32 %v2236_v0, %v2233_v23 }
 0x142   : > { %9375 = vrot.lane.b32.xlu0 %v967_v24, %s12234_s12  ;;  %11003 = vmatmul.mubr.msk.bf16.gmra.mrb[64].mxu1 %vm472_vm8, %v1813_v42  ;;  %v13868_v30 = vld [vmem:[#allocation2 + $0x28] sm:$0xff]  ;;  %v1293_v39 = vsel %vm20431_vm7, %v969_v47, 0.0  ;;  %vm20433_vm1 = vcmp.eq.s32.totalorder %v20432_v33, 1  ;;  %v13917_v31 = vadd.f32 %v13472_v38, %v13629_v22  ;;  %v20434_v22 = vld [vmem:[#allocation37_spill] sm:$0xff]  ;;  %v20436_v33 = vld [vmem:[#allocation36_spill] sm:$0xff]  ;;  %v14131_v50 = vadd.f32 %v13472_v38, %v13795_v5 }
 0x143   : > { %9377 = vrot.lane.b32.xlu1 %v968_v6, %s12234_s12  ;;  %11006 = vmatprep.mubr.msk.bf16.mxu1 %vm12233_vm6, %v20406_v19  ;;  %v1814_v24 = vrot.slane %v13868_v30, 4  ;;  %1368 = vst.msk [vmem:[#allocation2 + $0x30] sm:$0xff] %vm472_vm8, %v1341_v15  ;;  %v1355_v6 = vpack.c.bf16 %v1320_v44, %v1319_v55  ;;  %v20046_v61 = vshll.u32 %v13868_v30, 16  ;;  %v997_v15 = vmax.f32 %v13857_v43, 0.0 }
 0x144   : > { %v13836_v25 = vpop.f32.mrb[44].mxu0  ;;  %v13842_v40 = vpop.f32.mrb[44].mxu1  ;;  %v998_v55 = vmax.f32 %v13875_v45, 0.0  ;;  %vm20435_vm11 = vcmp.eq.s32.totalorder %v20434_v22, 1  ;;  %v972_v45 = vmax.f32 %v13917_v31, 0.0  ;;  %vm20437_vm4 = vcmp.eq.s32.totalorder %v20436_v33, 1 }
 0x145   : > { %v10926_v35 = vpop.f32.mrb[45].mxu0  ;;  %v10982_v36 = vpop.f32.mrb[45].mxu1  ;;  %v1815_v49 = vsel %vm1804_vm0, %v1812_v62, %v1814_v24  ;;  %1382 = vst.msk [vmem:[#allocation2 + $0xa0] sm:$0xff] %vm472_vm8, %v1355_v6  ;;  %v13938_v6 = vadd.f32 %v13472_v38, %v13631_v13 }
 0x146   : > { %v13846_v26 = vpop.f32.mrb[46].mxu0  ;;  %v13859_v11 = vpop.f32.mrb[46].mxu1  ;;  %9431 = vrot.lane.b32.xlu0 %v995_v8, %s12234_s12  ;;  %v13892_v35 = vadd.f32 %v13472_v38, %v13618_v14  ;;  %v13899_v36 = vadd.f32 %v13472_v38, %v13622_v29  ;;  %v1294_v14 = vsel %vm20433_vm1, %v970_v59, 0.0  ;;  %v2238_v29 = vsel %vm2194_vm3, %v2228_v51, %v2237_v7 }
 0x147   : > { %v10927_v10 = vpop.f32.mrb[47].mxu0  ;;  %v10983_v34 = vpop.f32.mrb[47].mxu1  ;;  %9433 = vrot.lane.b32.xlu1 %v996_v46, %s12234_s12  ;;  %11113 = vmatmul.mubr.msk.bf16.gmra.mrb[68].mxu0 %vm472_vm8, %v2238_v29  ;;  %v2245_v51 = vrot.slane %v20046_v61, 4 }
 0x148   : > { %v20047_v10 = vshrl.u32 %v13868_v30, 16  ;;  %v1342_v34 = vpack.c.bf16 %v1294_v14, %v1293_v39  ;;  %11116 = vmatprep.mubr.msk.bf16.mxu0 %vm12233_vm6, %v20406_v19  ;;  %v971_v28 = vmax.f32 %v13892_v35, 0.0  ;;  %v1322_v14 = vsel %vm20437_vm4, %v998_v55, 0.0 }
 0x149   : > { %v999_v13 = vmax.f32 %v13899_v36, 0.0  ;;  %v13966_v36 = vadd.f32 %v13472_v38, %v13674_v2 }
 0x14a   : > { %9379 = vrot.lane.b32.xlu0 %v969_v47, %s12234_s12  ;;  %v2242_v0 = vrot.slane %v20047_v10, 3  ;;  %11007 = vmatmul.mubr.msk.bf16.gmra.mrb[68].mxu1 %vm472_vm8, %v1815_v49  ;;  %1369 = vst.msk [vmem:[#allocation2 + $0x38] sm:$0xff] %vm472_vm8, %v1342_v34  ;;  %v1321_v47 = vsel %vm20435_vm11, %v997_v15, 0.0  ;;  %v13952_v35 = vld [vmem:[#allocation2 + $0x30] sm:$0xff]  ;;  %v20438_v34 = vld [vmem:[#allocation9_spill] sm:$0xff] }
 0x14b   : > { %9381 = vrot.lane.b32.xlu1 %v970_v59, %s12234_s12  ;;  %11010 = vmatprep.mubr.msk.bf16.mxu1 %vm12233_vm6, %v20406_v19  ;;  %v1356_v29 = vpack.c.bf16 %v1322_v14, %v1321_v47  ;;  %vm20439_vm7 = vcmp.eq.s32.totalorder %v20438_v34, 1  ;;  %v20440_v59 = vld [vmem:[#allocation8_spill] sm:$0xff]  ;;  %v20042_v47 = vshll.u32 %v13952_v35, 16 }
 0x14c   : > { %v13901_v42 = vpop.f32.mrb[48].mxu0  ;;  %v13910_v8 = vpop.f32.mrb[48].mxu1  ;;  %v2246_v49 = vor.u32 %v2245_v51, %v2242_v0  ;;  %v1295_v31 = vsel %vm20439_vm7, %v971_v28, 0.0  ;;  %vm20441_vm1 = vcmp.eq.s32.totalorder %v20440_v59, 1  ;;  %v13960_v0 = vadd.f32 %v13472_v38, %v13679_v3  ;;  %v20445_v59 = vld [vmem:[#allocation64_spill] sm:$0xff] }
 0x14d   : > { %v10930_v62 = vpop.f32.mrb[49].mxu0  ;;  %v10986_v46 = vpop.f32.mrb[49].mxu1  ;;  %1383 = vst.msk [vmem:[#allocation2 + $0xa8] sm:$0xff] %vm472_vm8, %v1356_v29  ;;  %v1323_v3 = vsel %vm1269_vm15, %v999_v13, 0.0 }
 0x14e   : > { %v13919_v23 = vpop.f32.mrb[50].mxu0  ;;  %v13928_v43 = vpop.f32.mrb[50].mxu1  ;;  %v13949_v62 = vadd.f32 %v13472_v38, %v13663_v54  ;;  %v1296_v46 = vsel %vm20441_vm1, %v972_v45, 0.0  ;;  %9435 = vrot.lane.b32.xlu0 %v997_v15, %s12234_s12  ;;  %v1816_v54 = vrot.slane %v13952_v35, 4  ;;  %v2247_v22 = vsel %vm2194_vm3, %v2237_v7, %v2246_v49 }
 0x14f   : > { %v10931_v44 = vpop.f32.mrb[51].mxu0  ;;  %v10987_v39 = vpop.f32.mrb[51].mxu1  ;;  %v1343_v51 = vpack.c.bf16 %v1296_v46, %v1295_v31  ;;  %v1000_v15 = vmax.f32 %v13938_v6, 0.0  ;;  %9437 = vrot.lane.b32.xlu1 %v998_v55, %s12234_s12  ;;  %v974_v29 = vmax.f32 %v13960_v0, 0.0  ;;  %v2254_v6 = vrot.slane %v20042_v47, 4  ;;  %v20443_v31 = vld [vmem:[#allocation39_spill] sm:$0xff]  ;;  %11117 = vmatmul.mubr.msk.bf16.gmra.mrb[72].mxu0 %vm472_vm8, %v2247_v22 }
 0x150   : > { %v20043_v44 = vshrl.u32 %v13952_v35, 16  ;;  %v1817_v2 = vsel %vm1804_vm0, %v1814_v24, %v1816_v54  ;;  %v973_v14 = vmax.f32 %v13949_v62, 0.0  ;;  %v13990_v55 = vadd.f32 %v13472_v38, %v13681_v60  ;;  %v20446_v39 = vld [vmem:[#allocation11_spill] sm:$0xff]  ;;  %11120 = vmatprep.mubr.msk.bf16.mxu0 %vm12233_vm6, %v20406_v19 }
 0x151   : > { %1370 = vst.msk [vmem:[#allocation2 + $0x40] sm:$0xff] %vm472_vm8, %v1343_v51  ;;  %vm20444_vm15 = vcmp.eq.s32.totalorder %v20443_v31, 1  ;;  %v13996_v46 = vadd.f32 %v13472_v38, %v20445_v59  ;;  %v14002_v0 = vld [vmem:[#allocation2 + $0x38] sm:$0xff]  ;;  %vm20447_vm11 = vcmp.eq.s32.totalorder %v20446_v39, 1  ;;  %v1001_v47 = vmax.f32 %v13966_v36, 0.0 }
 0x152   : > { %v2251_v7 = vrot.slane %v20043_v44, 3  ;;  %v1324_v24 = vsel %vm20444_vm15, %v1000_v15, 0.0  ;;  %9383 = vrot.lane.b32.xlu0 %v971_v28, %s12234_s12  ;;  %v1297_v60 = vsel %vm20447_vm11, %v973_v14, 0.0  ;;  %11011 = vmatmul.mubr.msk.bf16.gmra.mrb[72].mxu1 %vm472_vm8, %v1817_v2  ;;  %v20450_v28 = vld [vmem:[#allocation65_spill] sm:$0xff]  ;;  %v1818_v36 = vrot.slane %v14002_v0, 4 }
 0x153   : > { %v1357_v62 = vpack.c.bf16 %v1324_v24, %v1323_v3  ;;  %v14014_v3 = vadd.f32 %v13472_v38, %v20450_v28  ;;  %v20045_v24 = vshrl.u32 %v14002_v0, 16  ;;  %9385 = vrot.lane.b32.xlu1 %v972_v45, %s12234_s12  ;;  %11014 = vmatprep.mubr.msk.bf16.mxu1 %vm12233_vm6, %v20406_v19  ;;  %v14025_v2 = vadd.f32 %v13472_v38, %v13718_v52 }
 0x154   : > { %v13975_v33 = vpop.f32.mrb[52].mxu0  ;;  %v2255_v22 = vor.u32 %v2254_v6, %v2251_v7  ;;  %v20451_v7 = vld [vmem:[#allocation45_spill] sm:$0xff]  ;;  %v14032_v45 = vadd.f32 %v13472_v38, %v13722_v1  ;;  %v975_v52 = vmax.f32 %v13996_v46, 0.0 }
 0x155   : > { %v10934_v34 = vpop.f32.mrb[53].mxu0  ;;  %1384 = vst.msk [vmem:[#allocation2 + $0xb0] sm:$0xff] %vm472_vm8, %v1357_v62  ;;  %vm20452_vm7 = vcmp.eq.s32.totalorder %v20451_v7, 1  ;;  %v1002_v62 = vmax.f32 %v13990_v55, 0.0  ;;  %v1819_v55 = vsel %vm1804_vm0, %v1816_v54, %v1818_v36  ;;  %v14056_v7 = vadd.f32 %v13472_v38, %v13753_v48 }
 0x156   : > { %v13998_v51 = vpop.f32.mrb[54].mxu0  ;;  %v20448_v34 = vld [vmem:[#allocation10_spill] sm:$0xff]  ;;  %v1325_v6 = vsel %vm20452_vm7, %v1001_v47, 0.0  ;;  %v2256_v39 = vsel %vm2194_vm3, %v2246_v49, %v2255_v22  ;;  %9439 = vrot.lane.b32.xlu0 %v999_v13, %s12234_s12  ;;  %v14049_v49 = vadd.f32 %v13472_v38, %v13745_v16  ;;  %v1003_v13 = vmax.f32 %v14014_v3, 0.0 }
 0x157   : > { %vm20449_vm4 = vcmp.eq.s32.totalorder %v20448_v34, 1  ;;  %v10935_v44 = vpop.f32.mrb[55].mxu0  ;;  %v976_v34 = vmax.f32 %v14025_v2, 0.0  ;;  %9441 = vrot.lane.b32.xlu1 %v1000_v15, %s12234_s12  ;;  %11121 = vmatmul.mubr.msk.bf16.gmra.mrb[76].mxu0 %vm472_vm8, %v2256_v39  ;;  %v14071_v54 = vadd.f32 %v13472_v38, %v13747_v63  ;;  %v1004_v15 = vmax.f32 %v14032_v45, 0.0 }
 0x158   : > { %v1298_v31 = vsel %vm20449_vm4, %v974_v29, 0.0  ;;  %v20044_v44 = vshll.u32 %v14002_v0, 16  ;;  %v14045_v28 = vld [vmem:[#allocation2 + $0x40] sm:$0xff]  ;;  %11124 = vmatprep.mubr.msk.bf16.mxu0 %vm12233_vm6, %v20406_v19  ;;  %v977_v39 = vmax.f32 %v14049_v49, 0.0 }
 0x159   : > { %v1344_v59 = vpack.c.bf16 %v1298_v31, %v1297_v60  ;;  %v2260_v60 = vrot.slane %v20045_v24, 3  ;;  %v20457_v24 = vld [vmem:[#allocation13_spill] sm:$0xff]  ;;  %v20049_v61 = vshrl.u32 %v14045_v28, 16  ;;  %v20048_v10 = vshll.u32 %v14045_v28, 16 }
 0x15a   : > { %v2263_v31 = vrot.slane %v20044_v44, 4  ;;  %v20455_v44 = vld [vmem:[#allocation14_spill] sm:$0xff]  ;;  %vm20458_vm11 = vcmp.eq.s32.totalorder %v20457_v24, 1  ;;  %9387 = vrot.lane.b32.xlu0 %v973_v14, %s12234_s12  ;;  %11015 = vmatmul.mubr.msk.bf16.gmra.mrb[76].mxu1 %vm472_vm8, %v1819_v55  ;;  %v20459_v14 = vld [vmem:[#allocation47_spill] sm:$0xff] }
 0x15b   : > { %1371 = vst.msk [vmem:[#allocation2 + $0x48] sm:$0xff] %vm472_vm8, %v1344_v59  ;;  %v20453_v59 = vld [vmem:[#allocation43_spill] sm:$0xff]  ;;  %vm20456_vm15 = vcmp.eq.s32.totalorder %v20455_v44, 1  ;;  %v1300_v16 = vsel %vm20458_vm11, %v976_v34, 0.0  ;;  %v1820_v44 = vrot.slane %v14045_v28, 4  ;;  %vm20460_vm4 = vcmp.eq.s32.totalorder %v20459_v14, 1  ;;  %9389 = vrot.lane.b32.xlu1 %v974_v29, %s12234_s12  ;;  %11018 = vmatprep.mubr.msk.bf16.mxu1 %vm12233_vm6, %v20406_v19 }
 0x15c   : > { %vm20454_vm1 = vcmp.eq.s32.totalorder %v20453_v59, 1  ;;  %v1299_v59 = vsel %vm20456_vm15, %v975_v52, 0.0  ;;  %v2264_v24 = vor.u32 %v2263_v31, %v2260_v60  ;;  %v2269_v63 = vrot.slane %v20049_v61, 3  ;;  %v20461_v31 = vld [vmem:[#allocation46_spill] sm:$0xff] }
 0x15d   : > { %v1326_v1 = vsel %vm20454_vm1, %v1002_v62, 0.0  ;;  %v1345_v48 = vpack.c.bf16 %v1300_v16, %v1299_v59  ;;  %v2272_v60 = vrot.slane %v20048_v10, 4  ;;  %vm20462_vm7 = vcmp.eq.s32.totalorder %v20461_v31, 1  ;;  %v20463_v16 = vld [vmem:[#allocation17_spill] sm:$0xff]  ;;  %v20465_v31 = vld [vmem:[#allocation16_spill] sm:$0xff] }
 0x15e   : > { %v1358_v46 = vpack.c.bf16 %v1326_v1, %v1325_v6  ;;  %v1327_v6 = vsel %vm20460_vm4, %v1003_v13, 0.0  ;;  %v1328_v1 = vsel %vm20462_vm7, %v1004_v15, 0.0  ;;  %v978_v29 = vmax.f32 %v14056_v7, 0.0  ;;  %9443 = vrot.lane.b32.xlu0 %v1001_v47, %s12234_s12 }
 0x15f   : > { %1372 = vst.msk [vmem:[#allocation2 + $0x50] sm:$0xff] %vm472_vm8, %v1345_v48  ;;  %v1359_v59 = vpack.c.bf16 %v1328_v1, %v1327_v6  ;;  %vm20464_vm1 = vcmp.eq.s32.totalorder %v20463_v16, 1  ;;  %v14108_v14 = vadd.f32 %v13472_v38, %v13785_v53  ;;  %vm20466_vm15 = vcmp.eq.s32.totalorder %v20465_v31, 1  ;;  %9445 = vrot.lane.b32.xlu1 %v1002_v62, %s12234_s12 }
 0x160   : > { %1385 = vst.msk [vmem:[#allocation2 + $0xb8] sm:$0xff] %vm472_vm8, %v1358_v46  ;;  %v14100_v46 = vadd.f32 %v13472_v38, %v13762_v17  ;;  %v1301_v48 = vsel %vm20464_vm1, %v977_v39, 0.0  ;;  %v1302_v10 = vsel %vm20466_vm15, %v978_v29, 0.0  ;;  %v1005_v1 = vmax.f32 %v14071_v54, 0.0 }
 0x161   : > { %v2265_v16 = vsel %vm2194_vm3, %v2255_v22, %v2264_v24  ;;  %v1821_v61 = vsel %vm1804_vm0, %v1818_v36, %v1820_v44  ;;  %1386 = vst.msk [vmem:[#allocation2 + $0xc0] sm:$0xff] %vm472_vm8, %v1359_v59  ;;  %v1346_v53 = vpack.c.bf16 %v1302_v10, %v1301_v48  ;;  %v14123_v47 = vadd.f32 %v13472_v38, %v13804_v12  ;;  %v20468_v48 = vld [vmem:[#allocation50_spill] sm:$0xff] }
 0x162   : > { %v14095_v55 = vld [vmem:[#allocation2 + $0x48] sm:$0xff]  ;;  %v14126_v31 = vor.u32 %v2272_v60, %v2269_v63  ;;  %v1006_v10 = vmax.f32 %v14100_v46, 0.0  ;;  %v979_v12 = vmax.f32 %v14108_v14, 0.0  ;;  %v14141_v62 = vadd.f32 %v13472_v38, %v13836_v25  ;;  %11125 = vmatmul.mubr.msk.bf16.gmra.mrb[80].mxu0 %vm472_vm8, %v2265_v16  ;;  %9391 = vrot.lane.b32.xlu0 %v975_v52, %s12234_s12 }
 0x163   : > { %v20053_v17 = vshrl.u32 %v14095_v55, 16  ;;  %v20052_v6 = vshll.u32 %v14095_v55, 16  ;;  %v1822_v41 = vrot.slane %v14095_v55, 4  ;;  %1373 = vst.msk [vmem:[#allocation2 + $0x58] sm:$0xff] %vm472_vm8, %v1346_v53  ;;  %v980_v36 = vmax.f32 %v14123_v47, 0.0  ;;  %11019 = vmatmul.mubr.msk.bf16.gmra.mrb[80].mxu1 %vm472_vm8, %v1821_v61  ;;  %11128 = vmatprep.mubr.msk.bf16.mxu0 %vm12233_vm6, %v20406_v19  ;;  %v20472_v61 = vld [vmem:[#allocation19_spill] sm:$0xff] }
 0x164   : > { %v1329_v60 = vsel %vm1275_vm13, %v1005_v1, 0.0  ;;  %v14153_v59 = vadd.f32 %v13472_v38, %v13842_v40  ;;  %v14157_v25 = vadd.f32 %v13472_v38, %v13846_v26  ;;  %v14164_v52 = vadd.f32 %v13472_v38, %v13809_v18  ;;  %v20470_v40 = vld [vmem:[#allocation20_spill] sm:$0xff]  ;;  %9393 = vrot.lane.b32.xlu1 %v976_v34, %s12234_s12  ;;  %11022 = vmatprep.mubr.msk.bf16.mxu1 %vm12233_vm6, %v20406_v19 }
 0x165   : > { %v2278_v22 = vrot.slane %v20053_v17, 3  ;;  %v2281_v5 = vrot.slane %v20052_v6, 4  ;;  %vm20469_vm13 = vcmp.eq.s32.totalorder %v20468_v48, 1  ;;  %vm20471_vm11 = vcmp.eq.s32.totalorder %v20470_v40, 1 }
 0x166   : > { %v1330_v16 = vsel %vm20469_vm13, %v1006_v10, 0.0  ;;  %v1303_v26 = vsel %vm20471_vm11, %v979_v12, 0.0  ;;  %vm20473_vm4 = vcmp.eq.s32.totalorder %v20472_v61, 1  ;;  %v981_v48 = vmax.f32 %v14141_v62, 0.0  ;;  %9447 = vrot.lane.b32.xlu0 %v1003_v13, %s12234_s12  ;;  %v14203_v40 = vld [vmem:[#allocation2 + $0x50] sm:$0xff] }
 0x167   : > { %v1304_v53 = vsel %vm20473_vm4, %v980_v36, 0.0  ;;  %v1360_v18 = vpack.c.bf16 %v1330_v16, %v1329_v60  ;;  %v1007_v6 = vmax.f32 %v14131_v50, 0.0  ;;  %v1009_v2 = vmax.f32 %v14153_v59, 0.0 }
 0x168   : > { %v1347_v63 = vpack.c.bf16 %v1304_v53, %v1303_v26  ;;  %v982_v34 = vmax.f32 %v14157_v25, 0.0  ;;  %v14194_v60 = vadd.f32 %v13472_v38, %v13859_v11  ;;  %v2274_v16 = vsel %vm2194_vm3, %v2264_v24, %v14126_v31  ;;  %9449 = vrot.lane.b32.xlu1 %v1004_v15, %s12234_s12  ;;  %v20474_v38 = vld [vmem:[#allocation23_spill] sm:$0xff]  ;;  %v20476_v24 = vld [vmem:[#allocation22_spill] sm:$0xff] }
 0x169   : > { %1387 = vst.msk [vmem:[#allocation2 + $0xc8] sm:$0xff] %vm472_vm8, %v1360_v18  ;;  %v1823_v3 = vsel %vm1804_vm0, %v1820_v44, %v1822_v41  ;;  %v14201_v13 = vor.u32 %v2281_v5, %v2278_v22  ;;  %v1008_v26 = vmax.f32 %v14164_v52, 0.0  ;;  %vm20475_vm7 = vcmp.eq.s32.totalorder %v20474_v38, 1  ;;  %v12162_v5 = vld [vmem:[%s19927_s3] ss:$0 sm:$0xff] }
 0x16a   : > { %1374 = vst.msk [vmem:[#allocation2 + $0x60] sm:$0xff] %vm472_vm8, %v1347_v63  ;;  %v1305_v11 = vsel %vm20475_vm7, %v981_v48, 0.0  ;;  %vm20477_vm1 = vcmp.eq.s32.totalorder %v20476_v24, 1  ;;  %v1010_v22 = vmax.f32 %v14194_v60, 0.0  ;;  %v14222_v61 = vadd.f32 %v12162_v5, %v13901_v42  ;;  %v20479_v18 = vld [vmem:[#allocation54_spill] sm:$0xff]  ;;  %11129 = vmatmul.mubr.msk.bf16.gmra.mrb[84].mxu0 %vm472_vm8, %v2274_v16  ;;  %9395 = vrot.lane.b32.xlu0 %v977_v39, %s12234_s12 }
 0x16b   : > { %v1306_v44 = vsel %vm20477_vm1, %v982_v34, 0.0  ;;  %v1331_v15 = vsel %vm1277_vm9, %v1007_v6, 0.0  ;;  %vm20480_vm15 = vcmp.eq.s32.totalorder %v20479_v18, 1  ;;  %v14233_v38 = vadd.f32 %v12162_v5, %v13910_v8  ;;  %11023 = vmatmul.mubr.msk.bf16.gmra.mrb[84].mxu1 %vm472_vm8, %v1823_v3  ;;  %11132 = vmatprep.mubr.msk.bf16.mxu0 %vm12233_vm6, %v20406_v19  ;;  %v14654_v56 = vld [vmem:[#allocation2 + $0xc0] sm:$0xff] }
 0x16c   : > { %v1348_v53 = vpack.c.bf16 %v1306_v44, %v1305_v11  ;;  %v1332_v63 = vsel %vm20480_vm15, %v1008_v26, 0.0  ;;  %v1333_v24 = vsel %vm1279_vm14, %v1009_v2, 0.0  ;;  %v2285_v11 = vshrl.u32 %v14203_v40, 16  ;;  %v20482_v44 = vld [vmem:[#allocation57_spill] sm:$0xff]  ;;  %9397 = vrot.lane.b32.xlu1 %v978_v29, %s12234_s12  ;;  %11026 = vmatprep.mubr.msk.bf16.mxu1 %vm12233_vm6, %v20406_v19 }
 0x16d   : > { %vm20483_vm9 = vcmp.eq.s32.totalorder %v20482_v44, 1  ;;  %v1361_v8 = vpack.c.bf16 %v1332_v63, %v1331_v15  ;;  %v2288_v49 = vshll.u32 %v14203_v40, 16  ;;  %v1824_v16 = vrot.slane %v14203_v40, 4  ;;  %v20486_v44 = vld [vmem:[#allocation25_spill] sm:$0xff] }
 0x16e   : > { %v1334_v45 = vsel %vm20483_vm9, %v1010_v22, 0.0  ;;  %1375 = vst.msk [vmem:[#allocation2 + $0x68] sm:$0xff] %vm472_vm8, %v1348_v53  ;;  %v983_v3 = vmax.f32 %v14222_v61, 0.0  ;;  %v14262_v15 = vadd.f32 %v12162_v5, %v13919_v23  ;;  %v1011_v53 = vmax.f32 %v14233_v38, 0.0  ;;  %9451 = vrot.lane.b32.xlu0 %v1005_v1, %s12234_s12  ;;  %v14295_v1 = vld [vmem:[#allocation2 + $0x58] sm:$0xff] }
 0x16f   : > { %v1362_v39 = vpack.c.bf16 %v1334_v45, %v1333_v24  ;;  %1388 = vst.msk [vmem:[#allocation2 + $0xd0] sm:$0xff] %vm472_vm8, %v1361_v8  ;;  %v14267_v18 = vadd.f32 %v12162_v5, %v13928_v43  ;;  %v14270_v7 = vadd.f32 %v12162_v5, %v13975_v33  ;;  %v14273_v29 = vadd.f32 %v12162_v5, %v13998_v51 }
 0x170   : > { %v2283_v63 = vsel %vm2194_vm3, %v14126_v31, %v14201_v13  ;;  %v2287_v23 = vrot.slane %v2285_v11, 3  ;;  %v984_v43 = vmax.f32 %v14262_v15, 0.0  ;;  %v2290_v33 = vrot.slane %v2288_v49, 4  ;;  %9453 = vrot.lane.b32.xlu1 %v1006_v10, %s12234_s12  ;;  %v20484_v31 = vld [vmem:[#allocation26_spill] sm:$0xff] }
 0x171   : > { %1389 = vst.msk [vmem:[#allocation2 + $0xd8] sm:$0xff] %vm472_vm8, %v1362_v39  ;;  %v1012_v42 = vmax.f32 %v14267_v18, 0.0  ;;  %v985_v51 = vmax.f32 %v14270_v7, 0.0  ;;  %v986_v5 = vmax.f32 %v14273_v29, 0.0  ;;  %v1825_v54 = vsel %vm1804_vm0, %v1822_v41, %v1824_v16 }
 0x172   : > { %vm20485_vm14 = vcmp.eq.s32.totalorder %v20484_v31, 1  ;;  %vm20487_vm13 = vcmp.eq.s32.totalorder %v20486_v44, 1  ;;  %v1335_v46 = vsel %vm1281_vm2, %v1011_v53, 0.0  ;;  %11133 = vmatmul.mubr.msk.bf16.gmra.mrb[88].mxu0 %vm472_vm8, %v2283_v63  ;;  %9399 = vrot.lane.b32.xlu0 %v979_v12, %s12234_s12  ;;  %v20490_v31 = vld [vmem:[#allocation28_spill] sm:$0xff]  ;;  %v2291_v63 = vor.u32 %v2290_v33, %v2287_v23 }
 0x173   : > { %v1307_v24 = vsel %vm20485_vm14, %v983_v3, 0.0  ;;  %v1308_v45 = vsel %vm20487_vm13, %v984_v43, 0.0  ;;  %v1336_v41 = vsel %vm1282_vm10, %v1012_v42, 0.0  ;;  %vm20491_vm11 = vcmp.eq.s32.totalorder %v20490_v31, 1  ;;  %11027 = vmatmul.mubr.msk.bf16.gmra.mrb[88].mxu1 %vm472_vm8, %v1825_v54  ;;  %11136 = vmatprep.mubr.msk.bf16.mxu0 %vm12233_vm6, %v20406_v19 }
 0x174   : > { %v1349_v10 = vpack.c.bf16 %v1308_v45, %v1307_v24  ;;  %v1363_v15 = vpack.c.bf16 %v1336_v41, %v1335_v46  ;;  %v1309_v44 = vsel %vm20491_vm11, %v985_v51, 0.0  ;;  %v20492_v24 = vld [vmem:[#allocation27_spill] sm:$0xff]  ;;  %v2294_v14 = vshrl.u32 %v14295_v1, 16  ;;  %9401 = vrot.lane.b32.xlu1 %v980_v36, %s12234_s12  ;;  %11030 = vmatprep.mubr.msk.bf16.mxu1 %vm12233_vm6, %v20406_v19  ;;  %v14350_v46 = vld [vmem:[#allocation2 + $0x60] sm:$0xff] }
 0x175   : > { %vm20493_vm2 = vcmp.eq.s32.totalorder %v20492_v24, 1  ;;  %v2297_v12 = vshll.u32 %v14295_v1, 16  ;;  %v1826_v54 = vrot.slane %v14295_v1, 4  ;;  %v2292_v23 = vsel %vm2194_vm3, %v14201_v13, %v2291_v63 }
 0x176   : > { %v1310_v45 = vsel %vm20493_vm2, %v986_v5, 0.0  ;;  %1376 = vst.msk [vmem:[#allocation2 + $0x70] sm:$0xff] %vm472_vm8, %v1349_v10  ;;  %1390 = vst.msk [vmem:[#allocation2 + $0xe0] sm:$0xff] %vm472_vm8, %v1363_v15  ;;  %9455 = vrot.lane.b32.xlu0 %v1007_v6, %s12234_s12  ;;  %v2296_v47 = vrot.slane %v2294_v14, 3  ;;  %v2303_v6 = vshrl.u32 %v14350_v46, 16  ;;  %v2306_v52 = vshll.u32 %v14350_v46, 16 }
 0x177   : > { %v1350_v8 = vpack.c.bf16 %v1310_v45, %v1309_v44  ;;  %v2299_v36 = vrot.slane %v2297_v12, 4  ;;  %v1827_v33 = vsel %vm1804_vm0, %v1824_v16, %v1826_v54  ;;  %v1828_v62 = vrot.slane %v14350_v46, 4  ;;  %v14402_v10 = vld [vmem:[#allocation2 + $0xc8] sm:$0xff]  ;;  %v14410_v38 = vld [vmem:[#allocation2 + $0xd0] sm:$0xff] }
 0x178   : > { %9457 = vrot.lane.b32.xlu1 %v1008_v26, %s12234_s12  ;;  %v2305_v13 = vrot.slane %v2303_v6, 3  ;;  %v2308_v26 = vrot.slane %v2306_v52, 4  ;;  %v20060_v41 = vshll.u32 %v14402_v10, 16  ;;  %v20059_v31 = vshrl.u32 %v14410_v38, 16 }
 0x179   : > { %1377 = vst.msk [vmem:[#allocation2 + $0x78] sm:$0xff] %vm472_vm8, %v1350_v8  ;;  %v2300_v50 = vor.u32 %v2299_v36, %v2296_v47  ;;  %v1829_v25 = vsel %vm1804_vm0, %v1826_v54, %v1828_v62  ;;  %v20058_v24 = vshll.u32 %v14410_v38, 16  ;;  %v3117_v1 = vrot.slane %v2306_v52, 5 }
 0x17a   : > { %11137 = vmatmul.mubr.msk.bf16.gmra.mrb[92].mxu0 %vm472_vm8, %v2292_v23  ;;  %9403 = vrot.lane.b32.xlu0 %v981_v48, %s12234_s12  ;;  %v2309_v59 = vor.u32 %v2308_v26, %v2305_v13  ;;  %v3169_v44 = vrot.slane %v20060_v41, 5  ;;  %v3172_v45 = vrot.slane %v20059_v31, 4  ;;  %vm2780_vm10 = vsmask.f32 7424 }
 0x17b   : > { %11031 = vmatmul.mubr.msk.bf16.gmra.mrb[92].mxu1 %vm472_vm8, %v1827_v33  ;;  %11140 = vmatprep.mubr.msk.bf16.mxu0 %vm12233_vm6, %v20406_v19  ;;  %v2301_v48 = vsel %vm2194_vm3, %v2291_v63, %v2300_v50  ;;  %v3173_v47 = vrot.slane %v20058_v24, 5  ;;  %v14639_v24 = vld [vmem:[#allocation2 + $0xb8] sm:$0xff]  ;;  %vm3601_vm4 = vcmask 1046528   ;;  %vm5871_vm7 = vcmask 1042432  }
 0x17c   : > { %9405 = vrot.lane.b32.xlu1 %v982_v34, %s12234_s12  ;;  %11034 = vmatprep.mubr.msk.bf16.mxu1 %vm12233_vm6, %v20406_v19  ;;  %v14379_v34 = vld [vmem:[#allocation2 + $0x68] sm:$0xff]  ;;  %v2310_v61 = vsel %vm2194_vm3, %v2300_v50, %v2309_v59  ;;  %vm8629_vm1 = vcmp.ne.s16.totalorder %v13739_v20, 0  ;;  %vm8630_vm15 = vcmp.ne.s16.totalorder %v13728_v9, 0  ;;  %v10400_v9 = vld [vmem:[%s19928_s4 + $0x14] sm:$0xf] }
 0x17d   : > { %v2315_v60 = vshll.u32 %v14379_v34, 16  ;;  %v14408_v39 = vld [vmem:[#allocation2 + $0x70] sm:$0xff]  ;;  %v14450_v36 = vor.u32 %v3173_v47, %v3172_v45  ;;  %vm3743_vm9 = vsmask.f32 256 }
 0x17e   : > { %9459 = vrot.lane.b32.xlu0 %v1009_v2, %s12234_s12  ;;  %v2312_v2 = vshrl.u32 %v14379_v34, 16  ;;  %v2324_v15 = vshll.u32 %v14408_v39, 16  ;;  %v1832_v7 = vrot.slane %v14408_v39, 4 }
 0x17f   : > { %20494 = vst [vmem:[#allocation7_spill] sm:$0xff] %v14450_v36 }
 0x180   : > { %9461 = vrot.lane.b32.xlu1 %v1010_v22, %s12234_s12  ;;  %v1830_v22 = vrot.slane %v14379_v34, 4  ;;  %v2314_v16 = vrot.slane %v2312_v2, 3  ;;  %v14445_v23 = vld [vmem:[#allocation2 + $0x78] sm:$0xff]  ;;  %v3125_v34 = vrot.slane %v2324_v15, 5 }
 0x181   : > { %v2330_v50 = vshrl.u32 %v14445_v23, 16 }
 0x182   : > { %11141 = vmatmul.mubr.msk.bf16.gmra.mrb[96].mxu0 %vm472_vm8, %v2301_v48  ;;  %9407 = vrot.lane.b32.xlu0 %v983_v3, %s12234_s12  ;;  %v2317_v3 = vrot.slane %v2315_v60, 4  ;;  %v1833_v54 = vsel %vm1804_vm0, %v1830_v22, %v1832_v7  ;;  %v1834_v48 = vrot.slane %v14445_v23, 4 }
 0x183   : > { %11035 = vmatmul.mubr.msk.bf16.gmra.mrb[96].mxu1 %vm472_vm8, %v1829_v25  ;;  %11144 = vmatprep.mubr.msk.bf16.mxu0 %vm12233_vm6, %v20406_v19  ;;  %v2332_v26 = vrot.slane %v2330_v50, 3 }
 0x184   : > { %9409 = vrot.lane.b32.xlu1 %v984_v43, %s12234_s12  ;;  %11038 = vmatprep.mubr.msk.bf16.mxu1 %vm12233_vm6, %v20406_v19  ;;  %v1831_v43 = vsel %vm1804_vm0, %v1828_v62, %v1830_v22  ;;  %v2318_v18 = vor.u32 %v2317_v3, %v2314_v16  ;;  %v2333_v62 = vshll.u32 %v14445_v23, 16 }
 0x186   : > { %9463 = vrot.lane.b32.xlu0 %v1011_v53, %s12234_s12  ;;  %v20061_v53 = vshrl.u32 %v14402_v10, 16  ;;  %v2319_v63 = vsel %vm2194_vm3, %v2309_v59, %v2318_v18  ;;  %v2335_v25 = vrot.slane %v2333_v62, 4  ;;  %v1835_v59 = vsel %vm1804_vm0, %v1832_v7, %v1834_v48 }
 0x188   : > { %9465 = vrot.lane.b32.xlu1 %v1012_v42, %s12234_s12  ;;  %v2321_v42 = vshrl.u32 %v14408_v39, 16  ;;  %v2336_v22 = vor.u32 %v2335_v25, %v2332_v26  ;;  %v3109_v26 = vrot.slane %v2288_v49, 5 }
 0x18a   : > { %11145 = vmatmul.mubr.msk.bf16.gmra.mrb[100].mxu0 %vm472_vm8, %v2310_v61  ;;  %9411 = vrot.lane.b32.xlu0 %v985_v51, %s12234_s12  ;;  %v3168_v51 = vrot.slane %v20061_v53, 4  ;;  %v2323_v29 = vrot.slane %v2321_v42, 3  ;;  %v14472_v61 = vld [vmem:[#allocation2 + $0x80] sm:$0xff] }
 0x18b   : > { %11039 = vmatmul.mubr.msk.bf16.gmra.mrb[100].mxu1 %vm472_vm8, %v1831_v43  ;;  %11148 = vmatprep.mubr.msk.bf16.mxu0 %vm12233_vm6, %v20406_v19  ;;  %v2339_v3 = vshrl.u32 %v14472_v61, 16  ;;  %v2342_v43 = vshll.u32 %v14472_v61, 16 }
 0x18c   : > { %9413 = vrot.lane.b32.xlu1 %v986_v5, %s12234_s12  ;;  %11042 = vmatprep.mubr.msk.bf16.mxu1 %vm12233_vm6, %v20406_v19  ;;  %v2326_v5 = vrot.slane %v2324_v15, 4  ;;  %v14442_v8 = vor.u32 %v3169_v44, %v3168_v51  ;;  %v14480_v51 = vld [vmem:[#allocation2 + $0x88] sm:$0xff] }
 0x18d   : > { %v2341_v44 = vrot.slane %v2339_v3, 3  ;;  %v2344_v45 = vrot.slane %v2342_v43, 4  ;;  %v3133_v23 = vrot.slane %v2342_v43, 5 }
 0x18e   : > { %v2327_v33 = vor.u32 %v2326_v5, %v2323_v29  ;;  %v2348_v29 = vshrl.u32 %v14480_v51, 16  ;;  %v2351_v5 = vshll.u32 %v14480_v51, 16 }
 0x18f   : > { %v2345_v47 = vor.u32 %v2344_v45, %v2341_v44 }
 0x190   : > { %v2328_v13 = vsel %vm2194_vm3, %v2318_v18, %v2327_v33  ;;  %v2337_v16 = vsel %vm2194_vm3, %v2327_v33, %v2336_v22  ;;  %v1836_v18 = vrot.slane %v14472_v61, 4  ;;  %v3136_v61 = vrot.slane %v2348_v29, 4 }
 0x191   : > { %v2346_v25 = vsel %vm2194_vm3, %v2336_v22, %v2345_v47 }
 0x192   : > { %11149 = vmatmul.mubr.msk.bf16.gmra.mrb[104].mxu0 %vm472_vm8, %v2319_v63  ;;  %v1837_v7 = vsel %vm1804_vm0, %v1834_v48, %v1836_v18  ;;  %v14491_v63 = vld [vmem:[#allocation3 + $0x8] sm:$0xff]  ;;  %v14497_v48 = vld [vmem:[#allocation2 + $0x90] sm:$0xff] }
 0x193   : > { %11043 = vmatmul.mubr.msk.bf16.gmra.mrb[104].mxu1 %vm472_vm8, %v1833_v54  ;;  %11152 = vmatprep.mubr.msk.bf16.mxu0 %vm12233_vm6, %v20406_v19  ;;  %v1838_v54 = vrot.slane %v14480_v51, 4  ;;  %v2789_v33 = vshll.u32 %v14491_v63, 16  ;;  %v2357_v40 = vshrl.u32 %v14497_v48, 16  ;;  %v2360_v49 = vshll.u32 %v14497_v48, 16  ;;  %v14619_v51 = vld [vmem:[#allocation2 + $0xb0] sm:$0xff] }
 0x194   : > { %11046 = vmatprep.mubr.msk.bf16.mxu1 %vm12233_vm6, %v20406_v19  ;;  %v2793_v45 = vshrl.u32 %v14491_v63, 16 }
 0x195   : > { %v1839_v44 = vsel %vm1804_vm0, %v1836_v18, %v1838_v54  ;;  %v3116_v18 = vrot.slane %v2303_v6, 4  ;;  %v3121_v6 = vrot.slane %v2315_v60, 5  ;;  %v2359_v46 = vrot.slane %v2357_v40, 3 }
 0x196   : > { %v2362_v52 = vrot.slane %v2360_v49, 4 }
 0x19a   : > { %11153 = vmatmul.mubr.msk.bf16.gmra.mrb[108].mxu0 %vm472_vm8, %v2328_v13  ;;  %v3108_v13 = vrot.slane %v2285_v11, 4  ;;  %v3113_v11 = vrot.slane %v2297_v12, 5  ;;  %v14527_v12 = vrot.slane %v2789_v33, 1 }
 0x19b   : > { %11047 = vmatmul.mubr.msk.bf16.gmra.mrb[108].mxu1 %vm472_vm8, %v1835_v59  ;;  %11156 = vmatprep.mubr.msk.bf16.mxu0 %vm12233_vm6, %v20406_v19  ;;  %v2350_v59 = vrot.slane %v2348_v29, 3 }
 0x19c   : > { %11050 = vmatprep.mubr.msk.bf16.mxu1 %vm12233_vm6, %v20406_v19  ;;  %v14554_v60 = vor.u32 %v2793_v45, %v14527_v12 }
 0x1a2   : > { %11157 = vmatmul.mubr.msk.bf16.gmra.mrb[112].mxu0 %vm472_vm8, %v2337_v16  ;;  %v2353_v16 = vrot.slane %v2351_v5, 4 }
 0x1a3   : > { %11051 = vmatmul.mubr.msk.bf16.gmra.mrb[112].mxu1 %vm472_vm8, %v1837_v7  ;;  %11160 = vmatprep.mubr.msk.bf16.mxu0 %vm12233_vm6, %v20406_v19  ;;  %v3112_v7 = vrot.slane %v2294_v14, 4  ;;  %v14521_v14 = vor.u32 %v3109_v26, %v3108_v13  ;;  %v3118_v13 = vor.u32 %v3117_v1, %v3116_v18  ;;  %v3120_v26 = vrot.slane %v2312_v2, 4  ;;  %v14561_v18 = vld [vmem:[#allocation3 + $0x18] sm:$0xff] }
 0x1a4   : > { %11054 = vmatprep.mubr.msk.bf16.mxu1 %vm12233_vm6, %v20406_v19  ;;  %v14571_v1 = vor.u32 %v2362_v52, %v2359_v46  ;;  %v20062_v46 = vshrl.u32 %v14561_v18, 16 }
 0x1a5   : > { %v3114_v22 = vor.u32 %v3113_v11, %v3112_v7  ;;  %v14549_v7 = vld [vmem:[#allocation2 + $0x98] sm:$0xff]  ;;  %v3122_v2 = vor.u32 %v3121_v6, %v3120_v26  ;;  %v3132_v6 = vrot.slane %v2339_v3, 4 }
 0x1a6   : > { %v2369_v45 = vshll.u32 %v14549_v7, 16 }
 0x1a7   : > { %v14533_v17 = vsel %vm3063_vm12, %v14521_v14, %v3114_v22  ;;  %v14544_v33 = vsel %vm3063_vm12, %v3114_v22, %v3118_v13  ;;  %v14567_v39 = vsel %vm3063_vm12, %v3118_v13, %v3122_v2  ;;  %v3134_v3 = vor.u32 %v3133_v23, %v3132_v6  ;;  %v14609_v6 = vld [vmem:[#allocation2 + $0xa8] sm:$0xff] }
 0x1a8   : > { %20495 = vst [vmem:[#allocation6_spill] sm:$0xff] %v14533_v17  ;;  %20496 = vst [vmem:[#allocation37_spill] sm:$0xff] %v14544_v33  ;;  %v3140_v23 = vrot.slane %v2357_v40, 4 }
 0x1a9   : > { %20497 = vst [vmem:[#allocation36_spill] sm:$0xff] %v14567_v39  ;;  %v14851_v39 = vld [vmem:[#allocation3 + $0x70] sm:$0xff] }
 0x1aa   : > { %11161 = vmatmul.mubr.msk.bf16.gmra.mrb[116].mxu0 %vm472_vm8, %v2346_v25  ;;  %v2354_v25 = vor.u32 %v2353_v16, %v2350_v59  ;;  %v3124_v59 = vrot.slane %v2321_v42, 4  ;;  %v3128_v42 = vrot.slane %v2330_v50, 4  ;;  %v1842_v50 = vrot.slane %v14549_v7, 4  ;;  %20555 = vst [vmem:[#allocation69_spill] sm:$0xff] %v14851_v39 }
 0x1ab   : > { %11055 = vmatmul.mubr.msk.bf16.gmra.mrb[116].mxu1 %vm472_vm8, %v1839_v44  ;;  %11164 = vmatprep.mubr.msk.bf16.mxu0 %vm12233_vm6, %v20406_v19  ;;  %v1840_v44 = vrot.slane %v14497_v48, 4 }
 0x1ac   : > { %11058 = vmatprep.mubr.msk.bf16.mxu1 %vm12233_vm6, %v20406_v19  ;;  %v2355_v16 = vsel %vm2194_vm3, %v2345_v47, %v2354_v25  ;;  %v3126_v15 = vor.u32 %v3125_v34, %v3124_v59  ;;  %v3129_v47 = vrot.slane %v2333_v62, 5  ;;  %v2805_v62 = vshll.u32 %v14561_v18, 16  ;;  %v14590_v34 = vld [vmem:[#allocation3 + $0x18] sm:$0xf0] }
 0x1ad   : > { %v1841_v22 = vsel %vm1804_vm0, %v1838_v54, %v1840_v44  ;;  %v2366_v54 = vshrl.u32 %v14549_v7, 16  ;;  %v2371_v59 = vrot.slane %v2369_v45, 4 }
 0x1ae   : > { %v14579_v26 = vsel %vm3063_vm12, %v3122_v2, %v3126_v15  ;;  %v3130_v13 = vor.u32 %v3129_v47, %v3128_v42  ;;  %v14592_v2 = vld [vmem:[#allocation2 + $0xa0] sm:$0xff]  ;;  %v14600_v42 = vld [vmem:[#allocation3 + $0x10] sm:$0xff]  ;;  %v1843_v47 = vsel %vm1804_vm0, %v1840_v44, %v1842_v50  ;;  %v14623_v32 = vrot.slane %v2805_v62, 1 }
 0x1af   : > { %20498 = vst [vmem:[#allocation9_spill] sm:$0xff] %v14579_v26  ;;  %v2368_v52 = vrot.slane %v2366_v54, 3  ;;  %v2375_v44 = vshrl.u32 %v14592_v2, 16  ;;  %v2378_v43 = vshll.u32 %v14592_v2, 16  ;;  %v3144_v40 = vrot.slane %v2366_v54, 4  ;;  %v14832_v26 = vld [vmem:[#allocation3 + $0x68] sm:$0xff] }
 0x1b0   : > { %v14612_v29 = vsel %vm3063_vm12, %v3130_v13, %v3134_v3  ;;  %v20063_v58 = vrot.slane %v14592_v2, 4  ;;  %20549 = vst [vmem:[#allocation27_spill] sm:$0xff] %v14832_v26 }
 0x1b1   : > { %20500 = vst [vmem:[#allocation40_spill] sm:$0xff] %v14612_v29  ;;  %v3148_v41 = vrot.slane %v2375_v44, 4  ;;  %v3149_v53 = vrot.slane %v2378_v43, 5  ;;  %v14818_v29 = vld [vmem:[#allocation3 + $0x60] sm:$0xff] }
 0x1b2   : > { %11165 = vmatmul.mubr.msk.bf16.gmra.mrb[120].mxu0 %vm472_vm8, %v2355_v16  ;;  %v3137_v16 = vrot.slane %v2351_v5, 5  ;;  %20544 = vst [vmem:[#allocation62_spill] sm:$0xff] %v14818_v29 }
 0x1b3   : > { %11059 = vmatmul.mubr.msk.bf16.gmra.mrb[120].mxu1 %vm472_vm8, %v1841_v22  ;;  %11168 = vmatprep.mubr.msk.bf16.mxu0 %vm12233_vm6, %v20406_v19  ;;  %v14595_v22 = vsel %vm3063_vm12, %v3126_v15, %v3130_v13  ;;  %v2364_v15 = vsel %vm2194_vm3, %v2354_v25, %v14571_v1  ;;  %v3141_v25 = vrot.slane %v2360_v49, 5  ;;  %v7184_v13 = vshll.u32 %v14590_v34, 16 }
 0x1b4   : > { %11062 = vmatprep.mubr.msk.bf16.mxu1 %vm12233_vm6, %v20406_v19  ;;  %20499 = vst [vmem:[#allocation8_spill] sm:$0xff] %v14595_v22  ;;  %v3138_v5 = vor.u32 %v3137_v16, %v3136_v61  ;;  %v2384_v16 = vshrl.u32 %v14609_v6, 16  ;;  %v3145_v61 = vrot.slane %v2369_v45, 5  ;;  %v2377_v45 = vrot.slane %v2375_v44, 3 }
 0x1b5   : > { %v3142_v49 = vor.u32 %v3141_v25, %v3140_v23  ;;  %v2380_v23 = vrot.slane %v2378_v43, 4  ;;  %v3150_v11 = vor.u32 %v3149_v53, %v3148_v41  ;;  %v2801_v43 = vshrl.u32 %v14600_v42, 16 }
 0x1b6   : > { %v14634_v48 = vsel %vm3063_vm12, %v3134_v3, %v3138_v5  ;;  %v3146_v31 = vor.u32 %v3145_v61, %v3144_v40  ;;  %v4891_v3 = vrot.slane %v20062_v46, 4  ;;  %v3152_v37 = vrot.slane %v2384_v16, 4 }
 0x1b7   : > { %20501 = vst [vmem:[#allocation39_spill] sm:$0xff] %v14634_v48  ;;  %v14642_v54 = vsel %vm3063_vm12, %v3138_v5, %v3142_v49  ;;  %v4894_v5 = vrot.slane %v2805_v62, 5  ;;  %v1845_v53 = vsel %vm1804_vm0, %v1842_v50, %v20063_v58  ;;  %v20506_v46 = vshll.u32 %v14600_v42, 16  ;;  %v14678_v50 = vld [vmem:[#allocation3 + $0x20] sm:$0xff] }
 0x1b8   : > { %20502 = vst [vmem:[#allocation64_spill] sm:$0xff] %v14642_v54  ;;  %v14649_v25 = vsel %vm3063_vm12, %v3142_v49, %v3146_v31  ;;  %v14664_v41 = vsel %vm3063_vm12, %v3146_v31, %v3150_v11  ;;  %v14668_v49 = vrot.slane %v7184_v13, 1  ;;  %20507 = vst [vmem:[#allocation65_spill] sm:$0xff] %v14678_v50  ;;  %v14680_v58 = vor.u32 %v2380_v23, %v2377_v45 }
 0x1b9   : > { %20503 = vst [vmem:[#allocation11_spill] sm:$0xff] %v14649_v25  ;;  %20504 = vst [vmem:[#allocation10_spill] sm:$0xff] %v14664_v41  ;;  %v2799_v61 = vrot.slane %v20506_v46, 1  ;;  %v20510_v45 = vshrl.u32 %v14561_v18, 16  ;;  %v14698_v31 = vor.u32 %v4894_v5, %v4891_v3  ;;  %v4883_v41 = vrot.slane %v2801_v43, 4 }
 0x1ba   : > { %11169 = vmatmul.mubr.msk.bf16.gmra.mrb[124].mxu0 %vm472_vm8, %v2364_v15  ;;  %v2372_v15 = vor.u32 %v2371_v59, %v2368_v52  ;;  %v20064_v52 = vshll.u32 %v14619_v51, 16  ;;  %v20065_v59 = vshrl.u32 %v14639_v24, 16  ;;  %v20514_v3 = vmov %v20506_v46 }
 0x1bb   : > { %11063 = vmatmul.mubr.msk.bf16.gmra.mrb[124].mxu1 %vm472_vm8, %v1843_v47  ;;  %11172 = vmatprep.mubr.msk.bf16.mxu0 %vm12233_vm6, %v20406_v19  ;;  %v2387_v47 = vshll.u32 %v14609_v6, 16  ;;  %v14696_v23 = vor.u32 %v20510_v45, %v14623_v32  ;;  %v4886_v5 = vrot.slane %v20514_v3, 5  ;;  %v2386_v45 = vrot.slane %v2384_v16, 3  ;;  %v14730_v3 = vld [vmem:[#allocation3 + $0x40] sm:$0xff] }
 0x1bc   : > { %11066 = vmatprep.mubr.msk.bf16.mxu1 %vm12233_vm6, %v20406_v19  ;;  %v2373_v40 = vsel %vm2194_vm3, %v14571_v1, %v2372_v15  ;;  %v20505_v1 = vshrl.u32 %v14619_v51, 16  ;;  %v3157_v7 = vrot.slane %v20064_v52, 5  ;;  %v3160_v13 = vrot.slane %v20065_v59, 4  ;;  %20520 = vst [vmem:[#allocation16_spill] sm:$0xff] %v14730_v3 }
 0x1bd   : > { %v3153_v44 = vrot.slane %v2387_v47, 5  ;;  %20511 = vst [vmem:[#allocation43_spill] sm:$0xff] %v14696_v23  ;;  %v1846_v59 = vrot.slane %v14609_v6, 4  ;;  %v20515_v46 = vshrl.u32 %v14654_v56, 16  ;;  %v14727_v25 = vor.u32 %v2801_v43, %v2799_v61 }
 0x1be   : > { %v3156_v62 = vrot.slane %v20505_v1, 4  ;;  %v20509_v1 = vshll.u32 %v14639_v24, 16 }
 0x1bf   : > { %v3164_v6 = vrot.slane %v20515_v46, 4  ;;  %v20521_v46 = vrot.slane %v14592_v2, 4  ;;  %v14753_v2 = vshrl.u32 %v14678_v50, 16 }
 0x1c0   : > { %v3161_v52 = vrot.slane %v20509_v1, 5  ;;  %v14710_v1 = vsel %vm2780_vm10, %v14554_v60, %v2799_v61  ;;  %v20519_v60 = vshll.u32 %v14654_v56, 16  ;;  %v20524_v61 = vrot.slane %v14491_v63, 1 }
 0x1c1   : > { %v1847_v54 = vsel %vm1804_vm0, %v20521_v46, %v1846_v59  ;;  %v14758_v46 = vor.u32 %v4886_v5, %v4883_v41 }
 0x1c2   : > { %11173 = vmatmul.mubr.msk.bf16.gmra.mrb[128].mxu0 %vm472_vm8, %v2373_v40  ;;  %v3154_v40 = vor.u32 %v3153_v44, %v3152_v37  ;;  %v3158_v44 = vor.u32 %v3157_v7, %v3156_v62  ;;  %v3162_v7 = vor.u32 %v3161_v52, %v3160_v13  ;;  %v3165_v13 = vrot.slane %v20519_v60, 5 }
 0x1c3   : > { %11067 = vmatmul.mubr.msk.bf16.gmra.mrb[128].mxu1 %vm472_vm8, %v1845_v53  ;;  %11176 = vmatprep.mubr.msk.bf16.mxu0 %vm12233_vm6, %v20406_v19  ;;  %v14718_v53 = vld [vmem:[#allocation3 + $0x38] sm:$0xff] }
 0x1c4   : > { %11070 = vmatprep.mubr.msk.bf16.mxu1 %vm12233_vm6, %v20406_v19  ;;  %v14689_v37 = vsel %vm3063_vm12, %v3150_v11, %v3154_v40  ;;  %v14703_v11 = vld [vmem:[#allocation3 + $0x28] sm:$0xff]  ;;  %v14706_v62 = vsel %vm3063_vm12, %v3154_v40, %v3158_v44  ;;  %20517 = vst [vmem:[#allocation46_spill] sm:$0xff] %v14718_v53  ;;  %v2382_v40 = vsel %vm2194_vm3, %v2372_v15, %v14680_v58 }
 0x1c5   : > { %20508 = vst [vmem:[#allocation45_spill] sm:$0xff] %v14689_v37  ;;  %20512 = vst [vmem:[#allocation14_spill] sm:$0xff] %v14703_v11  ;;  %v14716_v37 = vld [vmem:[#allocation3 + $0x30] sm:$0xff]  ;;  %v14723_v52 = vsel %vm3063_vm12, %v3158_v44, %v3162_v7  ;;  %v14739_v15 = vsel %vm3063_vm12, %v14442_v8, %v14450_v36  ;;  %v20525_v44 = vshll.u32 %v14678_v50, 16  ;;  %v20541_v36 = vshll.u32 %v14619_v51, 16 }
 0x1c6   : > { %20513 = vst [vmem:[#allocation13_spill] sm:$0xff] %v14706_v62  ;;  %20516 = vst [vmem:[#allocation47_spill] sm:$0xff] %v14716_v37  ;;  %v2389_v62 = vrot.slane %v2387_v47, 4  ;;  %v20523_v47 = vrot.slane %v14600_v42, 1 }
 0x1c7   : > { %20518 = vst [vmem:[#allocation17_spill] sm:$0xff] %v14723_v52  ;;  %20522 = vst [vmem:[#allocation51_spill] sm:$0xff] %v14739_v15  ;;  %v14750_v60 = vrot.slane %v20525_v44, 1  ;;  %v14763_v15 = vld [vmem:[#allocation3 + $0x48] sm:$0xff]  ;;  %v14765_v44 = vld [vmem:[#allocation3 + $0x50] sm:$0xff] }
 0x1c8   : > { %v14746_v43 = vsel %vm3601_vm4, %v20524_v61, %v20523_v47  ;;  %20527 = vst [vmem:[#allocation20_spill] sm:$0xff] %v14763_v15  ;;  %20528 = vst [vmem:[#allocation19_spill] sm:$0xff] %v14765_v44  ;;  %v2390_v52 = vor.u32 %v2389_v62, %v2386_v45  ;;  %v1848_v47 = vrot.slane %v14619_v51, 4  ;;  %v20537_v62 = vshll.u32 %v14730_v3, 16 }
 0x1c9   : > { %20526 = vst [vmem:[#allocation50_spill] sm:$0xff] %v14750_v60  ;;  %v20542_v61 = vshrl.u32 %v14703_v11, 16 }
 0x1ca   : > { %11177 = vmatmul.mubr.msk.bf16.gmra.mrb[132].mxu0 %vm472_vm8, %v2382_v40  ;;  %v3166_v40 = vor.u32 %v3165_v13, %v3164_v6  ;;  %v20531_v13 = vshll.u32 %v14703_v11, 16 }
 0x1cb   : > { %11071 = vmatmul.mubr.msk.bf16.gmra.mrb[132].mxu1 %vm472_vm8, %v1847_v54  ;;  %11180 = vmatprep.mubr.msk.bf16.mxu0 %vm12233_vm6, %v20406_v19 }
 0x1cc   : > { %11074 = vmatprep.mubr.msk.bf16.mxu1 %vm12233_vm6, %v20406_v19  ;;  %v14771_v6 = vsel %vm3063_vm12, %v3162_v7, %v3166_v40  ;;  %v14775_v41 = vsel %vm3063_vm12, %v3166_v40, %v14442_v8  ;;  %v14780_v16 = vrot.slane %v20531_v13, 1  ;;  %v20533_v40 = vshll.u32 %v14716_v37, 16  ;;  %v14803_v7 = vld [vmem:[#allocation3 + $0x58] sm:$0xff] }
 0x1cd   : > { %20529 = vst [vmem:[#allocation23_spill] sm:$0xff] %v14771_v6  ;;  %20530 = vst [vmem:[#allocation22_spill] sm:$0xff] %v14775_v41  ;;  %v20535_v13 = vshll.u32 %v14718_v53, 16  ;;  %v14801_v6 = vrot.slane %v20537_v62, 1  ;;  %v2391_v8 = vsel %vm2194_vm3, %v14680_v58, %v2390_v52  ;;  %v1849_v58 = vsel %vm1804_vm0, %v1846_v59, %v1848_v47  ;;  %v14834_v62 = vld [vmem:[#allocation3 + $0xd0] sm:$0xff] }
 0x1ce   : > { %20532 = vst [vmem:[#allocation55_spill] sm:$0xff] %v14780_v16  ;;  %v14791_v5 = vrot.slane %v20533_v40, 1  ;;  %20539 = vst [vmem:[#allocation26_spill] sm:$0xff] %v14803_v7  ;;  %v20540_v40 = vshrl.u32 %v14619_v51, 16  ;;  %v14814_v48 = vor.u32 %v20542_v61, %v14780_v16  ;;  %v20547_v51 = vshll.u32 %v14765_v44, 16 }
 0x1cf   : > { %v14795_v54 = vrot.slane %v20535_v13, 1  ;;  %20538 = vst [vmem:[#allocation57_spill] sm:$0xff] %v14801_v6  ;;  %v2398_v13 = vrot.slane %v20541_v36, 4  ;;  %20550 = vst [vmem:[#allocation66_spill] sm:$0xff] %v14834_v62  ;;  %v20551_v59 = vshrl.u32 %v14716_v37, 16  ;;  %v20562_v41 = vshll.u32 %v14803_v7, 16 }
 0x1d0   : > { %20534 = vst [vmem:[#allocation54_spill] sm:$0xff] %v14791_v5  ;;  %v2395_v45 = vrot.slane %v20540_v40, 3  ;;  %20543 = vst [vmem:[#allocation25_spill] sm:$0xff] %v14814_v48  ;;  %v20545_v40 = vshll.u32 %v14763_v15, 16  ;;  %v14829_v61 = vrot.slane %v20547_v51, 1  ;;  %v20558_v48 = vshrl.u32 %v14763_v15, 16 }
 0x1d1   : > { %20536 = vst [vmem:[#allocation58_spill] sm:$0xff] %v14795_v54  ;;  %v14882_v36 = vrot.slane %v20562_v41, 1  ;;  %v14886_v15 = vld [vmem:[#allocation3 + $0x78] sm:$0xff]  ;;  %v20568_v41 = vshll.u32 %v14639_v24, 16 }
 0x1d2   : > { %11181 = vmatmul.mubr.msk.bf16.gmra.mrb[136].mxu0 %vm472_vm8, %v2391_v8  ;;  %v14824_v22 = vrot.slane %v20545_v40, 1  ;;  %20548 = vst [vmem:[#allocation28_spill] sm:$0xff] %v14829_v61  ;;  %v14842_v8 = vor.u32 %v20551_v59, %v14791_v5  ;;  %v20553_v40 = vshrl.u32 %v14718_v53, 16  ;;  %v1850_v53 = vrot.slane %v14639_v24, 4  ;;  %20564 = vst [vmem:[#allocation74_spill] sm:$0xff] %v14886_v15  ;;  %v14981_v5 = vld [vmem:[#allocation3 + $0x90] sm:$0xff] }
 0x1d3   : > { %11075 = vmatmul.mubr.msk.bf16.gmra.mrb[136].mxu1 %vm472_vm8, %v1849_v58  ;;  %11184 = vmatprep.mubr.msk.bf16.mxu0 %vm12233_vm6, %v20406_v19  ;;  %v20556_v58 = vshrl.u32 %v14730_v3, 16  ;;  %v20560_v59 = vshrl.u32 %v14765_v44, 16  ;;  %20563 = vst [vmem:[#allocation73_spill] sm:$0xff] %v14882_v36  ;;  %v20093_v3 = vmov 4048220490   ;;  %20591 = vst [vmem:[#allocation87_spill] sm:$0xff] %v14981_v5 }
 0x1d4   : > { %20546 = vst [vmem:[#allocation61_spill] sm:$0xff] %v14824_v22  ;;  %20552 = vst [vmem:[#allocation67_spill] sm:$0xff] %v14842_v8  ;;  %v14847_v51 = vor.u32 %v20553_v40, %v14795_v54  ;;  %11078 = vmatprep.mubr.msk.bf16.mxu1 %vm12233_vm6, %v20406_v19  ;;  %v14862_v40 = vld [vmem:[#allocation3 + $0xd8] sm:$0xf]  ;;  %v20569_v54 = vshll.u32 %v14832_v26, 16 }
 0x1d5   : > { %v14858_v33 = vor.u32 %v20556_v58, %v14801_v6  ;;  %v14871_v58 = vor.u32 %v20558_v48, %v14824_v22  ;;  %v14876_v8 = vor.u32 %v20560_v59, %v14829_v61  ;;  %v2997_v48 = vshll.u32 %v14862_v40, 16 }
 0x1d6   : > { %20554 = vst [vmem:[#allocation68_spill] sm:$0xff] %v14847_v51  ;;  %v2399_v51 = vor.u32 %v2398_v13, %v2395_v45  ;;  %v20567_v13 = vshrl.u32 %v14639_v24, 16  ;;  %v2407_v61 = vrot.slane %v20568_v41, 4  ;;  %v14900_v44 = vrot.slane %v20569_v54, 1 }
 0x1d7   : > { %20557 = vst [vmem:[#allocation70_spill] sm:$0xff] %v14858_v33  ;;  %20559 = vst [vmem:[#allocation71_spill] sm:$0xff] %v14871_v58  ;;  %v20565_v58 = vshll.u32 %v14818_v29, 16  ;;  %v20571_v22 = vshll.u32 %v14834_v62, 16  ;;  %v20577_v54 = vshrl.u32 %v14818_v29, 16  ;;  %v1852_v41 = vrot.slane %v14654_v56, 4 }
 0x1d8   : > { %20561 = vst [vmem:[#allocation72_spill] sm:$0xff] %v14876_v8  ;;  %v2400_v45 = vsel %vm2194_vm3, %v2390_v52, %v2399_v51  ;;  %v2404_v8 = vrot.slane %v20567_v13, 3  ;;  %20570 = vst [vmem:[#allocation76_spill] sm:$0xff] %v14900_v44  ;;  %v1851_v52 = vsel %vm1804_vm0, %v1848_v47, %v1850_v53  ;;  %v20573_v13 = vshll.u32 %v14851_v39, 16 }
 0x1d9   : > { %v14891_v59 = vrot.slane %v20565_v58, 1  ;;  %v14905_v6 = vrot.slane %v20571_v22, 1  ;;  %v20575_v22 = vshrl.u32 %v14803_v7, 16  ;;  %v14935_v7 = vld [vmem:[#allocation3 + $0x80] sm:$0xff]  ;;  %v20583_v33 = vshrl.u32 %v14851_v39, 16 }
 0x1da   : > { %11185 = vmatmul.mubr.msk.bf16.gmra.mrb[140].mxu0 %vm472_vm8, %v2400_v45  ;;  %v14912_v24 = vrot.slane %v20573_v13, 1  ;;  %v2999_v13 = vrot.slane %v2997_v48, 1  ;;  %20579 = vst [vmem:[#allocation81_spill] sm:$0xff] %v14935_v7  ;;  %v2408_v47 = vor.u32 %v2407_v61, %v2404_v8  ;;  %v20580_v48 = vshrl.u32 %v14832_v26, 16 }
 0x1db   : > { %20566 = vst [vmem:[#allocation75_spill] sm:$0xff] %v14891_v59  ;;  %20572 = vst [vmem:[#allocation77_spill] sm:$0xff] %v14905_v6  ;;  %11079 = vmatmul.mubr.msk.bf16.gmra.mrb[140].mxu1 %vm472_vm8, %v1851_v52  ;;  %11188 = vmatprep.mubr.msk.bf16.mxu0 %vm12233_vm6, %v20406_v19  ;;  %v14922_v45 = vor.u32 %v20575_v22, %v14882_v36  ;;  %v14931_v52 = vor.u32 %v20577_v54, %v14891_v59  ;;  %v14937_v22 = vld [vmem:[#allocation3 + $0xe0] sm:$0xff]  ;;  %v3001_v54 = vshrl.u32 %v14862_v40, 16  ;;  %v3572_v59 = vld [vmem:[#allocation3 + $0xd8] sm:$0x1f] }
 0x1dc   : > { %20574 = vst [vmem:[#allocation78_spill] sm:$0xff] %v14912_v24  ;;  %11082 = vmatprep.mubr.msk.bf16.mxu1 %vm12233_vm6, %v20406_v19  ;;  %v14942_v58 = vor.u32 %v20580_v48, %v14900_v44  ;;  %v20585_v61 = vshll.u32 %v14886_v15, 16  ;;  %v14960_v44 = vld [vmem:[#allocation3 + $0x88] sm:$0xff]  ;;  %v14964_v36 = vld [vmem:[#allocation3 + $0xd8] sm:$0xff]  ;;  %v20589_v48 = vshrl.u32 %v14654_v56, 16 }
 0x1dd   : > { %20576 = vst [vmem:[#allocation79_spill] sm:$0xff] %v14922_v45  ;;  %20578 = vst [vmem:[#allocation80_spill] sm:$0xff] %v14931_v52  ;;  %v20582_v45 = vshrl.u32 %v14834_v62, 16  ;;  %v14952_v52 = vor.u32 %v20583_v33, %v14912_v24  ;;  %v3003_v26 = vor.u32 %v3001_v54, %v2999_v13  ;;  %v5114_v33 = vshrl.u32 %v14937_v22, 16 }
 0x1de   : > { %20581 = vst [vmem:[#allocation82_spill] sm:$0xff] %v14942_v58  ;;  %v14956_v8 = vrot.slane %v20585_v61, 1  ;;  %20587 = vst [vmem:[#allocation85_spill] sm:$0xff] %v14960_v44  ;;  %v2409_v61 = vsel %vm2194_vm3, %v2399_v51, %v2408_v47  ;;  %v2413_v24 = vrot.slane %v20589_v48, 3  ;;  %v20590_v58 = vshll.u32 %v14654_v56, 16 }
 0x1df   : > { %v2995_v29 = vor.u32 %v20582_v45, %v14905_v6  ;;  %20584 = vst [vmem:[#allocation83_spill] sm:$0xff] %v14952_v52  ;;  %20588 = vst [vmem:[#allocation86_spill] sm:$0xff] %v14964_v36  ;;  %v5117_v52 = vshll.u32 %v14937_v22, 16  ;;  %v1853_v54 = vsel %vm1804_vm0, %v1850_v53, %v1852_v41  ;;  %v3655_v48 = vrot.slane %v3572_v59, 1  ;;  %v14995_v59 = vld [vmem:[#allocation3 + $0x98] sm:$0xff] }
 0x1e0   : > { %20586 = vst [vmem:[#allocation84_spill] sm:$0xff] %v14956_v8  ;;  %v2416_v39 = vrot.slane %v20590_v58, 4  ;;  %v5105_v56 = vshrl.u32 %v14964_v36, 16  ;;  %v5108_v58 = vshll.u32 %v14964_v36, 16  ;;  %20594 = vst [vmem:[#allocation89_spill] sm:$0xff] %v14995_v59  ;;  %v20104_v45 = vrot.slane %v14834_v62, 1 }
 0x1e1   : > { %v3000_v6 = vsel %vm2780_vm10, %v2995_v29, %v2999_v13  ;;  %v1771_v29 = vmax.bf16 %v20093_v3, %v14834_v62  ;;  %v1772_v13 = vmax.bf16 %v20093_v3, %v14862_v40  ;;  %v20592_v40 = vshll.u32 %v14935_v7, 16 }
 0x1e2   : > { %11189 = vmatmul.mubr.msk.bf16.gmra.mrb[144].mxu0 %vm472_vm8, %v2409_v61  ;;  %v5116_v17 = vrot.slane %v5114_v33, 4  ;;  %v2417_v37 = vor.u32 %v2416_v39, %v2413_v24  ;;  %v20595_v16 = vshll.u32 %v14960_v44, 16  ;;  %v5110_v33 = vrot.slane %v5108_v58, 5 }
 0x1e3   : > { %11083 = vmatmul.mubr.msk.bf16.gmra.mrb[144].mxu1 %vm472_vm8, %v1853_v54  ;;  %11192 = vmatprep.mubr.msk.bf16.mxu0 %vm12233_vm6, %v20406_v19  ;;  %v14990_v3 = vrot.slane %v20592_v40, 1  ;;  %v3058_v61 = vmax.bf16 %v3000_v6, %v1771_v29  ;;  %v3059_v51 = vmax.bf16 %v3003_v26, %v1772_v13  ;;  %v5119_v54 = vrot.slane %v5117_v52, 5 }
 0x1e4   : > { %11086 = vmatprep.mubr.msk.bf16.mxu1 %vm12233_vm6, %v20406_v19  ;;  %v15000_v11 = vrot.slane %v20595_v16, 1  ;;  %v1854_v26 = vrot.slane %v14402_v10, 4  ;;  %v3656_v6 = vsel %vm3601_vm4, %v20104_v45, %v3655_v48  ;;  %v4460_v29 = vrot.slane %v14937_v22, 4 }
 0x1e5   : > { %20593 = vst [vmem:[#allocation88_spill] sm:$0xff] %v14990_v3  ;;  %v5107_v13 = vrot.slane %v5105_v56, 4  ;;  %v20108_v39 = vshll.u32 %v14995_v59, 16  ;;  %v3711_v24 = vmax.bf16 %v3656_v6, %v3058_v61  ;;  %v3712_v52 = vmax.bf16 %v3655_v48, %v3059_v51  ;;  %v15036_v6 = vld [vmem:[#allocation3 + $0xe8] sm:$0xff] }
 0x1e6   : > { %20596 = vst [vmem:[#allocation90_spill] sm:$0xff] %v15000_v11  ;;  %v20107_v16 = vrot.slane %v14964_v36, 4  ;;  %v15011_v23 = vor.u32 %v5119_v54, %v5116_v17  ;;  %v2418_v40 = vsel %vm2194_vm3, %v2408_v47, %v2417_v37  ;;  %v20597_v53 = vshrl.u32 %v14402_v10, 16  ;;  %v5842_v54 = vld [vmem:[#allocation3 + $0xe8] sm:$0x1]  ;;  %20605 = vst [vmem:[#allocation94_spill] sm:$0xff] %v15036_v6 }
 0x1e7   : > { %v20598_v62 = vshll.u32 %v14402_v10, 16  ;;  %v20599_v56 = vshrl.u32 %v14886_v15, 16  ;;  %v20601_v51 = vshll.u32 %v14981_v5, 16  ;;  %v1855_v47 = vsel %vm1804_vm0, %v1852_v41, %v1854_v26 }
 0x1e8   : > { %v2422_v60 = vrot.slane %v20597_v53, 3  ;;  %v1979_v50 = vpop.f32.mrb[52].mxu1  ;;  %v20603_v10 = vshrl.u32 %v14935_v7, 16  ;;  %v4517_v17 = vmax.bf16 %v4460_v29, %v3712_v52  ;;  %v15430_v7 = vld [vmem:[#allocation2 + $0xa0] sm:$0xff] }
 0x1e9   : > { %v2425_v45 = vrot.slane %v20598_v62, 4  ;;  %v15021_v58 = vor.u32 %v20599_v56, %v14956_v8  ;;  %v15025_v48 = vrot.slane %v20601_v51, 1  ;;  %v10992_v53 = vpop.f32.mrb[53].mxu1  ;;  %v4461_v56 = vsel %vm1804_vm0, %v20107_v16, %v4460_v29 }
 0x1ea   : > { %11193 = vmatmul.mubr.msk.bf16.gmra.mrb[148].mxu0 %vm472_vm8, %v2418_v40  ;;  %v15033_v62 = vor.u32 %v20603_v10, %v14990_v3  ;;  %v15041_v51 = vor.u32 %v5110_v33, %v5107_v13  ;;  %v1982_v41 = vpop.f32.mrb[54].mxu1  ;;  %v15048_v40 = vrot.slane %v20108_v39, 1  ;;  %v15050_v53 = vld [vmem:[#allocation3 + $0xf0] sm:$0xf]  ;;  %v7389_v10 = vshll.u32 %v15036_v6, 16 }
 0x1eb   : > { %20600 = vst [vmem:[#allocation91_spill] sm:$0xff] %v15021_v58  ;;  %20602 = vst [vmem:[#allocation92_spill] sm:$0xff] %v15025_v48  ;;  %11087 = vmatmul.mubr.msk.bf16.gmra.mrb[148].mxu1 %vm472_vm8, %v1855_v47  ;;  %11196 = vmatprep.mubr.msk.bf16.mxu0 %vm12233_vm6, %v20406_v19  ;;  %v4516_v61 = vmax.bf16 %v4461_v56, %v3711_v24  ;;  %v10993_v13 = vpop.f32.mrb[55].mxu1  ;;  %v20608_v33 = vshrl.u32 %v14960_v44, 16  ;;  %v20610_v24 = vshrl.u32 %v14981_v5, 16  ;;  %v7393_v56 = vshrl.u32 %v15036_v6, 16 }
 0x1ec   : > { %20604 = vst [vmem:[#allocation93_spill] sm:$0xff] %v15033_v62  ;;  %20606 = vst [vmem:[#allocation95_spill] sm:$0xff] %v15041_v51  ;;  %11090 = vmatprep.mubr.msk.bf16.mxu1 %vm12233_vm6, %v20406_v19  ;;  %v5121_v39 = vsel %vm3063_vm12, %v15041_v51, %v15011_v23  ;;  %v2426_v62 = vor.u32 %v2425_v45, %v2422_v60  ;;  %v7397_v16 = vshll.u32 %v15050_v53, 16  ;;  %v20612_v60 = vshrl.u32 %v14995_v59, 16 }
 0x1ed   : > { %20607 = vst [vmem:[#allocation96_spill] sm:$0xff] %v15048_v40  ;;  %v15058_v47 = vor.u32 %v20608_v33, %v15000_v11  ;;  %v15067_v29 = vor.u32 %v20610_v24, %v15025_v48  ;;  %v5923_v11 = vrot.slane %v14937_v22, 5  ;;  %v15080_v24 = vrot.slane %v7389_v10, 1 }
 0x1ee   : > { %v15078_v45 = vor.u32 %v20612_v60, %v15048_v40  ;;  %v5176_v51 = vmax.bf16 %v5121_v39, %v4516_v61  ;;  %v5177_v52 = vmax.bf16 %v15011_v23, %v4517_v17  ;;  %v2427_v13 = vsel %vm2194_vm3, %v2417_v37, %v2426_v62  ;;  %v1715_v17 = vld [vmem:[#allocation2 + $0xd8] sm:$0xf] }
 0x1ef   : > { %20609 = vst [vmem:[#allocation97_spill] sm:$0xff] %v15058_v47  ;;  %20611 = vst [vmem:[#allocation98_spill] sm:$0xff] %v15067_v29  ;;  %v5925_v47 = vrot.slane %v5842_v54, 5  ;;  %v20115_v29 = vrot.slane %v14964_v36, 5  ;;  %v20615_v54 = vshrl.u32 %v14410_v38, 16  ;;  %v20616_v48 = vshll.u32 %v14410_v38, 16 }
 0x1f0   : > { %20613 = vst [vmem:[#allocation99_spill] sm:$0xff] %v15078_v45  ;;  %20614 = vst [vmem:[#allocation100_spill] sm:$0xff] %v15080_v24  ;;  %v7395_v59 = vor.u32 %v7393_v56, %v15080_v24  ;;  %v7401_v60 = vshrl.u32 %v15050_v53, 16  ;;  %v20617_v39 = vrot.slane %v14410_v38, 4  ;;  %v15095_v37 = vld [vmem:[#allocation3 + $0xa0] sm:$0xff]  ;;  %v7399_v10 = vrot.slane %v7397_v16, 1 }
 0x1f1   : > { %v2431_v33 = vrot.slane %v20615_v54, 3  ;;  %v2434_v22 = vrot.slane %v20616_v48, 4  ;;  %20618 = vst [vmem:[#allocation101_spill] sm:$0xff] %v15095_v37  ;;  %v15097_v54 = vld [vmem:[#allocation3 + $0xf0] sm:$0x1f]  ;;  %v5924_v48 = vsel %vm5871_vm7, %v20115_v29, %v5923_v11  ;;  %v5926_v56 = vsel %vm5871_vm7, %v5923_v11, %v5925_v47 }
 0x1f2   : > { %11197 = vmatmul.mubr.msk.bf16.gmra.mrb[152].mxu0 %vm472_vm8, %v2427_v13  ;;  %v1857_v23 = vsel %vm1804_vm0, %v1854_v26, %v20617_v39  ;;  %v15108_v39 = vld [vmem:[#allocation3 + $0xa8] sm:$0xff]  ;;  %v15110_v24 = vld [vmem:[#allocation3 + $0xb0] sm:$0xff]  ;;  %v5981_v16 = vmax.bf16 %v5924_v48, %v5176_v51  ;;  %v5982_v45 = vmax.bf16 %v5926_v56, %v5177_v52  ;;  %v2438_v5 = vshrl.u32 %v1715_v17, 16 }
 0x1f3   : > { %11091 = vmatmul.mubr.msk.bf16.gmra.mrb[152].mxu1 %vm472_vm8, %v1857_v23  ;;  %11200 = vmatprep.mubr.msk.bf16.mxu0 %vm12233_vm6, %v20406_v19  ;;  %20620 = vst [vmem:[#allocation103_spill] sm:$0xff] %v15108_v39  ;;  %20621 = vst [vmem:[#allocation104_spill] sm:$0xff] %v15110_v24  ;;  %v12163_v36 = vld [vmem:[#allocation2] sm:$0xf0]  ;;  %v2435_v23 = vor.u32 %v2434_v22, %v2431_v33  ;;  %v1858_v52 = vrot.slane %v1715_v17, 4  ;;  %v7403_v44 = vor.u32 %v7401_v60, %v7399_v10 }
 0x1f4   : > { %v2564_v61 = vpop.f32.mrb[56].mxu0  ;;  %11094 = vmatprep.mubr.msk.bf16.mxu1 %vm12233_vm6, %v20406_v19  ;;  %v3065_v11 = vshrl.u32 %v12163_v36, 16  ;;  %v3068_v47 = vshll.u32 %v12163_v36, 16  ;;  %v8053_v36 = vrot.slane %v15097_v54, 1  ;;  %v20624_v48 = vshll.u32 %v15095_v37, 16 }
 0x1f5   : > { %v15106_v13 = vadd.f32 %v2564_v61, %v1979_v50  ;;  %v11102_v26 = vpop.f32.mrb[57].mxu0  ;;  %v2441_v50 = vshll.u32 %v1715_v17, 16  ;;  %v2436_v51 = vsel %vm2194_vm3, %v2426_v62, %v2435_v23  ;;  %v2440_v17 = vrot.slane %v2438_v5, 3 }
 0x1f6   : > { %v2567_v29 = vpop.f32.mrb[58].mxu0  ;;  %v3067_v33 = vrot.slane %v3065_v11, 4  ;;  %v3070_v22 = vrot.slane %v3068_v47, 5  ;;  %v15130_v56 = vrot.slane %v20624_v48, 1  ;;  %v20626_v60 = vrot.slane %v14410_v38, 4 }
 0x1f7   : > { %20619 = vst [vmem:[#allocation102_spill] sm:$0xff] %v15106_v13  ;;  %v15114_v40 = vadd.f32 %v2567_v29, %v1982_v41  ;;  %v11103_v61 = vpop.f32.mrb[59].mxu0  ;;  %v6705_v41 = vmax.bf16 %v15036_v6, %v5981_v16  ;;  %v6706_v29 = vmax.bf16 %v15050_v53, %v5982_v45  ;;  %v7400_v13 = vsel %vm2780_vm10, %v7395_v59, %v7399_v10  ;;  %v3714_v10 = vld [vmem:[#allocation2 + $0x10] sm:$0xff] }
 0x1f8   : > { %v15124_v61 = vld [vmem:[#allocation3 + $0xb8] sm:$0xff]  ;;  %v2443_v26 = vrot.slane %v2441_v50, 4  ;;  %20625 = vst [vmem:[#allocation107_spill] sm:$0xff] %v15130_v56  ;;  %v1859_v53 = vsel %vm1804_vm0, %v20626_v60, %v1858_v52  ;;  %v20627_v45 = vshrl.u32 %v13573_v4, 16  ;;  %v20628_v16 = vshll.u32 %v13573_v4, 16 }
 0x1f9   : > { %20622 = vst [vmem:[#allocation105_spill] sm:$0xff] %v15114_v40  ;;  %20623 = vst [vmem:[#allocation106_spill] sm:$0xff] %v15124_v61  ;;  %v20629_v5 = vshll.u32 %v15108_v39, 16  ;;  %v20124_v11 = vshrl.u32 %v15108_v39, 16  ;;  %v20126_v47 = vshrl.u32 %v15110_v24, 16  ;;  %v20123_v50 = vrot.slane %v15036_v6, 1 }
 0x1fa   : > { %11201 = vmatmul.mubr.msk.bf16.gmra.mrb[156].mxu0 %vm472_vm8, %v2436_v51  ;;  %v3072_v54 = vrot.slane %v20627_v45, 4  ;;  %v3073_v59 = vrot.slane %v20628_v16, 5  ;;  %v7458_v4 = vmax.bf16 %v7400_v13, %v6705_v41  ;;  %v7459_v51 = vmax.bf16 %v7403_v44, %v6706_v29  ;;  %v10372_v29 = vld [vmem:[%s19928_s4 + $0x10] sm:$0xf]  ;;  %v15190_v13 = vld [vmem:[#allocation3 + $0xc8] sm:$0xff] }
 0x1fb   : > { %v15142_v62 = vrot.slane %v20629_v5, 1  ;;  %11095 = vmatmul.mubr.msk.bf16.gmra.mrb[156].mxu1 %vm472_vm8, %v1859_v53  ;;  %11204 = vmatprep.mubr.msk.bf16.mxu0 %vm12233_vm6, %v20406_v19  ;;  %v3071_v52 = vor.u32 %v3070_v22, %v3067_v33  ;;  %v20631_v48 = vshll.u32 %v15110_v24, 16  ;;  %v8054_v45 = vsel %vm3601_vm4, %v20123_v50, %v8053_v36  ;;  %v3713_v33 = vld [vmem:[#allocation2 + $0x8] sm:$0x80]  ;;  %20640 = vst [vmem:[#allocation115_spill] sm:$0xff] %v15190_v13 }
 0x1fc   : > { %11210 = vmatprep.mubr.msk.bf16.mxu1 %vm12233_vm6, %v20406_v19  ;;  %v2444_v53 = vor.u32 %v2443_v26, %v2440_v17  ;;  %v3749_v16 = vshrl.u32 %v3714_v10, 16  ;;  %v20633_v5 = vshrl.u32 %v15095_v37, 16  ;;  %v15167_v41 = vor.u32 %v3073_v59, %v3072_v54  ;;  %v15184_v59 = vld [vmem:[#allocation3 + $0xc0] sm:$0xff] }
 0x1fd   : > { %20630 = vst [vmem:[#allocation108_spill] sm:$0xff] %v15142_v62  ;;  %v15155_v60 = vrot.slane %v20631_v48, 1  ;;  %v15175_v26 = vor.u32 %v20124_v11, %v15142_v62  ;;  %20637 = vst [vmem:[#allocation113_spill] sm:$0xff] %v15184_v59  ;;  %v3715_v48 = vld [vmem:[#allocation2 + $0x18] sm:$0xff]  ;;  %v8109_v44 = vmax.bf16 %v8054_v45, %v7458_v4  ;;  %v8110_v11 = vmax.bf16 %v8053_v36, %v7459_v51 }
 0x1fe   : > { %v15163_v38 = vor.u32 %v20633_v5, %v15130_v56  ;;  %v20638_v5 = vshll.u32 %v15124_v61, 16  ;;  %v3075_v6 = vsel %vm3063_vm12, %v3071_v52, %v15167_v41  ;;  %v4575_v17 = vsel %vm1804_vm0, %v10372_v29, 0 }
 0x1ff   : > { %20632 = vst [vmem:[#allocation109_spill] sm:$0xff] %v15155_v60  ;;  %20635 = vst [vmem:[#allocation111_spill] sm:$0xff] %v15175_v26  ;;  %v15180_v22 = vor.u32 %v20126_v47, %v15155_v60  ;;  %v2445_v47 = vsel %vm2194_vm3, %v2435_v23, %v2444_v53  ;;  %v15196_v54 = vrot.slane %v3749_v16, 7  ;;  %v20129_v26 = vshll.u32 %v15184_v59, 16 }
 0x200   : > { %20634 = vst [vmem:[#allocation110_spill] sm:$0xff] %v15163_v38  ;;  %v15188_v50 = vrot.slane %v20638_v5, 1  ;;  %v20641_v5 = vshrl.u32 %v13720_v57, 16  ;;  %v20642_v4 = vshll.u32 %v13720_v57, 16  ;;  %v3757_v51 = vshrl.u32 %v3715_v48, 16  ;;  %v15251_v38 = vld [vmem:[#allocation2 + $0x30] sm:$0xff] }
 0x201   : > { %20636 = vst [vmem:[#allocation112_spill] sm:$0xff] %v15180_v22  ;;  %v3745_v22 = vshrl.u32 %v3713_v33, 16  ;;  %v3752_v23 = vshll.u32 %v3714_v10, 16  ;;  %v20643_v45 = vshrl.u32 %v15124_v61, 16  ;;  %v8657_v16 = vsel %vm8629_vm1, %v8109_v44, 0 }
 0x202   : > { %20639 = vst [vmem:[#allocation114_spill] sm:$0xff] %v15188_v50  ;;  %11205 = vmatmul.mubr.msk.bf16.gmra.mrb[160].mxu0 %vm472_vm8, %v2445_v47  ;;  %v3076_v60 = vrot.slane %v20641_v5, 4  ;;  %v3077_v36 = vrot.slane %v20642_v4, 5  ;;  %v15210_v47 = vld [vmem:[#allocation2 + $0x20] sm:$0xff]  ;;  %v8658_v29 = vsel %vm8630_vm15, %v8110_v11, 0  ;;  %v20645_v33 = vshrl.u32 %v13772_v27, 16 }
 0x203   : > { %11211 = vmatmul.mubr.msk.bf16.vlgmr.msra.gmra.mrb[160].mxu1 %vm472_vm8, %v3075_v6  ;;  %11320 = vmatprep.mubr.msk.bf16.mxu0 %vm12233_vm6, %v20406_v19  ;;  %v15215_v57 = vor.u32 %v20643_v45, %v15188_v50  ;;  %v3747_v6 = vrot.slane %v3745_v22, 7  ;;  %v3754_v10 = vor.u32 %v3752_v23, %v15196_v54  ;;  %v20646_v4 = vshll.u32 %v13772_v27, 16  ;;  %v15242_v50 = vld [vmem:[#allocation2 + $0x28] sm:$0xff] }
 0x204   : > { %11429 = vmatpush3.bf16.msra.mxu1 %v4575_v17  ;;  %11214 = vmatprep.mubr.msk.bf16.mxu1 %vm12233_vm6, %v20406_v19  ;;  %v3080_v5 = vrot.slane %v20645_v33, 4  ;;  %v3078_v11 = vor.u32 %v3077_v36, %v3076_v60  ;;  %v15227_v17 = vrot.slane %v3757_v51, 7  ;;  %v3765_v53 = vshrl.u32 %v15210_v47, 16 }
 0x205   : > { %20644 = vst [vmem:[#allocation116_spill] sm:$0xff] %v15215_v57  ;;  %v1987_v20 = vpop.f32.mrb[56].mxu1  ;;  %11648 = vmatprep.subr.bf16.mxu1 %v20406_v19  ;;  %v3081_v45 = vrot.slane %v20646_v4, 5  ;;  %v15234_v52 = vrot.slane %v20129_v26, 1  ;;  %v20648_v23 = vshll.u32 %v15190_v13, 16  ;;  %v8910_v57 = vshrl.u32 %v8658_v29, 16 }
 0x206   : > { %v10996_v44 = vpop.f32.mrb[57].mxu1  ;;  %v8901_v60 = vshrl.u32 %v8657_v16, 16  ;;  %v8913_v36 = vshll.u32 %v8658_v29, 16  ;;  %v5510_v27 = vsel %vm1804_vm0, %v10400_v9, 0  ;;  %v3760_v4 = vshll.u32 %v3715_v48, 16 }
 0x207   : > { %20647 = vst [vmem:[#allocation117_spill] sm:$0xff] %v15234_v52  ;;  %v15239_v33 = vrot.slane %v20648_v23, 1  ;;  %v1990_v44 = vpop.f32.mrb[58].mxu1  ;;  %v20650_v26 = vshrl.u32 %v15184_v59, 16  ;;  %v20134_v22 = vshrl.u32 %v15190_v13, 16  ;;  %v8904_v24 = vshll.u32 %v8657_v16, 16 }
 0x208   : > { %v10997_v51 = vpop.f32.mrb[59].mxu1  ;;  %v3755_v23 = vsel %vm3743_vm9, %v3747_v6, %v3754_v10  ;;  %v3079_v29 = vsel %vm3063_vm12, %v15167_v41, %v3078_v11  ;;  %v3762_v48 = vor.u32 %v3760_v4, %v15227_v17  ;;  %v15257_v9 = vor.u32 %v3081_v45, %v3080_v5  ;;  %v15283_v4 = vld [vmem:[#allocation2 + $0x40] sm:$0xff] }
 0x209   : > { %20649 = vst [vmem:[#allocation118_spill] sm:$0xff] %v15239_v33  ;;  %v15247_v61 = vor.u32 %v20650_v26, %v15234_v52  ;;  %v15259_v51 = vrot.slane %v3765_v53, 7  ;;  %v15261_v26 = vld [vmem:[#allocation2 + $0x38] sm:$0xff]  ;;  %v15266_v16 = vor.u32 %v20134_v22, %v15239_v33  ;;  %v15269_v10 = vrot.slane %v8910_v57, 3 }
 0x20a   : > { %11321 = vmatmul.mubr.msk.bf16.vlgmr.msra.gmra.mrb[164].mxu0 %vm472_vm8, %v3755_v23  ;;  %v3773_v41 = vshrl.u32 %v15242_v50, 16  ;;  %v15273_v5 = vrot.slane %v8901_v60, 3  ;;  %v15275_v53 = vrot.slane %v8913_v36, 4  ;;  %v3768_v45 = vshll.u32 %v15210_v47, 16  ;;  %v2572_v23 = vpop.f32.mrb[60].mxu0 }
 0x20b   : > { %20651 = vst [vmem:[#allocation119_spill] sm:$0xff] %v15247_v61  ;;  %20652 = vst [vmem:[#allocation120_spill] sm:$0xff] %v15266_v16  ;;  %11539 = vmatpush3.bf16.msra.mxu0 %v5510_v27  ;;  %11215 = vmatmul.mubr.msk.bf16.gmra.mrb[164].mxu1 %vm472_vm8, %v3079_v29  ;;  %v3781_v57 = vshrl.u32 %v15251_v38, 16  ;;  %v15285_v27 = vrot.slane %v8904_v24, 4  ;;  %v20657_v60 = vshrl.u32 %v13828_v21, 16  ;;  %v20658_v6 = vshll.u32 %v13828_v21, 16 }
 0x20c   : > { %20653 = vst [vmem:[#allocation121_spill] sm:$0xff] %v15269_v10  ;;  %20654 = vst [vmem:[#allocation122_spill] sm:$0xff] %v15273_v5  ;;  %11324 = vmatprep.mubr.msk.bf16.mxu0 %vm12233_vm6, %v20406_v19  ;;  %11218 = vmatprep.mubr.msk.bf16.mxu1 %vm12233_vm6, %v20406_v19  ;;  %v15293_v10 = vadd.f32 %v2572_v23, %v1987_v20  ;;  %v11106_v47 = vpop.f32.mrb[61].mxu0  ;;  %v3763_v24 = vsel %vm3743_vm9, %v15196_v54, %v3762_v48  ;;  %v3775_v61 = vrot.slane %v3773_v41, 7 }
 0x20d   : > { %20655 = vst [vmem:[#allocation123_spill] sm:$0xff] %v15275_v53  ;;  %20656 = vst [vmem:[#allocation124_spill] sm:$0xff] %v15285_v27  ;;  %v1995_v29 = vpop.f32.mrb[60].mxu1  ;;  %v3084_v36 = vrot.slane %v20657_v60, 4  ;;  %v3085_v22 = vrot.slane %v20658_v6, 5  ;;  %v3789_v53 = vshrl.u32 %v15261_v26, 16  ;;  %11758 = vmatprep.subr.bf16.mxu0 %v20406_v19  ;;  %v3083_v27 = vsel %vm3063_vm12, %v3078_v11, %v15257_v9 }
 0x20e   : > { %20659 = vst [vmem:[#allocation125_spill] sm:$0xff] %v15293_v10  ;;  %v11000_v5 = vpop.f32.mrb[61].mxu1  ;;  %v3770_v16 = vor.u32 %v3768_v45, %v15259_v51  ;;  %v15300_v60 = vld [vmem:[#allocation2 + $0x48] sm:$0xff]  ;;  %v2575_v21 = vpop.f32.mrb[62].mxu0  ;;  %v20660_v33 = vshrl.u32 %v13868_v30, 16  ;;  %v20661_v20 = vshll.u32 %v13868_v30, 16 }
 0x20f   : > { %v1998_v6 = vpop.f32.mrb[62].mxu1  ;;  %v3797_v5 = vshrl.u32 %v15283_v4, 16  ;;  %v15307_v47 = vadd.f32 %v2575_v21, %v1990_v44  ;;  %v11107_v54 = vpop.f32.mrb[63].mxu0  ;;  %v3783_v11 = vrot.slane %v3781_v57, 7  ;;  %v20663_v45 = vshrl.u32 %v13952_v35, 16 }
 0x210   : > { %v3088_v13 = vrot.slane %v20660_v33, 4  ;;  %v3089_v23 = vrot.slane %v20661_v20, 5  ;;  %v11001_v48 = vpop.f32.mrb[63].mxu1  ;;  %v20664_v59 = vshll.u32 %v13952_v35, 16  ;;  %v15313_v41 = vrot.slane %v3789_v53, 7 }
 0x211   : > { %20662 = vst [vmem:[#allocation126_spill] sm:$0xff] %v15307_v47  ;;  %v3092_v52 = vrot.slane %v20663_v45, 4  ;;  %v20665_v33 = vshrl.u32 %v14002_v0, 16  ;;  %v20666_v30 = vshll.u32 %v14002_v0, 16  ;;  %v3805_v44 = vshrl.u32 %v15300_v60, 16 }
 0x212   : > { %v3093_v62 = vrot.slane %v20664_v59, 5  ;;  %11325 = vmatmul.mubr.msk.bf16.gmra.mrb[168].mxu0 %vm472_vm8, %v3763_v24  ;;  %v3776_v57 = vshll.u32 %v15242_v50, 16  ;;  %v3784_v21 = vshll.u32 %v15251_v38, 16  ;;  %v20667_v54 = vshrl.u32 %v14045_v28, 16 }
 0x213   : > { %v3096_v39 = vrot.slane %v20665_v33, 4  ;;  %v3097_v20 = vrot.slane %v20666_v30, 5  ;;  %v20668_v59 = vshll.u32 %v14045_v28, 16  ;;  %11219 = vmatmul.mubr.msk.bf16.gmra.mrb[168].mxu1 %vm472_vm8, %v3083_v27  ;;  %11328 = vmatprep.mubr.msk.bf16.mxu0 %vm12233_vm6, %v20406_v19  ;;  %v3771_v0 = vsel %vm3743_vm9, %v15227_v17, %v3770_v16  ;;  %v15335_v30 = vld [vmem:[#allocation2 + $0x50] sm:$0xff]  ;;  %v2580_v27 = vpop.f32.mrb[64].mxu0 }
 0x214   : > { %v3100_v35 = vrot.slane %v20667_v54, 4  ;;  %v3086_v48 = vor.u32 %v3085_v22, %v3084_v36  ;;  %v3792_v24 = vshll.u32 %v15261_v26, 16  ;;  %v3799_v50 = vrot.slane %v3797_v5, 7  ;;  %11222 = vmatprep.mubr.msk.bf16.mxu1 %vm12233_vm6, %v20406_v19  ;;  %v15341_v22 = vld [vmem:[#allocation2 + $0x58] sm:$0xff]  ;;  %v11110_v16 = vpop.f32.mrb[65].mxu0 }
 0x215   : > { %v3101_v53 = vrot.slane %v20668_v59, 5  ;;  %v3778_v38 = vor.u32 %v3776_v57, %v3775_v61  ;;  %v3090_v45 = vor.u32 %v3089_v23, %v3088_v13  ;;  %v3786_v33 = vor.u32 %v3784_v21, %v3783_v11  ;;  %v2003_v36 = vpop.f32.mrb[64].mxu1  ;;  %v15349_v57 = vld [vmem:[#allocation2 + $0x60] sm:$0xff] }
 0x216   : > { %v3094_v28 = vor.u32 %v3093_v62, %v3092_v52  ;;  %v3794_v54 = vor.u32 %v3792_v24, %v15313_v41  ;;  %v3098_v59 = vor.u32 %v3097_v20, %v3096_v39  ;;  %v3800_v56 = vshll.u32 %v15283_v4, 16  ;;  %v2583_v39 = vpop.f32.mrb[66].mxu0  ;;  %v11004_v20 = vpop.f32.mrb[65].mxu1 }
 0x217   : > { %v15339_v17 = vrot.slane %v3805_v44, 7  ;;  %v15343_v26 = vadd.f32 %v2580_v27, %v1995_v29  ;;  %v3102_v5 = vor.u32 %v3101_v53, %v3100_v35  ;;  %v20670_v13 = vshrl.u32 %v14095_v55, 16  ;;  %v11111_v35 = vpop.f32.mrb[67].mxu0  ;;  %v2006_v53 = vpop.f32.mrb[66].mxu1  ;;  %v15389_v20 = vld [vmem:[#allocation2 + $0x90] sm:$0xff] }
 0x218   : > { %v20671_v52 = vshll.u32 %v14095_v55, 16  ;;  %v3087_v4 = vsel %vm3063_vm12, %v15257_v9, %v3086_v48  ;;  %v3802_v44 = vor.u32 %v3800_v56, %v3799_v50  ;;  %v3808_v29 = vshll.u32 %v15300_v60, 16  ;;  %v11005_v9 = vpop.f32.mrb[67].mxu1 }
 0x219   : > { %20669 = vst [vmem:[#allocation127_spill] sm:$0xff] %v15343_v26  ;;  %v3104_v62 = vrot.slane %v20670_v13, 4  ;;  %v3813_v21 = vshrl.u32 %v15335_v30, 16  ;;  %v15355_v24 = vadd.f32 %v2583_v39, %v1998_v6  ;;  %v3779_v55 = vsel %vm3743_vm9, %v15259_v51, %v3778_v38  ;;  %v15363_v13 = vld [vmem:[#allocation2 + $0x68] sm:$0xff]  ;;  %v15373_v39 = vld [vmem:[#allocation2 + $0x70] sm:$0xff]  ;;  %v15375_v51 = vld [vmem:[#allocation2 + $0x78] sm:$0xff] }
 0x21a   : > { %v3105_v23 = vrot.slane %v20671_v52, 5  ;;  %v15360_v27 = vsel %vm3063_vm12, %v3086_v48, %v3090_v45  ;;  %v3821_v16 = vshrl.u32 %v15341_v22, 16  ;;  %v15366_v56 = vsel %vm3743_vm9, %v3775_v61, %v3786_v33  ;;  %11329 = vmatmul.mubr.msk.bf16.gmra.mrb[172].mxu0 %vm472_vm8, %v3771_v0  ;;  %v15387_v33 = vld [vmem:[#allocation2 + $0x88] sm:$0xff] }
 0x21b   : > { %20672 = vst [vmem:[#allocation128_spill] sm:$0xff] %v15355_v24  ;;  %v15369_v60 = vsel %vm3063_vm12, %v3090_v45, %v3094_v28  ;;  %v3810_v6 = vor.u32 %v3808_v29, %v15339_v17  ;;  %v3829_v52 = vshrl.u32 %v15349_v57, 16  ;;  %v15379_v48 = vsel %vm3743_vm9, %v3783_v11, %v3794_v54  ;;  %11223 = vmatmul.mubr.msk.bf16.gmra.mrb[172].mxu1 %vm472_vm8, %v3087_v4 }
 0x21c   : > { %v15382_v38 = vsel %vm3063_vm12, %v3094_v28, %v3098_v59  ;;  %v15385_v61 = vsel %vm3063_vm12, %v3098_v59, %v3102_v5  ;;  %v3106_v45 = vor.u32 %v3105_v23, %v3104_v62  ;;  %11332 = vmatprep.mubr.msk.bf16.mxu0 %vm12233_vm6, %v20406_v19  ;;  %v15396_v11 = vsel %vm3743_vm9, %v15313_v41, %v3802_v44  ;;  %v15400_v59 = vld [vmem:[#allocation2 + $0x80] sm:$0xff]  ;;  %v15402_v62 = vld [vmem:[#allocation2 + $0x98] sm:$0xff]  ;;  %v2588_v44 = vpop.f32.mrb[68].mxu0 }
 0x21d   : > { %v3815_v0 = vrot.slane %v3813_v21, 7  ;;  %v3816_v28 = vshll.u32 %v15335_v30, 16  ;;  %v3837_v54 = vshrl.u32 %v15363_v13, 16  ;;  %11226 = vmatprep.mubr.msk.bf16.mxu1 %vm12233_vm6, %v20406_v19  ;;  %v3823_v23 = vrot.slane %v3821_v16, 7  ;;  %v11114_v26 = vpop.f32.mrb[69].mxu0  ;;  %v2011_v16 = vpop.f32.mrb[68].mxu1 }
 0x21e   : > { %v3824_v4 = vshll.u32 %v15341_v22, 16  ;;  %v3845_v29 = vshrl.u32 %v15373_v39, 16  ;;  %v3853_v41 = vshrl.u32 %v15375_v51, 16  ;;  %v15410_v21 = vsel %vm3743_vm9, %v3799_v50, %v3810_v6  ;;  %v2591_v37 = vpop.f32.mrb[70].mxu0  ;;  %v11008_v50 = vpop.f32.mrb[69].mxu1 }
 0x21f   : > { %v15412_v30 = vrot.slane %v3829_v52, 7  ;;  %v3869_v35 = vshrl.u32 %v15387_v33, 16  ;;  %v3877_v9 = vshrl.u32 %v15389_v20, 16  ;;  %v15416_v24 = vadd.f32 %v2588_v44, %v2003_v36  ;;  %v11115_v26 = vpop.f32.mrb[71].mxu0 }
 0x220   : > { %v15419_v22 = vsel %vm3063_vm12, %v3102_v5, %v3106_v45  ;;  %v3861_v47 = vshrl.u32 %v15400_v59, 16  ;;  %v3885_v10 = vshrl.u32 %v15402_v62, 16  ;;  %v3818_v6 = vor.u32 %v3816_v28, %v3815_v0 }
 0x221   : > { %20673 = vst [vmem:[#allocation129_spill] sm:$0xff] %v15416_v24  ;;  %v15425_v52 = vsel %vm3063_vm12, %v3106_v45, %v14521_v14  ;;  %v3832_v40 = vshll.u32 %v15349_v57, 16  ;;  %v3839_v36 = vrot.slane %v3837_v54, 7  ;;  %v15428_v44 = vadd.f32 %v2591_v37, %v2006_v53  ;;  %v2014_v24 = vpop.f32.mrb[70].mxu1  ;;  %v15452_v54 = vld [vmem:[#allocation2 + $0x20] sm:$0xff] }
 0x222   : > { %v3826_v5 = vor.u32 %v3824_v4, %v3823_v23  ;;  %v3847_v58 = vrot.slane %v3845_v29, 7  ;;  %v3855_v3 = vrot.slane %v3853_v41, 7  ;;  %v11009_v8 = vpop.f32.mrb[71].mxu1  ;;  %v3840_v28 = vshll.u32 %v15363_v13, 16  ;;  %11333 = vmatmul.mubr.msk.bf16.gmra.mrb[176].mxu0 %vm472_vm8, %v3779_v55  ;;  %20675 = vst [vmem:[#allocation131_spill] sm:$0xff] %v15452_v54  ;;  %v2596_v4 = vpop.f32.mrb[72].mxu0 }
 0x223   : > { %20674 = vst [vmem:[#allocation130_spill] sm:$0xff] %v15428_v44  ;;  %v3834_v50 = vor.u32 %v3832_v40, %v15412_v30  ;;  %v3871_v15 = vrot.slane %v3869_v35, 7  ;;  %v3879_v14 = vrot.slane %v3877_v9, 7  ;;  %v3848_v57 = vshll.u32 %v15373_v39, 16  ;;  %11227 = vmatmul.mubr.msk.bf16.gmra.mrb[176].mxu1 %vm472_vm8, %v15360_v27  ;;  %11336 = vmatprep.mubr.msk.bf16.mxu0 %vm12233_vm6, %v20406_v19  ;;  %v15450_v27 = vld [vmem:[#allocation2 + $0xa8] sm:$0xff]  ;;  %v11118_v9 = vpop.f32.mrb[73].mxu0 }
 0x224   : > { %v3856_v37 = vshll.u32 %v15375_v51, 16  ;;  %v3863_v53 = vrot.slane %v3861_v47, 7  ;;  %v15437_v45 = vrot.slane %v3885_v10, 7  ;;  %v3842_v8 = vor.u32 %v3840_v28, %v3839_v36  ;;  %11230 = vmatprep.mubr.msk.bf16.mxu1 %vm12233_vm6, %v20406_v19  ;;  %v4351_v9 = vld [vmem:[#allocation3 + $0x8] sm:$0x80] }
 0x225   : > { %v3872_v40 = vshll.u32 %v15387_v33, 16  ;;  %v3880_v13 = vshll.u32 %v15389_v20, 16  ;;  %v3893_v55 = vshrl.u32 %v15430_v7, 16  ;;  %v3850_v39 = vor.u32 %v3848_v57, %v3847_v58  ;;  %v6707_v57 = vld [vmem:[#allocation2 + $0x18] sm:$0xf0] }
 0x226   : > { %v3858_v47 = vor.u32 %v3856_v37, %v3855_v3  ;;  %v3864_v10 = vshll.u32 %v15400_v59, 16  ;;  %v3888_v51 = vshll.u32 %v15402_v62, 16  ;;  %v15456_v33 = vsel %vm3743_vm9, %v15339_v17, %v3818_v6  ;;  %v2019_v59 = vpop.f32.mrb[72].mxu1  ;;  %v2599_v37 = vpop.f32.mrb[74].mxu0 }
 0x227   : > { %v15459_v20 = vsel %vm3743_vm9, %v3815_v0, %v3826_v5  ;;  %v3874_v29 = vor.u32 %v3872_v40, %v3871_v15  ;;  %v3882_v41 = vor.u32 %v3880_v13, %v3879_v14  ;;  %v15461_v35 = vadd.f32 %v2596_v4, %v2011_v16  ;;  %v11012_v44 = vpop.f32.mrb[73].mxu1  ;;  %v11119_v40 = vpop.f32.mrb[75].mxu0 }
 0x228   : > { %v15464_v62 = vsel %vm3743_vm9, %v3823_v23, %v3834_v50  ;;  %v3866_v26 = vor.u32 %v3864_v10, %v3863_v53  ;;  %v3890_v28 = vor.u32 %v3888_v51, %v15437_v45  ;;  %v15467_v17 = vrot.slane %v3893_v55, 7  ;;  %v2022_v13 = vpop.f32.mrb[74].mxu1 }
 0x229   : > { %20676 = vst [vmem:[#allocation132_spill] sm:$0xff] %v15461_v35  ;;  %v3901_v0 = vshrl.u32 %v15450_v27, 16  ;;  %v20154_v6 = vshrl.u32 %v15452_v54, 16  ;;  %v20153_v16 = vshll.u32 %v15452_v54, 16  ;;  %v15472_v5 = vadd.f32 %v2599_v37, %v2014_v24  ;;  %v11013_v55 = vpop.f32.mrb[75].mxu1  ;;  %v12164_v37 = vld [vmem:[#allocation3 + $0x8] sm:$0xff] }
 0x22a   : > { %v15476_v23 = vsel %vm3743_vm9, %v15412_v30, %v3842_v8  ;;  %v15479_v50 = vsel %vm3743_vm9, %v3839_v36, %v3850_v39  ;;  %v15482_v44 = vsel %vm3743_vm9, %v3847_v58, %v3858_v47  ;;  %v15485_v10 = vsel %vm3743_vm9, %v3855_v3, %v3866_v26  ;;  %v15494_v30 = vld [vmem:[#allocation2 + $0xb0] sm:$0xff]  ;;  %11337 = vmatmul.mubr.msk.bf16.gmra.mrb[180].mxu0 %vm472_vm8, %v15366_v56  ;;  %v2779_v39 = vld [vmem:[#allocation3] sm:$0xf0]  ;;  %v15511_v56 = vld [vmem:[#allocation2 + $0x28] sm:$0xff]  ;;  %v2604_v26 = vpop.f32.mrb[76].mxu0 }
 0x22b   : > { %20677 = vst [vmem:[#allocation133_spill] sm:$0xff] %v15472_v5  ;;  %v15488_v51 = vsel %vm3743_vm9, %v3863_v53, %v3874_v29  ;;  %v15491_v24 = vsel %vm3743_vm9, %v3871_v15, %v3882_v41  ;;  %v3896_v4 = vshll.u32 %v15430_v7, 16  ;;  %v15499_v58 = vsel %vm3743_vm9, %v3879_v14, %v3890_v28  ;;  %11231 = vmatmul.mubr.msk.bf16.gmra.mrb[180].mxu1 %vm472_vm8, %v15369_v60 }
 0x22c   : > { %20678 = vst [vmem:[#allocation134_spill] sm:$0xff] %v15491_v24  ;;  %20679 = vst [vmem:[#allocation135_spill] sm:$0xff] %v15499_v58  ;;  %v7464_v3 = vshrl.u32 %v6707_v57, 16  ;;  %v7467_v8 = vshll.u32 %v6707_v57, 16  ;;  %11340 = vmatprep.mubr.msk.bf16.mxu0 %vm12233_vm6, %v20406_v19  ;;  %v15509_v7 = vrot.slane %v3901_v0, 7  ;;  %v7471_v14 = vrot.slane %v20154_v6, 4  ;;  %11234 = vmatprep.mubr.msk.bf16.mxu1 %vm12233_vm6, %v20406_v19 }
 0x22d   : > { %v15507_v15 = vor.u32 %v3896_v4, %v15467_v17  ;;  %20680 = vst [vmem:[#allocation136_spill] sm:$0xff] %v15511_v56  ;;  %v7472_v53 = vrot.slane %v20153_v16, 5  ;;  %v1717_v57 = vld [vmem:[#allocation3] sm:$0xf8]  ;;  %v20681_v0 = vmov 4048220490   ;;  %v15524_v16 = vadd.f32 %v2604_v26, %v2019_v59 }
 0x22e   : > { %v7466_v29 = vrot.slane %v7464_v3, 4  ;;  %v7469_v41 = vrot.slane %v7467_v8, 5  ;;  %v1746_v40 = vmax.bf16 %v20681_v0, %v12164_v37  ;;  %v2782_v55 = vshrl.u32 %v2779_v39, 16  ;;  %v11122_v6 = vpop.f32.mrb[77].mxu0  ;;  %v2027_v36 = vpop.f32.mrb[76].mxu1 }
 0x22f   : > { %v15521_v28 = vor.u32 %v7472_v53, %v7471_v14  ;;  %v2784_v4 = vshll.u32 %v2779_v39, 16  ;;  %v20157_v60 = vshrl.u32 %v15511_v56, 16  ;;  %v3602_v47 = vrot.slane %v2779_v39, 1  ;;  %v2607_v3 = vpop.f32.mrb[78].mxu0  ;;  %v11016_v8 = vpop.f32.mrb[77].mxu1 }
 0x230   : > { %v7470_v54 = vor.u32 %v7469_v41, %v7466_v29  ;;  %v20158_v5 = vshll.u32 %v15511_v56, 16  ;;  %v3033_v53 = vmax.bf16 %v14710_v1, %v1746_v40  ;;  %v4407_v35 = vrot.slane %v4351_v9, 4  ;;  %v11123_v37 = vpop.f32.mrb[79].mxu0  ;;  %v2030_v24 = vpop.f32.mrb[78].mxu1  ;;  %v15561_v8 = vld [vmem:[#allocation3 + $0x28] sm:$0xff] }
 0x231   : > { %v2786_v14 = vrot.slane %v2784_v4, 1  ;;  %v15529_v58 = vadd.f32 %v2607_v3, %v2022_v13  ;;  %v1745_v6 = vmax.bf16 %v20681_v0, %v1717_v57  ;;  %v20683_v39 = vrot.slane %v14561_v18, 4  ;;  %v11017_v26 = vpop.f32.mrb[79].mxu1 }
 0x232   : > { %v15533_v59 = vsel %vm3063_vm12, %v7470_v54, %v15521_v28  ;;  %v20684_v29 = vrot.slane %v14600_v42, 4  ;;  %v20685_v1 = vrot.slane %v14491_v63, 1  ;;  %v3686_v9 = vmax.bf16 %v14746_v43, %v3033_v53  ;;  %11341 = vmatmul.mubr.msk.bf16.gmra.mrb[184].mxu0 %vm472_vm8, %v15379_v48 }
 0x233   : > { %20682 = vst [vmem:[#allocation137_spill] sm:$0xff] %v15533_v59  ;;  %v2787_v4 = vor.u32 %v2786_v14, %v2782_v55  ;;  %v4896_v54 = vsel %vm3063_vm12, %v14758_v46, %v14698_v31  ;;  %v20687_v3 = vrot.slane %v14561_v18, 5  ;;  %v20688_v55 = vrot.slane %v14600_v42, 5  ;;  %11235 = vmatmul.mubr.msk.bf16.gmra.mrb[184].mxu1 %vm472_vm8, %v15382_v38  ;;  %11344 = vmatprep.mubr.msk.bf16.mxu0 %vm12233_vm6, %v20406_v19 }
 0x234   : > { %v4411_v41 = vsel %vm1804_vm0, %v20684_v29, %v20683_v39  ;;  %v3604_v13 = vsel %vm3601_vm4, %v3602_v47, %v20685_v1  ;;  %v20686_v57 = vmov %v20684_v29  ;;  %v15558_v47 = vld [vmem:[#allocation3 + $0x20] sm:$0xff]  ;;  %v7197_v14 = vshll.u32 %v15561_v8, 16  ;;  %11238 = vmatprep.mubr.msk.bf16.mxu1 %vm12233_vm6, %v20406_v19 }
 0x235   : > { %v4409_v40 = vsel %vm1804_vm0, %v4407_v35, %v20686_v57  ;;  %v5874_v63 = vsel %vm5871_vm7, %v20688_v55, %v20687_v3  ;;  %v7189_v43 = vshll.u32 %v15558_v47, 16  ;;  %v2792_v48 = vsel %vm2780_vm10, %v2787_v4, %v14527_v12  ;;  %v20689_v39 = vld [vmem:[#allocation5_spill] sm:$0xff]  ;;  %v2612_v57 = vpop.f32.mrb[80].mxu0  ;;  %v12167_v4 = vld [vmem:[#allocation3 + $0x18] sm:$0xf0] }
 0x236   : > { %v4491_v35 = vmax.bf16 %v4411_v41, %v3686_v9  ;;  %v8001_v53 = vrot.slane %v15558_v47, 1  ;;  %vm8604_vm14 = vcmp.ne.s16.totalorder %v20689_v39, 0  ;;  %v3032_v29 = vmax.bf16 %v2792_v48, %v1745_v6  ;;  %v11126_v59 = vpop.f32.mrb[81].mxu0  ;;  %v2035_v6 = vpop.f32.mrb[80].mxu1 }
 0x237   : > { %v7191_v26 = vrot.slane %v7189_v43, 1  ;;  %v7199_v1 = vrot.slane %v7197_v14, 1  ;;  %v7475_v38 = vrot.slane %v20157_v60, 4  ;;  %v20690_v12 = vshrl.u32 %v14590_v34, 16  ;;  %v11020_v34 = vpop.f32.mrb[81].mxu1  ;;  %v15594_v59 = vld [vmem:[#allocation3 + $0x20] sm:$0xff] }
 0x238   : > { %v5151_v3 = vmax.bf16 %v4896_v54, %v4491_v35  ;;  %v8000_v9 = vrot.slane %v12167_v4, 1  ;;  %v7476_v55 = vrot.slane %v20158_v5, 5  ;;  %v15582_v37 = vadd.f32 %v2612_v57, %v2027_v36  ;;  %v2615_v35 = vpop.f32.mrb[82].mxu0  ;;  %v2038_v57 = vpop.f32.mrb[82].mxu1 }
 0x239   : > { %v7187_v41 = vor.u32 %v14668_v49, %v20690_v12  ;;  %v3685_v43 = vmax.bf16 %v3604_v13, %v3032_v29  ;;  %v7195_v14 = vor.u32 %v7191_v26, %v14753_v2  ;;  %v20691_v48 = vrot.slane %v15561_v8, 1  ;;  %v12168_v12 = vld [vmem:[#allocation3 + $0x10] sm:$0xff]  ;;  %v11127_v29 = vpop.f32.mrb[83].mxu0  ;;  %v11021_v34 = vpop.f32.mrb[83].mxu1 }
 0x23a   : > { %v5956_v60 = vmax.bf16 %v5874_v63, %v5151_v3  ;;  %v15588_v49 = vor.u32 %v7476_v55, %v7475_v38  ;;  %v1747_v4 = vmax.bf16 %v20681_v0, %v12168_v12  ;;  %v2808_v36 = vsel %vm2780_vm10, %v14727_v25, %v14623_v32  ;;  %v20695_v55 = vld [vmem:[#allocation4_spill] sm:$0xff]  ;;  %11345 = vmatmul.mubr.msk.bf16.gmra.mrb[188].mxu0 %vm472_vm8, %v15396_v11  ;;  %v20697_v12 = vld [vmem:[#allocation65_spill] sm:$0xff] }
 0x23b   : > { %v8004_v54 = vsel %vm3601_vm4, %v8001_v53, %v20691_v48  ;;  %v15596_v13 = vadd.f32 %v2615_v35, %v2030_v24  ;;  %v4490_v5 = vmax.bf16 %v4409_v40, %v3685_v43  ;;  %v7200_v48 = vsel %vm2780_vm10, %v7195_v14, %v7199_v1  ;;  %v15612_v43 = vld [vmem:[#allocation3 + $0x30] sm:$0xff]  ;;  %11239 = vmatmul.mubr.msk.bf16.gmra.mrb[188].mxu1 %vm472_vm8, %v15385_v61 }
 0x23c   : > { %20692 = vst [vmem:[#allocation5_spill] sm:$0xff] %v15588_v49  ;;  %v20693_v63 = vrot.slane %v14561_v18, 1  ;;  %v20694_v38 = vrot.slane %v14600_v42, 1  ;;  %vm8603_vm13 = vcmp.ne.s16.totalorder %v20695_v55, 0  ;;  %v6680_v32 = vmax.bf16 %v15558_v47, %v5956_v60  ;;  %11348 = vmatprep.mubr.msk.bf16.mxu0 %vm12233_vm6, %v20406_v19  ;;  %11242 = vmatprep.mubr.msk.bf16.mxu1 %vm12233_vm6, %v20406_v19 }
 0x23d   : > { %v15609_v25 = vsel %vm3063_vm12, %v15521_v28, %v15588_v49  ;;  %v3034_v24 = vmax.bf16 %v2808_v36, %v1747_v4  ;;  %v20159_v40 = vrot.slane %v15558_v47, 4  ;;  %v5150_v14 = vmax.bf16 %v14758_v46, %v4490_v5 }
 0x23e   : > { %v3608_v3 = vsel %vm3601_vm4, %v20694_v38, %v20693_v63  ;;  %20696 = vst [vmem:[#allocation4_spill] sm:$0xff] %v15609_v25  ;;  %v4900_v35 = vrot.slane %v14753_v2, 4  ;;  %v20698_v29 = vshll.u32 %v20697_v12, 16  ;;  %v6651_v38 = vld [vmem:[#allocation3 + $0x18] sm:$0xf8]  ;;  %v7433_v28 = vmax.bf16 %v7200_v48, %v6680_v32  ;;  %v2043_v56 = vpop.f32.mrb[84].mxu1 }
 0x23f   : > { %v3687_v4 = vmax.bf16 %v3608_v3, %v3034_v24  ;;  %v20699_v46 = vrot.slane %v14561_v18, 4  ;;  %v7201_v5 = vshrl.u32 %v15561_v8, 16  ;;  %v20700_v36 = vrot.slane %v14600_v42, 5  ;;  %v2620_v3 = vpop.f32.mrb[84].mxu0 }
 0x240   : > { %v4903_v60 = vrot.slane %v20698_v29, 5  ;;  %v8002_v61 = vsel %vm3601_vm4, %v8000_v9, %v8001_v53  ;;  %v7205_v48 = vshll.u32 %v15612_v43, 16  ;;  %v7192_v32 = vsel %vm2780_vm10, %v7187_v41, %v7191_v26  ;;  %v11130_v25 = vpop.f32.mrb[85].mxu0 }
 0x241   : > { %v4413_v11 = vsel %vm1804_vm0, %v20699_v46, %v20159_v40  ;;  %v5955_v34 = vmax.bf16 %v20700_v36, %v5150_v14  ;;  %v8084_v24 = vmax.bf16 %v8004_v54, %v7433_v28  ;;  %v7203_v46 = vor.u32 %v7201_v5, %v7199_v1  ;;  %v20701_v40 = vld [vmem:[#allocation12_spill] sm:$0xff]  ;;  %v2623_v41 = vpop.f32.mrb[86].mxu0  ;;  %v11024_v54 = vpop.f32.mrb[85].mxu1 }
 0x242   : > { %v15636_v29 = vor.u32 %v4903_v60, %v4900_v35  ;;  %v4492_v63 = vmax.bf16 %v4413_v11, %v3687_v4  ;;  %vm8605_vm11 = vcmp.ne.s16.totalorder %v20701_v40, 0  ;;  %v15641_v49 = vadd.f32 %v2620_v3, %v2035_v6  ;;  %11349 = vmatmul.mubr.msk.bf16.gmra.mrb[192].mxu0 %vm472_vm8, %v15410_v21  ;;  %v20710_v54 = vld [vmem:[#allocation14_spill] sm:$0xff] }
 0x243   : > { %v6679_v42 = vmax.bf16 %v6651_v38, %v5955_v34  ;;  %v20702_v9 = vrot.slane %v15594_v59, 5  ;;  %v20703_v14 = vrot.slane %v14561_v18, 5  ;;  %v8632_v1 = vsel %vm8604_vm14, %v8084_v24, 0  ;;  %v11131_v38 = vpop.f32.mrb[87].mxu0  ;;  %v12169_v34 = vld [vmem:[#allocation3 + $0x18] sm:$0xff]  ;;  %v20704_v24 = vld [vmem:[#allocation50_spill] sm:$0xff]  ;;  %11243 = vmatmul.mubr.msk.bf16.gmra.mrb[192].mxu1 %vm472_vm8, %v15419_v22  ;;  %11352 = vmatprep.mubr.msk.bf16.mxu0 %vm12233_vm6, %v20406_v19 }
 0x244   : > { %v4905_v53 = vsel %vm3063_vm12, %v14698_v31, %v15636_v29  ;;  %v15653_v35 = vrot.slane %v7205_v48, 1  ;;  %v8005_v25 = vrot.slane %v15612_v43, 1  ;;  %v15656_v60 = vadd.f32 %v2623_v41, %v2038_v57  ;;  %v2046_v31 = vpop.f32.mrb[86].mxu1  ;;  %11246 = vmatprep.mubr.msk.bf16.mxu1 %vm12233_vm6, %v20406_v19  ;;  %v15696_v38 = vld [vmem:[#allocation3 + $0x28] sm:$0xff] }
 0x245   : > { %v5876_v26 = vsel %vm5871_vm7, %v20703_v14, %v20702_v9  ;;  %v5152_v6 = vmax.bf16 %v4905_v53, %v4492_v63  ;;  %v7432_v28 = vmax.bf16 %v7192_v32, %v6679_v42  ;;  %v8676_v4 = vshrl.u32 %v8632_v1, 16  ;;  %v11025_v5 = vpop.f32.mrb[87].mxu1  ;;  %v20705_v42 = vld [vmem:[#allocation43_spill] sm:$0xff] }
 0x246   : > { %v8679_v11 = vshll.u32 %v8632_v1, 16  ;;  %v15661_v36 = vsel %vm3743_vm9, %v15437_v45, %v15507_v15  ;;  %v7208_v63 = vsel %vm2780_vm10, %v7203_v46, %v15653_v35  ;;  %v1748_v48 = vmax.bf16 %v20681_v0, %v12169_v34 }
 0x247   : > { %v5957_v39 = vmax.bf16 %v5876_v26, %v5152_v6  ;;  %v8083_v57 = vmax.bf16 %v8002_v61, %v7432_v28  ;;  %v8678_v3 = vrot.slane %v8676_v4, 3  ;;  %v2816_v53 = vsel %vm2780_vm10, %v20705_v42, %v20704_v24  ;;  %v2628_v28 = vpop.f32.mrb[88].mxu0 }
 0x248   : > { %v8681_v32 = vrot.slane %v8679_v11, 4  ;;  %v20706_v45 = vshll.u32 %v15450_v27, 16  ;;  %v3035_v21 = vmax.bf16 %v2816_v53, %v1748_v48  ;;  %v4414_v61 = vrot.slane %v15561_v8, 4  ;;  %v11134_v34 = vpop.f32.mrb[89].mxu0  ;;  %v2051_v48 = vpop.f32.mrb[88].mxu1 }
 0x249   : > { %v6681_v46 = vmax.bf16 %v15561_v8, %v5957_v39  ;;  %v8631_v9 = vsel %vm8603_vm13, %v8083_v57, 0  ;;  %v20707_v22 = vrot.slane %v15561_v8, 1  ;;  %v20708_v27 = vrot.slane %v20697_v12, 1 }
 0x24a   : > { %v3906_v15 = vor.u32 %v20706_v45, %v15509_v7  ;;  %v20709_v26 = vrot.slane %v14561_v18, 1  ;;  %v20711_v1 = vshrl.u32 %v20710_v54, 16  ;;  %v8668_v55 = vshrl.u32 %v8631_v9, 16  ;;  %11353 = vmatmul.mubr.msk.bf16.gmra.mrb[196].mxu0 %vm472_vm8, %v15456_v33 }
 0x24b   : > { %v8006_v14 = vsel %vm3601_vm4, %v20707_v22, %v8005_v25  ;;  %v8671_v4 = vshll.u32 %v8631_v9, 16  ;;  %v15698_v11 = vor.u32 %v8681_v32, %v8678_v3  ;;  %v7434_v5 = vmax.bf16 %v7208_v63, %v6681_v46  ;;  %v15709_v22 = vld [vmem:[#allocation3 + $0x38] sm:$0xff]  ;;  %v2631_v9 = vpop.f32.mrb[90].mxu0  ;;  %v11028_v3 = vpop.f32.mrb[89].mxu1  ;;  %11247 = vmatmul.mubr.msk.bf16.gmra.mrb[196].mxu1 %vm472_vm8, %v15425_v52  ;;  %11356 = vmatprep.mubr.msk.bf16.mxu0 %vm12233_vm6, %v20406_v19 }
 0x24c   : > { %v3610_v41 = vsel %vm3601_vm4, %v20709_v26, %v20708_v27  ;;  %v4909_v6 = vrot.slane %v20711_v1, 4  ;;  %v15700_v39 = vadd.f32 %v2628_v28, %v2043_v56  ;;  %v20712_v18 = vrot.slane %v15558_v47, 4  ;;  %v2054_v26 = vpop.f32.mrb[90].mxu1  ;;  %11250 = vmatprep.mubr.msk.bf16.mxu1 %vm12233_vm6, %v20406_v19 }
 0x24d   : > { %v3688_v57 = vmax.bf16 %v3610_v41, %v3035_v21  ;;  %v20713_v53 = vshll.u32 %v20710_v54, 16  ;;  %v8670_v32 = vrot.slane %v8668_v55, 3  ;;  %v8673_v63 = vrot.slane %v8671_v4, 4  ;;  %v11135_v21 = vpop.f32.mrb[91].mxu0  ;;  %v15714_v41 = vld [vmem:[#allocation2 + $0xb8] sm:$0xff] }
 0x24e   : > { %v4415_v42 = vsel %vm1804_vm0, %v20712_v18, %v4414_v61  ;;  %v8085_v56 = vmax.bf16 %v8006_v14, %v7434_v5  ;;  %v5877_v46 = vrot.slane %v15696_v38, 5  ;;  %v15712_v27 = vadd.f32 %v2631_v9, %v2046_v31  ;;  %v11029_v18 = vpop.f32.mrb[91].mxu1  ;;  %v20715_v5 = vld [vmem:[#allocation15_spill] sm:$0xff] }
 0x24f   : > { %v4912_v45 = vrot.slane %v20713_v53, 5  ;;  %v4493_v1 = vmax.bf16 %v4415_v42, %v3688_v57  ;;  %v7209_v34 = vshrl.u32 %v15612_v43, 16  ;;  %v8674_v53 = vor.u32 %v8673_v63, %v8670_v32  ;;  %v2636_v63 = vpop.f32.mrb[92].mxu0 }
 0x250   : > { %v8633_v55 = vsel %vm8605_vm11, %v8085_v56, 0  ;;  %v20714_v14 = vrot.slane %v15594_v59, 5  ;;  %v7213_v4 = vshll.u32 %v15709_v22, 16  ;;  %vm8606_vm2 = vcmp.ne.s16.totalorder %v20715_v5, 0  ;;  %v20732_v5 = vld [vmem:[#allocation54_spill] sm:$0xff] }
 0x251   : > { %v15716_v28 = vor.u32 %v4912_v45, %v4909_v6  ;;  %v8685_v6 = vshrl.u32 %v8633_v55, 16  ;;  %v8688_v57 = vshll.u32 %v8633_v55, 16  ;;  %v7211_v42 = vor.u32 %v7209_v34, %v15653_v35  ;;  %v2059_v55 = vpop.f32.mrb[92].mxu1 }
 0x252   : > { %v5878_v31 = vsel %vm5871_vm7, %v20714_v14, %v5877_v46  ;;  %v20716_v59 = vshrl.u32 %v15494_v30, 16  ;;  %v3917_v33 = vshrl.u32 %v15714_v41, 16  ;;  %v15745_v9 = vsel %vm2194_vm3, %v8674_v53, %v15698_v11  ;;  %v11138_v53 = vpop.f32.mrb[93].mxu0  ;;  %11357 = vmatmul.mubr.msk.bf16.gmra.mrb[200].mxu0 %vm472_vm8, %v15459_v20 }
 0x253   : > { %v4914_v40 = vsel %vm3063_vm12, %v15636_v29, %v15716_v28  ;;  %20717 = vst [vmem:[#allocation65_spill] sm:$0xff] %v15745_v9  ;;  %v8687_v29 = vrot.slane %v8685_v6, 3  ;;  %v8690_v35 = vrot.slane %v8688_v57, 4  ;;  %v7215_v52 = vrot.slane %v7213_v4, 1  ;;  %v20719_v6 = vld [vmem:[#allocation55_spill] sm:$0xff]  ;;  %11360 = vmatprep.mubr.msk.bf16.mxu0 %vm12233_vm6, %v20406_v19 }
 0x254   : > { %v15740_v45 = vrot.slane %v20716_v59, 7  ;;  %v5153_v3 = vmax.bf16 %v4914_v40, %v4493_v1  ;;  %v8007_v32 = vrot.slane %v15709_v22, 1  ;;  %v15752_v56 = vsel %vm3743_vm9, %v15467_v17, %v3906_v15  ;;  %v2639_v15 = vpop.f32.mrb[94].mxu0  ;;  %v11032_v40 = vpop.f32.mrb[93].mxu1  ;;  %v20750_v9 = vld [vmem:[#allocation67_spill] sm:$0xff] }
 0x255   : > { %v1749_v18 = vmax.bf16 %v20681_v0, %v15558_v47  ;;  %v15757_v1 = vadd.f32 %v2636_v63, %v2051_v48  ;;  %v15759_v14 = vor.u32 %v8690_v35, %v8687_v29  ;;  %v7216_v4 = vsel %vm2780_vm10, %v7211_v42, %v7215_v52  ;;  %v15773_v29 = vld [vmem:[#allocation3 + $0x30] sm:$0xff]  ;;  %v15776_v35 = vld [vmem:[#allocation3 + $0x40] sm:$0xff]  ;;  %v2062_v63 = vpop.f32.mrb[94].mxu1 }
 0x256   : > { %v5958_v34 = vmax.bf16 %v5878_v31, %v5153_v3  ;;  %v20720_v57 = vor.u32 %v14753_v2, %v20704_v24  ;;  %v20721_v47 = vrot.slane %v20710_v54, 1  ;;  %v20722_v48 = vrot.slane %v20697_v12, 1  ;;  %v11139_v24 = vpop.f32.mrb[95].mxu0 }
 0x257   : > { %20718 = vst [vmem:[#allocation12_spill] sm:$0xff] %v15757_v1  ;;  %v20164_v42 = vrot.slane %v15773_v29, 4  ;;  %v15778_v2 = vadd.f32 %v2639_v15, %v2054_v26  ;;  %v8008_v12 = vsel %vm3601_vm4, %v8005_v25, %v8007_v32  ;;  %v20728_v25 = vshll.u32 %v15494_v30, 16 }
 0x258   : > { %v2824_v17 = vsel %vm2780_vm10, %v20720_v57, %v20719_v6  ;;  %v6682_v31 = vmax.bf16 %v15612_v43, %v5958_v34  ;;  %v3612_v3 = vsel %vm3601_vm4, %v20722_v48, %v20721_v47  ;;  %v15783_v34 = vsel %vm2194_vm3, %v15698_v11, %v15759_v14  ;;  %v11033_v57 = vpop.f32.mrb[95].mxu1 }
 0x259   : > { %v3036_v59 = vmax.bf16 %v2824_v17, %v1749_v18  ;;  %20723 = vst [vmem:[#allocation50_spill] sm:$0xff] %v15778_v2  ;;  %20724 = vst [vmem:[#allocation43_spill] sm:$0xff] %v15783_v34  ;;  %v20725_v18 = vld [vmem:[#allocation47_spill] sm:$0xff]  ;;  %v15792_v17 = vld [vmem:[#allocation2 + $0xc0] sm:$0xff]  ;;  %v4417_v11 = vsel %vm1804_vm0, %v4414_v61, %v20164_v42  ;;  %v15806_v48 = vor.u32 %v20728_v25, %v15740_v45  ;;  %v20165_v30 = vrot.slane %v15776_v35, 1  ;;  %v2067_v38 = vpop.f32.mrb[96].mxu1 }
 0x25a   : > { %v20726_v53 = vshrl.u32 %v20725_v18, 16  ;;  %v7435_v26 = vmax.bf16 %v7216_v4, %v6682_v31  ;;  %v20727_v40 = vshll.u32 %v20725_v18, 16  ;;  %v20163_v4 = vrot.slane %v15612_v43, 5  ;;  %v15859_v34 = vld [vmem:[#allocation3 + $0x38] sm:$0xff]  ;;  %11361 = vmatmul.mubr.msk.bf16.gmra.mrb[204].mxu0 %vm472_vm8, %v15464_v62 }
 0x25b   : > { %v3689_v15 = vmax.bf16 %v3612_v3, %v3036_v59  ;;  %v7217_v31 = vshrl.u32 %v15709_v22, 16  ;;  %v7221_v59 = vshll.u32 %v15776_v35, 16  ;;  %v20729_v3 = vld [vmem:[#allocation6_spill] sm:$0xff]  ;;  %11364 = vmatprep.mubr.msk.bf16.mxu0 %vm12233_vm6, %v20406_v19  ;;  %v20741_v62 = vrot.slane %v15773_v29, 4 }
 0x25c   : > { %v4918_v6 = vrot.slane %v20726_v53, 4  ;;  %v4921_v47 = vrot.slane %v20727_v40, 5  ;;  %11251 = vmatmul.mubr.msk.bf16.gmra.mrb[200].mxu1 %vm472_vm8, %v20729_v3  ;;  %v8086_v61 = vmax.bf16 %v8008_v12, %v7435_v26  ;;  %v15820_v53 = vrot.slane %v3917_v33, 7  ;;  %v20730_v26 = vld [vmem:[#allocation18_spill] sm:$0xff] }
 0x25d   : > { %v4494_v24 = vmax.bf16 %v4417_v11, %v3689_v15  ;;  %11254 = vmatprep.mubr.msk.bf16.mxu1 %vm12233_vm6, %v20406_v19  ;;  %v5880_v12 = vsel %vm5871_vm7, %v5877_v46, %v20163_v4  ;;  %vm8607_vm1 = vcmp.ne.s16.totalorder %v20730_v26, 0  ;;  %v7219_v11 = vor.u32 %v7217_v31, %v7215_v52  ;;  %v11036_v4 = vpop.f32.mrb[97].mxu1  ;;  %v20733_v52 = vld [vmem:[#allocation25_spill] sm:$0xff] }
 0x25e   : > { %v15815_v20 = vor.u32 %v4921_v47, %v4918_v6  ;;  %v2644_v6 = vpop.f32.mrb[96].mxu0  ;;  %v8634_v15 = vsel %vm8606_vm2, %v8086_v61, 0  ;;  %v1750_v47 = vmax.bf16 %v20681_v0, %v15561_v8  ;;  %v7223_v42 = vrot.slane %v7221_v59, 1  ;;  %v2070_v59 = vpop.f32.mrb[98].mxu1 }
 0x25f   : > { %v15837_v25 = vadd.f32 %v2644_v6, %v2059_v55  ;;  %v11142_v3 = vpop.f32.mrb[97].mxu0  ;;  %v8694_v40 = vshrl.u32 %v8634_v15, 16  ;;  %v8697_v46 = vshll.u32 %v8634_v15, 16  ;;  %v2832_v8 = vsel %vm2780_vm10, %v20733_v52, %v20732_v5 }
 0x260   : > { %v4923_v33 = vsel %vm3063_vm12, %v15716_v28, %v15815_v20  ;;  %v2647_v21 = vpop.f32.mrb[98].mxu0  ;;  %v8010_v28 = vsel %vm3601_vm4, %v8007_v32, %v20165_v30  ;;  %v20734_v55 = vrot.slane %v20725_v18, 1  ;;  %v20735_v31 = vrot.slane %v20710_v54, 1  ;;  %v15854_v3 = vld [vmem:[#allocation3 + $0x48] sm:$0xff]  ;;  %v11037_v32 = vpop.f32.mrb[99].mxu1  ;;  %v15856_v30 = vld [vmem:[#allocation2 + $0xc8] sm:$0xff] }
 0x261   : > { %20731 = vst [vmem:[#allocation14_spill] sm:$0xff] %v15837_v25  ;;  %v5154_v57 = vmax.bf16 %v4923_v33, %v4494_v24  ;;  %v15852_v24 = vadd.f32 %v2647_v21, %v2062_v63  ;;  %v11143_v4 = vpop.f32.mrb[99].mxu0  ;;  %v8696_v6 = vrot.slane %v8694_v40, 3  ;;  %v8699_v15 = vrot.slane %v8697_v46, 4 }
 0x262   : > { %v3614_v61 = vsel %vm3601_vm4, %v20735_v31, %v20734_v55  ;;  %v7224_v5 = vsel %vm2780_vm10, %v7219_v11, %v7223_v42  ;;  %v3037_v52 = vmax.bf16 %v2832_v8, %v1750_v47  ;;  %v20166_v54 = vrot.slane %v15859_v34, 4  ;;  %v20737_v55 = vld [vmem:[#allocation46_spill] sm:$0xff]  ;;  %v20740_v47 = vld [vmem:[#allocation37_spill] sm:$0xff]  ;;  %11365 = vmatmul.mubr.msk.bf16.gmra.mrb[208].mxu0 %vm472_vm8, %v15476_v23 }
 0x263   : > { %20736 = vst [vmem:[#allocation15_spill] sm:$0xff] %v15852_v24  ;;  %v5959_v33 = vmax.bf16 %v5880_v12, %v5154_v57  ;;  %v20738_v21 = vshrl.u32 %v20737_v55, 16  ;;  %v15866_v40 = vor.u32 %v8699_v15, %v8696_v6  ;;  %v20739_v12 = vshll.u32 %v20737_v55, 16  ;;  %11368 = vmatprep.mubr.msk.bf16.mxu0 %vm12233_vm6, %v20406_v19 }
 0x264   : > { %v20167_v11 = vrot.slane %v15709_v22, 5  ;;  %11255 = vmatmul.mubr.msk.bf16.gmra.mrb[204].mxu1 %vm472_vm8, %v20740_v47  ;;  %v3690_v8 = vmax.bf16 %v3614_v61, %v3037_v52  ;;  %v4419_v31 = vsel %vm1804_vm0, %v20741_v62, %v20166_v54  ;;  %v7225_v4 = vshrl.u32 %v15776_v35, 16  ;;  %v2652_v52 = vpop.f32.mrb[100].mxu0 }
 0x265   : > { %v4927_v63 = vrot.slane %v20738_v21, 4  ;;  %v6683_v57 = vmax.bf16 %v15709_v22, %v5959_v33  ;;  %v4930_v46 = vrot.slane %v20739_v12, 5  ;;  %v7229_v6 = vshll.u32 %v15854_v3, 16  ;;  %11258 = vmatprep.mubr.msk.bf16.mxu1 %vm12233_vm6, %v20406_v19 }
 0x266   : > { %v3933_v15 = vshrl.u32 %v15856_v30, 16  ;;  %v15889_v33 = vsel %vm2194_vm3, %v15759_v14, %v15866_v40  ;;  %v15896_v21 = vsel %vm3743_vm9, %v15509_v7, %v15806_v48  ;;  %v4495_v47 = vmax.bf16 %v4419_v31, %v3690_v8  ;;  %v20744_v14 = vld [vmem:[#allocation21_spill] sm:$0xff] }
 0x267   : > { %20742 = vst [vmem:[#allocation55_spill] sm:$0xff] %v15889_v33  ;;  %v7436_v61 = vmax.bf16 %v7224_v5, %v6683_v57  ;;  %v15891_v32 = vor.u32 %v4930_v46, %v4927_v63  ;;  %v20743_v62 = vrot.slane %v15612_v43, 5  ;;  %vm8608_vm15 = vcmp.ne.s16.totalorder %v20744_v14, 0  ;;  %v11146_v63 = vpop.f32.mrb[101].mxu0  ;;  %v2075_v57 = vpop.f32.mrb[100].mxu1 }
 0x268   : > { %v15905_v5 = vadd.f32 %v2652_v52, %v2067_v38  ;;  %v7227_v48 = vor.u32 %v7225_v4, %v7223_v42  ;;  %v2655_v12 = vpop.f32.mrb[102].mxu0  ;;  %v11040_v8 = vpop.f32.mrb[101].mxu1  ;;  %v20746_v31 = vshll.u32 %v15714_v41, 16  ;;  %v7231_v52 = vrot.slane %v7229_v6, 1 }
 0x269   : > { %v5882_v54 = vsel %vm5871_vm7, %v20743_v62, %v20167_v11  ;;  %v8087_v46 = vmax.bf16 %v8010_v28, %v7436_v61  ;;  %v4932_v7 = vsel %vm3063_vm12, %v15815_v20, %v15891_v32  ;;  %v20747_v62 = vshrl.u32 %v15792_v17, 16  ;;  %v11147_v28 = vpop.f32.mrb[103].mxu0  ;;  %v2078_v61 = vpop.f32.mrb[102].mxu1 }
 0x26a   : > { %20745 = vst [vmem:[#allocation47_spill] sm:$0xff] %v15905_v5  ;;  %v3922_v43 = vor.u32 %v20746_v31, %v15820_v53  ;;  %v5155_v38 = vmax.bf16 %v4932_v7, %v4495_v47  ;;  %v15917_v63 = vadd.f32 %v2655_v12, %v2070_v59  ;;  %v20168_v42 = vrot.slane %v15854_v3, 1  ;;  %v11041_v41 = vpop.f32.mrb[103].mxu1  ;;  %v20753_v7 = vld [vmem:[#allocation36_spill] sm:$0xff]  ;;  %v15945_v28 = vld [vmem:[#allocation3 + $0x50] sm:$0xff]  ;;  %11369 = vmatmul.mubr.msk.bf16.gmra.mrb[212].mxu0 %vm472_vm8, %v15479_v50 }
 0x26b   : > { %v15915_v11 = vrot.slane %v20747_v62, 7  ;;  %v8635_v20 = vsel %vm8607_vm1, %v8087_v46, 0  ;;  %v1751_v4 = vmax.bf16 %v20681_v0, %v15773_v29  ;;  %v20749_v62 = vld [vmem:[#allocation58_spill] sm:$0xff]  ;;  %v7232_v59 = vsel %vm2780_vm10, %v7227_v48, %v7231_v52  ;;  %v15935_v46 = vld [vmem:[#allocation3 + $0x40] sm:$0xff]  ;;  %11372 = vmatprep.mubr.msk.bf16.mxu0 %vm12233_vm6, %v20406_v19 }
 0x26c   : > { %20748 = vst [vmem:[#allocation6_spill] sm:$0xff] %v15917_v63  ;;  %v8703_v8 = vshrl.u32 %v8635_v20, 16  ;;  %v8706_v31 = vshll.u32 %v8635_v20, 16  ;;  %v5960_v33 = vmax.bf16 %v5882_v54, %v5155_v38  ;;  %v2840_v6 = vsel %vm2780_vm10, %v20750_v9, %v20749_v62  ;;  %11259 = vmatmul.mubr.msk.bf16.gmra.mrb[208].mxu1 %vm472_vm8, %v20753_v7 }
 0x26d   : > { %v3038_v26 = vmax.bf16 %v2840_v6, %v1751_v4  ;;  %v20751_v12 = vrot.slane %v20737_v55, 1  ;;  %v20752_v47 = vrot.slane %v20725_v18, 1  ;;  %v20169_v54 = vrot.slane %v15935_v46, 4  ;;  %11262 = vmatprep.mubr.msk.bf16.mxu1 %vm12233_vm6, %v20406_v19  ;;  %v15949_v18 = vld [vmem:[#allocation2 + $0xd0] sm:$0xff]  ;;  %v2660_v6 = vpop.f32.mrb[104].mxu0 }
 0x26e   : > { %v15942_v23 = vrot.slane %v3933_v15, 7  ;;  %v8705_v9 = vrot.slane %v8703_v8, 3  ;;  %v8708_v48 = vrot.slane %v8706_v31, 4  ;;  %v6684_v38 = vmax.bf16 %v15776_v35, %v5960_v33  ;;  %v20756_v8 = vld [vmem:[#allocation16_spill] sm:$0xff] }
 0x26f   : > { %v3616_v29 = vsel %vm3601_vm4, %v20752_v47, %v20751_v12  ;;  %v20754_v20 = vrot.slane %v15776_v35, 1  ;;  %v20755_v15 = vrot.slane %v15859_v34, 4  ;;  %v20757_v31 = vshrl.u32 %v20756_v8, 16 }
 0x270   : > { %v3691_v41 = vmax.bf16 %v3616_v29, %v3038_v26  ;;  %v15963_v12 = vor.u32 %v8708_v48, %v8705_v9  ;;  %v7437_v47 = vmax.bf16 %v7232_v59, %v6684_v38  ;;  %v20758_v7 = vshll.u32 %v20756_v8, 16  ;;  %v11150_v26 = vpop.f32.mrb[105].mxu0  ;;  %v2083_v29 = vpop.f32.mrb[104].mxu1 }
 0x271   : > { %v8012_v4 = vsel %vm3601_vm4, %v20754_v20, %v20168_v42  ;;  %v4421_v33 = vsel %vm1804_vm0, %v20755_v15, %v20169_v54  ;;  %v4936_v62 = vrot.slane %v20757_v31, 4  ;;  %v20170_v5 = vrot.slane %v15776_v35, 5  ;;  %v2663_v54 = vpop.f32.mrb[106].mxu0  ;;  %v11044_v31 = vpop.f32.mrb[105].mxu1 }
 0x272   : > { %v4939_v63 = vrot.slane %v20758_v7, 5  ;;  %v15968_v20 = vadd.f32 %v2660_v6, %v2075_v57  ;;  %v4496_v42 = vmax.bf16 %v4421_v33, %v3691_v41  ;;  %v7233_v24 = vshrl.u32 %v15854_v3, 16  ;;  %v11151_v6 = vpop.f32.mrb[107].mxu0  ;;  %v2086_v41 = vpop.f32.mrb[106].mxu1  ;;  %11373 = vmatmul.mubr.msk.bf16.gmra.mrb[216].mxu0 %vm472_vm8, %v15482_v44 }
 0x273   : > { %v7237_v15 = vshll.u32 %v15945_v28, 16  ;;  %v3941_v9 = vshrl.u32 %v15949_v18, 16  ;;  %v15976_v59 = vsel %vm2194_vm3, %v15866_v40, %v15963_v12  ;;  %v8088_v48 = vmax.bf16 %v8012_v4, %v7437_v47  ;;  %v20763_v40 = vld [vmem:[#allocation24_spill] sm:$0xff]  ;;  %v11045_v4 = vpop.f32.mrb[107].mxu1  ;;  %v20765_v47 = vld [vmem:[#allocation9_spill] sm:$0xff]  ;;  %11376 = vmatprep.mubr.msk.bf16.mxu0 %vm12233_vm6, %v20406_v19 }
 0x274   : > { %20759 = vst [vmem:[#allocation18_spill] sm:$0xff] %v15968_v20  ;;  %20760 = vst [vmem:[#allocation54_spill] sm:$0xff] %v15976_v59  ;;  %v15978_v38 = vor.u32 %v4939_v63, %v4936_v62  ;;  %v15980_v57 = vadd.f32 %v2663_v54, %v2078_v61  ;;  %v15984_v33 = vsel %vm3743_vm9, %v15740_v45, %v3922_v43  ;;  %v20762_v7 = vrot.slane %v15709_v22, 5  ;;  %v20767_v4 = vld [vmem:[#allocation68_spill] sm:$0xff] }
 0x275   : > { %v7235_v31 = vor.u32 %v7233_v24, %v7231_v52  ;;  %vm8609_vm14 = vcmp.ne.s16.totalorder %v20763_v40, 0  ;;  %v8636_v63 = vsel %vm8608_vm15, %v8088_v48, 0  ;;  %v7239_v54 = vrot.slane %v7237_v15, 1  ;;  %11263 = vmatmul.mubr.msk.bf16.gmra.mrb[212].mxu1 %vm472_vm8, %v20765_v47  ;;  %v16011_v15 = vld [vmem:[#allocation3 + $0x48] sm:$0xff] }
 0x276   : > { %20761 = vst [vmem:[#allocation25_spill] sm:$0xff] %v15980_v57  ;;  %v5884_v26 = vsel %vm5871_vm7, %v20762_v7, %v20170_v5  ;;  %v4941_v61 = vsel %vm3063_vm12, %v15891_v32, %v15978_v38  ;;  %v20171_v45 = vrot.slane %v15945_v28, 1  ;;  %v20764_v22 = vshll.u32 %v15792_v17, 16  ;;  %11266 = vmatprep.mubr.msk.bf16.mxu1 %vm12233_vm6, %v20406_v19  ;;  %v20766_v7 = vld [vmem:[#allocation57_spill] sm:$0xff]  ;;  %v2091_v5 = vpop.f32.mrb[108].mxu1 }
 0x277   : > { %v8712_v43 = vshrl.u32 %v8636_v63, 16  ;;  %v8715_v52 = vshll.u32 %v8636_v63, 16  ;;  %v5156_v62 = vmax.bf16 %v4941_v61, %v4496_v42  ;;  %v7240_v14 = vsel %vm2780_vm10, %v7235_v31, %v7239_v54  ;;  %v2668_v61 = vpop.f32.mrb[108].mxu0 }
 0x278   : > { %v3930_v24 = vor.u32 %v20764_v22, %v15915_v11  ;;  %v1752_v50 = vmax.bf16 %v20681_v0, %v15859_v34  ;;  %v20173_v17 = vrot.slane %v16011_v15, 4  ;;  %v2848_v63 = vsel %vm2780_vm10, %v20767_v4, %v20766_v7  ;;  %v11154_v4 = vpop.f32.mrb[109].mxu0 }
 0x279   : > { %v8714_v42 = vrot.slane %v8712_v43, 3  ;;  %v8717_v48 = vrot.slane %v8715_v52, 4  ;;  %v5961_v6 = vmax.bf16 %v5884_v26, %v5156_v62  ;;  %v20768_v31 = vrot.slane %v15854_v3, 1  ;;  %v16034_v62 = vld [vmem:[#allocation3 + $0x58] sm:$0xff] }
 0x27a   : > { %v3039_v22 = vmax.bf16 %v2848_v63, %v1752_v50  ;;  %v20769_v47 = vrot.slane %v20756_v8, 1  ;;  %v20770_v32 = vrot.slane %v20737_v55, 1  ;;  %v20771_v26 = vrot.slane %v15935_v46, 4  ;;  %v20773_v63 = vld [vmem:[#allocation20_spill] sm:$0xff]  ;;  %11377 = vmatmul.mubr.msk.bf16.gmra.mrb[220].mxu0 %vm472_vm8, %v15485_v10 }
 0x27b   : > { %v8014_v34 = vsel %vm3601_vm4, %v20768_v31, %v20171_v45  ;;  %v16036_v7 = vadd.f32 %v2668_v61, %v2083_v29  ;;  %v16038_v31 = vor.u32 %v8717_v48, %v8714_v42  ;;  %v6685_v50 = vmax.bf16 %v15854_v3, %v5961_v6  ;;  %v16049_v48 = vld [vmem:[#allocation2 + $0xd8] sm:$0xff]  ;;  %11380 = vmatprep.mubr.msk.bf16.mxu0 %vm12233_vm6, %v20406_v19 }
 0x27c   : > { %v3618_v43 = vsel %vm3601_vm4, %v20770_v32, %v20769_v47  ;;  %v4423_v52 = vsel %vm1804_vm0, %v20771_v26, %v20173_v17  ;;  %v20774_v55 = vshrl.u32 %v20773_v63, 16  ;;  %v2671_v32 = vpop.f32.mrb[110].mxu0  ;;  %v11048_v47 = vpop.f32.mrb[109].mxu1  ;;  %v20775_v57 = vshll.u32 %v20773_v63, 16 }
 0x27d   : > { %20772 = vst [vmem:[#allocation46_spill] sm:$0xff] %v16036_v7  ;;  %v3692_v59 = vmax.bf16 %v3618_v43, %v3039_v22  ;;  %v20172_v26 = vrot.slane %v15854_v3, 5  ;;  %v7241_v29 = vshrl.u32 %v15945_v28, 16  ;;  %v16047_v61 = vadd.f32 %v2671_v32, %v2086_v41  ;;  %v11155_v4 = vpop.f32.mrb[111].mxu0  ;;  %v2094_v42 = vpop.f32.mrb[110].mxu1 }
 0x27e   : > { %v4945_v45 = vrot.slane %v20774_v55, 4  ;;  %v4948_v20 = vrot.slane %v20775_v57, 5  ;;  %v16054_v6 = vsel %vm2194_vm3, %v15963_v12, %v16038_v31  ;;  %v7438_v55 = vmax.bf16 %v7240_v14, %v6685_v50  ;;  %v11049_v43 = vpop.f32.mrb[111].mxu1 }
 0x27f   : > { %20776 = vst [vmem:[#allocation37_spill] sm:$0xff] %v16047_v61  ;;  %20777 = vst [vmem:[#allocation21_spill] sm:$0xff] %v16054_v6  ;;  %v7245_v22 = vshll.u32 %v16034_v62, 16  ;;  %v20778_v57 = vshll.u32 %v15856_v30, 16  ;;  %v16062_v41 = vrot.slane %v3941_v9, 7  ;;  %v4497_v32 = vmax.bf16 %v4423_v52, %v3692_v59  ;;  %v20780_v9 = vld [vmem:[#allocation29_spill] sm:$0xff] }
 0x280   : > { %v16064_v4 = vor.u32 %v4948_v20, %v4945_v45  ;;  %v16070_v12 = vsel %vm3743_vm9, %v15820_v53, %v3930_v24  ;;  %v8089_v14 = vmax.bf16 %v8014_v34, %v7438_v55  ;;  %v20779_v50 = vrot.slane %v15776_v35, 5  ;;  %v20781_v59 = vld [vmem:[#allocation8_spill] sm:$0xff]  ;;  %v20782_v20 = vld [vmem:[#allocation61_spill] sm:$0xff]  ;;  %v20783_v45 = vld [vmem:[#allocation70_spill] sm:$0xff]  ;;  %v2676_v55 = vpop.f32.mrb[112].mxu0 }
 0x281   : > { %v16060_v47 = vor.u32 %v20778_v57, %v15942_v23  ;;  %v7243_v43 = vor.u32 %v7241_v29, %v7239_v54  ;;  %vm8610_vm13 = vcmp.ne.s16.totalorder %v20780_v9, 0  ;;  %11267 = vmatmul.mubr.msk.bf16.gmra.mrb[216].mxu1 %vm472_vm8, %v20781_v59  ;;  %v1753_v35 = vmax.bf16 %v20681_v0, %v15935_v46  ;;  %v11158_v44 = vpop.f32.mrb[113].mxu0 }
 0x282   : > { %v5886_v30 = vsel %vm5871_vm7, %v20779_v50, %v20172_v26  ;;  %v4950_v53 = vsel %vm3063_vm12, %v15978_v38, %v16064_v4  ;;  %v2856_v54 = vsel %vm2780_vm10, %v20783_v45, %v20782_v20  ;;  %11270 = vmatprep.mubr.msk.bf16.mxu1 %vm12233_vm6, %v20406_v19  ;;  %v8637_v34 = vsel %vm8609_vm14, %v8089_v14, 0  ;;  %v2099_v20 = vpop.f32.mrb[112].mxu1  ;;  %v16104_v14 = vld [vmem:[#allocation3 + $0x50] sm:$0xff]  ;;  %v16108_v44 = vld [vmem:[#allocation3 + $0x60] sm:$0xff]  ;;  %11381 = vmatmul.mubr.msk.bf16.gmra.mrb[224].mxu0 %vm472_vm8, %v15488_v51 }
 0x283   : > { %v5157_v52 = vmax.bf16 %v4950_v53, %v4497_v32  ;;  %v7247_v29 = vrot.slane %v7245_v22, 1  ;;  %v8721_v57 = vshrl.u32 %v8637_v34, 16  ;;  %v8724_v38 = vshll.u32 %v8637_v34, 16  ;;  %v2679_v32 = vpop.f32.mrb[114].mxu0  ;;  %v11052_v53 = vpop.f32.mrb[113].mxu1  ;;  %11384 = vmatprep.mubr.msk.bf16.mxu0 %vm12233_vm6, %v20406_v19 }
 0x284   : > { %v8015_v50 = vrot.slane %v16034_v62, 1  ;;  %v3040_v46 = vmax.bf16 %v2856_v54, %v1753_v35  ;;  %v16097_v59 = vadd.f32 %v2676_v55, %v2091_v5  ;;  %v20785_v26 = vrot.slane %v20773_v63, 1  ;;  %v11159_v54 = vpop.f32.mrb[115].mxu0 }
 0x285   : > { %v5962_v45 = vmax.bf16 %v5886_v30, %v5157_v52  ;;  %v20786_v24 = vrot.slane %v20756_v8, 1  ;;  %v20174_v22 = vrot.slane %v16104_v14, 4  ;;  %v8723_v34 = vrot.slane %v8721_v57, 3  ;;  %v2102_v52 = vpop.f32.mrb[114].mxu1  ;;  %v16112_v8 = vld [vmem:[#allocation2 + $0xd8] sm:$0x1f] }
 0x286   : > { %20784 = vst [vmem:[#allocation58_spill] sm:$0xff] %v16097_v59  ;;  %v8726_v17 = vrot.slane %v8724_v38, 4  ;;  %v7248_v5 = vsel %vm2780_vm10, %v7243_v43, %v7247_v29  ;;  %v16110_v30 = vadd.f32 %v2679_v32, %v2094_v42  ;;  %v20789_v57 = vld [vmem:[#allocation19_spill] sm:$0xff]  ;;  %v20791_v42 = vrot.slane %v15945_v28, 1 }
 0x287   : > { %v3620_v40 = vsel %vm3601_vm4, %v20786_v24, %v20785_v26  ;;  %v6686_v26 = vmax.bf16 %v15945_v28, %v5962_v45  ;;  %v20788_v24 = vrot.slane %v16011_v15, 4  ;;  %v20790_v38 = vshrl.u32 %v20789_v57, 16 }
 0x288   : > { %v3693_v35 = vmax.bf16 %v3620_v40, %v3040_v46  ;;  %20787 = vst [vmem:[#allocation67_spill] sm:$0xff] %v16110_v30  ;;  %v11053_v46 = vpop.f32.mrb[115].mxu1  ;;  %v16122_v40 = vor.u32 %v8726_v17, %v8723_v34  ;;  %v8016_v32 = vsel %vm3601_vm4, %v20791_v42, %v8015_v50  ;;  %v20792_v53 = vshll.u32 %v20789_v57, 16  ;;  %v20793_v17 = vld [vmem:[#allocation40_spill] sm:$0xff]  ;;  %v20796_v42 = vld [vmem:[#allocation30_spill] sm:$0xff] }
 0x289   : > { %v4425_v55 = vsel %vm1804_vm0, %v20788_v24, %v20174_v22  ;;  %v4954_v43 = vrot.slane %v20790_v38, 4  ;;  %v20175_v45 = vrot.slane %v15945_v28, 5  ;;  %v7439_v6 = vmax.bf16 %v7248_v5, %v6686_v26  ;;  %11271 = vmatmul.mubr.msk.bf16.gmra.mrb[220].mxu1 %vm472_vm8, %v20793_v17  ;;  %v20798_v26 = vld [vmem:[#allocation71_spill] sm:$0xff]  ;;  %v2107_v5 = vpop.f32.mrb[116].mxu1 }
 0x28a   : > { %v4957_v54 = vrot.slane %v20792_v53, 5  ;;  %v4498_v24 = vmax.bf16 %v4425_v55, %v3693_v35  ;;  %v7249_v22 = vshrl.u32 %v16034_v62, 16  ;;  %v7253_v38 = vshll.u32 %v16108_v44, 16  ;;  %11274 = vmatprep.mubr.msk.bf16.mxu1 %vm12233_vm6, %v20406_v19  ;;  %v2684_v53 = vpop.f32.mrb[116].mxu0  ;;  %v11056_v59 = vpop.f32.mrb[117].mxu1 }
 0x28b   : > { %v3177_v34 = vshrl.u32 %v16112_v8, 16  ;;  %v16142_v46 = vsel %vm2194_vm3, %v16038_v31, %v16122_v40  ;;  %v16152_v35 = vsel %vm3743_vm9, %v15915_v11, %v16060_v47  ;;  %v8090_v55 = vmax.bf16 %v8016_v32, %v7439_v6  ;;  %v20797_v47 = vld [vmem:[#allocation28_spill] sm:$0xff] }
 0x28c   : > { %20794 = vst [vmem:[#allocation36_spill] sm:$0xff] %v16142_v46  ;;  %v16144_v10 = vor.u32 %v4957_v54, %v4954_v43  ;;  %v20795_v31 = vrot.slane %v15854_v3, 5  ;;  %vm8611_vm11 = vcmp.ne.s16.totalorder %v20796_v42, 0  ;;  %v7251_v17 = vor.u32 %v7249_v22, %v7247_v29  ;;  %v11162_v3 = vpop.f32.mrb[117].mxu0 }
 0x28d   : > { %v1754_v11 = vmax.bf16 %v20681_v0, %v16011_v15  ;;  %v2864_v6 = vsel %vm2780_vm10, %v20798_v26, %v20797_v47  ;;  %v16169_v32 = vadd.f32 %v2684_v53, %v2099_v20  ;;  %v7255_v46 = vrot.slane %v7253_v38, 1  ;;  %v2687_v30 = vpop.f32.mrb[118].mxu0  ;;  %v2110_v26 = vpop.f32.mrb[118].mxu1  ;;  %v16183_v38 = vld [vmem:[#allocation3 + $0x58] sm:$0xff] }
 0x28e   : > { %v5888_v43 = vsel %vm5871_vm7, %v20795_v31, %v20175_v45  ;;  %v4959_v54 = vsel %vm3063_vm12, %v16064_v4, %v16144_v10  ;;  %v8638_v31 = vsel %vm8610_vm13, %v8090_v55, 0  ;;  %v20800_v22 = vrot.slane %v16108_v44, 1  ;;  %v11163_v20 = vpop.f32.mrb[119].mxu0  ;;  %v11057_v55 = vpop.f32.mrb[119].mxu1 }
 0x28f   : > { %20799 = vst [vmem:[#allocation16_spill] sm:$0xff] %v16169_v32  ;;  %v5158_v45 = vmax.bf16 %v4959_v54, %v4498_v24  ;;  %v8730_v4 = vshrl.u32 %v8638_v31, 16  ;;  %v8733_v29 = vshll.u32 %v8638_v31, 16  ;;  %v3041_v61 = vmax.bf16 %v2864_v6, %v1754_v11  ;;  %v20805_v11 = vld [vmem:[#allocation26_spill] sm:$0xff] }
 0x290   : > { %v8018_v15 = vsel %vm3601_vm4, %v8015_v50, %v20800_v22  ;;  %v16176_v7 = vadd.f32 %v2687_v30, %v2102_v52  ;;  %v20802_v47 = vrot.slane %v20789_v57, 1  ;;  %v20803_v9 = vrot.slane %v20773_v63, 1  ;;  %v16187_v52 = vld [vmem:[#allocation3 + $0x68] sm:$0xff] }
 0x291   : > { %v5963_v53 = vmax.bf16 %v5888_v43, %v5158_v45  ;;  %v20177_v59 = vrot.slane %v16183_v38, 4  ;;  %v8732_v54 = vrot.slane %v8730_v4, 3  ;;  %v8735_v3 = vrot.slane %v8733_v29, 4 }
 0x292   : > { %20801 = vst [vmem:[#allocation24_spill] sm:$0xff] %v16176_v7  ;;  %v3622_v24 = vsel %vm3601_vm4, %v20803_v9, %v20802_v47  ;;  %v7256_v50 = vsel %vm2780_vm10, %v7251_v17, %v7255_v46  ;;  %v20804_v63 = vrot.slane %v16104_v14, 4  ;;  %v20806_v6 = vshrl.u32 %v20805_v11, 16 }
 0x293   : > { %v3694_v30 = vmax.bf16 %v3622_v24, %v3041_v61  ;;  %v6687_v45 = vmax.bf16 %v16034_v62, %v5963_v53  ;;  %v20807_v4 = vshll.u32 %v20805_v11, 16  ;;  %v20808_v61 = vld [vmem:[#allocation39_spill] sm:$0xff]  ;;  %v16205_v51 = vor.u32 %v8735_v3, %v8732_v54  ;;  %v2692_v54 = vpop.f32.mrb[120].mxu0 }
 0x294   : > { %v4427_v43 = vsel %vm1804_vm0, %v20804_v63, %v20177_v59  ;;  %v4963_v31 = vrot.slane %v20806_v6, 4  ;;  %11275 = vmatmul.mubr.msk.bf16.gmra.mrb[224].mxu1 %vm472_vm8, %v20808_v61  ;;  %v20176_v22 = vrot.slane %v16034_v62, 5  ;;  %v7257_v20 = vshrl.u32 %v16108_v44, 16  ;;  %v20812_v6 = vld [vmem:[#allocation31_spill] sm:$0xff] }
 0x295   : > { %v4966_v17 = vrot.slane %v20807_v4, 5  ;;  %v4499_v29 = vmax.bf16 %v4427_v43, %v3694_v30  ;;  %11278 = vmatprep.mubr.msk.bf16.mxu1 %vm12233_vm6, %v20406_v19  ;;  %v20809_v53 = vshll.u32 %v15949_v18, 16  ;;  %v7440_v9 = vmax.bf16 %v7256_v50, %v6687_v45  ;;  %v11166_v45 = vpop.f32.mrb[121].mxu0 }
 0x296   : > { %v7261_v55 = vshll.u32 %v16187_v52, 16  ;;  %v20810_v3 = vshrl.u32 %v16049_v48, 16  ;;  %v16223_v63 = vrot.slane %v3177_v34, 4  ;;  %v16228_v43 = vsel %vm2194_vm3, %v16122_v40, %v16205_v51  ;;  %v2695_v40 = vpop.f32.mrb[122].mxu0 }
 0x297   : > { %v16214_v47 = vor.u32 %v20809_v53, %v16062_v41  ;;  %v16216_v24 = vor.u32 %v4966_v17, %v4963_v31  ;;  %20811 = vst [vmem:[#allocation9_spill] sm:$0xff] %v16228_v43  ;;  %v7259_v18 = vor.u32 %v7257_v20, %v7255_v46  ;;  %vm8612_vm2 = vcmp.ne.s16.totalorder %v20812_v6, 0  ;;  %v2115_v31 = vpop.f32.mrb[120].mxu1 }
 0x298   : > { %v16221_v30 = vrot.slane %v20810_v3, 7  ;;  %v16231_v50 = vadd.f32 %v2692_v54, %v2107_v5  ;;  %v8091_v4 = vmax.bf16 %v8018_v15, %v7440_v9  ;;  %v20814_v34 = vrot.slane %v15945_v28, 5  ;;  %v11060_v53 = vpop.f32.mrb[121].mxu1  ;;  %v11167_v9 = vpop.f32.mrb[123].mxu0 }
 0x299   : > { %v4968_v17 = vsel %vm3063_vm12, %v16144_v10, %v16216_v24  ;;  %v7263_v20 = vrot.slane %v7261_v55, 1  ;;  %v20178_v5 = vrot.slane %v16187_v52, 1  ;;  %v1755_v54 = vmax.bf16 %v20681_v0, %v16104_v14  ;;  %v2118_v3 = vpop.f32.mrb[122].mxu1  ;;  %v20818_v53 = vld [vmem:[#allocation72_spill] sm:$0xff] }
 0x29a   : > { %20813 = vst [vmem:[#allocation57_spill] sm:$0xff] %v16231_v50  ;;  %v5890_v61 = vsel %vm5871_vm7, %v20814_v34, %v20176_v22  ;;  %v5159_v46 = vmax.bf16 %v4968_v17, %v4499_v29  ;;  %v16244_v15 = vadd.f32 %v2695_v40, %v2110_v26  ;;  %v20816_v10 = vshll.u32 %v16112_v8, 16  ;;  %v20817_v34 = vld [vmem:[#allocation73_spill] sm:$0xff]  ;;  %v11061_v55 = vpop.f32.mrb[123].mxu1  ;;  %v20819_v26 = vld [vmem:[#allocation134_spill] sm:$0xff] }
 0x29b   : > { %v8639_v28 = vsel %vm8611_vm11, %v8091_v4, 0  ;;  %v2872_v29 = vsel %vm2780_vm10, %v20818_v53, %v20817_v34  ;;  %v7264_v14 = vsel %vm2780_vm10, %v7259_v18, %v7263_v20  ;;  %11385 = vmatmul.mubr.msk.bf16.gmra.mrb[228].mxu0 %vm472_vm8, %v20819_v26  ;;  %v20820_v8 = vrot.slane %v20805_v11, 1  ;;  %v16263_v4 = vld [vmem:[#allocation3 + $0x60] sm:$0xff]  ;;  %v20822_v34 = vld [vmem:[#allocation62_spill] sm:$0xff]  ;;  %v20824_v18 = vld [vmem:[#allocation64_spill] sm:$0xff]  ;;  %v2123_v50 = vpop.f32.mrb[124].mxu1 }
 0x29c   : > { %20815 = vst [vmem:[#allocation68_spill] sm:$0xff] %v16244_v15  ;;  %v16248_v45 = vrot.slane %v20816_v10, 5  ;;  %v8739_v17 = vshrl.u32 %v8639_v28, 16  ;;  %v8742_v22 = vshll.u32 %v8639_v28, 16  ;;  %v5964_v59 = vmax.bf16 %v5890_v61, %v5159_v46  ;;  %v16268_v61 = vld [vmem:[#allocation3 + $0x70] sm:$0xff]  ;;  %11279 = vmatmul.mubr.msk.bf16.gmra.mrb[228].mxu1 %vm472_vm8, %v20824_v18  ;;  %11388 = vmatprep.mubr.msk.bf16.mxu0 %vm12233_vm6, %v20406_v19  ;;  %v16274_v46 = vld [vmem:[#allocation2 + $0xe0] sm:$0xff] }
 0x29d   : > { %v3042_v40 = vmax.bf16 %v2872_v29, %v1755_v54  ;;  %v20821_v9 = vrot.slane %v20789_v57, 1  ;;  %v20179_v10 = vrot.slane %v16263_v4, 4  ;;  %v20823_v53 = vshrl.u32 %v20822_v34, 16  ;;  %11282 = vmatprep.mubr.msk.bf16.mxu1 %vm12233_vm6, %v20406_v19  ;;  %v2700_v18 = vpop.f32.mrb[124].mxu0  ;;  %v11064_v32 = vpop.f32.mrb[125].mxu1 }
 0x29e   : > { %v8741_v57 = vrot.slane %v8739_v17, 3  ;;  %v8744_v54 = vrot.slane %v8742_v22, 4  ;;  %v6688_v29 = vmax.bf16 %v16108_v44, %v5964_v59  ;;  %v20825_v55 = vrot.slane %v16108_v44, 1  ;;  %v2126_v32 = vpop.f32.mrb[126].mxu1 }
 0x29f   : > { %v3624_v42 = vsel %vm3601_vm4, %v20821_v9, %v20820_v8  ;;  %v4972_v28 = vrot.slane %v20823_v53, 4  ;;  %v20826_v9 = vrot.slane %v16183_v38, 4  ;;  %v20827_v22 = vshll.u32 %v20822_v34, 16 }
 0x2a0   : > { %v8020_v26 = vsel %vm3601_vm4, %v20825_v55, %v20178_v5  ;;  %v3695_v8 = vmax.bf16 %v3624_v42, %v3042_v40  ;;  %v20180_v59 = vrot.slane %v16108_v44, 5  ;;  %v16292_v43 = vor.u32 %v8744_v54, %v8741_v57  ;;  %v11170_v42 = vpop.f32.mrb[125].mxu0 }
 0x2a1   : > { %v4429_v53 = vsel %vm1804_vm0, %v20826_v9, %v20179_v10  ;;  %v4975_v17 = vrot.slane %v20827_v22, 5  ;;  %v7441_v15 = vmax.bf16 %v7264_v14, %v6688_v29  ;;  %v7265_v55 = vshrl.u32 %v16187_v52, 16  ;;  %v2703_v22 = vpop.f32.mrb[126].mxu0  ;;  %v16306_v14 = vld [vmem:[#allocation2 + $0x10] sm:$0xff] }
 0x2a2   : > { %v7269_v5 = vshll.u32 %v16268_v61, 16  ;;  %v16296_v40 = vadd.f32 %v2700_v18, %v2115_v31  ;;  %v4500_v9 = vmax.bf16 %v4429_v53, %v3695_v8  ;;  %v16304_v57 = vsel %vm3743_vm9, %v15942_v23, %v16214_v47  ;;  %v20830_v18 = vld [vmem:[#allocation32_spill] sm:$0xff]  ;;  %v11171_v8 = vpop.f32.mrb[127].mxu0 }
 0x2a3   : > { %v16299_v10 = vor.u32 %v4975_v17, %v4972_v28  ;;  %v16311_v31 = vsel %vm2194_vm3, %v16205_v51, %v16292_v43  ;;  %v8092_v54 = vmax.bf16 %v8020_v26, %v7441_v15  ;;  %v7267_v29 = vor.u32 %v7265_v55, %v7263_v20  ;;  %v11065_v15 = vpop.f32.mrb[127].mxu1  ;;  %v20833_v55 = vld [vmem:[#allocation135_spill] sm:$0xff]  ;;  %v2708_v42 = vpop.f32.mrb[128].mxu0 }
 0x2a4   : > { %20828 = vst [vmem:[#allocation20_spill] sm:$0xff] %v16296_v40  ;;  %20829 = vst [vmem:[#allocation29_spill] sm:$0xff] %v16311_v31  ;;  %vm8613_vm1 = vcmp.ne.s16.totalorder %v20830_v18, 0  ;;  %v16314_v28 = vadd.f32 %v2703_v22, %v2118_v3  ;;  %v20832_v47 = vrot.slane %v16034_v62, 5  ;;  %v7271_v26 = vrot.slane %v7269_v5, 1  ;;  %11389 = vmatmul.mubr.msk.bf16.gmra.mrb[232].mxu0 %vm472_vm8, %v20833_v55  ;;  %v20834_v8 = vld [vmem:[#allocation11_spill] sm:$0xff] }
 0x2a5   : > { %v4977_v23 = vsel %vm3063_vm12, %v16216_v24, %v16299_v10  ;;  %v8640_v20 = vsel %vm8612_vm2, %v8092_v54, 0  ;;  %v20181_v17 = vrot.slane %v16268_v61, 1  ;;  %v1756_v62 = vmax.bf16 %v20681_v0, %v16183_v38  ;;  %11283 = vmatmul.mubr.msk.bf16.gmra.mrb[232].mxu1 %vm472_vm8, %v20834_v8  ;;  %11392 = vmatprep.mubr.msk.bf16.mxu0 %vm12233_vm6, %v20406_v19  ;;  %v20836_v54 = vld [vmem:[#allocation79_spill] sm:$0xff]  ;;  %v2131_v7 = vpop.f32.mrb[128].mxu1 }
 0x2a6   : > { %20831 = vst [vmem:[#allocation8_spill] sm:$0xff] %v16314_v28  ;;  %v5892_v51 = vsel %vm5871_vm7, %v20832_v47, %v20180_v59  ;;  %v5160_v3 = vmax.bf16 %v4977_v23, %v4500_v9  ;;  %v8748_v24 = vshrl.u32 %v8640_v20, 16  ;;  %v8751_v22 = vshll.u32 %v8640_v20, 16  ;;  %v20835_v9 = vld [vmem:[#allocation75_spill] sm:$0xff]  ;;  %v16341_v47 = vld [vmem:[#allocation3 + $0x68] sm:$0xff]  ;;  %11286 = vmatprep.mubr.msk.bf16.mxu1 %vm12233_vm6, %v20406_v19 }
 0x2a7   : > { %v7272_v5 = vsel %vm2780_vm10, %v7267_v29, %v7271_v26  ;;  %v2880_v23 = vsel %vm2780_vm10, %v20836_v54, %v20835_v9  ;;  %v20182_v15 = vrot.slane %v16341_v47, 4  ;;  %v20837_v8 = vrot.slane %v20822_v34, 1 }
 0x2a8   : > { %v5965_v6 = vmax.bf16 %v5892_v51, %v5160_v3  ;;  %v8750_v38 = vrot.slane %v8748_v24, 3  ;;  %v8753_v20 = vrot.slane %v8751_v22, 4  ;;  %v3043_v55 = vmax.bf16 %v2880_v23, %v1756_v62  ;;  %v16351_v3 = vld [vmem:[#allocation3 + $0x78] sm:$0xff] }
 0x2a9   : > { %v20838_v51 = vrot.slane %v20805_v11, 1  ;;  %v20839_v54 = vrot.slane %v16187_v52, 1  ;;  %v20840_v24 = vrot.slane %v16263_v4, 4  ;;  %v20841_v11 = vld [vmem:[#allocation27_spill] sm:$0xff]  ;;  %v20184_v25 = vrot.slane %v16187_v52, 5 }
 0x2aa   : > { %v6689_v9 = vmax.bf16 %v16187_v52, %v5965_v6  ;;  %v20842_v62 = vshrl.u32 %v20841_v11, 16  ;;  %v16368_v6 = vor.u32 %v8753_v20, %v8750_v38  ;;  %v20844_v31 = vshll.u32 %v20841_v11, 16 }
 0x2ab   : > { %v3626_v29 = vsel %vm3601_vm4, %v20838_v51, %v20837_v8  ;;  %v8022_v53 = vsel %vm3601_vm4, %v20839_v54, %v20181_v17  ;;  %v4431_v22 = vsel %vm1804_vm0, %v20840_v24, %v20182_v15  ;;  %v16366_v8 = vadd.f32 %v2708_v42, %v2123_v50  ;;  %v11174_v51 = vpop.f32.mrb[129].mxu0  ;;  %v11068_v17 = vpop.f32.mrb[129].mxu1 }
 0x2ac   : > { %v4981_v23 = vrot.slane %v20842_v62, 4  ;;  %v3696_v59 = vmax.bf16 %v3626_v29, %v3043_v55  ;;  %v4984_v28 = vrot.slane %v20844_v31, 5  ;;  %v2711_v54 = vpop.f32.mrb[130].mxu0  ;;  %v7442_v40 = vmax.bf16 %v7272_v5, %v6689_v9  ;;  %v2134_v42 = vpop.f32.mrb[130].mxu1  ;;  %v20848_v51 = vld [vmem:[#allocation33_spill] sm:$0xff]  ;;  %11393 = vmatmul.mubr.msk.bf16.gmra.mrb[236].mxu0 %vm472_vm8, %v15661_v36 }
 0x2ad   : > { %20843 = vst [vmem:[#allocation61_spill] sm:$0xff] %v16366_v8  ;;  %v7273_v24 = vshrl.u32 %v16268_v61, 16  ;;  %v7277_v15 = vshll.u32 %v16351_v3, 16  ;;  %v16375_v62 = vadd.f32 %v2711_v54, %v2126_v32  ;;  %v11175_v50 = vpop.f32.mrb[131].mxu0  ;;  %v16380_v38 = vsel %vm2194_vm3, %v16292_v43, %v16368_v6  ;;  %v11069_v17 = vpop.f32.mrb[131].mxu1  ;;  %11396 = vmatprep.mubr.msk.bf16.mxu0 %vm12233_vm6, %v20406_v19 }
 0x2ae   : > { %20846 = vst [vmem:[#allocation19_spill] sm:$0xff] %v16380_v38  ;;  %v4501_v20 = vmax.bf16 %v4431_v22, %v3696_v59  ;;  %v16382_v31 = vor.u32 %v4984_v28, %v4981_v23  ;;  %v20847_v5 = vshll.u32 %v16049_v48, 16  ;;  %v5211_v29 = vshll.u32 %v16306_v14, 16  ;;  %v2716_v50 = vpop.f32.mrb[132].mxu0 }
 0x2af   : > { %20845 = vst [vmem:[#allocation70_spill] sm:$0xff] %v16375_v62  ;;  %v8093_v32 = vmax.bf16 %v8022_v53, %v7442_v40  ;;  %v7275_v9 = vor.u32 %v7273_v24, %v7271_v26  ;;  %vm8614_vm15 = vcmp.ne.s16.totalorder %v20848_v51, 0  ;;  %v20849_v59 = vrot.slane %v16108_v44, 5  ;;  %v20850_v40 = vld [vmem:[#allocation10_spill] sm:$0xff] }
 0x2b0   : > { %v16387_v55 = vor.u32 %v20847_v5, %v16221_v30  ;;  %v4986_v43 = vsel %vm3063_vm12, %v16299_v10, %v16382_v31  ;;  %v7279_v28 = vrot.slane %v7277_v15, 1  ;;  %v20183_v22 = vrot.slane %v16351_v3, 1  ;;  %11287 = vmatmul.mubr.msk.bf16.gmra.mrb[236].mxu1 %vm472_vm8, %v20850_v40  ;;  %v20854_v5 = vld [vmem:[#allocation80_spill] sm:$0xff] }
 0x2b1   : > { %v5894_v48 = vsel %vm5871_vm7, %v20849_v59, %v20184_v25  ;;  %v8641_v10 = vsel %vm8613_vm1, %v8093_v32, 0  ;;  %v5161_v53 = vmax.bf16 %v4986_v43, %v4501_v20  ;;  %v1757_v44 = vmax.bf16 %v20681_v0, %v16263_v4  ;;  %11290 = vmatprep.mubr.msk.bf16.mxu1 %vm12233_vm6, %v20406_v19  ;;  %v20853_v4 = vld [vmem:[#allocation76_spill] sm:$0xff]  ;;  %v16427_v43 = vld [vmem:[#allocation3 + $0x70] sm:$0xff] }
 0x2b2   : > { %v20851_v26 = vshrl.u32 %v16274_v46, 16  ;;  %v8757_v23 = vshrl.u32 %v8641_v10, 16  ;;  %v8760_v54 = vshll.u32 %v8641_v10, 16  ;;  %v7280_v24 = vsel %vm2780_vm10, %v7275_v9, %v7279_v28  ;;  %v11178_v10 = vpop.f32.mrb[133].mxu0  ;;  %v2139_v9 = vpop.f32.mrb[132].mxu1 }
 0x2b3   : > { %v5966_v17 = vmax.bf16 %v5894_v48, %v5161_v53  ;;  %v20852_v18 = vrot.slane %v16268_v61, 1  ;;  %v2888_v32 = vsel %vm2780_vm10, %v20854_v5, %v20853_v4  ;;  %v16430_v40 = vadd.f32 %v2716_v50, %v2131_v7  ;;  %v2719_v25 = vpop.f32.mrb[134].mxu0  ;;  %v11072_v4 = vpop.f32.mrb[133].mxu1  ;;  %v16439_v5 = vld [vmem:[#allocation2 + $0x18] sm:$0xff] }
 0x2b4   : > { %v16416_v15 = vrot.slane %v20851_v26, 7  ;;  %v8759_v26 = vrot.slane %v8757_v23, 3  ;;  %v8762_v48 = vrot.slane %v8760_v54, 4  ;;  %v20856_v53 = vrot.slane %v20841_v11, 1  ;;  %v20860_v10 = vld [vmem:[#allocation69_spill] sm:$0xff]  ;;  %11397 = vmatmul.mubr.msk.bf16.gmra.mrb[240].mxu0 %vm472_vm8, %v15752_v56 }
 0x2b5   : > { %v8024_v20 = vsel %vm3601_vm4, %v20852_v18, %v20183_v22  ;;  %20855 = vst [vmem:[#allocation40_spill] sm:$0xff] %v16430_v40  ;;  %v20857_v36 = vrot.slane %v20822_v34, 1  ;;  %v16437_v22 = vld [vmem:[#allocation3 + $0x80] sm:$0xff]  ;;  %v6690_v59 = vmax.bf16 %v16268_v61, %v5966_v17  ;;  %v3044_v7 = vmax.bf16 %v2888_v32, %v1757_v44  ;;  %v16456_v32 = vld [vmem:[#allocation2 + $0x20] sm:$0xff]  ;;  %11400 = vmatprep.mubr.msk.bf16.mxu0 %vm12233_vm6, %v20406_v19 }
 0x2b6   : > { %v20858_v50 = vrot.slane %v16427_v43, 4  ;;  %v20859_v23 = vrot.slane %v16341_v47, 4  ;;  %v20861_v38 = vshrl.u32 %v20860_v10, 16  ;;  %v16449_v40 = vadd.f32 %v2719_v25, %v2134_v42 }
 0x2b7   : > { %v3628_v18 = vsel %vm3601_vm4, %v20857_v36, %v20856_v53  ;;  %v11179_v36 = vpop.f32.mrb[135].mxu0  ;;  %v2142_v53 = vpop.f32.mrb[134].mxu1  ;;  %v16451_v62 = vor.u32 %v8762_v48, %v8759_v26  ;;  %v20862_v4 = vshll.u32 %v20860_v10, 16  ;;  %v20185_v44 = vrot.slane %v16268_v61, 5 }
 0x2b8   : > { %v4433_v54 = vsel %vm1804_vm0, %v20859_v23, %v20858_v50  ;;  %v4990_v34 = vrot.slane %v20861_v38, 4  ;;  %v11073_v17 = vpop.f32.mrb[135].mxu1  ;;  %v7443_v2 = vmax.bf16 %v7280_v24, %v6690_v59  ;;  %v3697_v1 = vmax.bf16 %v3628_v18, %v3044_v7  ;;  %v20864_v24 = vld [vmem:[#allocation45_spill] sm:$0xff]  ;;  %v20865_v23 = vld [vmem:[#allocation34_spill] sm:$0xff] }
 0x2b9   : > { %v4993_v8 = vrot.slane %v20862_v4, 5  ;;  %v7281_v50 = vshrl.u32 %v16351_v3, 16  ;;  %v7285_v38 = vshll.u32 %v16437_v22, 16  ;;  %v16466_v42 = vsel %vm2194_vm3, %v16368_v6, %v16451_v62  ;;  %11291 = vmatmul.mubr.msk.bf16.gmra.mrb[240].mxu1 %vm472_vm8, %v20864_v24 }
 0x2ba   : > { %20863 = vst [vmem:[#allocation30_spill] sm:$0xff] %v16466_v42  ;;  %v20187_v48 = vrot.slane %v16437_v22, 1  ;;  %v16475_v59 = vrot.slane %v5211_v29, 1  ;;  %v8094_v56 = vmax.bf16 %v8024_v20, %v7443_v2  ;;  %v4502_v18 = vmax.bf16 %v4433_v54, %v3697_v1  ;;  %11294 = vmatprep.mubr.msk.bf16.mxu1 %vm12233_vm6, %v20406_v19  ;;  %v2724_v2 = vpop.f32.mrb[136].mxu0 }
 0x2bb   : > { %v16468_v26 = vor.u32 %v4993_v8, %v4990_v34  ;;  %v7283_v7 = vor.u32 %v7281_v50, %v7279_v28  ;;  %vm8615_vm14 = vcmp.ne.s16.totalorder %v20865_v23, 0  ;;  %v20866_v29 = vrot.slane %v16187_v52, 5  ;;  %v11182_v17 = vpop.f32.mrb[137].mxu0  ;;  %v2147_v50 = vpop.f32.mrb[136].mxu1 }
 0x2bc   : > { %v8642_v28 = vsel %vm8614_vm15, %v8094_v56, 0  ;;  %v7287_v54 = vrot.slane %v7285_v38, 1  ;;  %v1758_v36 = vmax.bf16 %v20681_v0, %v16341_v47  ;;  %v16494_v4 = vadd.f32 %v2724_v2, %v2139_v9  ;;  %v2727_v8 = vpop.f32.mrb[138].mxu0  ;;  %v11076_v51 = vpop.f32.mrb[137].mxu1  ;;  %v16505_v9 = vld [vmem:[#allocation3 + $0x78] sm:$0xff]  ;;  %11401 = vmatmul.mubr.msk.bf16.gmra.mrb[244].mxu0 %vm472_vm8, %v15896_v21 }
 0x2bd   : > { %v4995_v34 = vsel %vm3063_vm12, %v16382_v31, %v16468_v26  ;;  %v5896_v1 = vsel %vm5871_vm7, %v20866_v29, %v20185_v44  ;;  %v8766_v31 = vshrl.u32 %v8642_v28, 16  ;;  %v8769_v24 = vshll.u32 %v8642_v28, 16  ;;  %v11183_v17 = vpop.f32.mrb[139].mxu0  ;;  %v2150_v6 = vpop.f32.mrb[138].mxu1  ;;  %11404 = vmatprep.mubr.msk.bf16.mxu0 %vm12233_vm6, %v20406_v19 }
 0x2be   : > { %v5162_v20 = vmax.bf16 %v4995_v34, %v4502_v18  ;;  %v20867_v52 = vrot.slane %v16351_v3, 1  ;;  %v7288_v38 = vsel %vm2780_vm10, %v7283_v7, %v7287_v54  ;;  %v20868_v18 = vld [vmem:[#allocation78_spill] sm:$0xff]  ;;  %v20186_v2 = vrot.slane %v16505_v9, 4  ;;  %v11077_v51 = vpop.f32.mrb[139].mxu1 }
 0x2bf   : > { %v20869_v34 = vld [vmem:[#allocation82_spill] sm:$0xff]  ;;  %v16508_v28 = vadd.f32 %v2727_v8, %v2142_v53  ;;  %v8768_v25 = vrot.slane %v8766_v31, 3  ;;  %v8771_v44 = vrot.slane %v8769_v24, 4  ;;  %v20872_v53 = vrot.slane %v16427_v43, 4 }
 0x2c0   : > { %v8026_v29 = vsel %vm3601_vm4, %v20867_v52, %v20187_v48  ;;  %v5967_v56 = vmax.bf16 %v5896_v1, %v5162_v20  ;;  %v2896_v47 = vsel %vm2780_vm10, %v20869_v34, %v20868_v18  ;;  %v20870_v52 = vrot.slane %v20860_v10, 1  ;;  %v16515_v20 = vld [vmem:[#allocation3 + $0x88] sm:$0xff]  ;;  %v2155_v48 = vpop.f32.mrb[140].mxu1 }
 0x2c1   : > { %v20871_v1 = vrot.slane %v20841_v11, 1  ;;  %v3045_v34 = vmax.bf16 %v2896_v47, %v1758_v36  ;;  %v4435_v8 = vsel %vm1804_vm0, %v20872_v53, %v20186_v2  ;;  %v20873_v31 = vld [vmem:[#allocation74_spill] sm:$0xff]  ;;  %v16527_v11 = vor.u32 %v8771_v44, %v8768_v25  ;;  %v20876_v47 = vld [vmem:[#allocation13_spill] sm:$0xff]  ;;  %v20881_v2 = vld [vmem:[#allocation35_spill] sm:$0xff] }
 0x2c2   : > { %v6691_v18 = vmax.bf16 %v16351_v3, %v5967_v56  ;;  %v20874_v24 = vshrl.u32 %v20873_v31, 16  ;;  %v20190_v56 = vrot.slane %v16351_v3, 5  ;;  %v7289_v36 = vshrl.u32 %v16437_v22, 16  ;;  %11295 = vmatmul.mubr.msk.bf16.gmra.mrb[244].mxu1 %vm472_vm8, %v20876_v47 }
 0x2c3   : > { %v3630_v7 = vsel %vm3601_vm4, %v20871_v1, %v20870_v52  ;;  %v20875_v52 = vshll.u32 %v20873_v31, 16  ;;  %v7293_v21 = vshll.u32 %v16515_v20, 16  ;;  %11298 = vmatprep.mubr.msk.bf16.mxu1 %vm12233_vm6, %v20406_v19  ;;  %v16544_v44 = vsel %vm3743_vm9, %v16062_v41, %v16387_v55 }
 0x2c4   : > { %v4999_v17 = vrot.slane %v20874_v24, 4  ;;  %v7444_v53 = vmax.bf16 %v7288_v38, %v6691_v18  ;;  %v3698_v24 = vmax.bf16 %v3630_v7, %v3045_v34  ;;  %v16549_v25 = vsel %vm2194_vm3, %v16451_v62, %v16527_v11  ;;  %v2732_v7 = vpop.f32.mrb[140].mxu0  ;;  %v20879_v34 = vld [vmem:[#allocation7_spill] sm:$0xff]  ;;  %11405 = vmatmul.mubr.msk.bf16.gmra.mrb[248].mxu0 %vm472_vm8, %v15984_v33 }
 0x2c5   : > { %v5002_v1 = vrot.slane %v20875_v52, 5  ;;  %20877 = vst [vmem:[#allocation28_spill] sm:$0xff] %v16549_v25  ;;  %v20189_v38 = vrot.slane %v16515_v20, 1  ;;  %v20878_v18 = vor.u32 %v16248_v45, %v16223_v63  ;;  %v20880_v41 = vshll.u32 %v16274_v46, 16  ;;  %11408 = vmatprep.mubr.msk.bf16.mxu0 %vm12233_vm6, %v20406_v19 }
 0x2c6   : > { %v8095_v51 = vmax.bf16 %v8026_v29, %v7444_v53  ;;  %v4503_v62 = vmax.bf16 %v4435_v8, %v3698_v24  ;;  %vm8616_vm13 = vcmp.ne.s16.totalorder %v20881_v2, 0  ;;  %v20882_v45 = vrot.slane %v16268_v61, 5  ;;  %v11080_v29 = vpop.f32.mrb[141].mxu1 }
 0x2c7   : > { %v16551_v52 = vor.u32 %v5002_v1, %v4999_v17  ;;  %v16559_v47 = vsel %vm3063_vm12, %v20879_v34, %v20878_v18  ;;  %v16564_v55 = vor.u32 %v20880_v41, %v16416_v15  ;;  %v16567_v17 = vadd.f32 %v2732_v7, %v2147_v50  ;;  %v11186_v1 = vpop.f32.mrb[141].mxu0  ;;  %v2158_v34 = vpop.f32.mrb[142].mxu1 }
 0x2c8   : > { %v5898_v46 = vsel %vm5871_vm7, %v20882_v45, %v20190_v56  ;;  %v7291_v15 = vor.u32 %v7289_v36, %v7287_v54  ;;  %v2735_v18 = vpop.f32.mrb[142].mxu0  ;;  %v8643_v8 = vsel %vm8615_vm14, %v8095_v51, 0  ;;  %v7295_v53 = vrot.slane %v7293_v21, 1  ;;  %v11081_v36 = vpop.f32.mrb[143].mxu1  ;;  %v20885_v51 = vld [vmem:[#allocation84_spill] sm:$0xff]  ;;  %v16596_v45 = vld [vmem:[#allocation3 + $0x80] sm:$0xff] }
 0x2c9   : > { %v5004_v63 = vsel %vm3063_vm12, %v16468_v26, %v16551_v52  ;;  %v1759_v24 = vmax.bf16 %v20681_v0, %v16427_v43  ;;  %v16581_v7 = vadd.f32 %v2735_v18, %v2150_v6  ;;  %v11187_v26 = vpop.f32.mrb[143].mxu0  ;;  %v8775_v41 = vshrl.u32 %v8643_v8, 16 }
 0x2ca   : > { %v5163_v50 = vmax.bf16 %v5004_v63, %v4503_v62  ;;  %v8778_v1 = vshll.u32 %v8643_v8, 16  ;;  %v20884_v61 = vrot.slane %v16437_v22, 1  ;;  %v20886_v62 = vld [vmem:[#allocation83_spill] sm:$0xff]  ;;  %v20887_v43 = vrot.slane %v20873_v31, 1 }
 0x2cb   : > { %20883 = vst [vmem:[#allocation71_spill] sm:$0xff] %v16581_v7  ;;  %v2904_v21 = vsel %vm2780_vm10, %v20886_v62, %v20885_v51  ;;  %v20888_v6 = vrot.slane %v20860_v10, 1  ;;  %v20188_v18 = vrot.slane %v16596_v45, 4  ;;  %v8777_v29 = vrot.slane %v8775_v41, 3  ;;  %v16602_v26 = vld [vmem:[#allocation3 + $0x90] sm:$0xff]  ;;  %v20891_v41 = vld [vmem:[#allocation81_spill] sm:$0xff] }
 0x2cc   : > { %v8028_v54 = vsel %vm3601_vm4, %v20884_v61, %v20189_v38  ;;  %v5968_v23 = vmax.bf16 %v5898_v46, %v5163_v50  ;;  %v8780_v8 = vrot.slane %v8778_v1, 4  ;;  %v7296_v46 = vsel %vm2780_vm10, %v7291_v15, %v7295_v53  ;;  %v20889_v61 = vld [vmem:[#allocation17_spill] sm:$0xff]  ;;  %11409 = vmatmul.mubr.msk.bf16.gmra.mrb[252].mxu0 %vm472_vm8, %v16070_v12 }
 0x2cd   : > { %v3632_v63 = vsel %vm3601_vm4, %v20888_v6, %v20887_v43  ;;  %v3046_v50 = vmax.bf16 %v2904_v21, %v1759_v24  ;;  %11299 = vmatmul.mubr.msk.bf16.gmra.mrb[248].mxu1 %vm472_vm8, %v20889_v61  ;;  %v20890_v36 = vrot.slane %v16505_v9, 4  ;;  %v20892_v1 = vshrl.u32 %v20891_v41, 16  ;;  %v2740_v6 = vpop.f32.mrb[144].mxu0  ;;  %11412 = vmatprep.mubr.msk.bf16.mxu0 %vm12233_vm6, %v20406_v19 }
 0x2ce   : > { %v6692_v10 = vmax.bf16 %v16437_v22, %v5968_v23  ;;  %v20893_v24 = vshll.u32 %v20891_v41, 16  ;;  %11302 = vmatprep.mubr.msk.bf16.mxu1 %vm12233_vm6, %v20406_v19  ;;  %v16620_v62 = vor.u32 %v8780_v8, %v8777_v29  ;;  %v7297_v43 = vshrl.u32 %v16515_v20, 16  ;;  %v11190_v29 = vpop.f32.mrb[145].mxu0 }
 0x2cf   : > { %v4437_v33 = vsel %vm1804_vm0, %v20890_v36, %v20188_v18  ;;  %v5008_v15 = vrot.slane %v20892_v1, 4  ;;  %v3699_v21 = vmax.bf16 %v3632_v63, %v3046_v50  ;;  %v20894_v61 = vshll.u32 %v16439_v5, 16  ;;  %v16628_v18 = vld [vmem:[#allocation2 + $0x28] sm:$0xff]  ;;  %v2163_v63 = vpop.f32.mrb[144].mxu1 }
 0x2d0   : > { %v5011_v51 = vrot.slane %v20893_v24, 5  ;;  %v7445_v1 = vmax.bf16 %v7296_v46, %v6692_v10  ;;  %v7301_v24 = vshll.u32 %v16602_v26, 16  ;;  %v16633_v56 = vadd.f32 %v2740_v6, %v2155_v48  ;;  %v20898_v46 = vld [vmem:[#allocation38_spill] sm:$0xff]  ;;  %v2743_v10 = vpop.f32.mrb[146].mxu0 }
 0x2d1   : > { %v16626_v36 = vrot.slane %v20894_v61, 1  ;;  %v20896_v8 = vshrl.u32 %v16306_v14, 16  ;;  %v16643_v61 = vsel %vm2194_vm3, %v16527_v11, %v16620_v62  ;;  %v4504_v23 = vmax.bf16 %v4437_v33, %v3699_v21  ;;  %v11191_v11 = vpop.f32.mrb[147].mxu0 }
 0x2d2   : > { %v16630_v38 = vor.u32 %v5011_v51, %v5008_v15  ;;  %20895 = vst [vmem:[#allocation26_spill] sm:$0xff] %v16633_v56  ;;  %20897 = vst [vmem:[#allocation39_spill] sm:$0xff] %v16643_v61  ;;  %vm8617_vm11 = vcmp.ne.s16.totalorder %v20898_v46, 0  ;;  %v11084_v15 = vpop.f32.mrb[145].mxu1  ;;  %v8096_v51 = vmax.bf16 %v8028_v54, %v7445_v1  ;;  %v20899_v14 = vrot.slane %v16437_v22, 5 }
 0x2d3   : > { %v16638_v50 = vor.u32 %v16475_v59, %v20896_v8  ;;  %v20900_v59 = vrot.slane %v16351_v3, 5  ;;  %v7299_v29 = vor.u32 %v7297_v43, %v7295_v53  ;;  %v16654_v8 = vadd.f32 %v2743_v10, %v2158_v34  ;;  %v2166_v33 = vpop.f32.mrb[146].mxu1 }
 0x2d4   : > { %v5013_v48 = vsel %vm3063_vm12, %v16551_v52, %v16630_v38  ;;  %v20902_v21 = vshll.u32 %v16456_v32, 16  ;;  %v11085_v15 = vpop.f32.mrb[147].mxu1  ;;  %v8644_v52 = vsel %vm8616_vm13, %v8096_v51, 0  ;;  %v7303_v25 = vrot.slane %v7301_v24, 1  ;;  %11413 = vmatmul.mubr.msk.bf16.gmra.mrb[0].mxu0 %vm472_vm8, %v16152_v35 }
 0x2d5   : > { %v5900_v6 = vsel %vm5871_vm7, %v20900_v59, %v20899_v14  ;;  %20901 = vst [vmem:[#allocation31_spill] sm:$0xff] %v16654_v8  ;;  %v5164_v1 = vmax.bf16 %v5013_v48, %v4504_v23  ;;  %v20191_v3 = vrot.slane %v16602_v26, 1  ;;  %v1760_v53 = vmax.bf16 %v20681_v0, %v16505_v9  ;;  %v20903_v14 = vld [vmem:[#allocation88_spill] sm:$0xff]  ;;  %v20904_v59 = vld [vmem:[#allocation91_spill] sm:$0xff]  ;;  %v2171_v54 = vpop.f32.mrb[148].mxu1  ;;  %11416 = vmatprep.mubr.msk.bf16.mxu0 %vm12233_vm6, %v20406_v19 }
 0x2d6   : > { %v16658_v61 = vrot.slane %v20902_v21, 1  ;;  %v8784_v34 = vshrl.u32 %v8644_v52, 16  ;;  %v8787_v43 = vshll.u32 %v8644_v52, 16  ;;  %v2912_v23 = vsel %vm2780_vm10, %v20904_v59, %v20903_v14  ;;  %v20905_v48 = vld [vmem:[#allocation23_spill] sm:$0xff]  ;;  %v20908_v52 = vld [vmem:[#allocation85_spill] sm:$0xff]  ;;  %v16689_v14 = vld [vmem:[#allocation3 + $0x98] sm:$0xff] }
 0x2d7   : > { %v5969_v10 = vmax.bf16 %v5900_v6, %v5164_v1  ;;  %11303 = vmatmul.mubr.msk.bf16.gmra.mrb[252].mxu1 %vm472_vm8, %v20905_v48  ;;  %v7304_v2 = vsel %vm2780_vm10, %v7299_v29, %v7303_v25  ;;  %v3047_v24 = vmax.bf16 %v2912_v23, %v1760_v53  ;;  %v20906_v9 = vrot.slane %v20891_v41, 1  ;;  %v16681_v6 = vld [vmem:[#allocation3 + $0x88] sm:$0xff]  ;;  %v2748_v59 = vpop.f32.mrb[148].mxu0 }
 0x2d8   : > { %v20907_v12 = vrot.slane %v20873_v31, 1  ;;  %v20192_v11 = vrot.slane %v16681_v6, 4  ;;  %11306 = vmatprep.mubr.msk.bf16.mxu1 %vm12233_vm6, %v20406_v19  ;;  %v8786_v21 = vrot.slane %v8784_v34, 3  ;;  %v8789_v1 = vrot.slane %v8787_v43, 4 }
 0x2d9   : > { %v6693_v15 = vmax.bf16 %v16515_v20, %v5969_v10  ;;  %v20909_v29 = vshrl.u32 %v20908_v52, 16  ;;  %v20910_v31 = vrot.slane %v16515_v20, 1  ;;  %v20911_v34 = vrot.slane %v16596_v45, 4 }
 0x2da   : > { %v3634_v51 = vsel %vm3601_vm4, %v20907_v12, %v20906_v9  ;;  %v20912_v10 = vshll.u32 %v20908_v52, 16  ;;  %v16703_v12 = vadd.f32 %v2748_v59, %v2163_v63  ;;  %v16705_v42 = vor.u32 %v8789_v1, %v8786_v21 }
 0x2db   : > { %v5017_v53 = vrot.slane %v20909_v29, 4  ;;  %v8030_v23 = vsel %vm3601_vm4, %v20910_v31, %v20191_v3  ;;  %v3700_v48 = vmax.bf16 %v3634_v51, %v3047_v24  ;;  %v4439_v43 = vsel %vm1804_vm0, %v20911_v34, %v20192_v11  ;;  %v11194_v29 = vpop.f32.mrb[149].mxu0  ;;  %v11088_v24 = vpop.f32.mrb[149].mxu1 }
 0x2dc   : > { %v5020_v9 = vrot.slane %v20912_v10, 5  ;;  %v7446_v8 = vmax.bf16 %v7304_v2, %v6693_v15  ;;  %v20193_v56 = vrot.slane %v16515_v20, 5  ;;  %v2751_v31 = vpop.f32.mrb[150].mxu0  ;;  %v7305_v7 = vshrl.u32 %v16602_v26, 16  ;;  %v2174_v59 = vpop.f32.mrb[150].mxu1  ;;  %v16714_v10 = vld [vmem:[#allocation2 + $0x30] sm:$0xff]  ;;  %11417 = vmatmul.mubr.msk.bf16.gmra.mrb[4].mxu0 %vm472_vm8, %v16304_v57 }
 0x2dd   : > { %v4505_v51 = vmax.bf16 %v4439_v43, %v3700_v48  ;;  %v7309_v34 = vshll.u32 %v16689_v14, 16  ;;  %v16712_v11 = vadd.f32 %v2751_v31, %v2166_v33  ;;  %v11195_v63 = vpop.f32.mrb[151].mxu0  ;;  %v16720_v2 = vsel %vm2194_vm3, %v16620_v62, %v16705_v42  ;;  %v20914_v15 = vld [vmem:[#allocation41_spill] sm:$0xff]  ;;  %v20916_v29 = vld [vmem:[#allocation22_spill] sm:$0xff]  ;;  %11420 = vmatprep.mubr.msk.bf16.mxu0 %vm12233_vm6, %v20406_v19 }
 0x2de   : > { %v16708_v3 = vor.u32 %v5020_v9, %v5017_v53  ;;  %20913 = vst [vmem:[#allocation73_spill] sm:$0xff] %v16720_v2  ;;  %v8097_v1 = vmax.bf16 %v8030_v23, %v7446_v8  ;;  %vm8618_vm2 = vcmp.ne.s16.totalorder %v20914_v15, 0  ;;  %v11089_v53 = vpop.f32.mrb[151].mxu1  ;;  %v16726_v33 = vsel %vm3743_vm9, %v16221_v30, %v16564_v55 }
 0x2df   : > { %v20915_v43 = vrot.slane %v16437_v22, 5  ;;  %v7307_v9 = vor.u32 %v7305_v7, %v7303_v25  ;;  %v7311_v30 = vrot.slane %v7309_v34, 1  ;;  %v20194_v55 = vrot.slane %v16689_v14, 1  ;;  %11307 = vmatmul.mubr.msk.bf16.gmra.mrb[0].mxu1 %vm472_vm8, %v20916_v29  ;;  %v20919_v34 = vld [vmem:[#allocation93_spill] sm:$0xff]  ;;  %v16764_v29 = vld [vmem:[#allocation3 + $0x90] sm:$0xff] }
 0x2e0   : > { %v5022_v48 = vsel %vm3063_vm12, %v16630_v38, %v16708_v3  ;;  %v8645_v8 = vsel %vm8617_vm11, %v8097_v1, 0  ;;  %v20917_v22 = vshrl.u32 %v16439_v5, 16  ;;  %11310 = vmatprep.mubr.msk.bf16.mxu1 %vm12233_vm6, %v20406_v19  ;;  %v1761_v24 = vmax.bf16 %v20681_v0, %v16596_v45  ;;  %v2756_v5 = vpop.f32.mrb[152].mxu0 }
 0x2e1   : > { %v5902_v62 = vsel %vm5871_vm7, %v20915_v43, %v20193_v56  ;;  %v5165_v23 = vmax.bf16 %v5022_v48, %v4505_v51  ;;  %v8793_v38 = vshrl.u32 %v8645_v8, 16  ;;  %v8796_v7 = vshll.u32 %v8645_v8, 16  ;;  %v20918_v51 = vld [vmem:[#allocation90_spill] sm:$0xff]  ;;  %v11198_v45 = vpop.f32.mrb[153].mxu0 }
 0x2e2   : > { %v16748_v25 = vor.u32 %v20917_v22, %v16626_v36  ;;  %v7312_v31 = vsel %vm2780_vm10, %v7307_v9, %v7311_v30  ;;  %v2920_v63 = vsel %vm2780_vm10, %v20919_v34, %v20918_v51  ;;  %v20920_v48 = vrot.slane %v20908_v52, 1  ;;  %v2759_v34 = vpop.f32.mrb[154].mxu0 }
 0x2e3   : > { %v5970_v46 = vmax.bf16 %v5902_v62, %v5165_v23  ;;  %v8795_v1 = vrot.slane %v8793_v38, 3  ;;  %v8798_v53 = vrot.slane %v8796_v7, 4  ;;  %v20921_v43 = vrot.slane %v20891_v41, 1  ;;  %v2179_v23 = vpop.f32.mrb[152].mxu1  ;;  %v16775_v41 = vld [vmem:[#allocation3 + $0xa0] sm:$0xff] }
 0x2e4   : > { %v20196_v62 = vrot.slane %v16764_v29, 4  ;;  %v16767_v9 = vadd.f32 %v2756_v5, %v2171_v54  ;;  %v20922_v38 = vrot.slane %v16602_v26, 1  ;;  %v3048_v51 = vmax.bf16 %v2920_v63, %v1761_v24  ;;  %v11199_v24 = vpop.f32.mrb[155].mxu0  ;;  %11421 = vmatmul.mubr.msk.bf16.gmra.mrb[8].mxu0 %vm472_vm8, %v16544_v44 }
 0x2e5   : > { %v3636_v8 = vsel %vm3601_vm4, %v20921_v43, %v20920_v48  ;;  %v6694_v22 = vmax.bf16 %v16602_v26, %v5970_v46  ;;  %v11092_v48 = vpop.f32.mrb[153].mxu1  ;;  %v16777_v43 = vor.u32 %v8798_v53, %v8795_v1  ;;  %v20923_v54 = vrot.slane %v16681_v6, 4  ;;  %v20924_v46 = vld [vmem:[#allocation87_spill] sm:$0xff]  ;;  %v2764_v24 = vpop.f32.mrb[156].mxu0  ;;  %11424 = vmatprep.mubr.msk.bf16.mxu0 %vm12233_vm6, %v20406_v19 }
 0x2e6   : > { %v8032_v7 = vsel %vm3601_vm4, %v20922_v38, %v20194_v55  ;;  %v20925_v45 = vshrl.u32 %v20924_v46, 16  ;;  %v20926_v35 = vshll.u32 %v20924_v46, 16  ;;  %v16788_v38 = vadd.f32 %v2759_v34, %v2174_v59  ;;  %v2182_v63 = vpop.f32.mrb[154].mxu1 }
 0x2e7   : > { %v4441_v5 = vsel %vm1804_vm0, %v20923_v54, %v20196_v62  ;;  %v7447_v55 = vmax.bf16 %v7312_v31, %v6694_v22  ;;  %v3701_v48 = vmax.bf16 %v3636_v8, %v3048_v51  ;;  %v20195_v1 = vrot.slane %v16602_v26, 5  ;;  %v11093_v53 = vpop.f32.mrb[155].mxu1  ;;  %v20930_v22 = vld [vmem:[#allocation51_spill] sm:$0xff] }
 0x2e8   : > { %v5026_v21 = vrot.slane %v20925_v45, 4  ;;  %v5029_v56 = vrot.slane %v20926_v35, 5  ;;  %v16794_v2 = vsel %vm2194_vm3, %v16705_v42, %v16777_v43  ;;  %v7313_v45 = vshrl.u32 %v16689_v14, 16  ;;  %11311 = vmatmul.mubr.msk.bf16.gmra.mrb[4].mxu1 %vm472_vm8, %v20930_v22  ;;  %v2187_v22 = vpop.f32.mrb[156].mxu1 }
 0x2e9   : > { %20927 = vst [vmem:[#allocation72_spill] sm:$0xff] %v16794_v2  ;;  %v7317_v35 = vshll.u32 %v16775_v41, 16  ;;  %v16805_v59 = vsel %vm2780_vm10, %v16638_v50, %v16626_v36  ;;  %v20928_v31 = vshrl.u32 %v16456_v32, 16  ;;  %v8098_v42 = vmax.bf16 %v8032_v7, %v7447_v55  ;;  %11314 = vmatprep.mubr.msk.bf16.mxu1 %vm12233_vm6, %v20406_v19  ;;  %v11096_v57 = vpop.f32.mrb[157].mxu1 }
 0x2ea   : > { %v16796_v54 = vor.u32 %v5029_v56, %v5026_v21  ;;  %v4506_v56 = vmax.bf16 %v4441_v5, %v3701_v48  ;;  %v20929_v21 = vld [vmem:[#allocation42_spill] sm:$0xff]  ;;  %v20931_v32 = vrot.slane %v16515_v20, 5  ;;  %v7315_v55 = vor.u32 %v7313_v45, %v7311_v30 }
 0x2eb   : > { %v16810_v8 = vor.u32 %v20928_v31, %v16658_v61  ;;  %vm8619_vm9 = vcmp.ne.s16.totalorder %v20929_v21, 0  ;;  %v8646_v7 = vsel %vm8618_vm2, %v8098_v42, 0  ;;  %v7319_v34 = vrot.slane %v7317_v35, 1  ;;  %v11202_v31 = vpop.f32.mrb[157].mxu0  ;;  %v20933_v35 = vld [vmem:[#allocation92_spill] sm:$0xff] }
 0x2ec   : > { %v5031_v36 = vsel %vm3063_vm12, %v16708_v3, %v16796_v54  ;;  %v5904_v50 = vsel %vm5871_vm7, %v20931_v32, %v20195_v1  ;;  %v20198_v5 = vrot.slane %v16775_v41, 1  ;;  %v20932_v3 = vshll.u32 %v16628_v18, 16  ;;  %v2767_v32 = vpop.f32.mrb[158].mxu0  ;;  %11425 = vmatmul.mubr.msk.bf16.gmra.mrb[12].mxu0 %vm472_vm8, %v16726_v33 }
 0x2ed   : > { %v5166_v51 = vmax.bf16 %v5031_v36, %v4506_v56  ;;  %v8802_v53 = vshrl.u32 %v8646_v7, 16  ;;  %v8805_v20 = vshll.u32 %v8646_v7, 16  ;;  %v1762_v30 = vmax.bf16 %v20681_v0, %v16681_v6  ;;  %v20934_v56 = vld [vmem:[#allocation97_spill] sm:$0xff]  ;;  %11540 = vmatprep.mubr.msk.bf16.mxu0 %vm12233_vm6, %v20406_v19 }
 0x2ee   : > { %v16833_v48 = vrot.slane %v20932_v3, 1  ;;  %v16837_v45 = vadd.f32 %v2764_v24, %v2179_v23  ;;  %v7320_v42 = vsel %vm2780_vm10, %v7315_v55, %v7319_v34  ;;  %v2928_v36 = vsel %vm2780_vm10, %v20934_v56, %v20933_v35  ;;  %v16861_v35 = vld [vmem:[#allocation2 + $0x38] sm:$0xff] }
 0x2ef   : > { %v5971_v15 = vmax.bf16 %v5904_v50, %v5166_v51  ;;  %v8804_v3 = vrot.slane %v8802_v53, 3  ;;  %v8807_v1 = vrot.slane %v8805_v20, 4  ;;  %v3049_v62 = vmax.bf16 %v2928_v36, %v1762_v30  ;;  %v11203_v50 = vpop.f32.mrb[159].mxu0  ;;  %v2190_v51 = vpop.f32.mrb[158].mxu1  ;;  %v16856_v53 = vld [vmem:[#allocation3 + $0x98] sm:$0xff]  ;;  %v16859_v30 = vld [vmem:[#allocation3 + $0xa8] sm:$0xff] }
 0x2f0   : > { %v20935_v7 = vrot.slane %v20924_v46, 1  ;;  %v20936_v6 = vrot.slane %v20908_v52, 1  ;;  %v16848_v24 = vadd.f32 %v2767_v32, %v2182_v63  ;;  %v20938_v31 = vrot.slane %v16689_v14, 1  ;;  %v11097_v52 = vpop.f32.mrb[159].mxu1  ;;  %v20939_v36 = vld [vmem:[#allocation89_spill] sm:$0xff]  ;;  %11315 = vmatmul.mubr.msk.bf16.gmra.mrb[8].mxu1 %vm472_vm8, %v16559_v47 }
 0x2f1   : > { %v6695_v55 = vmax.bf16 %v16689_v14, %v5971_v15  ;;  %v20197_v20 = vrot.slane %v16856_v53, 4  ;;  %v16863_v63 = vor.u32 %v8807_v1, %v8804_v3  ;;  %v20940_v15 = vshrl.u32 %v20939_v36, 16  ;;  %v10428_v50 = vld [vmem:[%s19928_s4 + $0x18] sm:$0xf]  ;;  %11430 = vmatprep.mubr.msk.bf16.mxu1 %vm12233_vm6, %v20406_v19  ;;  %v10456_v47 = vld [vmem:[%s19928_s4 + $0x1c] sm:$0xf] }
 0x2f2   : > { %v3638_v23 = vsel %vm3601_vm4, %v20936_v6, %v20935_v7  ;;  %20937 = vst [vmem:[#allocation134_spill] sm:$0xff] %v16848_v24  ;;  %v8034_v57 = vsel %vm3601_vm4, %v20938_v31, %v20198_v5  ;;  %v20941_v7 = vshll.u32 %v20939_v36, 16  ;;  %v20942_v1 = vrot.slane %v16764_v29, 4 }
 0x2f3   : > { %v3702_v56 = vmax.bf16 %v3638_v23, %v3049_v62  ;;  %v5035_v32 = vrot.slane %v20940_v15, 4  ;;  %v7448_v31 = vmax.bf16 %v7320_v42, %v6695_v55  ;;  %v20199_v3 = vrot.slane %v16689_v14, 5 }
 0x2f4   : > { %v5038_v6 = vrot.slane %v20941_v7, 5  ;;  %v4443_v62 = vsel %vm1804_vm0, %v20942_v1, %v20197_v20  ;;  %v7321_v23 = vshrl.u32 %v16775_v41, 16  ;;  %v16888_v44 = vsel %vm2194_vm3, %v16777_v43, %v16863_v63  ;;  %11541 = vmatmul.mubr.msk.bf16.vlgmr.msra.gmra.mrb[16].mxu0 %vm472_vm8, %v16805_v59  ;;  %v20968_v59 = vld [vmem:[#allocation99_spill] sm:$0xff] }
 0x2f5   : > { %20943 = vst [vmem:[#allocation62_spill] sm:$0xff] %v16888_v44  ;;  %v4507_v42 = vmax.bf16 %v4443_v62, %v3702_v56  ;;  %v7325_v52 = vshll.u32 %v16859_v30, 16  ;;  %v16901_v15 = vsel %vm2780_vm10, %v16748_v25, %v16658_v61  ;;  %v8099_v7 = vmax.bf16 %v8034_v57, %v7448_v31  ;;  %v3303_v57 = vpop.f32.mrb[160].mxu1  ;;  %v20946_v44 = vld [vmem:[#allocation102_spill] sm:$0xff]  ;;  %11544 = vmatprep.mubr.msk.bf16.mxu0 %vm12233_vm6, %v20406_v19 }
 0x2f6   : > { %v16890_v55 = vor.u32 %v5038_v6, %v5035_v32  ;;  %v7323_v56 = vor.u32 %v7321_v23, %v7319_v34  ;;  %v20944_v32 = vld [vmem:[#allocation44_spill] sm:$0xff]  ;;  %v2772_v6 = vpop.f32.mrb[160].mxu0  ;;  %v6346_v1 = vsel %vm1804_vm0, %v10428_v50, 0  ;;  %v20945_v20 = vrot.slane %v16602_v26, 5  ;;  %v11212_v2 = vpop.f32.mrb[161].mxu1 }
 0x2f7   : > { %vm8620_vm1 = vcmp.ne.s16.totalorder %v20944_v32, 0  ;;  %v16915_v43 = vadd.f32 %v2772_v6, %v2187_v22  ;;  %v11206_v34 = vpop.f32.mrb[161].mxu0  ;;  %v8647_v31 = vsel %vm8619_vm9, %v8099_v7, 0  ;;  %v7327_v23 = vrot.slane %v7325_v52, 1  ;;  %v3306_v6 = vpop.f32.mrb[162].mxu1 }
 0x2f8   : > { %v5040_v62 = vsel %vm3063_vm12, %v16796_v54, %v16890_v55  ;;  %v5906_v61 = vsel %vm5871_vm7, %v20945_v20, %v20199_v3  ;;  %v2775_v5 = vpop.f32.mrb[162].mxu0  ;;  %v3518_v54 = vadd.f32 %v3303_v57, %v20946_v44  ;;  %v16921_v24 = vsel %vm1804_vm0, %v10456_v47, 0  ;;  %v11213_v7 = vpop.f32.mrb[163].mxu1  ;;  %v20950_v47 = vld [vmem:[#allocation98_spill] sm:$0xff] }
 0x2f9   : > { %v5167_v50 = vmax.bf16 %v5040_v62, %v4507_v42  ;;  %v8811_v26 = vshrl.u32 %v8647_v31, 16  ;;  %v8814_v20 = vshll.u32 %v8647_v31, 16  ;;  %v16923_v3 = vadd.f32 %v2775_v5, %v2190_v51  ;;  %v11207_v22 = vpop.f32.mrb[163].mxu0  ;;  %v20948_v42 = vld [vmem:[#allocation105_spill] sm:$0xff]  ;;  %v20949_v62 = vld [vmem:[#allocation96_spill] sm:$0xff]  ;;  %11759 = vmatpush3.bf16.msra.mxu0 %v16921_v24 }
 0x2fa   : > { %v7328_v25 = vsel %vm2780_vm10, %v7323_v56, %v7327_v23  ;;  %v1763_v21 = vmax.bf16 %v20681_v0, %v16764_v29  ;;  %v3519_v52 = vadd.f32 %v3306_v6, %v20948_v42  ;;  %v2936_v57 = vsel %vm2780_vm10, %v20950_v47, %v20949_v62  ;;  %v12184_v22 = vld [vmem:[#allocation2 + $0x10] sm:$0xff]  ;;  %v16952_v6 = vld [vmem:[#allocation3 + $0xa0] sm:$0xff]  ;;  %11978 = vmatprep.subr.bf16.mxu0 %v20406_v19 }
 0x2fb   : > { %20947 = vst [vmem:[#allocation64_spill] sm:$0xff] %v16923_v3  ;;  %v5972_v34 = vmax.bf16 %v5906_v61, %v5167_v50  ;;  %v8813_v44 = vrot.slane %v8811_v26, 3  ;;  %v8816_v2 = vrot.slane %v8814_v20, 4  ;;  %v20951_v51 = vrot.slane %v16859_v30, 1  ;;  %v16945_v20 = vld [vmem:[#allocation3 + $0xb0] sm:$0xff]  ;;  %11431 = vmatmul.mubr.msk.bf16.vlgmr.msra.gmra.mrb[12].mxu1 %vm472_vm8, %v12184_v22 }
 0x2fc   : > { %v20952_v56 = vrot.slane %v16775_v41, 1  ;;  %v3050_v61 = vmax.bf16 %v2936_v57, %v1763_v21  ;;  %v20953_v31 = vrot.slane %v20939_v36, 1  ;;  %v20954_v50 = vrot.slane %v20924_v46, 1  ;;  %v20955_v21 = vld [vmem:[#allocation101_spill] sm:$0xff]  ;;  %11649 = vmatpush3.bf16.msra.mxu1 %v6346_v1  ;;  %11434 = vmatprep.mubr.msk.bf16.mxu1 %vm12233_vm6, %v20406_v19 }
 0x2fd   : > { %v6696_v5 = vmax.bf16 %v16775_v41, %v5972_v34  ;;  %v16950_v33 = vor.u32 %v8816_v2, %v8813_v44  ;;  %v20200_v34 = vrot.slane %v16952_v6, 4  ;;  %v20956_v42 = vshrl.u32 %v20955_v21, 16  ;;  %v4082_v2 = vpop.f32.mrb[164].mxu0  ;;  %11868 = vmatprep.subr.bf16.mxu1 %v20406_v19  ;;  %11545 = vmatmul.mubr.msk.bf16.gmra.mrb[20].mxu0 %vm472_vm8, %v16901_v15 }
 0x2fe   : > { %v8036_v29 = vsel %vm3601_vm4, %v20952_v56, %v20951_v51  ;;  %v3640_v26 = vsel %vm3601_vm4, %v20954_v50, %v20953_v31  ;;  %v20957_v46 = vshll.u32 %v20955_v21, 16  ;;  %v20201_v51 = vrot.slane %v16775_v41, 5  ;;  %v11322_v50 = vpop.f32.mrb[165].mxu0  ;;  %11548 = vmatprep.mubr.msk.bf16.mxu0 %vm12233_vm6, %v20406_v19 }
 0x2ff   : > { %v5044_v7 = vrot.slane %v20956_v42, 4  ;;  %v7449_v47 = vmax.bf16 %v7328_v25, %v6696_v5  ;;  %v3703_v57 = vmax.bf16 %v3640_v26, %v3050_v61  ;;  %v7329_v44 = vshrl.u32 %v16859_v30, 16  ;;  %v3311_v26 = vpop.f32.mrb[164].mxu1  ;;  %v4085_v3 = vpop.f32.mrb[166].mxu0 }
 0x300   : > { %v5047_v62 = vrot.slane %v20957_v46, 5  ;;  %v16967_v56 = vsel %vm2194_vm3, %v16863_v63, %v16950_v33  ;;  %v20959_v1 = vrot.slane %v16856_v53, 4  ;;  %v7333_v5 = vshll.u32 %v16945_v20, 16 }
 0x301   : > { %20958 = vst [vmem:[#allocation32_spill] sm:$0xff] %v16967_v56  ;;  %v16977_v61 = vadd.f32 %v4082_v2, %v3518_v54  ;;  %v8100_v22 = vmax.bf16 %v8036_v29, %v7449_v47  ;;  %v20961_v63 = vrot.slane %v16689_v14, 5  ;;  %v20962_v56 = vld [vmem:[#allocation48_spill] sm:$0xff]  ;;  %v7331_v29 = vor.u32 %v7329_v44, %v7327_v23  ;;  %v11323_v14 = vpop.f32.mrb[167].mxu0 }
 0x302   : > { %v4445_v31 = vsel %vm1804_vm0, %v20959_v1, %v20200_v34  ;;  %v16974_v25 = vor.u32 %v5047_v62, %v5044_v7  ;;  %vm8621_vm15 = vcmp.ne.s16.totalorder %v20962_v56, 0  ;;  %v20963_v1 = vld [vmem:[#allocation125_spill] sm:$0xff]  ;;  %v11216_v62 = vpop.f32.mrb[165].mxu1  ;;  %v16986_v34 = vld [vmem:[#allocation2 + $0x40] sm:$0xff]  ;;  %v16991_v47 = vrot.slane %v7333_v5, 1 }
 0x303   : > { %20960 = vst [vmem:[#allocation135_spill] sm:$0xff] %v16977_v61  ;;  %v4508_v42 = vmax.bf16 %v4445_v31, %v3703_v57  ;;  %v5908_v46 = vsel %vm5871_vm7, %v20961_v63, %v20201_v51  ;;  %v3520_v7 = vadd.f32 %v3311_v26, %v20963_v1  ;;  %v16993_v57 = vadd.f32 %v4085_v3, %v3519_v52  ;;  %v3314_v2 = vpop.f32.mrb[166].mxu1  ;;  %v20965_v63 = vld [vmem:[#allocation126_spill] sm:$0xff]  ;;  %v12186_v5 = vld [vmem:[#allocation2 + $0x18] sm:$0xff] }
 0x304   : > { %v5049_v54 = vsel %vm3063_vm12, %v16890_v55, %v16974_v25  ;;  %v8648_v31 = vsel %vm8620_vm1, %v8100_v22, 0  ;;  %v20202_v26 = vrot.slane %v16945_v20, 1  ;;  %v3521_v1 = vadd.f32 %v3314_v2, %v20965_v63  ;;  %v11217_v62 = vpop.f32.mrb[167].mxu1  ;;  %11435 = vmatmul.mubr.msk.bf16.gmra.mrb[16].mxu1 %vm472_vm8, %v12186_v5 }
 0x305   : > { %20964 = vst [vmem:[#allocation11_spill] sm:$0xff] %v16993_v57  ;;  %v5168_v50 = vmax.bf16 %v5049_v54, %v4508_v42  ;;  %v20966_v51 = vshll.u32 %v16714_v10, 16  ;;  %v8820_v55 = vshrl.u32 %v8648_v31, 16  ;;  %v8823_v23 = vshll.u32 %v8648_v31, 16  ;;  %v20967_v54 = vld [vmem:[#allocation107_spill] sm:$0xff]  ;;  %11438 = vmatprep.mubr.msk.bf16.mxu1 %vm12233_vm6, %v20406_v19  ;;  %v4090_v62 = vpop.f32.mrb[168].mxu0 }
 0x306   : > { %v7336_v44 = vsel %vm2780_vm10, %v7331_v29, %v16991_v47  ;;  %v1764_v42 = vmax.bf16 %v20681_v0, %v16856_v53  ;;  %v2944_v14 = vsel %vm2780_vm10, %v20968_v59, %v20967_v54  ;;  %v20970_v53 = vrot.slane %v20955_v21, 1  ;;  %v20979_v57 = vld [vmem:[#allocation128_spill] sm:$0xff] }
 0x307   : > { %v17001_v61 = vrot.slane %v20966_v51, 1  ;;  %v5973_v52 = vmax.bf16 %v5908_v46, %v5168_v50  ;;  %v8822_v51 = vrot.slane %v8820_v55, 3  ;;  %v8825_v22 = vrot.slane %v8823_v23, 4  ;;  %v17031_v50 = vld [vmem:[#allocation3 + $0xa8] sm:$0xff] }
 0x308   : > { %v20969_v46 = vrot.slane %v16859_v30, 1  ;;  %v20971_v2 = vrot.slane %v20939_v36, 1  ;;  %v20203_v63 = vrot.slane %v17031_v50, 4  ;;  %v3051_v23 = vmax.bf16 %v2944_v14, %v1764_v42  ;;  %v11326_v36 = vpop.f32.mrb[169].mxu0  ;;  %v17053_v42 = vld [vmem:[#allocation3 + $0xb8] sm:$0xff] }
 0x309   : > { %v6697_v24 = vmax.bf16 %v16859_v30, %v5973_v52  ;;  %v17035_v55 = vor.u32 %v8825_v22, %v8822_v51  ;;  %v20972_v52 = vld [vmem:[#allocation103_spill] sm:$0xff]  ;;  %v17041_v3 = vadd.f32 %v4090_v62, %v3520_v7  ;;  %v20976_v51 = vrot.slane %v16952_v6, 4  ;;  %v4093_v14 = vpop.f32.mrb[170].mxu0 }
 0x30a   : > { %v8038_v29 = vsel %vm3601_vm4, %v20969_v46, %v20202_v26  ;;  %v3642_v31 = vsel %vm3601_vm4, %v20971_v2, %v20970_v53  ;;  %v20973_v5 = vshrl.u32 %v20972_v52, 16  ;;  %v20974_v59 = vshll.u32 %v20972_v52, 16  ;;  %v3319_v53 = vpop.f32.mrb[168].mxu1 }
 0x30b   : > { %20975 = vst [vmem:[#allocation75_spill] sm:$0xff] %v17041_v3  ;;  %v17046_v2 = vsel %vm2780_vm10, %v16810_v8, %v16833_v48  ;;  %v7450_v32 = vmax.bf16 %v7336_v44, %v6697_v24  ;;  %v4447_v22 = vsel %vm1804_vm0, %v20976_v51, %v20203_v63  ;;  %v11220_v62 = vpop.f32.mrb[169].mxu1  ;;  %v3704_v8 = vmax.bf16 %v3642_v31, %v3051_v23  ;;  %v11327_v24 = vpop.f32.mrb[171].mxu0  ;;  %v20980_v23 = vld [vmem:[#allocation49_spill] sm:$0xff] }
 0x30c   : > { %v5053_v54 = vrot.slane %v20973_v5, 4  ;;  %v5056_v46 = vrot.slane %v20974_v59, 5  ;;  %v20977_v5 = vld [vmem:[#allocation127_spill] sm:$0xff]  ;;  %v17059_v59 = vsel %vm2194_vm3, %v16950_v33, %v17035_v55  ;;  %v17063_v44 = vadd.f32 %v4093_v14, %v3521_v1  ;;  %v3322_v26 = vpop.f32.mrb[170].mxu1  ;;  %11549 = vmatmul.mubr.msk.bf16.gmra.mrb[24].mxu0 %vm472_vm8, %v17046_v2 }
 0x30d   : > { %v3522_v7 = vadd.f32 %v3319_v53, %v20977_v5  ;;  %20978 = vst [vmem:[#allocation79_spill] sm:$0xff] %v17059_v59  ;;  %v8101_v3 = vmax.bf16 %v8038_v29, %v7450_v32  ;;  %v20204_v51 = vrot.slane %v16859_v30, 5  ;;  %v7337_v63 = vshrl.u32 %v16945_v20, 16  ;;  %v11221_v5 = vpop.f32.mrb[171].mxu1  ;;  %11552 = vmatprep.mubr.msk.bf16.mxu0 %vm12233_vm6, %v20406_v19 }
 0x30e   : > { %v17061_v36 = vor.u32 %v5056_v46, %v5053_v54  ;;  %v3523_v53 = vadd.f32 %v3322_v26, %v20979_v57  ;;  %v4509_v62 = vmax.bf16 %v4447_v22, %v3704_v8  ;;  %v7341_v31 = vshll.u32 %v17053_v42, 16  ;;  %v12188_v54 = vld [vmem:[#allocation2 + $0x20] sm:$0xff]  ;;  %v4098_v22 = vpop.f32.mrb[172].mxu0 }
 0x30f   : > { %vm8622_vm14 = vcmp.ne.s16.totalorder %v20980_v23, 0  ;;  %v20981_v1 = vshrl.u32 %v16628_v18, 16  ;;  %v8649_v57 = vsel %vm8621_vm15, %v8101_v3, 0  ;;  %v20982_v26 = vrot.slane %v16775_v41, 5  ;;  %11439 = vmatmul.mubr.msk.bf16.gmra.mrb[20].mxu1 %vm472_vm8, %v12188_v54  ;;  %v20987_v54 = vld [vmem:[#allocation110_spill] sm:$0xff] }
 0x310   : > { %v5058_v33 = vsel %vm3063_vm12, %v16974_v25, %v17061_v36  ;;  %v7339_v29 = vor.u32 %v7337_v63, %v16991_v47  ;;  %v8829_v18 = vshrl.u32 %v8649_v57, 16  ;;  %v7343_v46 = vrot.slane %v7341_v31, 1  ;;  %11442 = vmatprep.mubr.msk.bf16.mxu1 %vm12233_vm6, %v20406_v19  ;;  %v11330_v31 = vpop.f32.mrb[173].mxu0 }
 0x311   : > { %v17078_v32 = vor.u32 %v20981_v1, %v16833_v48  ;;  %v5910_v25 = vsel %vm5871_vm7, %v20982_v26, %v20204_v51  ;;  %v8832_v48 = vshll.u32 %v8649_v57, 16  ;;  %v5169_v15 = vmax.bf16 %v5058_v33, %v4509_v62  ;;  %v3327_v1 = vpop.f32.mrb[172].mxu1  ;;  %v20986_v26 = vld [vmem:[#allocation108_spill] sm:$0xff] }
 0x312   : > { %v20983_v56 = vshll.u32 %v16861_v35, 16  ;;  %v20206_v47 = vrot.slane %v17053_v42, 1  ;;  %v1765_v63 = vmax.bf16 %v20681_v0, %v16952_v6  ;;  %v20984_v14 = vshrl.u32 %v16714_v10, 16 }
 0x313   : > { %v8831_v24 = vrot.slane %v8829_v18, 3  ;;  %v8834_v5 = vrot.slane %v8832_v48, 4  ;;  %v5974_v62 = vmax.bf16 %v5910_v25, %v5169_v15  ;;  %v17106_v33 = vadd.f32 %v4098_v22, %v3522_v7  ;;  %v20990_v18 = vld [vmem:[#allocation129_spill] sm:$0xff]  ;;  %v11224_v25 = vpop.f32.mrb[173].mxu1 }
 0x314   : > { %v17095_v41 = vrot.slane %v20983_v56, 1  ;;  %v17104_v8 = vor.u32 %v20984_v14, %v17001_v61  ;;  %v7344_v57 = vsel %vm2780_vm10, %v7339_v29, %v7343_v46  ;;  %v2952_v56 = vsel %vm2780_vm10, %v20987_v54, %v20986_v26  ;;  %v4101_v14 = vpop.f32.mrb[174].mxu0  ;;  %v3330_v51 = vpop.f32.mrb[174].mxu1  ;;  %v20993_v54 = vld [vmem:[#allocation104_spill] sm:$0xff] }
 0x315   : > { %20985 = vst [vmem:[#allocation27_spill] sm:$0xff] %v17106_v33  ;;  %v20988_v6 = vrot.slane %v20972_v52, 1  ;;  %v20989_v3 = vrot.slane %v20955_v21, 1  ;;  %v3524_v48 = vadd.f32 %v3327_v1, %v20990_v18  ;;  %v17118_v7 = vor.u32 %v8834_v5, %v8831_v24  ;;  %v11331_v31 = vpop.f32.mrb[175].mxu0 }
 0x316   : > { %v6698_v15 = vmax.bf16 %v16945_v20, %v5974_v62  ;;  %v3052_v22 = vmax.bf16 %v2952_v56, %v1765_v63  ;;  %v17121_v29 = vadd.f32 %v4101_v14, %v3523_v53  ;;  %v20992_v26 = vrot.slane %v16945_v20, 1  ;;  %v20995_v63 = vld [vmem:[#allocation130_spill] sm:$0xff]  ;;  %v11225_v62 = vpop.f32.mrb[175].mxu1  ;;  %v17136_v56 = vld [vmem:[#allocation2 + $0x48] sm:$0xff] }
 0x317   : > { %v3644_v10 = vsel %vm3601_vm4, %v20989_v3, %v20988_v6  ;;  %v17128_v3 = vld [vmem:[#allocation3 + $0xb0] sm:$0xff]  ;;  %v20994_v24 = vshrl.u32 %v20993_v54, 16  ;;  %v17133_v6 = vld [vmem:[#allocation3 + $0xc0] sm:$0xff]  ;;  %v3525_v53 = vadd.f32 %v3330_v51, %v20995_v63  ;;  %v17141_v14 = vsel %vm2194_vm3, %v17035_v55, %v17118_v7 }
 0x318   : > { %20991 = vst [vmem:[#allocation33_spill] sm:$0xff] %v17121_v29  ;;  %v8040_v21 = vsel %vm3601_vm4, %v20992_v26, %v20206_v47  ;;  %v20205_v1 = vrot.slane %v17128_v3, 4  ;;  %20996 = vst [vmem:[#allocation10_spill] sm:$0xff] %v17141_v14  ;;  %v7451_v18 = vmax.bf16 %v7344_v57, %v6698_v15  ;;  %v3705_v25 = vmax.bf16 %v3644_v10, %v3052_v22  ;;  %v12190_v55 = vld [vmem:[#allocation2 + $0x28] sm:$0xff]  ;;  %v4106_v47 = vpop.f32.mrb[176].mxu0 }
 0x319   : > { %v5062_v5 = vrot.slane %v20994_v24, 4  ;;  %v20997_v31 = vrot.slane %v17031_v50, 4  ;;  %v20998_v51 = vshll.u32 %v20993_v54, 16  ;;  %v20207_v63 = vrot.slane %v16945_v20, 5  ;;  %11443 = vmatmul.mubr.msk.bf16.gmra.mrb[24].mxu1 %vm472_vm8, %v12190_v55  ;;  %v11334_v14 = vpop.f32.mrb[177].mxu0 }
 0x31a   : > { %v7345_v62 = vshrl.u32 %v17053_v42, 16  ;;  %v8102_v2 = vmax.bf16 %v8040_v21, %v7451_v18  ;;  %v7349_v10 = vshll.u32 %v17133_v6, 16  ;;  %11446 = vmatprep.mubr.msk.bf16.mxu1 %vm12233_vm6, %v20406_v19  ;;  %v20999_v22 = vshll.u32 %v16986_v34, 16  ;;  %v4109_v23 = vpop.f32.mrb[178].mxu0 }
 0x31b   : > { %v4449_v26 = vsel %vm1804_vm0, %v20997_v31, %v20205_v1  ;;  %v5065_v24 = vrot.slane %v20998_v51, 5  ;;  %v21000_v18 = vrot.slane %v16859_v30, 5  ;;  %v3335_v51 = vpop.f32.mrb[176].mxu1  ;;  %v5243_v30 = vsel %vm2780_vm10, %v17078_v32, %v17001_v61 }
 0x31c   : > { %v4510_v57 = vmax.bf16 %v4449_v26, %v3705_v25  ;;  %v17163_v31 = vrot.slane %v20999_v22, 1  ;;  %v8650_v21 = vsel %vm8622_vm14, %v8102_v2, 0  ;;  %v7347_v26 = vor.u32 %v7345_v62, %v7343_v46  ;;  %v11228_v29 = vpop.f32.mrb[177].mxu1  ;;  %v21005_v62 = vld [vmem:[#allocation52_spill] sm:$0xff]  ;;  %11553 = vmatmul.mubr.msk.bf16.gmra.mrb[28].mxu0 %vm472_vm8, %v5243_v30 }
 0x31d   : > { %v17167_v1 = vor.u32 %v5065_v24, %v5062_v5  ;;  %v5912_v25 = vsel %vm5871_vm7, %v21000_v18, %v20207_v63  ;;  %v7351_v15 = vrot.slane %v7349_v10, 1  ;;  %v17176_v22 = vadd.f32 %v4106_v47, %v3524_v48  ;;  %v21002_v24 = vld [vmem:[#allocation132_spill] sm:$0xff]  ;;  %v21008_v63 = vld [vmem:[#allocation109_spill] sm:$0xff]  ;;  %11556 = vmatprep.mubr.msk.bf16.mxu0 %vm12233_vm6, %v20406_v19 }
 0x31e   : > { %v8838_v59 = vshrl.u32 %v8650_v21, 16  ;;  %v8841_v55 = vshll.u32 %v8650_v21, 16  ;;  %v3526_v2 = vadd.f32 %v3335_v51, %v21002_v24  ;;  %v21003_v47 = vrot.slane %v17133_v6, 1  ;;  %v3338_v21 = vpop.f32.mrb[178].mxu1  ;;  %v21007_v24 = vld [vmem:[#allocation133_spill] sm:$0xff] }
 0x31f   : > { %21001 = vst [vmem:[#allocation76_spill] sm:$0xff] %v17176_v22  ;;  %v5067_v5 = vsel %vm3063_vm12, %v17061_v36, %v17167_v1  ;;  %v21004_v48 = vrot.slane %v17053_v42, 1  ;;  %vm8623_vm13 = vcmp.ne.s16.totalorder %v21005_v62, 0  ;;  %v17191_v10 = vadd.f32 %v4109_v23, %v3525_v53  ;;  %v11335_v36 = vpop.f32.mrb[179].mxu0  ;;  %v11229_v32 = vpop.f32.mrb[179].mxu1  ;;  %v21009_v22 = vld [vmem:[#allocation111_spill] sm:$0xff] }
 0x320   : > { %v5170_v46 = vmax.bf16 %v5067_v5, %v4510_v57  ;;  %v8840_v18 = vrot.slane %v8838_v59, 3  ;;  %v8843_v51 = vrot.slane %v8841_v55, 4  ;;  %v1766_v29 = vmax.bf16 %v20681_v0, %v17031_v50 }
 0x321   : > { %v8042_v14 = vsel %vm3601_vm4, %v21004_v48, %v21003_v47  ;;  %21006 = vst [vmem:[#allocation80_spill] sm:$0xff] %v17191_v10  ;;  %v3527_v61 = vadd.f32 %v3338_v21, %v21007_v24  ;;  %v7352_v5 = vsel %vm2780_vm10, %v7347_v26, %v7351_v15  ;;  %v2960_v47 = vsel %vm2780_vm10, %v21009_v22, %v21008_v63  ;;  %v17208_v48 = vld [vmem:[#allocation3 + $0xb8] sm:$0xff]  ;;  %v17211_v26 = vld [vmem:[#allocation3 + $0xc8] sm:$0xff] }
 0x322   : > { %v5975_v57 = vmax.bf16 %v5912_v25, %v5170_v46  ;;  %v17201_v53 = vor.u32 %v8843_v51, %v8840_v18  ;;  %v3053_v23 = vmax.bf16 %v2960_v47, %v1766_v29  ;;  %v21010_v59 = vrot.slane %v20993_v54, 1  ;;  %v12192_v46 = vld [vmem:[#allocation2 + $0x30] sm:$0xff]  ;;  %v21012_v22 = vld [vmem:[#allocation106_spill] sm:$0xff]  ;;  %v4114_v47 = vpop.f32.mrb[180].mxu0  ;;  %v3343_v18 = vpop.f32.mrb[180].mxu1 }
 0x323   : > { %v21011_v55 = vrot.slane %v20972_v52, 1  ;;  %v20208_v25 = vrot.slane %v17208_v48, 4  ;;  %11447 = vmatmul.mubr.msk.bf16.gmra.mrb[28].mxu1 %vm472_vm8, %v12192_v46  ;;  %v21013_v30 = vshrl.u32 %v21012_v22, 16  ;;  %v21014_v52 = vshll.u32 %v21012_v22, 16  ;;  %v17240_v46 = vld [vmem:[#allocation2 + $0x50] sm:$0xff] }
 0x324   : > { %v6699_v63 = vmax.bf16 %v17053_v42, %v5975_v57  ;;  %11450 = vmatprep.mubr.msk.bf16.mxu1 %vm12233_vm6, %v20406_v19  ;;  %v17227_v51 = vsel %vm2194_vm3, %v17118_v7, %v17201_v53  ;;  %v21016_v24 = vrot.slane %v17128_v3, 4  ;;  %v7353_v57 = vshrl.u32 %v17133_v6, 16 }
 0x325   : > { %v3646_v50 = vsel %vm3601_vm4, %v21011_v55, %v21010_v59  ;;  %v5071_v36 = vrot.slane %v21013_v30, 4  ;;  %v5074_v21 = vrot.slane %v21014_v52, 5  ;;  %21015 = vst [vmem:[#allocation69_spill] sm:$0xff] %v17227_v51  ;;  %v21017_v59 = vshrl.u32 %v16861_v35, 16  ;;  %v11338_v52 = vpop.f32.mrb[181].mxu0 }
 0x326   : > { %v3706_v29 = vmax.bf16 %v3646_v50, %v3053_v23  ;;  %v4451_v32 = vsel %vm1804_vm0, %v21016_v24, %v20208_v25  ;;  %v7452_v30 = vmax.bf16 %v7352_v5, %v6699_v63  ;;  %v7357_v23 = vshll.u32 %v17211_v26, 16  ;;  %v4117_v10 = vpop.f32.mrb[182].mxu0  ;;  %v11232_v5 = vpop.f32.mrb[181].mxu1 }
 0x327   : > { %v17238_v55 = vor.u32 %v21017_v59, %v17095_v41  ;;  %v17242_v7 = vor.u32 %v5074_v21, %v5071_v36  ;;  %v17245_v50 = vadd.f32 %v4114_v47, %v3526_v2  ;;  %v21018_v25 = vrot.slane %v17053_v42, 5 }
 0x328   : > { %v4511_v24 = vmax.bf16 %v4451_v32, %v3706_v29  ;;  %v21019_v51 = vrot.slane %v16945_v20, 5  ;;  %v7355_v59 = vor.u32 %v7353_v57, %v7351_v15  ;;  %v3528_v33 = vadd.f32 %v3343_v18, %v15524_v16  ;;  %v11339_v29 = vpop.f32.mrb[183].mxu0  ;;  %v3346_v32 = vpop.f32.mrb[182].mxu1 }
 0x329   : > { %v8103_v63 = vmax.bf16 %v8042_v14, %v7452_v30  ;;  %v5076_v2 = vsel %vm3063_vm12, %v17167_v1, %v17242_v7  ;;  %v17256_v36 = vrot.slane %v7357_v23, 1  ;;  %v17258_v21 = vadd.f32 %v4117_v10, %v3527_v61  ;;  %v11233_v1 = vpop.f32.mrb[183].mxu1  ;;  %v12193_v23 = vld [vmem:[#allocation2 + $0x38] sm:$0xff] }
 0x32a   : > { %v5914_v35 = vsel %vm5871_vm7, %v21019_v51, %v21018_v25  ;;  %v5272_v20 = vshll.u32 %v17240_v46, 16  ;;  %v5171_v15 = vmax.bf16 %v5076_v2, %v4511_v24  ;;  %v21020_v51 = vld [vmem:[#allocation53_spill] sm:$0xff]  ;;  %v5251_v16 = vsel %vm2780_vm10, %v17104_v8, %v17095_v41  ;;  %v21021_v41 = vld [vmem:[#allocation114_spill] sm:$0xff]  ;;  %v21022_v8 = vld [vmem:[#allocation112_spill] sm:$0xff] }
 0x32b   : > { %vm8624_vm11 = vcmp.ne.s16.totalorder %v21020_v51, 0  ;;  %v3529_v14 = vadd.f32 %v3346_v32, %v15529_v58  ;;  %v8651_v10 = vsel %vm8623_vm13, %v8103_v63, 0  ;;  %v8043_v61 = vrot.slane %v17211_v26, 1  ;;  %11557 = vmatmul.mubr.msk.bf16.gmra.mrb[32].mxu0 %vm472_vm8, %v5251_v16  ;;  %11451 = vmatmul.mubr.msk.bf16.gmra.mrb[32].mxu1 %vm472_vm8, %v12193_v23  ;;  %v4122_v32 = vpop.f32.mrb[184].mxu0 }
 0x32c   : > { %v8847_v18 = vshrl.u32 %v8651_v10, 16  ;;  %v8850_v57 = vshll.u32 %v8651_v10, 16  ;;  %v5976_v47 = vmax.bf16 %v5914_v35, %v5171_v15  ;;  %v1767_v30 = vmax.bf16 %v20681_v0, %v17128_v3  ;;  %11560 = vmatprep.mubr.msk.bf16.mxu0 %vm12233_vm6, %v20406_v19  ;;  %v17286_v3 = vld [vmem:[#allocation3 + $0xc0] sm:$0xff]  ;;  %11454 = vmatprep.mubr.msk.bf16.mxu1 %vm12233_vm6, %v20406_v19 }
 0x32d   : > { %v7360_v58 = vsel %vm2780_vm10, %v7355_v59, %v17256_v36  ;;  %v2968_v62 = vsel %vm2780_vm10, %v21022_v8, %v21021_v41  ;;  %v21023_v52 = vrot.slane %v21012_v22, 1  ;;  %v21024_v24 = vrot.slane %v20993_v54, 1  ;;  %v21027_v10 = vld [vmem:[#allocation113_spill] sm:$0xff] }
 0x32e   : > { %v20209_v5 = vrot.slane %v17286_v3, 4  ;;  %v8849_v63 = vrot.slane %v8847_v18, 3  ;;  %v8852_v2 = vrot.slane %v8850_v57, 4  ;;  %v6700_v59 = vmax.bf16 %v17133_v6, %v5976_v47  ;;  %v11342_v47 = vpop.f32.mrb[185].mxu0 }
 0x32f   : > { %v3648_v35 = vsel %vm3601_vm4, %v21024_v24, %v21023_v52  ;;  %v3054_v29 = vmax.bf16 %v2968_v62, %v1767_v30  ;;  %v21025_v15 = vshrl.u32 %v16986_v34, 16  ;;  %v21026_v54 = vrot.slane %v17208_v48, 4  ;;  %v3351_v30 = vpop.f32.mrb[184].mxu1  ;;  %v4125_v24 = vpop.f32.mrb[186].mxu0 }
 0x330   : > { %v21028_v23 = vshrl.u32 %v21027_v10, 16  ;;  %v21029_v18 = vshll.u32 %v21027_v10, 16  ;;  %v17304_v8 = vadd.f32 %v4122_v32, %v3528_v33  ;;  %v17306_v62 = vor.u32 %v8852_v2, %v8849_v63  ;;  %v11236_v25 = vpop.f32.mrb[185].mxu1  ;;  %v17317_v32 = vld [vmem:[#allocation3 + $0xd0] sm:$0xff] }
 0x331   : > { %v5262_v16 = vor.u32 %v21025_v15, %v17163_v31  ;;  %v4453_v1 = vsel %vm1804_vm0, %v21026_v54, %v20209_v5  ;;  %v7453_v34 = vmax.bf16 %v7360_v58, %v6700_v59  ;;  %v3707_v52 = vmax.bf16 %v3648_v35, %v3054_v29  ;;  %v11343_v58 = vpop.f32.mrb[187].mxu0  ;;  %v3354_v35 = vpop.f32.mrb[186].mxu1 }
 0x332   : > { %v5080_v41 = vrot.slane %v21028_v23, 4  ;;  %v5083_v57 = vrot.slane %v21029_v18, 5  ;;  %v3530_v15 = vadd.f32 %v3351_v30, %v15582_v37  ;;  %v21030_v54 = vrot.slane %v17133_v6, 1 }
 0x333   : > { %v5915_v33 = vrot.slane %v17133_v6, 5  ;;  %v17319_v63 = vadd.f32 %v4125_v24, %v3529_v14  ;;  %v17324_v37 = vsel %vm2194_vm3, %v17201_v53, %v17306_v62  ;;  %v4512_v2 = vmax.bf16 %v4453_v1, %v3707_v52 }
 0x334   : > { %v8044_v23 = vsel %vm3601_vm4, %v21030_v54, %v8043_v61  ;;  %v17314_v5 = vor.u32 %v5083_v57, %v5080_v41  ;;  %21031 = vst [vmem:[#allocation45_spill] sm:$0xff] %v17324_v37  ;;  %v5259_v59 = vsel %vm2780_vm10, %v17238_v55, %v17163_v31  ;;  %v3531_v29 = vadd.f32 %v3354_v35, %v15596_v13  ;;  %v11237_v41 = vpop.f32.mrb[187].mxu1  ;;  %v21033_v13 = vld [vmem:[#allocation56_spill] sm:$0xff]  ;;  %v12195_v55 = vld [vmem:[#allocation2 + $0x40] sm:$0xff]  ;;  %v4130_v35 = vpop.f32.mrb[188].mxu0 }
 0x335   : > { %v8104_v25 = vmax.bf16 %v8044_v23, %v7453_v34  ;;  %v21032_v18 = vshll.u32 %v17136_v56, 16  ;;  %11561 = vmatmul.mubr.msk.bf16.gmra.mrb[36].mxu0 %vm472_vm8, %v5259_v59  ;;  %v7361_v47 = vshrl.u32 %v17211_v26, 16  ;;  %v7365_v31 = vshll.u32 %v17317_v32, 16  ;;  %11455 = vmatmul.mubr.msk.bf16.gmra.mrb[36].mxu1 %vm472_vm8, %v12195_v55  ;;  %v21035_v59 = vld [vmem:[#allocation117_spill] sm:$0xff]  ;;  %v21036_v41 = vld [vmem:[#allocation116_spill] sm:$0xff] }
 0x336   : > { %v5085_v57 = vsel %vm3063_vm12, %v17242_v7, %v17314_v5  ;;  %vm8625_vm2 = vcmp.ne.s16.totalorder %v21033_v13, 0  ;;  %11564 = vmatprep.mubr.msk.bf16.mxu0 %vm12233_vm6, %v20406_v19  ;;  %v21034_v51 = vrot.slane %v17053_v42, 5  ;;  %v20212_v52 = vrot.slane %v17317_v32, 1  ;;  %11458 = vmatprep.mubr.msk.bf16.mxu1 %vm12233_vm6, %v20406_v19 }
 0x337   : > { %v17332_v14 = vrot.slane %v21032_v18, 1  ;;  %v8652_v53 = vsel %vm8624_vm11, %v8104_v25, 0  ;;  %v5172_v1 = vmax.bf16 %v5085_v57, %v4512_v2  ;;  %v7363_v54 = vor.u32 %v7361_v47, %v17256_v36 }
 0x338   : > { %v8856_v30 = vshrl.u32 %v8652_v53, 16  ;;  %v8859_v7 = vshll.u32 %v8652_v53, 16  ;;  %v5916_v34 = vsel %vm5871_vm7, %v21034_v51, %v5915_v33  ;;  %v17355_v23 = vrot.slane %v7365_v31, 1  ;;  %v11346_v53 = vpop.f32.mrb[189].mxu0 }
 0x339   : > { %v5977_v24 = vmax.bf16 %v5916_v34, %v5172_v1  ;;  %v1768_v58 = vmax.bf16 %v20681_v0, %v17208_v48  ;;  %v5267_v25 = vsel %vm2780_vm10, %v5262_v16, %v17332_v14  ;;  %v2976_v18 = vsel %vm2780_vm10, %v21036_v41, %v21035_v59  ;;  %v3359_v1 = vpop.f32.mrb[188].mxu1  ;;  %v4133_v31 = vpop.f32.mrb[190].mxu0  ;;  %v17389_v41 = vld [vmem:[#allocation3 + $0xd8] sm:$0xff]  ;;  %v21040_v53 = vld [vmem:[#allocation115_spill] sm:$0xff] }
 0x33a   : > { %v8858_v42 = vrot.slane %v8856_v30, 3  ;;  %v8861_v2 = vrot.slane %v8859_v7, 4  ;;  %v17364_v57 = vadd.f32 %v4130_v35, %v3530_v15  ;;  %v7368_v47 = vsel %vm2780_vm10, %v7363_v54, %v17355_v23  ;;  %v11240_v16 = vpop.f32.mrb[189].mxu1  ;;  %v11347_v54 = vpop.f32.mrb[191].mxu0 }
 0x33b   : > { %v6701_v36 = vmax.bf16 %v17211_v26, %v5977_v24  ;;  %v3055_v48 = vmax.bf16 %v2976_v18, %v1768_v58  ;;  %v3532_v55 = vadd.f32 %v3359_v1, %v15641_v49  ;;  %v8046_v15 = vsel %vm3601_vm4, %v8043_v61, %v20212_v52  ;;  %v3362_v58 = vpop.f32.mrb[190].mxu1  ;;  %v17384_v49 = vld [vmem:[#allocation2 + $0x58] sm:$0xff] }
 0x33c   : > { %v17370_v30 = vor.u32 %v8861_v2, %v8858_v42  ;;  %v21037_v7 = vrot.slane %v21027_v10, 1  ;;  %v21038_v51 = vrot.slane %v21012_v22, 1  ;;  %v17382_v24 = vadd.f32 %v4133_v31, %v3531_v29  ;;  %v17386_v2 = vld [vmem:[#allocation3 + $0xc8] sm:$0xff]  ;;  %v11241_v18 = vpop.f32.mrb[191].mxu1 }
 0x33d   : > { %v7454_v35 = vmax.bf16 %v7368_v47, %v6701_v36  ;;  %v20210_v59 = vrot.slane %v17386_v2, 4  ;;  %v3533_v61 = vadd.f32 %v3362_v58, %v15656_v60  ;;  %v17392_v22 = vld [vmem:[#allocation2 + $0x60] sm:$0xff]  ;;  %v21041_v1 = vshrl.u32 %v21040_v53, 16  ;;  %11565 = vmatmul.mubr.msk.bf16.gmra.mrb[40].mxu0 %vm472_vm8, %v5267_v25 }
 0x33e   : > { %v3650_v34 = vsel %vm3601_vm4, %v21038_v51, %v21037_v7  ;;  %v17397_v29 = vsel %vm2194_vm3, %v17306_v62, %v17370_v30  ;;  %v21042_v47 = vshll.u32 %v21040_v53, 16  ;;  %v5274_v31 = vrot.slane %v5272_v20, 1  ;;  %v12197_v51 = vld [vmem:[#allocation2 + $0x48] sm:$0xff]  ;;  %11568 = vmatprep.mubr.msk.bf16.mxu0 %vm12233_vm6, %v20406_v19 }
 0x33f   : > { %v3708_v42 = vmax.bf16 %v3650_v34, %v3055_v48  ;;  %21039 = vst [vmem:[#allocation34_spill] sm:$0xff] %v17397_v29  ;;  %v5089_v36 = vrot.slane %v21041_v1, 4  ;;  %v8105_v60 = vmax.bf16 %v8046_v15, %v7454_v35  ;;  %v21043_v16 = vrot.slane %v17286_v3, 4  ;;  %11459 = vmatmul.mubr.msk.bf16.gmra.mrb[40].mxu1 %vm472_vm8, %v12197_v51 }
 0x340   : > { %v5092_v48 = vrot.slane %v21042_v47, 5  ;;  %v20211_v62 = vrot.slane %v17211_v26, 5  ;;  %v5280_v25 = vshll.u32 %v17384_v49, 16  ;;  %v7373_v20 = vshll.u32 %v17389_v41, 16  ;;  %11462 = vmatprep.mubr.msk.bf16.mxu1 %vm12233_vm6, %v20406_v19  ;;  %v4138_v47 = vpop.f32.mrb[192].mxu0 }
 0x341   : > { %v4455_v7 = vsel %vm1804_vm0, %v21043_v16, %v20210_v59  ;;  %v21044_v15 = vshrl.u32 %v17136_v56, 16  ;;  %v8653_v18 = vsel %vm8625_vm2, %v8105_v60, 0  ;;  %v7369_v1 = vshrl.u32 %v17317_v32, 16  ;;  %v21045_v60 = vld [vmem:[#allocation59_spill] sm:$0xff] }
 0x342   : > { %v4513_v34 = vmax.bf16 %v4455_v7, %v3708_v42  ;;  %v17416_v54 = vor.u32 %v5092_v48, %v5089_v36  ;;  %v8865_v42 = vshrl.u32 %v8653_v18, 16  ;;  %v8868_v36 = vshll.u32 %v8653_v18, 16  ;;  %v3367_v7 = vpop.f32.mrb[192].mxu1 }
 0x343   : > { %v5270_v58 = vor.u32 %v21044_v15, %v17332_v14  ;;  %v17431_v16 = vrot.slane %v7373_v20, 1  ;;  %v17433_v56 = vadd.f32 %v4138_v47, %v3532_v55  ;;  %v11350_v14 = vpop.f32.mrb[193].mxu0  ;;  %v5918_v13 = vsel %vm5871_vm7, %v5915_v33, %v20211_v62  ;;  %v11244_v20 = vpop.f32.mrb[193].mxu1 }
 0x344   : > { %v5094_v48 = vsel %vm3063_vm12, %v17314_v5, %v17416_v54  ;;  %vm8626_vm9 = vcmp.ne.s16.totalorder %v21045_v60, 0  ;;  %v4141_v18 = vpop.f32.mrb[194].mxu0  ;;  %v3534_v5 = vadd.f32 %v3367_v7, %v15700_v39  ;;  %v8867_v35 = vrot.slane %v8865_v42, 3  ;;  %v21046_v42 = vld [vmem:[#allocation118_spill] sm:$0xff] }
 0x345   : > { %v5275_v51 = vsel %vm2780_vm10, %v5270_v58, %v5274_v31  ;;  %v5173_v15 = vmax.bf16 %v5094_v48, %v4513_v34  ;;  %v8870_v55 = vrot.slane %v8868_v36, 4  ;;  %v7371_v47 = vor.u32 %v7369_v1, %v17355_v23  ;;  %v11351_v58 = vpop.f32.mrb[195].mxu0  ;;  %v3370_v34 = vpop.f32.mrb[194].mxu1  ;;  %v21047_v23 = vld [vmem:[#allocation119_spill] sm:$0xff] }
 0x346   : > { %v17444_v14 = vadd.f32 %v4141_v18, %v3533_v61  ;;  %v20213_v59 = vrot.slane %v17389_v41, 1  ;;  %v1769_v6 = vmax.bf16 %v20681_v0, %v17286_v3  ;;  %v3535_v33 = vadd.f32 %v3370_v34, %v15712_v27  ;;  %v11245_v62 = vpop.f32.mrb[195].mxu1  ;;  %11569 = vmatmul.mubr.msk.bf16.gmra.mrb[44].mxu0 %vm472_vm8, %v5275_v51  ;;  %v17461_v3 = vld [vmem:[#allocation3 + $0xd0] sm:$0xff]  ;;  %v21051_v18 = vld [vmem:[#allocation66_spill] sm:$0xff] }
 0x347   : > { %v5978_v48 = vmax.bf16 %v5918_v13, %v5173_v15  ;;  %v17450_v52 = vor.u32 %v8870_v55, %v8867_v35  ;;  %v7376_v39 = vsel %vm2780_vm10, %v7371_v47, %v17431_v16  ;;  %v2984_v61 = vsel %vm2780_vm10, %v21047_v23, %v21046_v42  ;;  %v17464_v62 = vld [vmem:[#allocation3 + $0xe0] sm:$0xff]  ;;  %v12199_v35 = vld [vmem:[#allocation2 + $0x50] sm:$0xff]  ;;  %11572 = vmatprep.mubr.msk.bf16.mxu0 %vm12233_vm6, %v20406_v19  ;;  %v4146_v23 = vpop.f32.mrb[196].mxu0 }
 0x348   : > { %v17458_v1 = vrot.slane %v5280_v25, 1  ;;  %v3056_v7 = vmax.bf16 %v2984_v61, %v1769_v6  ;;  %v4456_v27 = vrot.slane %v17461_v3, 4  ;;  %11463 = vmatmul.mubr.msk.bf16.gmra.mrb[44].mxu1 %vm472_vm8, %v12199_v35  ;;  %v21049_v51 = vrot.slane %v21040_v53, 1 }
 0x349   : > { %v6702_v36 = vmax.bf16 %v17317_v32, %v5978_v48  ;;  %v17472_v25 = vsel %vm2194_vm3, %v17370_v30, %v17450_v52  ;;  %v21050_v15 = vrot.slane %v21027_v10, 1  ;;  %v21052_v20 = vshrl.u32 %v21051_v18, 16  ;;  %11466 = vmatprep.mubr.msk.bf16.mxu1 %vm12233_vm6, %v20406_v19 }
 0x34a   : > { %21048 = vst [vmem:[#allocation78_spill] sm:$0xff] %v17472_v25  ;;  %v21053_v47 = vshll.u32 %v21051_v18, 16  ;;  %v21054_v34 = vshrl.u32 %v17240_v46, 16  ;;  %v21055_v10 = vrot.slane %v17317_v32, 1  ;;  %v21056_v35 = vrot.slane %v17386_v2, 4 }
 0x34b   : > { %v3652_v13 = vsel %vm3601_vm4, %v21050_v15, %v21049_v51  ;;  %v5098_v55 = vrot.slane %v21052_v20, 4  ;;  %v7455_v30 = vmax.bf16 %v7376_v39, %v6702_v36  ;;  %v7381_v51 = vshll.u32 %v17464_v62, 16  ;;  %v11354_v36 = vpop.f32.mrb[197].mxu0 }
 0x34c   : > { %v5101_v58 = vrot.slane %v21053_v47, 5  ;;  %v5278_v48 = vor.u32 %v21054_v34, %v5274_v31  ;;  %v3709_v6 = vmax.bf16 %v3652_v13, %v3056_v7  ;;  %v8048_v61 = vsel %vm3601_vm4, %v21055_v10, %v20213_v59  ;;  %v3375_v7 = vpop.f32.mrb[196].mxu1  ;;  %v4149_v47 = vpop.f32.mrb[198].mxu0  ;;  %v21057_v34 = vld [vmem:[#allocation12_spill] sm:$0xff] }
 0x34d   : > { %v4457_v46 = vsel %vm1804_vm0, %v21056_v35, %v4456_v27  ;;  %v17499_v39 = vadd.f32 %v4146_v23, %v3534_v5  ;;  %v8106_v13 = vmax.bf16 %v8048_v61, %v7455_v30  ;;  %v3536_v10 = vadd.f32 %v3375_v7, %v21057_v34  ;;  %v11248_v59 = vpop.f32.mrb[197].mxu1  ;;  %v11355_v23 = vpop.f32.mrb[199].mxu0 }
 0x34e   : > { %v5102_v31 = vor.u32 %v5101_v58, %v5098_v55  ;;  %v5283_v15 = vsel %vm2780_vm10, %v5278_v48, %v17458_v1  ;;  %v4514_v20 = vmax.bf16 %v4457_v46, %v3709_v6  ;;  %v7377_v55 = vshrl.u32 %v17389_v41, 16  ;;  %v3378_v35 = vpop.f32.mrb[198].mxu1  ;;  %v21061_v46 = vld [vmem:[#allocation60_spill] sm:$0xff]  ;;  %v12200_v23 = vld [vmem:[#allocation2 + $0x58] sm:$0xff] }
 0x34f   : > { %v17507_v58 = vrot.slane %v7381_v51, 1  ;;  %v17509_v5 = vadd.f32 %v4149_v47, %v3535_v33  ;;  %v8654_v48 = vsel %vm8626_vm9, %v8106_v13, 0  ;;  %v21059_v6 = vrot.slane %v17317_v32, 5  ;;  %v11249_v51 = vpop.f32.mrb[199].mxu1  ;;  %11573 = vmatmul.mubr.msk.bf16.gmra.mrb[48].mxu0 %vm472_vm8, %v5283_v15 }
 0x350   : > { %v5103_v42 = vsel %vm3063_vm12, %v17416_v54, %v5102_v31  ;;  %v21060_v61 = vrot.slane %v17211_v26, 5  ;;  %vm8627_vm1 = vcmp.ne.s16.totalorder %v21061_v46, 0  ;;  %v21062_v54 = vld [vmem:[#allocation50_spill] sm:$0xff]  ;;  %v8874_v7 = vshrl.u32 %v8654_v48, 16  ;;  %v21063_v26 = vld [vmem:[#allocation77_spill] sm:$0xff]  ;;  %11467 = vmatmul.mubr.msk.bf16.gmra.mrb[48].mxu1 %vm472_vm8, %v12200_v23  ;;  %11576 = vmatprep.mubr.msk.bf16.mxu0 %vm12233_vm6, %v20406_v19  ;;  %v4154_v51 = vpop.f32.mrb[200].mxu0 }
 0x351   : > { %21058 = vst [vmem:[#allocation82_spill] sm:$0xff] %v17509_v5  ;;  %v5174_v30 = vmax.bf16 %v5103_v42, %v4514_v20  ;;  %v3537_v36 = vadd.f32 %v3378_v35, %v21062_v54  ;;  %v8877_v33 = vshll.u32 %v8654_v48, 16  ;;  %v7379_v47 = vor.u32 %v7377_v55, %v17431_v16  ;;  %v21064_v20 = vld [vmem:[#allocation120_spill] sm:$0xff]  ;;  %v21065_v48 = vld [vmem:[#allocation122_spill] sm:$0xff]  ;;  %11470 = vmatprep.mubr.msk.bf16.mxu1 %vm12233_vm6, %v20406_v19 }
 0x352   : > { %v5920_v59 = vsel %vm5871_vm7, %v21060_v61, %v21059_v6  ;;  %v8049_v42 = vrot.slane %v17464_v62, 1  ;;  %v1770_v13 = vmax.bf16 %v20681_v0, %v17386_v2  ;;  %v2992_v34 = vsel %vm2780_vm10, %v21064_v20, %v21063_v26  ;;  %v21067_v2 = vld [vmem:[#allocation121_spill] sm:$0xff]  ;;  %v21068_v6 = vld [vmem:[#allocation123_spill] sm:$0xff] }
 0x353   : > { %v5979_v60 = vmax.bf16 %v5920_v59, %v5174_v30  ;;  %v5284_v16 = vshrl.u32 %v17384_v49, 16  ;;  %v8876_v55 = vrot.slane %v8874_v7, 3  ;;  %v8879_v15 = vrot.slane %v8877_v33, 4  ;;  %v21066_v30 = vld [vmem:[#allocation124_spill] sm:$0xff] }
 0x354   : > { %v7384_v35 = vsel %vm2780_vm10, %v7379_v47, %v17507_v58  ;;  %v17536_v0 = vor.u32 %v21066_v30, %v21065_v48  ;;  %v8916_v61 = vor.u32 %v21068_v6, %v21067_v2  ;;  %v3057_v54 = vmax.bf16 %v2992_v34, %v1770_v13  ;;  %v17546_v47 = vld [vmem:[#allocation2 + $0x68] sm:$0xff]  ;;  %v11358_v2 = vpop.f32.mrb[201].mxu0 }
 0x355   : > { %v6703_v59 = vmax.bf16 %v17389_v41, %v5979_v60  ;;  %v5286_v49 = vor.u32 %v5284_v16, %v17458_v1  ;;  %v21069_v7 = vshll.u32 %v17392_v22, 16  ;;  %v8880_v26 = vor.u32 %v8879_v15, %v8876_v55  ;;  %v3383_v60 = vpop.f32.mrb[200].mxu1  ;;  %v4157_v6 = vpop.f32.mrb[202].mxu0  ;;  %v21074_v55 = vld [vmem:[#allocation14_spill] sm:$0xff] }
 0x356   : > { %v21070_v20 = vrot.slane %v21051_v18, 1  ;;  %v21071_v23 = vrot.slane %v21040_v53, 1  ;;  %v17553_v30 = vadd.f32 %v4154_v51, %v3536_v10  ;;  %v21073_v1 = vrot.slane %v17389_v41, 1  ;;  %v11252_v18 = vpop.f32.mrb[201].mxu1  ;;  %v21076_v10 = vld [vmem:[#allocation86_spill] sm:$0xff] }
 0x357   : > { %v5290_v33 = vrot.slane %v21069_v7, 1  ;;  %v7456_v13 = vmax.bf16 %v7384_v35, %v6703_v59  ;;  %v3538_v15 = vadd.f32 %v3383_v60, %v21074_v55  ;;  %v17563_v53 = vsel %vm2194_vm3, %v17450_v52, %v8880_v26  ;;  %v21078_v59 = vld [vmem:[#allocation95_spill] sm:$0xff] }
 0x358   : > { %v3654_v48 = vsel %vm3601_vm4, %v21071_v23, %v21070_v20  ;;  %21072 = vst [vmem:[#allocation74_spill] sm:$0xff] %v17553_v30  ;;  %v8050_v34 = vsel %vm3601_vm4, %v21073_v1, %v8049_v42  ;;  %21075 = vst [vmem:[#allocation13_spill] sm:$0xff] %v17563_v53  ;;  %v21077_v51 = vrot.slane %v21076_v10, 4  ;;  %v5112_v41 = vsel %vm3063_vm12, %v5102_v31, %v21078_v59  ;;  %v3386_v20 = vpop.f32.mrb[202].mxu1  ;;  %v21080_v60 = vld [vmem:[#allocation15_spill] sm:$0xff] }
 0x359   : > { %v3710_v16 = vmax.bf16 %v3654_v48, %v3057_v54  ;;  %v17572_v7 = vadd.f32 %v4157_v6, %v3537_v36  ;;  %v11359_v54 = vpop.f32.mrb[203].mxu0  ;;  %v5296_v23 = vshll.u32 %v17546_v47, 16  ;;  %v8107_v48 = vmax.bf16 %v8050_v34, %v7456_v13  ;;  %v11253_v55 = vpop.f32.mrb[203].mxu1  ;;  %v12201_v6 = vld [vmem:[#allocation2 + $0x60] sm:$0xff] }
 0x35a   : > { %v4459_v35 = vsel %vm1804_vm0, %v4456_v27, %v21077_v51  ;;  %v5291_v52 = vsel %vm2780_vm10, %v5286_v49, %v5290_v33  ;;  %v3539_v1 = vadd.f32 %v3386_v20, %v21080_v60  ;;  %v7385_v3 = vshrl.u32 %v17464_v62, 16  ;;  %11471 = vmatmul.mubr.msk.bf16.gmra.mrb[52].mxu1 %vm472_vm8, %v12201_v6  ;;  %v4162_v51 = vpop.f32.mrb[204].mxu0 }
 0x35b   : > { %21079 = vst [vmem:[#allocation7_spill] sm:$0xff] %v17572_v7  ;;  %v4515_v2 = vmax.bf16 %v4459_v35, %v3710_v16  ;;  %v17580_v27 = vsel %vm2194_vm3, %v17536_v0, %v8916_v61  ;;  %11577 = vmatmul.mubr.msk.bf16.gmra.mrb[52].mxu0 %vm472_vm8, %v5291_v52  ;;  %v8655_v31 = vsel %vm8627_vm1, %v8107_v48, 0  ;;  %v21082_v34 = vrot.slane %v21076_v10, 5  ;;  %11474 = vmatprep.mubr.msk.bf16.mxu1 %vm12233_vm6, %v20406_v19  ;;  %v11362_v10 = vpop.f32.mrb[205].mxu0 }
 0x35c   : > { %21081 = vst [vmem:[#allocation35_spill] sm:$0xff] %v17580_v27  ;;  %11580 = vmatprep.mubr.msk.bf16.mxu0 %vm12233_vm6, %v20406_v19  ;;  %v8883_v49 = vshrl.u32 %v8655_v31, 16  ;;  %v8886_v13 = vshll.u32 %v8655_v31, 16  ;;  %v21083_v16 = vrot.slane %v17317_v32, 5  ;;  %v7387_v18 = vor.u32 %v7385_v3, %v17507_v58  ;;  %v3391_v32 = vpop.f32.mrb[204].mxu1  ;;  %v4165_v52 = vpop.f32.mrb[206].mxu0 }
 0x35d   : > { %v5175_v36 = vmax.bf16 %v5112_v41, %v4515_v2  ;;  %v5292_v35 = vshrl.u32 %v17392_v22, 16  ;;  %v5298_v59 = vrot.slane %v5296_v23, 1  ;;  %v17597_v41 = vld [vmem:[#allocation2 + $0x70] sm:$0xff]  ;;  %v17599_v48 = vadd.f32 %v4162_v51, %v3538_v15  ;;  %v21085_v58 = vld [vmem:[#allocation47_spill] sm:$0xff]  ;;  %v11256_v55 = vpop.f32.mrb[205].mxu1  ;;  %v11363_v6 = vpop.f32.mrb[207].mxu0 }
 0x35e   : > { %v5922_v61 = vsel %vm5871_vm7, %v21083_v16, %v21082_v34  ;;  %v8885_v54 = vrot.slane %v8883_v49, 3  ;;  %v8888_v20 = vrot.slane %v8886_v13, 4  ;;  %v3540_v60 = vadd.f32 %v3391_v32, %v21085_v58  ;;  %v3394_v49 = vpop.f32.mrb[206].mxu1  ;;  %v21088_v16 = vld [vmem:[#allocation6_spill] sm:$0xff]  ;;  %v4170_v10 = vpop.f32.mrb[208].mxu0  ;;  %v21114_v27 = vld [vmem:[#allocation68_spill] sm:$0xff] }
 0x35f   : > { %v5980_v46 = vmax.bf16 %v5922_v61, %v5175_v36  ;;  %21084 = vst [vmem:[#allocation84_spill] sm:$0xff] %v17599_v48  ;;  %v5294_v3 = vor.u32 %v5292_v35, %v5290_v33  ;;  %v21086_v36 = vld [vmem:[#allocation100_spill] sm:$0xff]  ;;  %v17605_v23 = vadd.f32 %v4165_v52, %v3539_v1  ;;  %v5304_v15 = vshll.u32 %v17597_v41, 16  ;;  %v21090_v33 = vld [vmem:[#allocation94_spill] sm:$0xff]  ;;  %v11366_v58 = vpop.f32.mrb[209].mxu0 }
 0x360   : > { %v8889_v31 = vor.u32 %v8888_v20, %v8885_v54  ;;  %v7392_v22 = vsel %vm2780_vm10, %v7387_v18, %v21086_v36  ;;  %v3541_v61 = vadd.f32 %v3394_v49, %v21088_v16  ;;  %v21091_v35 = vrot.slane %v21090_v33, 1  ;;  %v21092_v54 = vld [vmem:[#allocation63_spill] sm:$0xff]  ;;  %v4173_v36 = vpop.f32.mrb[210].mxu0  ;;  %v21128_v48 = vld [vmem:[#allocation134_spill] sm:$0xff] }
 0x361   : > { %v6704_v2 = vmax.bf16 %v17464_v62, %v5980_v46  ;;  %21087 = vst [vmem:[#allocation83_spill] sm:$0xff] %v17605_v23  ;;  %v5299_v34 = vsel %vm2780_vm10, %v5294_v3, %v5298_v59  ;;  %v11257_v46 = vpop.f32.mrb[207].mxu1  ;;  %vm8628_vm7 = vcmp.ne.s16.totalorder %v21092_v54, 0  ;;  %v12202_v20 = vld [vmem:[#allocation2 + $0x68] sm:$0xff]  ;;  %v5300_v62 = vshrl.u32 %v17546_v47, 16  ;;  %v5191_v3 = vld [vmem:[#allocation2 + $0x78] sm:$0xff] }
 0x362   : > { %v17611_v51 = vsel %vm2194_vm3, %v8880_v26, %v8889_v31  ;;  %v8052_v1 = vsel %vm3601_vm4, %v8049_v42, %v21091_v35  ;;  %11475 = vmatmul.mubr.msk.bf16.gmra.mrb[56].mxu1 %vm472_vm8, %v12202_v20  ;;  %v5306_v32 = vrot.slane %v5304_v15, 1  ;;  %v17626_v52 = vadd.f32 %v4170_v10, %v3540_v60  ;;  %v3399_v55 = vpop.f32.mrb[208].mxu1  ;;  %v11367_v33 = vpop.f32.mrb[211].mxu0  ;;  %v21096_v15 = vld [vmem:[#allocation25_spill] sm:$0xff]  ;;  %v12203_v20 = vld [vmem:[#allocation2 + $0x70] sm:$0xff] }
 0x363   : > { %v7457_v13 = vmax.bf16 %v7392_v22, %v6704_v2  ;;  %21089 = vst [vmem:[#allocation17_spill] sm:$0xff] %v17611_v51  ;;  %11581 = vmatmul.mubr.msk.bf16.gmra.mrb[56].mxu0 %vm472_vm8, %v5299_v34  ;;  %11478 = vmatprep.mubr.msk.bf16.mxu1 %vm12233_vm6, %v20406_v19  ;;  %v21094_v22 = vld [vmem:[#allocation18_spill] sm:$0xff]  ;;  %v11260_v49 = vpop.f32.mrb[209].mxu1  ;;  %v17629_v46 = vadd.f32 %v4173_v36, %v3541_v61  ;;  %v5308_v10 = vshrl.u32 %v17597_v41, 16 }
 0x364   : > { %11584 = vmatprep.mubr.msk.bf16.mxu0 %vm12233_vm6, %v20406_v19  ;;  %21093 = vst [vmem:[#allocation81_spill] sm:$0xff] %v17626_v52  ;;  %v3542_v6 = vadd.f32 %v3399_v55, %v21094_v22  ;;  %v3402_v35 = vpop.f32.mrb[210].mxu1  ;;  %v21100_v36 = vld [vmem:[#allocation46_spill] sm:$0xff] }
 0x365   : > { %v8108_v18 = vmax.bf16 %v8052_v1, %v7457_v13  ;;  %v5302_v13 = vor.u32 %v5300_v62, %v5298_v59  ;;  %21095 = vst [vmem:[#allocation38_spill] sm:$0xff] %v17629_v46  ;;  %v3543_v1 = vadd.f32 %v3402_v35, %v21096_v15  ;;  %v11261_v60 = vpop.f32.mrb[211].mxu1  ;;  %v5310_v49 = vor.u32 %v5308_v10, %v5306_v32  ;;  %v21102_v35 = vld [vmem:[#allocation37_spill] sm:$0xff] }
 0x366   : > { %v3407_v58 = vpop.f32.mrb[212].mxu1  ;;  %v5316_v15 = vshrl.u32 %v5191_v3, 16 }
 0x367   : > { %v8656_v26 = vsel %vm8628_vm7, %v8108_v18, 0  ;;  %v5307_v47 = vsel %vm2780_vm10, %v5302_v13, %v5306_v32  ;;  %v5312_v18 = vshll.u32 %v5191_v3, 16  ;;  %v3544_v22 = vadd.f32 %v3407_v58, %v21100_v36 }
 0x368   : > { %v8892_v42 = vshrl.u32 %v8656_v26, 16  ;;  %v8895_v2 = vshll.u32 %v8656_v26, 16  ;;  %v4178_v26 = vpop.f32.mrb[212].mxu0 }
 0x369   : > { %v5314_v62 = vrot.slane %v5312_v18, 1 }
 0x36a   : > { %v8894_v34 = vrot.slane %v8892_v42, 3  ;;  %v8897_v16 = vrot.slane %v8895_v2, 4  ;;  %11479 = vmatmul.mubr.msk.bf16.gmra.mrb[60].mxu1 %vm472_vm8, %v12203_v20  ;;  %v17647_v42 = vadd.f32 %v4178_v26, %v3542_v6  ;;  %v11370_v2 = vpop.f32.mrb[213].mxu0  ;;  %v12204_v6 = vld [vmem:[#allocation2 + $0x78] sm:$0xff]  ;;  %v5193_v26 = vld [vmem:[#allocation2 + $0x88] sm:$0xff] }
 0x36b   : > { %11585 = vmatmul.mubr.msk.bf16.gmra.mrb[60].mxu0 %vm472_vm8, %v5307_v47  ;;  %11482 = vmatprep.mubr.msk.bf16.mxu1 %vm12233_vm6, %v20406_v19  ;;  %v4181_v55 = vpop.f32.mrb[214].mxu0  ;;  %v5315_v33 = vsel %vm2780_vm10, %v5310_v49, %v5314_v62  ;;  %v5318_v60 = vor.u32 %v5316_v15, %v5314_v62  ;;  %v21104_v2 = vld [vmem:[#allocation58_spill] sm:$0xff]  ;;  %v5328_v62 = vshll.u32 %v5193_v26, 16 }
 0x36c   : > { %v8898_v54 = vor.u32 %v8897_v16, %v8894_v34  ;;  %11588 = vmatprep.mubr.msk.bf16.mxu0 %vm12233_vm6, %v20406_v19  ;;  %21099 = vst [vmem:[#allocation23_spill] sm:$0xff] %v17647_v42  ;;  %v17650_v13 = vadd.f32 %v4181_v55, %v3543_v1  ;;  %v5192_v16 = vld [vmem:[#allocation2 + $0x80] sm:$0xff] }
 0x36d   : > { %v5320_v32 = vshll.u32 %v5192_v16, 16 }
 0x36e   : > { %v17638_v59 = vsel %vm2194_vm3, %v8889_v31, %v8898_v54  ;;  %v17642_v61 = vsel %vm2194_vm3, %v8898_v54, %v17536_v0  ;;  %v11264_v31 = vpop.f32.mrb[213].mxu1  ;;  %21101 = vst [vmem:[#allocation85_spill] sm:$0xff] %v17650_v13  ;;  %v11371_v0 = vpop.f32.mrb[215].mxu0 }
 0x36f   : > { %21097 = vst [vmem:[#allocation88_spill] sm:$0xff] %v17638_v59  ;;  %21098 = vst [vmem:[#allocation91_spill] sm:$0xff] %v17642_v61  ;;  %v3410_v34 = vpop.f32.mrb[214].mxu1  ;;  %v4186_v1 = vpop.f32.mrb[216].mxu0  ;;  %v5322_v36 = vrot.slane %v5320_v32, 1  ;;  %v21118_v59 = vld [vmem:[#allocation8_spill] sm:$0xff] }
 0x370   : > { %v3545_v47 = vadd.f32 %v3410_v34, %v21102_v35  ;;  %v11265_v41 = vpop.f32.mrb[215].mxu1  ;;  %v17660_v18 = vadd.f32 %v4186_v1, %v3544_v22  ;;  %v11374_v54 = vpop.f32.mrb[217].mxu0  ;;  %v21106_v34 = vld [vmem:[#allocation67_spill] sm:$0xff]  ;;  %v12205_v22 = vld [vmem:[#allocation2 + $0x80] sm:$0xff] }
 0x371   : > { %v3415_v20 = vpop.f32.mrb[216].mxu1  ;;  %v4189_v10 = vpop.f32.mrb[218].mxu0  ;;  %v5323_v0 = vsel %vm2780_vm10, %v5318_v60, %v5322_v36  ;;  %v5324_v41 = vshrl.u32 %v5192_v16, 16  ;;  %v5194_v60 = vld [vmem:[#allocation2 + $0x90] sm:$0xff] }
 0x372   : > { %11483 = vmatmul.mubr.msk.bf16.gmra.mrb[64].mxu1 %vm472_vm8, %v12204_v6  ;;  %21103 = vst [vmem:[#allocation41_spill] sm:$0xff] %v17660_v18  ;;  %v3546_v58 = vadd.f32 %v3415_v20, %v21104_v2  ;;  %v11268_v55 = vpop.f32.mrb[217].mxu1  ;;  %v17663_v31 = vadd.f32 %v4189_v10, %v3545_v47  ;;  %v11375_v49 = vpop.f32.mrb[219].mxu0  ;;  %v5330_v6 = vrot.slane %v5328_v62, 1  ;;  %v21108_v20 = vld [vmem:[#allocation16_spill] sm:$0xff]  ;;  %v5336_v62 = vshll.u32 %v5194_v60, 16 }
 0x373   : > { %11589 = vmatmul.mubr.msk.bf16.gmra.mrb[64].mxu0 %vm472_vm8, %v5315_v33  ;;  %11486 = vmatprep.mubr.msk.bf16.mxu1 %vm12233_vm6, %v20406_v19  ;;  %v3418_v3 = vpop.f32.mrb[218].mxu1  ;;  %v4194_v47 = vpop.f32.mrb[220].mxu0  ;;  %v5326_v55 = vor.u32 %v5324_v41, %v5322_v36 }
 0x374   : > { %11592 = vmatprep.mubr.msk.bf16.mxu0 %vm12233_vm6, %v20406_v19  ;;  %21105 = vst [vmem:[#allocation22_spill] sm:$0xff] %v17663_v31  ;;  %v3547_v33 = vadd.f32 %v3418_v3, %v21106_v34  ;;  %v11269_v35 = vpop.f32.mrb[219].mxu1  ;;  %v17673_v15 = vadd.f32 %v4194_v47, %v3546_v58  ;;  %v11378_v32 = vpop.f32.mrb[221].mxu0  ;;  %v12206_v58 = vld [vmem:[#allocation2 + $0x88] sm:$0xff]  ;;  %v5338_v47 = vrot.slane %v5336_v62, 1 }
 0x375   : > { %v3423_v1 = vpop.f32.mrb[220].mxu1  ;;  %v4197_v54 = vpop.f32.mrb[222].mxu0  ;;  %v5331_v34 = vsel %vm2780_vm10, %v5326_v55, %v5330_v6  ;;  %v21110_v35 = vld [vmem:[#allocation24_spill] sm:$0xff]  ;;  %v21124_v31 = vld [vmem:[#allocation31_spill] sm:$0xff] }
 0x376   : > { %21107 = vst [vmem:[#allocation90_spill] sm:$0xff] %v17673_v15  ;;  %v3548_v10 = vadd.f32 %v3423_v1, %v21108_v20  ;;  %v11272_v2 = vpop.f32.mrb[221].mxu1  ;;  %v17676_v49 = vadd.f32 %v4197_v54, %v3547_v33  ;;  %v11379_v3 = vpop.f32.mrb[223].mxu0  ;;  %v5332_v33 = vshrl.u32 %v5193_v26, 16  ;;  %v5195_v54 = vld [vmem:[#allocation2 + $0x98] sm:$0xff] }
 0x377   : > { %v4202_v36 = vpop.f32.mrb[224].mxu0  ;;  %v21112_v2 = vld [vmem:[#allocation57_spill] sm:$0xff]  ;;  %v5344_v62 = vshll.u32 %v5195_v54, 16 }
 0x378   : > { %21109 = vst [vmem:[#allocation93_spill] sm:$0xff] %v17676_v49  ;;  %v17686_v41 = vadd.f32 %v4202_v36, %v3548_v10  ;;  %v11382_v32 = vpop.f32.mrb[225].mxu0  ;;  %v12207_v10 = vld [vmem:[#allocation2 + $0x90] sm:$0xff] }
 0x379   : > { %v4205_v20 = vpop.f32.mrb[226].mxu0  ;;  %v5346_v36 = vrot.slane %v5344_v62, 1 }
 0x37a   : > { %11487 = vmatmul.mubr.msk.bf16.gmra.mrb[68].mxu1 %vm472_vm8, %v12205_v22  ;;  %21111 = vst [vmem:[#allocation87_spill] sm:$0xff] %v17686_v41 }
 0x37b   : > { %11593 = vmatmul.mubr.msk.bf16.gmra.mrb[68].mxu0 %vm472_vm8, %v5323_v0  ;;  %11490 = vmatprep.mubr.msk.bf16.mxu1 %vm12233_vm6, %v20406_v19  ;;  %v3426_v0 = vpop.f32.mrb[222].mxu1 }
 0x37c   : > { %11596 = vmatprep.mubr.msk.bf16.mxu0 %vm12233_vm6, %v20406_v19  ;;  %v3549_v22 = vadd.f32 %v3426_v0, %v21110_v35  ;;  %v11273_v16 = vpop.f32.mrb[223].mxu1  ;;  %v5334_v0 = vor.u32 %v5332_v33, %v5330_v6  ;;  %v11383_v35 = vpop.f32.mrb[227].mxu0 }
 0x37d   : > { %v3431_v1 = vpop.f32.mrb[224].mxu1  ;;  %v4210_v6 = vpop.f32.mrb[228].mxu0 }
 0x37e   : > { %v3550_v55 = vadd.f32 %v3431_v1, %v21112_v2  ;;  %v11276_v3 = vpop.f32.mrb[225].mxu1  ;;  %v11386_v32 = vpop.f32.mrb[229].mxu0  ;;  %v5196_v1 = vld [vmem:[#allocation2 + $0xa0] sm:$0xff]  ;;  %v21116_v2 = vld [vmem:[#allocation20_spill] sm:$0xff] }
 0x37f   : > { %v3434_v16 = vpop.f32.mrb[226].mxu1  ;;  %v5352_v62 = vshll.u32 %v5196_v1, 16 }
 0x380   : > { %v3551_v61 = vadd.f32 %v3434_v16, %v21114_v27  ;;  %v11277_v26 = vpop.f32.mrb[227].mxu1  ;;  %v17699_v33 = vadd.f32 %v4210_v6, %v3550_v55  ;;  %v12208_v6 = vld [vmem:[#allocation2 + $0x98] sm:$0xff] }
 0x381   : > { %v3439_v27 = vpop.f32.mrb[228].mxu1 }
 0x382   : > { %11491 = vmatmul.mubr.msk.bf16.gmra.mrb[72].mxu1 %vm472_vm8, %v12206_v58  ;;  %v5339_v58 = vsel %vm2780_vm10, %v5334_v0, %v5338_v47  ;;  %21115 = vst [vmem:[#allocation51_spill] sm:$0xff] %v17699_v33  ;;  %v17702_v3 = vadd.f32 %v3439_v27, %v21116_v2  ;;  %v11280_v0 = vpop.f32.mrb[229].mxu1  ;;  %v5197_v27 = vld [vmem:[#allocation2 + $0xa8] sm:$0xff]  ;;  %v21119_v2 = vld [vmem:[#allocation61_spill] sm:$0xff] }
 0x383   : > { %11597 = vmatmul.mubr.msk.bf16.gmra.mrb[72].mxu0 %vm472_vm8, %v5331_v34  ;;  %11494 = vmatprep.mubr.msk.bf16.mxu1 %vm12233_vm6, %v20406_v19  ;;  %v17689_v34 = vadd.f32 %v4205_v20, %v3549_v22  ;;  %v5340_v22 = vshrl.u32 %v5194_v60, 16  ;;  %v4213_v20 = vpop.f32.mrb[230].mxu0  ;;  %v3442_v26 = vpop.f32.mrb[230].mxu1 }
 0x384   : > { %11600 = vmatprep.mubr.msk.bf16.mxu0 %vm12233_vm6, %v20406_v19  ;;  %v17704_v16 = vadd.f32 %v4213_v20, %v3551_v61  ;;  %v17708_v60 = vadd.f32 %v3442_v26, %v21118_v59  ;;  %v11281_v55 = vpop.f32.mrb[231].mxu1 }
 0x385   : > { %21113 = vst [vmem:[#allocation42_spill] sm:$0xff] %v17689_v34  ;;  %v5342_v35 = vor.u32 %v5340_v22, %v5338_v47  ;;  %v5348_v47 = vshrl.u32 %v5195_v54, 16  ;;  %v5354_v22 = vrot.slane %v5352_v62, 1  ;;  %v3447_v59 = vpop.f32.mrb[232].mxu1  ;;  %v5360_v54 = vshll.u32 %v5197_v27, 16  ;;  %v12209_v62 = vld [vmem:[#allocation2 + $0xa0] sm:$0xff] }
 0x386   : > { %21117 = vst [vmem:[#allocation92_spill] sm:$0xff] %v17704_v16  ;;  %v17721_v0 = vadd.f32 %v3447_v59, %v21119_v2  ;;  %v21122_v34 = vld [vmem:[#allocation71_spill] sm:$0xff] }
 0x38a   : > { %11495 = vmatmul.mubr.msk.bf16.gmra.mrb[76].mxu1 %vm472_vm8, %v12207_v10  ;;  %v5347_v10 = vsel %vm2780_vm10, %v5342_v35, %v5346_v36  ;;  %v11284_v35 = vpop.f32.mrb[233].mxu1 }
 0x38b   : > { %11601 = vmatmul.mubr.msk.bf16.gmra.mrb[76].mxu0 %vm472_vm8, %v5339_v58  ;;  %11498 = vmatprep.mubr.msk.bf16.mxu1 %vm12233_vm6, %v20406_v19  ;;  %v11387_v58 = vpop.f32.mrb[231].mxu0  ;;  %v5198_v35 = vld [vmem:[#allocation2 + $0xb0] sm:$0xff] }
 0x38c   : > { %11604 = vmatprep.mubr.msk.bf16.mxu0 %vm12233_vm6, %v20406_v19  ;;  %v17716_v61 = vpop.f32.mrb[232].mxu0  ;;  %v5350_v58 = vor.u32 %v5348_v47, %v5346_v36  ;;  %v5356_v47 = vshrl.u32 %v5196_v1, 16  ;;  %v5368_v1 = vshll.u32 %v5198_v35, 16 }
 0x38d   : > { %v11390_v32 = vpop.f32.mrb[233].mxu0 }
 0x38e   : > { %v17718_v20 = vpop.f32.mrb[234].mxu0  ;;  %v5355_v55 = vsel %vm2780_vm10, %v5350_v58, %v5354_v22  ;;  %v5362_v32 = vrot.slane %v5360_v54, 1  ;;  %v21121_v58 = vld [vmem:[#allocation40_spill] sm:$0xff]  ;;  %v12210_v54 = vld [vmem:[#allocation2 + $0xa8] sm:$0xff] }
 0x38f   : > { %v11391_v26 = vpop.f32.mrb[235].mxu0 }
 0x390   : > { %v17733_v36 = vpop.f32.mrb[236].mxu0 }
 0x391   : > { %v11394_v59 = vpop.f32.mrb[237].mxu0 }
 0x392   : > { %11499 = vmatmul.mubr.msk.bf16.gmra.mrb[80].mxu1 %vm472_vm8, %v12208_v6  ;;  %v21120_v6 = vld [vmem:[#allocation70_spill] sm:$0xff]  ;;  %v5370_v59 = vrot.slane %v5368_v1, 1  ;;  %v12211_v1 = vld [vmem:[#allocation2 + $0xb0] sm:$0xff] }
 0x393   : > { %11605 = vmatmul.mubr.msk.bf16.gmra.mrb[80].mxu0 %vm472_vm8, %v5347_v10  ;;  %11502 = vmatprep.mubr.msk.bf16.mxu1 %vm12233_vm6, %v20406_v19  ;;  %v3450_v10 = vpop.f32.mrb[234].mxu1 }
 0x394   : > { %11608 = vmatprep.mubr.msk.bf16.mxu0 %vm12233_vm6, %v20406_v19  ;;  %v17725_v51 = vadd.f32 %v3450_v10, %v21120_v6  ;;  %v11285_v53 = vpop.f32.mrb[235].mxu1 }
 0x395   : > { %v3455_v2 = vpop.f32.mrb[236].mxu1  ;;  %v17735_v53 = vpop.f32.mrb[238].mxu0 }
 0x396   : > { %v17738_v26 = vadd.f32 %v3455_v2, %v21121_v58  ;;  %v11288_v10 = vpop.f32.mrb[237].mxu1  ;;  %v11395_v6 = vpop.f32.mrb[239].mxu0  ;;  %v5199_v58 = vld [vmem:[#allocation2 + $0xb8] sm:$0xff] }
 0x39a   : > { %11503 = vmatmul.mubr.msk.bf16.gmra.mrb[84].mxu1 %vm472_vm8, %v12209_v62  ;;  %v3458_v62 = vpop.f32.mrb[238].mxu1 }
 0x39b   : > { %11609 = vmatmul.mubr.msk.bf16.gmra.mrb[84].mxu0 %vm472_vm8, %v5355_v55  ;;  %11506 = vmatprep.mubr.msk.bf16.mxu1 %vm12233_vm6, %v20406_v19  ;;  %v5358_v55 = vor.u32 %v5356_v47, %v5354_v22  ;;  %v17742_v29 = vadd.f32 %v3458_v62, %v16449_v40  ;;  %v11289_v37 = vpop.f32.mrb[239].mxu1  ;;  %v17750_v22 = vpop.f32.mrb[240].mxu0  ;;  %v5364_v47 = vshrl.u32 %v5197_v27, 16  ;;  %v5376_v27 = vshll.u32 %v5199_v58, 16 }
 0x39c   : > { %11612 = vmatprep.mubr.msk.bf16.mxu0 %vm12233_vm6, %v20406_v19  ;;  %v11398_v2 = vpop.f32.mrb[241].mxu0  ;;  %v3463_v40 = vpop.f32.mrb[240].mxu1 }
 0x39d   : > { %v5363_v25 = vsel %vm2780_vm10, %v5358_v55, %v5362_v32  ;;  %v17752_v37 = vpop.f32.mrb[242].mxu0  ;;  %v11292_v10 = vpop.f32.mrb[241].mxu1  ;;  %v5366_v55 = vor.u32 %v5364_v47, %v5362_v32  ;;  %v5372_v32 = vshrl.u32 %v5198_v35, 16  ;;  %v5378_v47 = vrot.slane %v5376_v27, 1  ;;  %v12212_v27 = vld [vmem:[#allocation2 + $0xb8] sm:$0xff] }
 0x39e   : > { %v11399_v6 = vpop.f32.mrb[243].mxu0  ;;  %v3466_v62 = vpop.f32.mrb[242].mxu1 }
 0x39f   : > { %v17759_v16 = vadd.f32 %v3466_v62, %v16508_v28  ;;  %v11293_v33 = vpop.f32.mrb[243].mxu1  ;;  %v5374_v6 = vor.u32 %v5372_v32, %v5370_v59 }
 0x3a0   : > { %v3471_v28 = vpop.f32.mrb[244].mxu1 }
 0x3a1   : > { %v17772_v10 = vadd.f32 %v3471_v28, %v16567_v17  ;;  %v5201_v28 = vld [vmem:[#allocation2 + $0xc8] sm:$0xff] }
 0x3a2   : > { %11507 = vmatmul.mubr.msk.bf16.gmra.mrb[88].mxu1 %vm472_vm8, %v12210_v54  ;;  %v5371_v54 = vsel %vm2780_vm10, %v5366_v55, %v5370_v59  ;;  %v11296_v55 = vpop.f32.mrb[245].mxu1  ;;  %v5380_v59 = vshrl.u32 %v5199_v58, 16  ;;  %v5392_v58 = vshll.u32 %v5201_v28, 16 }
 0x3a3   : > { %11613 = vmatmul.mubr.msk.bf16.gmra.mrb[88].mxu0 %vm472_vm8, %v5363_v25  ;;  %11510 = vmatprep.mubr.msk.bf16.mxu1 %vm12233_vm6, %v20406_v19  ;;  %v17755_v25 = vadd.f32 %v3463_v40, %v16494_v4  ;;  %v17767_v4 = vpop.f32.mrb[244].mxu0  ;;  %v5200_v40 = vld [vmem:[#allocation2 + $0xc0] sm:$0xff] }
 0x3a4   : > { %11616 = vmatprep.mubr.msk.bf16.mxu0 %vm12233_vm6, %v20406_v19  ;;  %v11402_v2 = vpop.f32.mrb[245].mxu0  ;;  %v5384_v35 = vshll.u32 %v5200_v40, 16  ;;  %v21123_v55 = vld [vmem:[#allocation26_spill] sm:$0xff] }
 0x3a5   : > { %v17769_v33 = vpop.f32.mrb[246].mxu0 }
 0x3a6   : > { %v11403_v62 = vpop.f32.mrb[247].mxu0  ;;  %v5386_v32 = vrot.slane %v5384_v35, 1  ;;  %v12213_v35 = vld [vmem:[#allocation2 + $0xc0] sm:$0xff] }
 0x3a7   : > { %v17784_v17 = vpop.f32.mrb[248].mxu0 }
 0x3a8   : > { %v11406_v2 = vpop.f32.mrb[249].mxu0 }
 0x3a9   : > { %v5394_v2 = vrot.slane %v5392_v58, 1  ;;  %v12214_v58 = vld [vmem:[#allocation2 + $0xc8] sm:$0xff] }
 0x3aa   : > { %11511 = vmatmul.mubr.msk.bf16.gmra.mrb[92].mxu1 %vm472_vm8, %v12211_v1  ;;  %v5379_v1 = vsel %vm2780_vm10, %v5374_v6, %v5378_v47 }
 0x3ab   : > { %11617 = vmatmul.mubr.msk.bf16.gmra.mrb[92].mxu0 %vm472_vm8, %v5371_v54  ;;  %11514 = vmatprep.mubr.msk.bf16.mxu1 %vm12233_vm6, %v20406_v19  ;;  %v3474_v54 = vpop.f32.mrb[246].mxu1 }
 0x3ac   : > { %11620 = vmatprep.mubr.msk.bf16.mxu0 %vm12233_vm6, %v20406_v19  ;;  %v17776_v41 = vadd.f32 %v3474_v54, %v21122_v34  ;;  %v11297_v49 = vpop.f32.mrb[247].mxu1  ;;  %v5382_v54 = vor.u32 %v5380_v59, %v5378_v47  ;;  %v5388_v59 = vshrl.u32 %v5200_v40, 16 }
 0x3ad   : > { %v3479_v34 = vpop.f32.mrb[248].mxu1  ;;  %v17786_v49 = vpop.f32.mrb[250].mxu0 }
 0x3ae   : > { %v17789_v6 = vadd.f32 %v3479_v34, %v21123_v55  ;;  %v11300_v62 = vpop.f32.mrb[249].mxu1  ;;  %v5387_v15 = vsel %vm2780_vm10, %v5382_v54, %v5386_v32  ;;  %v5202_v55 = vld [vmem:[#allocation2 + $0xd0] sm:$0xff]  ;;  %v5390_v54 = vor.u32 %v5388_v59, %v5386_v32  ;;  %v5396_v32 = vshrl.u32 %v5201_v28, 16 }
 0x3af   : > { %v5400_v40 = vshll.u32 %v5202_v55, 16 }
 0x3b1   : > { %v5402_v59 = vrot.slane %v5400_v40, 1  ;;  %v12215_v40 = vld [vmem:[#allocation2 + $0xd0] sm:$0xff] }
 0x3b2   : > { %11515 = vmatmul.mubr.msk.bf16.gmra.mrb[96].mxu1 %vm472_vm8, %v12212_v27  ;;  %v3482_v27 = vpop.f32.mrb[250].mxu1 }
 0x3b3   : > { %11621 = vmatmul.mubr.msk.bf16.gmra.mrb[96].mxu0 %vm472_vm8, %v5379_v1  ;;  %11518 = vmatprep.mubr.msk.bf16.mxu1 %vm12233_vm6, %v20406_v19  ;;  %v11407_v1 = vpop.f32.mrb[251].mxu0  ;;  %v17793_v18 = vadd.f32 %v3482_v27, %v21124_v31  ;;  %v11301_v13 = vpop.f32.mrb[251].mxu1 }
 0x3b4   : > { %11624 = vmatprep.mubr.msk.bf16.mxu0 %vm12233_vm6, %v20406_v19  ;;  %v17801_v47 = vpop.f32.mrb[252].mxu0  ;;  %v3487_v31 = vpop.f32.mrb[252].mxu1 }
 0x3b5   : > { %v11410_v34 = vpop.f32.mrb[253].mxu0  ;;  %v11304_v62 = vpop.f32.mrb[253].mxu1 }
 0x3b6   : > { %v17803_v13 = vpop.f32.mrb[254].mxu0  ;;  %v3490_v27 = vpop.f32.mrb[254].mxu1 }
 0x3b7   : > { %v11411_v1 = vpop.f32.mrb[255].mxu0  ;;  %v17810_v42 = vadd.f32 %v3490_v27, %v16712_v11  ;;  %v11305_v46 = vpop.f32.mrb[255].mxu1 }
 0x3b8   : > { %v3495_v11 = vpop.f32.mrb[0].mxu1  ;;  %v5398_v1 = vor.u32 %v5396_v32, %v5394_v2 }
 0x3b9   : > { %v17823_v62 = vadd.f32 %v3495_v11, %v16767_v9  ;;  %v5204_v11 = vld [vmem:[#allocation2 + $0xe0] sm:$0xff] }
 0x3ba   : > { %11519 = vmatmul.mubr.msk.bf16.gmra.mrb[100].mxu1 %vm472_vm8, %v12213_v35  ;;  %v5395_v35 = vsel %vm2780_vm10, %v5390_v54, %v5394_v2  ;;  %v11308_v54 = vpop.f32.mrb[1].mxu1  ;;  %v5404_v2 = vshrl.u32 %v5202_v55, 16  ;;  %v5416_v55 = vshll.u32 %v5204_v11, 16 }
 0x3bb   : > { %11625 = vmatmul.mubr.msk.bf16.gmra.mrb[100].mxu0 %vm472_vm8, %v5387_v15  ;;  %11522 = vmatprep.mubr.msk.bf16.mxu1 %vm12233_vm6, %v20406_v19  ;;  %v17806_v15 = vadd.f32 %v3487_v31, %v16703_v12  ;;  %v17818_v12 = vpop.f32.mrb[0].mxu0  ;;  %v5203_v31 = vld [vmem:[#allocation2 + $0xd8] sm:$0xff] }
 0x3bc   : > { %11628 = vmatprep.mubr.msk.bf16.mxu0 %vm12233_vm6, %v20406_v19  ;;  %v11414_v34 = vpop.f32.mrb[1].mxu0  ;;  %v5408_v28 = vshll.u32 %v5203_v31, 16 }
 0x3bd   : > { %v17820_v46 = vpop.f32.mrb[2].mxu0 }
 0x3be   : > { %v11415_v27 = vpop.f32.mrb[3].mxu0  ;;  %v5410_v32 = vrot.slane %v5408_v28, 1  ;;  %v12216_v28 = vld [vmem:[#allocation2 + $0xd8] sm:$0xff] }
 0x3bf   : > { %v17835_v9 = vpop.f32.mrb[4].mxu0  ;;  %v5406_v27 = vor.u32 %v5404_v2, %v5402_v59  ;;  %v5418_v2 = vrot.slane %v5416_v55, 1 }
 0x3c0   : > { %v11418_v34 = vpop.f32.mrb[5].mxu0 }
 0x3c1   : > { %v5983_v34 = vld [vmem:[#allocation2 + $0x18] sm:$0xf8] }
 0x3c2   : > { %11523 = vmatmul.mubr.msk.bf16.gmra.mrb[104].mxu1 %vm472_vm8, %v12214_v58  ;;  %v5403_v58 = vsel %vm2780_vm10, %v5398_v1, %v5402_v59  ;;  %v5412_v59 = vshrl.u32 %v5203_v31, 16 }
 0x3c3   : > { %11629 = vmatmul.mubr.msk.bf16.gmra.mrb[104].mxu0 %vm472_vm8, %v5395_v35  ;;  %11526 = vmatprep.mubr.msk.bf16.mxu1 %vm12233_vm6, %v20406_v19  ;;  %v3498_v35 = vpop.f32.mrb[2].mxu1 }
 0x3c4   : > { %11632 = vmatprep.mubr.msk.bf16.mxu0 %vm12233_vm6, %v20406_v19  ;;  %v17827_v52 = vadd.f32 %v3498_v35, %v16788_v38  ;;  %v11309_v23 = vpop.f32.mrb[3].mxu1 }
 0x3c5   : > { %v3503_v38 = vpop.f32.mrb[4].mxu1  ;;  %v17837_v23 = vpop.f32.mrb[6].mxu0 }
 0x3c6   : > { %21125 = vst [vmem:[#allocation97_spill] sm:$0xff] %v17827_v52  ;;  %21126 = vst [vmem:[#allocation89_spill] sm:$0xff] %v17837_v23  ;;  %v17840_v54 = vadd.f32 %v3503_v38, %v16837_v45  ;;  %v11312_v1 = vpop.f32.mrb[5].mxu1  ;;  %v11419_v35 = vpop.f32.mrb[7].mxu0  ;;  %v21134_v52 = vld [vmem:[#allocation131_spill] sm:$0xff] }
 0x3c7   : > { %v17852_v45 = vpop.f32.mrb[8].mxu0 }
 0x3c8   : > { %21127 = vst [vmem:[#allocation44_spill] sm:$0xff] %v17840_v54  ;;  %21130 = vst [vmem:[#allocation105_spill] sm:$0xff] %v17852_v45  ;;  %v6017_v54 = vshll.u32 %v5983_v34, 16  ;;  %v21132_v45 = vld [vmem:[#allocation64_spill] sm:$0xff] }
 0x3ca   : > { %11527 = vmatmul.mubr.msk.bf16.gmra.mrb[108].mxu1 %vm472_vm8, %v12215_v40  ;;  %v5411_v40 = vsel %vm2780_vm10, %v5406_v27, %v5410_v32 }
 0x3cb   : > { %11633 = vmatmul.mubr.msk.bf16.gmra.mrb[108].mxu0 %vm472_vm8, %v5403_v58  ;;  %11530 = vmatprep.mubr.msk.bf16.mxu1 %vm12233_vm6, %v20406_v19  ;;  %v3506_v58 = vpop.f32.mrb[6].mxu1 }
 0x3cc   : > { %11636 = vmatprep.mubr.msk.bf16.mxu0 %vm12233_vm6, %v20406_v19  ;;  %v17844_v7 = vadd.f32 %v3506_v58, %v21128_v48  ;;  %v11313_v30 = vpop.f32.mrb[7].mxu1  ;;  %v11422_v48 = vpop.f32.mrb[9].mxu0  ;;  %v5414_v58 = vor.u32 %v5412_v59, %v5410_v32  ;;  %v12217_v32 = vld [vmem:[#allocation2 + $0xe0] sm:$0xff]  ;;  %v5420_v59 = vshrl.u32 %v5204_v11, 16 }
 0x3cd   : > { %v3511_v38 = vpop.f32.mrb[8].mxu1  ;;  %v5205_v30 = vld [vmem:[#allocation2 + $0xe8] sm:$0x1]  ;;  %v17854_v1 = vpop.f32.mrb[10].mxu0 }
 0x3ce   : > { %21129 = vst [vmem:[#allocation102_spill] sm:$0xff] %v17844_v7  ;;  %21131 = vst [vmem:[#allocation96_spill] sm:$0xff] %v17854_v1  ;;  %v17857_v27 = vadd.f32 %v3511_v38, %v16915_v43  ;;  %v11316_v35 = vpop.f32.mrb[9].mxu1  ;;  %v6014_v7 = vshrl.u32 %v5983_v34, 16  ;;  %v5419_v23 = vsel %vm2780_vm10, %v5414_v58, %v5418_v2  ;;  %v5424_v48 = vshll.u32 %v5205_v30, 16 }
 0x3cf   : > { %v21135_v1 = vshrl.u32 %v21134_v52, 16  ;;  %v21136_v43 = vshll.u32 %v21134_v52, 16  ;;  %v6019_v34 = vrot.slane %v6017_v54, 4 }
 0x3d0   : > { %v5426_v35 = vrot.slane %v5424_v48, 1 }
 0x3d1   : > { %v6024_v5 = vrot.slane %v21135_v1, 3  ;;  %v6027_v38 = vrot.slane %v21136_v43, 4 }
 0x3d2   : > { %11531 = vmatmul.mubr.msk.bf16.gmra.mrb[112].mxu1 %vm472_vm8, %v12216_v28  ;;  %v3514_v28 = vpop.f32.mrb[10].mxu1 }
 0x3d3   : > { %11637 = vmatmul.mubr.msk.bf16.gmra.mrb[112].mxu0 %vm472_vm8, %v5411_v40  ;;  %11534 = vmatprep.mubr.msk.bf16.mxu1 %vm12233_vm6, %v20406_v19  ;;  %v11423_v40 = vpop.f32.mrb[11].mxu0  ;;  %v17861_v31 = vadd.f32 %v3514_v28, %v21132_v45  ;;  %v11317_v55 = vpop.f32.mrb[11].mxu1  ;;  %v6016_v45 = vrot.slane %v6014_v7, 3  ;;  %v6028_v52 = vor.u32 %v6027_v38, %v6024_v5 }
 0x3d4   : > { %11640 = vmatprep.mubr.msk.bf16.mxu0 %vm12233_vm6, %v20406_v19  ;;  %v17873_v30 = vpop.f32.mrb[12].mxu0  ;;  %v4611_v58 = vpop.f32.mrb[12].mxu1  ;;  %v10484_v40 = vld [vmem:[%s19928_s4 + $0x20] sm:$0xf]  ;;  %v21138_v55 = vld [vmem:[#allocation135_spill] sm:$0xff] }
 0x3d5   : > { %21133 = vst [vmem:[#allocation98_spill] sm:$0xff] %v17861_v31  ;;  %v11426_v1 = vpop.f32.mrb[13].mxu0  ;;  %v17881_v11 = vadd.f32 %v4611_v58, %v21138_v55  ;;  %v11432_v43 = vpop.f32.mrb[13].mxu1  ;;  %v6020_v54 = vor.u32 %v6019_v34, %v6016_v45  ;;  %v7666_v5 = vsel %vm1804_vm0, %v10484_v40, 0  ;;  %v17897_v45 = vld [vmem:[#allocation2 + $0x30] sm:$0xff] }
 0x3d6   : > { %v17878_v28 = vpop.f32.mrb[14].mxu0  ;;  %v4614_v7 = vpop.f32.mrb[14].mxu1  ;;  %v21142_v1 = vld [vmem:[#allocation136_spill] sm:$0xff]  ;;  %21145 = vst [vmem:[#allocation126_spill] sm:$0xff] %v17897_v45 }
 0x3d7   : > { %21137 = vst [vmem:[#allocation101_spill] sm:$0xff] %v17878_v28  ;;  %21139 = vst [vmem:[#allocation48_spill] sm:$0xff] %v17881_v11  ;;  %v6029_v38 = vsel %vm2194_vm3, %v6020_v54, %v6028_v52  ;;  %v21143_v28 = vshrl.u32 %v21142_v1, 16  ;;  %v21144_v55 = vshll.u32 %v21142_v1, 16  ;;  %v20214_v54 = vshll.u32 %v17897_v45, 16 }
 0x3d8   : > { %v12219_v1 = vld [vmem:[#allocation2 + $0x18] sm:$0xf0] }
 0x3d9   : > { %v6033_v58 = vrot.slane %v21143_v28, 3  ;;  %v6036_v43 = vrot.slane %v21144_v55, 4  ;;  %v6738_v55 = vrot.slane %v12219_v1, 4 }
 0x3da   : > { %11535 = vmatmul.mubr.msk.bf16.gmra.mrb[116].mxu1 %vm472_vm8, %v12217_v32  ;;  %v11427_v32 = vpop.f32.mrb[15].mxu0 }
 0x3db   : > { %11641 = vmatmul.mubr.msk.bf16.gmra.mrb[116].mxu0 %vm472_vm8, %v5419_v23  ;;  %11650 = vmatprep.mubr.msk.bf16.mxu1 %vm12233_vm6, %v20406_v19  ;;  %v5422_v23 = vor.u32 %v5420_v59, %v5418_v2  ;;  %v21140_v2 = vld [vmem:[#allocation11_spill] sm:$0xff]  ;;  %v11433_v59 = vpop.f32.mrb[15].mxu1  ;;  %v17904_v34 = vpop.f32.mrb[16].mxu0  ;;  %v6037_v32 = vor.u32 %v6036_v43, %v6033_v58 }
 0x3dc   : > { %11644 = vmatprep.mubr.msk.bf16.mxu0 %vm12233_vm6, %v20406_v19  ;;  %v17885_v48 = vadd.f32 %v4614_v7, %v21140_v2  ;;  %21146 = vst [vmem:[#allocation107_spill] sm:$0xff] %v17904_v34  ;;  %v11542_v40 = vpop.f32.mrb[17].mxu0  ;;  %v4619_v28 = vpop.f32.mrb[16].mxu1  ;;  %v20215_v7 = vshrl.u32 %v17897_v45, 16  ;;  %v21147_v59 = vld [vmem:[#allocation75_spill] sm:$0xff] }
 0x3dd   : > { %v5427_v31 = vsel %vm2780_vm10, %v5422_v23, %v5426_v35  ;;  %v12218_v23 = vld [vmem:[#allocation2 + $0x20] sm:$0xff]  ;;  %v17908_v2 = vpop.f32.mrb[18].mxu0  ;;  %vm21148_vm10 = vcmask 1041408  }
 0x3de   : > { %21141 = vst [vmem:[#allocation125_spill] sm:$0xff] %v17885_v48  ;;  %v6739_v35 = vrot.slane %v12218_v23, 4  ;;  %v11543_v34 = vpop.f32.mrb[19].mxu0  ;;  %v17916_v23 = vadd.f32 %v17716_v61, %v17702_v3  ;;  %v17930_v3 = vadd.f32 %v17718_v20, %v17708_v60 }
 0x3df   : > { %v17939_v61 = vpop.f32.mrb[20].mxu0 }
 0x3e0   : > { %v6740_v58 = vsel %vm1804_vm0, %v6738_v55, %v6739_v35  ;;  %v11546_v34 = vpop.f32.mrb[21].mxu0  ;;  %v21150_v55 = vld [vmem:[#allocation27_spill] sm:$0xff] }
 0x3e1   : > { %v21152_v34 = vld [vmem:[#allocation33_spill] sm:$0xff] }
 0x3e2   : > { %11651 = vmatmul.mubr.msk.bf16.vlgmr.msra.gmra.mrb[120].mxu1 %vm472_vm8, %v6029_v38  ;;  %v11436_v38 = vpop.f32.mrb[17].mxu1 }
 0x3e3   : > { %11645 = vmatmul.mubr.msk.bf16.gmra.mrb[120].mxu0 %vm472_vm8, %v5427_v31  ;;  %11869 = vmatpush3.bf16.msra.mxu1 %v7666_v5  ;;  %v8659_v31 = vld [vmem:[%s19930_s6] sm:$0x3]  ;;  %v17911_v5 = vadd.f32 %v4619_v28, %v21147_v59  ;;  %v4622_v11 = vpop.f32.mrb[18].mxu1  ;;  %v6038_v28 = vsel %vm2194_vm3, %v6028_v52, %v6037_v32  ;;  %v6042_v59 = vrot.slane %v20215_v7, 3  ;;  %v12220_v52 = vld [vmem:[#allocation2 + $0x28] sm:$0xff]  ;;  %v17950_v7 = vadd.f32 %v17733_v36, %v17721_v0 }
 0x3e4   : > { %11760 = vmatprep.mubr.msk.bf16.mxu0 %vm12233_vm6, %v20406_v19  ;;  %11654 = vmatprep.mubr.msk.bf16.mxu1 %vm12233_vm6, %v20406_v19  ;;  %v9000_v48 = vsel %vm21148_vm10, %v8659_v31, 0  ;;  %v17920_v43 = vadd.f32 %v4622_v11, %v17063_v44  ;;  %v11437_v40 = vpop.f32.mrb[19].mxu1  ;;  %v6045_v31 = vrot.slane %v20214_v54, 4  ;;  %v17933_v44 = vld [vmem:[#allocation2 + $0x38] sm:$0xff]  ;;  %v6741_v11 = vrot.slane %v12220_v52, 4  ;;  %v17969_v36 = vld [vmem:[#allocation2 + $0x40] sm:$0xff] }
 0x3e5   : > { %21149 = vst [vmem:[#allocation99_spill] sm:$0xff] %v17933_v44  ;;  %v4627_v38 = vpop.f32.mrb[20].mxu1  ;;  %v20216_v60 = vshrl.u32 %v17933_v44, 16  ;;  %21151 = vst [vmem:[#allocation103_spill] sm:$0xff] %v17950_v7  ;;  %v17964_v0 = vadd.f32 %v17735_v53, %v17725_v51  ;;  %v20219_v51 = vshrl.u32 %v17969_v36, 16  ;;  %v17985_v7 = vadd.f32 %v17750_v22, %v17738_v26  ;;  %v18004_v22 = vld [vmem:[#allocation2 + $0x48] sm:$0xff] }
 0x3e6   : > { %v6046_v1 = vor.u32 %v6045_v31, %v6042_v59  ;;  %v11440_v40 = vpop.f32.mrb[21].mxu1  ;;  %v6742_v52 = vsel %vm1804_vm0, %v6739_v35, %v6741_v11  ;;  %21155 = vst [vmem:[#allocation128_spill] sm:$0xff] %v17969_v36  ;;  %v17999_v26 = vadd.f32 %v17752_v37, %v17742_v29  ;;  %21160 = vst [vmem:[#allocation108_spill] sm:$0xff] %v18004_v22  ;;  %v20220_v29 = vshrl.u32 %v18004_v22, 16 }
 0x3e7   : > { %v4630_v54 = vpop.f32.mrb[22].mxu1  ;;  %21154 = vst [vmem:[#allocation127_spill] sm:$0xff] %v17964_v0 }
 0x3e8   : > { %v17954_v59 = vadd.f32 %v4630_v54, %v21152_v34  ;;  %v11441_v31 = vpop.f32.mrb[23].mxu1  ;;  %v6047_v20 = vsel %vm2194_vm3, %v6037_v32, %v6046_v1  ;;  %v6743_v32 = vrot.slane %v17897_v45, 4  ;;  %v21156_v34 = vld [vmem:[#allocation76_spill] sm:$0xff]  ;;  %21159 = vst [vmem:[#allocation49_spill] sm:$0xff] %v17999_v26  ;;  %v18020_v26 = vadd.f32 %v17767_v4, %v17755_v25 }
 0x3e9   : > { %v21157_v45 = vld [vmem:[#allocation80_spill] sm:$0xff]  ;;  %v18034_v25 = vadd.f32 %v17769_v33, %v17759_v16 }
 0x3ea   : > { %11655 = vmatmul.mubr.msk.bf16.gmra.mrb[124].mxu1 %vm472_vm8, %v6038_v28 }
 0x3eb   : > { %11761 = vmatmul.mubr.msk.bf16.vlgmr.msra.gmra.mrb[124].mxu0 %vm472_vm8, %v6740_v58  ;;  %11658 = vmatprep.mubr.msk.bf16.mxu1 %vm12233_vm6, %v20406_v19  ;;  %v17946_v58 = vadd.f32 %v4627_v38, %v21150_v55  ;;  %v6051_v38 = vrot.slane %v20216_v60, 3  ;;  %v21153_v55 = vshll.u32 %v17933_v44, 16 }
 0x3ec   : > { %11979 = vmatpush3.bf16.msra.mxu0 %v9000_v48  ;;  %11764 = vmatprep.mubr.msk.bf16.mxu0 %vm12233_vm6, %v20406_v19  ;;  %v17943_v48 = vpop.f32.mrb[22].mxu0 }
 0x3ed   : > { %v11547_v28 = vpop.f32.mrb[23].mxu0  ;;  %v6054_v40 = vrot.slane %v21153_v55, 4 }
 0x3ee   : > { %v17973_v35 = vpop.f32.mrb[24].mxu0  ;;  %v4635_v28 = vpop.f32.mrb[24].mxu1 }
 0x3ef   : > { %v11550_v54 = vpop.f32.mrb[25].mxu0  ;;  %v17981_v31 = vadd.f32 %v4635_v28, %v21156_v34  ;;  %v11444_v55 = vpop.f32.mrb[25].mxu1  ;;  %v6060_v28 = vrot.slane %v20219_v51, 3 }
 0x3f0   : > { %v4638_v0 = vpop.f32.mrb[26].mxu1  ;;  %v6744_v54 = vsel %vm1804_vm0, %v6741_v11, %v6743_v32  ;;  %v6745_v11 = vrot.slane %v17933_v44, 4  ;;  %v18055_v44 = vadd.f32 %v17784_v17, %v17772_v10  ;;  %v18069_v10 = vadd.f32 %v17786_v49, %v17776_v41 }
 0x3f2   : > { %11659 = vmatmul.mubr.msk.bf16.gmra.mrb[128].mxu1 %vm472_vm8, %v6047_v20  ;;  %v17978_v20 = vpop.f32.mrb[26].mxu0  ;;  %21163 = vst [vmem:[#allocation129_spill] sm:$0xff] %v18055_v44  ;;  %21165 = vst [vmem:[#allocation104_spill] sm:$0xff] %v18069_v10  ;;  %v21189_v10 = vld [vmem:[#allocation96_spill] sm:$0xff]  ;;  %v18230_v44 = vadd.f32 %v17873_v30, %v17857_v27 }
 0x3f3   : > { %11765 = vmatmul.mubr.msk.bf16.gmra.mrb[128].mxu0 %vm472_vm8, %v6742_v52  ;;  %11662 = vmatprep.mubr.msk.bf16.mxu1 %vm12233_vm6, %v20406_v19  ;;  %v6055_v52 = vor.u32 %v6054_v40, %v6051_v38  ;;  %v11551_v60 = vpop.f32.mrb[27].mxu0  ;;  %v17989_v38 = vadd.f32 %v4638_v0, %v21157_v45  ;;  %v11445_v40 = vpop.f32.mrb[27].mxu1 }
 0x3f4   : > { %11768 = vmatprep.mubr.msk.bf16.mxu0 %vm12233_vm6, %v20406_v19  ;;  %v21158_v60 = vshll.u32 %v17969_v36, 16  ;;  %v18008_v45 = vpop.f32.mrb[28].mxu0  ;;  %21195 = vst [vmem:[#allocation59_spill] sm:$0xff] %v18230_v44 }
 0x3f5   : > { %v6056_v53 = vsel %vm2194_vm3, %v6046_v1, %v6055_v52  ;;  %v11554_v1 = vpop.f32.mrb[29].mxu0 }
 0x3f6   : > { %v6063_v34 = vrot.slane %v21158_v60, 4  ;;  %v4643_v0 = vpop.f32.mrb[28].mxu1  ;;  %v6746_v1 = vsel %vm1804_vm0, %v6743_v32, %v6745_v11  ;;  %v6747_v32 = vrot.slane %v17969_v36, 4  ;;  %v18090_v36 = vadd.f32 %v17801_v47, %v17789_v6 }
 0x3f7   : > { %v11448_v40 = vpop.f32.mrb[29].mxu1  ;;  %v18104_v6 = vadd.f32 %v17803_v13, %v17793_v18 }
 0x3f8   : > { %v6064_v55 = vor.u32 %v6063_v34, %v6060_v28  ;;  %v4646_v51 = vpop.f32.mrb[30].mxu1  ;;  %21167 = vst [vmem:[#allocation132_spill] sm:$0xff] %v18090_v36 }
 0x3f9   : > { %v18024_v28 = vadd.f32 %v4646_v51, %v17258_v21  ;;  %v11449_v34 = vpop.f32.mrb[31].mxu1  ;;  %v18039_v21 = vld [vmem:[#allocation2 + $0x50] sm:$0xff]  ;;  %21169 = vst [vmem:[#allocation52_spill] sm:$0xff] %v18104_v6  ;;  %v21184_v6 = vld [vmem:[#allocation105_spill] sm:$0xff] }
 0x3fa   : > { %11663 = vmatmul.mubr.msk.bf16.gmra.mrb[132].mxu1 %vm472_vm8, %v6056_v53  ;;  %v18013_v53 = vpop.f32.mrb[30].mxu0  ;;  %v6065_v37 = vsel %vm2194_vm3, %v6055_v52, %v6064_v55  ;;  %21162 = vst [vmem:[#allocation110_spill] sm:$0xff] %v18039_v21  ;;  %v20223_v16 = vshrl.u32 %v18039_v21, 16 }
 0x3fb   : > { %11769 = vmatmul.mubr.msk.bf16.gmra.mrb[132].mxu0 %vm472_vm8, %v6744_v54  ;;  %11666 = vmatprep.mubr.msk.bf16.mxu1 %vm12233_vm6, %v20406_v19  ;;  %v18016_v54 = vadd.f32 %v4643_v0, %v17245_v50  ;;  %v11555_v60 = vpop.f32.mrb[31].mxu0  ;;  %v6069_v50 = vrot.slane %v20220_v29, 3  ;;  %v21161_v0 = vshll.u32 %v18004_v22, 16 }
 0x3fc   : > { %11772 = vmatprep.mubr.msk.bf16.mxu0 %vm12233_vm6, %v20406_v19 }
 0x3fd   : > { %v6072_v40 = vrot.slane %v21161_v0, 4 }
 0x3fe   : > { %v18043_v4 = vpop.f32.mrb[32].mxu0  ;;  %v4651_v51 = vpop.f32.mrb[32].mxu1 }
 0x3ff   : > { %v11558_v52 = vpop.f32.mrb[33].mxu0  ;;  %v6073_v60 = vor.u32 %v6072_v40, %v6069_v50  ;;  %v11452_v34 = vpop.f32.mrb[33].mxu1 }
 0x400   : > { %v4654_v29 = vpop.f32.mrb[34].mxu1  ;;  %v6748_v52 = vsel %vm1804_vm0, %v6745_v11, %v6747_v32  ;;  %v6749_v11 = vrot.slane %v18004_v22, 4  ;;  %v18125_v22 = vadd.f32 %v17818_v12, %v17806_v15  ;;  %v18139_v15 = vadd.f32 %v17820_v46, %v17810_v42 }
 0x401   : > { %v18059_v50 = vadd.f32 %v4654_v29, %v17319_v63  ;;  %v11453_v40 = vpop.f32.mrb[35].mxu1  ;;  %v6074_v33 = vsel %vm2194_vm3, %v6064_v55, %v6073_v60  ;;  %v18074_v63 = vld [vmem:[#allocation2 + $0x58] sm:$0xff] }
 0x402   : > { %11667 = vmatmul.mubr.msk.bf16.gmra.mrb[136].mxu1 %vm472_vm8, %v6065_v37  ;;  %v18048_v37 = vpop.f32.mrb[34].mxu0  ;;  %21166 = vst [vmem:[#allocation130_spill] sm:$0xff] %v18074_v63  ;;  %v20226_v41 = vshrl.u32 %v18074_v63, 16  ;;  %21171 = vst [vmem:[#allocation109_spill] sm:$0xff] %v18125_v22  ;;  %v21183_v22 = vld [vmem:[#allocation44_spill] sm:$0xff] }
 0x403   : > { %11773 = vmatmul.mubr.msk.bf16.gmra.mrb[136].mxu0 %vm472_vm8, %v6746_v1  ;;  %11670 = vmatprep.mubr.msk.bf16.mxu1 %vm12233_vm6, %v20406_v19  ;;  %v18051_v1 = vadd.f32 %v4651_v51, %v17304_v8  ;;  %v11559_v0 = vpop.f32.mrb[35].mxu0  ;;  %v6078_v8 = vrot.slane %v20223_v16, 3  ;;  %v21164_v51 = vshll.u32 %v18039_v21, 16  ;;  %21173 = vst [vmem:[#allocation111_spill] sm:$0xff] %v18139_v15  ;;  %v21179_v15 = vld [vmem:[#allocation89_spill] sm:$0xff]  ;;  %v18195_v36 = vadd.f32 %v21184_v6, %v21183_v22 }
 0x404   : > { %11776 = vmatprep.mubr.msk.bf16.mxu0 %vm12233_vm6, %v20406_v19 }
 0x405   : > { %v6081_v34 = vrot.slane %v21164_v51, 4  ;;  %21185 = vst [vmem:[#allocation113_spill] sm:$0xff] %v18195_v36 }
 0x407   : > { %v6082_v0 = vor.u32 %v6081_v34, %v6078_v8 }
 0x408   : > { %v18078_v17 = vpop.f32.mrb[36].mxu0  ;;  %v4659_v29 = vpop.f32.mrb[36].mxu1 }
 0x409   : > { %v11562_v55 = vpop.f32.mrb[37].mxu0  ;;  %v11456_v40 = vpop.f32.mrb[37].mxu1  ;;  %v6083_v49 = vsel %vm2194_vm3, %v6073_v60, %v6082_v0 }
 0x40a   : > { %11671 = vmatmul.mubr.msk.bf16.gmra.mrb[140].mxu1 %vm472_vm8, %v6074_v33  ;;  %v18083_v33 = vpop.f32.mrb[38].mxu0  ;;  %v4662_v16 = vpop.f32.mrb[38].mxu1  ;;  %v6750_v55 = vsel %vm1804_vm0, %v6747_v32, %v6749_v11  ;;  %v6751_v32 = vrot.slane %v18039_v21, 4  ;;  %v18160_v21 = vadd.f32 %v17835_v9, %v17823_v62  ;;  %v18179_v9 = vld [vmem:[#allocation2 + $0x70] sm:$0xff] }
 0x40b   : > { %11777 = vmatmul.mubr.msk.bf16.gmra.mrb[140].mxu0 %vm472_vm8, %v6748_v52  ;;  %11674 = vmatprep.mubr.msk.bf16.mxu1 %vm12233_vm6, %v20406_v19  ;;  %v18086_v52 = vadd.f32 %v4659_v29, %v17364_v57  ;;  %v11563_v51 = vpop.f32.mrb[39].mxu0  ;;  %v18094_v8 = vadd.f32 %v4662_v16, %v17382_v24  ;;  %v11457_v34 = vpop.f32.mrb[39].mxu1  ;;  %v6087_v57 = vrot.slane %v20226_v41, 3  ;;  %v21168_v29 = vshll.u32 %v18074_v63, 16  ;;  %v18109_v24 = vld [vmem:[#allocation2 + $0x60] sm:$0xff]  ;;  %21181 = vst [vmem:[#allocation112_spill] sm:$0xff] %v18179_v9 }
 0x40c   : > { %11780 = vmatprep.mubr.msk.bf16.mxu0 %vm12233_vm6, %v20406_v19  ;;  %21170 = vst [vmem:[#allocation133_spill] sm:$0xff] %v18109_v24  ;;  %v20229_v18 = vshrl.u32 %v18109_v24, 16  ;;  %21175 = vst [vmem:[#allocation53_spill] sm:$0xff] %v18160_v21 }
 0x40d   : > { %v6090_v40 = vrot.slane %v21168_v29, 4 }
 0x40f   : > { %v6091_v51 = vor.u32 %v6090_v40, %v6087_v57 }
 0x410   : > { %v18113_v47 = vpop.f32.mrb[40].mxu0 }
 0x411   : > { %v11566_v60 = vpop.f32.mrb[41].mxu0  ;;  %v6092_v13 = vsel %vm2194_vm3, %v6082_v0, %v6091_v51 }
 0x412   : > { %11675 = vmatmul.mubr.msk.bf16.gmra.mrb[144].mxu1 %vm472_vm8, %v6083_v49  ;;  %v4667_v16 = vpop.f32.mrb[40].mxu1  ;;  %v18118_v49 = vpop.f32.mrb[42].mxu0  ;;  %v6752_v60 = vsel %vm1804_vm0, %v6749_v11, %v6751_v32  ;;  %v6753_v11 = vrot.slane %v18074_v63, 4  ;;  %v21176_v63 = vld [vmem:[#allocation82_spill] sm:$0xff] }
 0x413   : > { %11781 = vmatmul.mubr.msk.bf16.gmra.mrb[144].mxu0 %vm472_vm8, %v6750_v55  ;;  %11678 = vmatprep.mubr.msk.bf16.mxu1 %vm12233_vm6, %v20406_v19  ;;  %v18121_v55 = vadd.f32 %v4667_v16, %v17433_v56  ;;  %v11460_v34 = vpop.f32.mrb[41].mxu1  ;;  %v11567_v29 = vpop.f32.mrb[43].mxu0  ;;  %v6096_v56 = vrot.slane %v20229_v18, 3  ;;  %v21172_v16 = vshll.u32 %v18109_v24, 16 }
 0x414   : > { %11784 = vmatprep.mubr.msk.bf16.mxu0 %vm12233_vm6, %v20406_v19  ;;  %v4670_v41 = vpop.f32.mrb[42].mxu1 }
 0x415   : > { %v18129_v57 = vadd.f32 %v4670_v41, %v17444_v14  ;;  %v11461_v40 = vpop.f32.mrb[43].mxu1  ;;  %v6099_v34 = vrot.slane %v21172_v16, 4  ;;  %v18144_v14 = vld [vmem:[#allocation2 + $0x68] sm:$0xff] }
 0x416   : > { %21174 = vst [vmem:[#allocation106_spill] sm:$0xff] %v18144_v14  ;;  %v20234_v42 = vshrl.u32 %v18144_v14, 16 }
 0x417   : > { %v6100_v29 = vor.u32 %v6099_v34, %v6096_v56 }
 0x419   : > { %v18148_v12 = vpop.f32.mrb[44].mxu0  ;;  %v6101_v46 = vsel %vm2194_vm3, %v6091_v51, %v6100_v29 }
 0x41a   : > { %11679 = vmatmul.mubr.msk.bf16.gmra.mrb[148].mxu1 %vm472_vm8, %v6092_v13  ;;  %v11570_v0 = vpop.f32.mrb[45].mxu0 }
 0x41b   : > { %11785 = vmatmul.mubr.msk.bf16.gmra.mrb[148].mxu0 %vm472_vm8, %v6752_v60  ;;  %11682 = vmatprep.mubr.msk.bf16.mxu1 %vm12233_vm6, %v20406_v19  ;;  %v4675_v41 = vpop.f32.mrb[44].mxu1  ;;  %v18153_v13 = vpop.f32.mrb[46].mxu0  ;;  %v6754_v0 = vsel %vm1804_vm0, %v6751_v32, %v6753_v11  ;;  %v6755_v32 = vrot.slane %v18109_v24, 4  ;;  %v21186_v24 = vld [vmem:[#allocation7_spill] sm:$0xff] }
 0x41c   : > { %11788 = vmatprep.mubr.msk.bf16.mxu0 %vm12233_vm6, %v20406_v19  ;;  %v18156_v60 = vadd.f32 %v4675_v41, %v17499_v39  ;;  %v11464_v40 = vpop.f32.mrb[45].mxu1  ;;  %v11571_v16 = vpop.f32.mrb[47].mxu0  ;;  %v6105_v39 = vrot.slane %v20234_v42, 3  ;;  %v21177_v41 = vshll.u32 %v18144_v14, 16 }
 0x41d   : > { %v4678_v18 = vpop.f32.mrb[46].mxu1  ;;  %v21178_v16 = vld [vmem:[#allocation97_spill] sm:$0xff] }
 0x41e   : > { %v18164_v56 = vadd.f32 %v4678_v18, %v21176_v63  ;;  %v11465_v34 = vpop.f32.mrb[47].mxu1  ;;  %v6108_v40 = vrot.slane %v21177_v41, 4  ;;  %v18174_v62 = vadd.f32 %v21179_v15, %v21178_v16  ;;  %v20237_v15 = vshrl.u32 %v18179_v9, 16  ;;  %v21182_v41 = vld [vmem:[#allocation74_spill] sm:$0xff] }
 0x420   : > { %21180 = vst [vmem:[#allocation114_spill] sm:$0xff] %v18174_v62 }
 0x422   : > { %11683 = vmatmul.mubr.msk.bf16.gmra.mrb[152].mxu1 %vm472_vm8, %v6101_v46  ;;  %v18183_v63 = vpop.f32.mrb[48].mxu0 }
 0x423   : > { %11789 = vmatmul.mubr.msk.bf16.gmra.mrb[152].mxu0 %vm472_vm8, %v6754_v0  ;;  %11686 = vmatprep.mubr.msk.bf16.mxu1 %vm12233_vm6, %v20406_v19  ;;  %v11574_v51 = vpop.f32.mrb[49].mxu0  ;;  %v4683_v18 = vpop.f32.mrb[48].mxu1  ;;  %v6109_v0 = vor.u32 %v6108_v40, %v6105_v39 }
 0x424   : > { %11792 = vmatprep.mubr.msk.bf16.mxu0 %vm12233_vm6, %v20406_v19  ;;  %v18188_v46 = vpop.f32.mrb[50].mxu0  ;;  %v18191_v16 = vadd.f32 %v4683_v18, %v21182_v41  ;;  %v11468_v42 = vpop.f32.mrb[49].mxu1  ;;  %v6756_v51 = vsel %vm1804_vm0, %v6753_v11, %v6755_v32  ;;  %v6114_v18 = vrot.slane %v20237_v15, 3  ;;  %v21188_v41 = vld [vmem:[#allocation102_spill] sm:$0xff] }
 0x425   : > { %v11575_v62 = vpop.f32.mrb[51].mxu0  ;;  %v4686_v21 = vpop.f32.mrb[50].mxu1  ;;  %v6110_v34 = vsel %vm2194_vm3, %v6100_v29, %v6109_v0  ;;  %v21187_v42 = vshll.u32 %v18179_v9, 16  ;;  %v18209_v22 = vadd.f32 %v21189_v10, %v21188_v41 }
 0x426   : > { %v18199_v39 = vadd.f32 %v4686_v21, %v21186_v24  ;;  %v11469_v40 = vpop.f32.mrb[51].mxu1  ;;  %v18214_v21 = vld [vmem:[#allocation2 + $0x78] sm:$0xff]  ;;  %v6757_v24 = vrot.slane %v18144_v14, 4  ;;  %v21196_v14 = vld [vmem:[#allocation83_spill] sm:$0xff] }
 0x427   : > { %v6117_v62 = vrot.slane %v21187_v42, 4  ;;  %21190 = vst [vmem:[#allocation56_spill] sm:$0xff] %v18209_v22  ;;  %21191 = vst [vmem:[#allocation117_spill] sm:$0xff] %v18214_v21  ;;  %v20240_v10 = vshrl.u32 %v18214_v21, 16  ;;  %v21193_v42 = vld [vmem:[#allocation84_spill] sm:$0xff] }
 0x42a   : > { %11687 = vmatmul.mubr.msk.bf16.gmra.mrb[156].mxu1 %vm472_vm8, %v6110_v34 }
 0x42b   : > { %11793 = vmatmul.mubr.msk.bf16.gmra.mrb[156].mxu0 %vm472_vm8, %v6756_v51  ;;  %11690 = vmatprep.mubr.msk.bf16.mxu1 %vm12233_vm6, %v20406_v19  ;;  %v6118_v51 = vor.u32 %v6117_v62, %v6114_v18 }
 0x42c   : > { %11796 = vmatprep.mubr.msk.bf16.mxu0 %vm12233_vm6, %v20406_v19 }
 0x42d   : > { %v4691_v29 = vpop.f32.mrb[52].mxu1  ;;  %v6119_v40 = vsel %vm2194_vm3, %v6109_v0, %v6118_v51 }
 0x42e   : > { %v18218_v6 = vpop.f32.mrb[52].mxu0  ;;  %v18226_v41 = vadd.f32 %v4691_v29, %v21193_v42  ;;  %v11472_v15 = vpop.f32.mrb[53].mxu1  ;;  %v6123_v29 = vrot.slane %v20240_v10, 3  ;;  %v21199_v42 = vld [vmem:[#allocation98_spill] sm:$0xff] }
 0x42f   : > { %v11578_v11 = vpop.f32.mrb[53].mxu0  ;;  %v4694_v36 = vpop.f32.mrb[54].mxu1  ;;  %v21198_v15 = vshll.u32 %v18214_v21, 16 }
 0x430   : > { %v18223_v34 = vpop.f32.mrb[54].mxu0  ;;  %21194 = vst [vmem:[#allocation115_spill] sm:$0xff] %v18226_v41  ;;  %v6758_v11 = vsel %vm1804_vm0, %v6755_v32, %v6757_v24  ;;  %v18234_v18 = vadd.f32 %v4694_v36, %v21196_v14  ;;  %v11473_v62 = vpop.f32.mrb[55].mxu1  ;;  %v21200_v41 = vld [vmem:[#allocation101_spill] sm:$0xff]  ;;  %v6759_v36 = vrot.slane %v18179_v9, 4  ;;  %v18254_v14 = vld [vmem:[#allocation2 + $0x80] sm:$0xff] }
 0x431   : > { %21192 = vst [vmem:[#allocation116_spill] sm:$0xff] %v18223_v34  ;;  %v11579_v22 = vpop.f32.mrb[55].mxu0  ;;  %v18244_v27 = vadd.f32 %v21200_v41, %v21199_v42  ;;  %21203 = vst [vmem:[#allocation12_spill] sm:$0xff] %v18254_v14  ;;  %v21204_v41 = vld [vmem:[#allocation81_spill] sm:$0xff]  ;;  %v20244_v44 = vshll.u32 %v18254_v14, 16  ;;  %v21208_v34 = vld [vmem:[#allocation38_spill] sm:$0xff] }
 0x432   : > { %21197 = vst [vmem:[#allocation118_spill] sm:$0xff] %v18234_v18  ;;  %v6126_v22 = vrot.slane %v21198_v15, 4  ;;  %11691 = vmatmul.mubr.msk.bf16.gmra.mrb[160].mxu1 %vm472_vm8, %v6119_v40  ;;  %v21205_v18 = vld [vmem:[#allocation48_spill] sm:$0xff] }
 0x433   : > { %11797 = vmatmul.mubr.msk.bf16.gmra.mrb[160].mxu0 %vm472_vm8, %v6758_v11  ;;  %21201 = vst [vmem:[#allocation119_spill] sm:$0xff] %v18244_v27  ;;  %11694 = vmatprep.mubr.msk.bf16.mxu1 %vm12233_vm6, %v20406_v19  ;;  %v20243_v27 = vshrl.u32 %v18254_v14, 16 }
 0x434   : > { %11800 = vmatprep.mubr.msk.bf16.mxu0 %vm12233_vm6, %v20406_v19  ;;  %v6127_v11 = vor.u32 %v6126_v22, %v6123_v29 }
 0x435   : > { %v4699_v0 = vpop.f32.mrb[56].mxu1 }
 0x436   : > { %v18251_v30 = vpop.f32.mrb[56].mxu0  ;;  %v18259_v15 = vadd.f32 %v4699_v0, %v21204_v41  ;;  %v11476_v40 = vpop.f32.mrb[57].mxu1  ;;  %v6128_v0 = vsel %vm2194_vm3, %v6118_v51, %v6127_v11  ;;  %v21210_v41 = vld [vmem:[#allocation125_spill] sm:$0xff]  ;;  %v6135_v51 = vrot.slane %v20244_v44, 4  ;;  %v18300_v44 = vadd.f32 %v17939_v61, %v17911_v5  ;;  %v18319_v61 = vld [vmem:[#allocation2 + $0x90] sm:$0xff] }
 0x437   : > { %21202 = vst [vmem:[#allocation66_spill] sm:$0xff] %v18251_v30  ;;  %v11582_v32 = vpop.f32.mrb[57].mxu0  ;;  %v4702_v10 = vpop.f32.mrb[58].mxu1  ;;  %v21206_v30 = vld [vmem:[#allocation107_spill] sm:$0xff]  ;;  %v18275_v40 = vadd.f32 %v17908_v2, %v21210_v41  ;;  %v6761_v2 = vrot.slane %v18214_v21, 4  ;;  %v21215_v21 = vld [vmem:[#allocation85_spill] sm:$0xff]  ;;  %v18314_v5 = vadd.f32 %v17943_v48, %v17920_v43 }
 0x438   : > { %v18256_v62 = vpop.f32.mrb[58].mxu0  ;;  %v18265_v9 = vadd.f32 %v21206_v30, %v21205_v18  ;;  %v6760_v32 = vsel %vm1804_vm0, %v6757_v24, %v6759_v36  ;;  %v18269_v29 = vadd.f32 %v4702_v10, %v21208_v34  ;;  %v11477_v22 = vpop.f32.mrb[59].mxu1  ;;  %v18280_v18 = vld [vmem:[#allocation2 + $0x88] sm:$0xff]  ;;  %v6132_v24 = vrot.slane %v20243_v27, 3  ;;  %21219 = vst [vmem:[#allocation121_spill] sm:$0xff] %v18319_v61 }
 0x439   : > { %v11583_v42 = vpop.f32.mrb[59].mxu0  ;;  %21211 = vst [vmem:[#allocation77_spill] sm:$0xff] %v18275_v40  ;;  %21212 = vst [vmem:[#allocation120_spill] sm:$0xff] %v18280_v18 }
 0x43a   : > { %21207 = vst [vmem:[#allocation60_spill] sm:$0xff] %v18265_v9  ;;  %21209 = vst [vmem:[#allocation50_spill] sm:$0xff] %v18269_v29  ;;  %11695 = vmatmul.mubr.msk.bf16.gmra.mrb[164].mxu1 %vm472_vm8, %v6128_v0  ;;  %v21214_v0 = vld [vmem:[#allocation23_spill] sm:$0xff]  ;;  %v6136_v29 = vor.u32 %v6135_v51, %v6132_v24  ;;  %v20247_v51 = vshrl.u32 %v18319_v61, 16 }
 0x43b   : > { %11801 = vmatmul.mubr.msk.bf16.gmra.mrb[164].mxu0 %vm472_vm8, %v6760_v32  ;;  %11698 = vmatprep.mubr.msk.bf16.mxu1 %vm12233_vm6, %v20406_v19  ;;  %21218 = vst [vmem:[#allocation124_spill] sm:$0xff] %v18314_v5  ;;  %v18335_v5 = vadd.f32 %v17973_v35, %v17946_v58  ;;  %v18349_v58 = vadd.f32 %v17978_v20, %v17954_v59  ;;  %v18354_v35 = vld [vmem:[#allocation2 + $0x98] sm:$0xff] }
 0x43c   : > { %11804 = vmatprep.mubr.msk.bf16.mxu0 %vm12233_vm6, %v20406_v19  ;;  %v6137_v32 = vsel %vm2194_vm3, %v6127_v11, %v6136_v29  ;;  %21225 = vst [vmem:[#allocation86_spill] sm:$0xff] %v18354_v35  ;;  %v20252_v59 = vshrl.u32 %v18354_v35, 16 }
 0x43d   : > { %v4707_v30 = vpop.f32.mrb[60].mxu1  ;;  %21221 = vst [vmem:[#allocation123_spill] sm:$0xff] %v18335_v5  ;;  %21224 = vst [vmem:[#allocation14_spill] sm:$0xff] %v18349_v58  ;;  %v18370_v5 = vadd.f32 %v18008_v45, %v17981_v31  ;;  %v18384_v31 = vadd.f32 %v18013_v53, %v17989_v38  ;;  %v18389_v45 = vld [vmem:[#allocation2 + $0xa0] sm:$0xff] }
 0x43e   : > { %v18288_v10 = vpop.f32.mrb[60].mxu0  ;;  %v18296_v41 = vadd.f32 %v4707_v30, %v21214_v0  ;;  %v11480_v40 = vpop.f32.mrb[61].mxu1  ;;  %v21216_v30 = vshrl.u32 %v18280_v18, 16  ;;  %21231 = vst [vmem:[#allocation47_spill] sm:$0xff] %v18389_v45  ;;  %v20255_v38 = vshrl.u32 %v18389_v45, 16 }
 0x43f   : > { %21213 = vst [vmem:[#allocation122_spill] sm:$0xff] %v18288_v10  ;;  %v11586_v34 = vpop.f32.mrb[61].mxu0  ;;  %v4710_v9 = vpop.f32.mrb[62].mxu1  ;;  %21227 = vst [vmem:[#allocation95_spill] sm:$0xff] %v18370_v5  ;;  %v18405_v5 = vadd.f32 %v18043_v4, %v18016_v54  ;;  %v18419_v54 = vadd.f32 %v18048_v37, %v18024_v28  ;;  %v18424_v4 = vld [vmem:[#allocation2 + $0xa8] sm:$0xff] }
 0x440   : > { %v18293_v22 = vpop.f32.mrb[62].mxu0  ;;  %v6762_v34 = vsel %vm1804_vm0, %v6759_v36, %v6761_v2  ;;  %v18304_v10 = vadd.f32 %v4710_v9, %v21215_v21  ;;  %v11481_v42 = vpop.f32.mrb[63].mxu1  ;;  %v6141_v40 = vrot.slane %v21216_v30, 3  ;;  %21230 = vst [vmem:[#allocation15_spill] sm:$0xff] %v18384_v31  ;;  %21237 = vst [vmem:[#allocation94_spill] sm:$0xff] %v18424_v4  ;;  %v20258_v28 = vshrl.u32 %v18424_v4, 16 }
 0x441   : > { %v11587_v27 = vpop.f32.mrb[63].mxu0  ;;  %v21220_v42 = vld [vmem:[#allocation41_spill] sm:$0xff]  ;;  %21233 = vst [vmem:[#allocation100_spill] sm:$0xff] %v18405_v5  ;;  %21236 = vst [vmem:[#allocation6_spill] sm:$0xff] %v18419_v54  ;;  %v18440_v5 = vadd.f32 %v18078_v17, %v18051_v1  ;;  %v18454_v1 = vadd.f32 %v18083_v33, %v18059_v50  ;;  %v18459_v17 = vld [vmem:[#allocation2 + $0xb0] sm:$0xff] }
 0x442   : > { %v21217_v27 = vshll.u32 %v18280_v18, 16  ;;  %11699 = vmatmul.mubr.msk.bf16.gmra.mrb[168].mxu1 %vm472_vm8, %v6137_v32  ;;  %v20261_v50 = vshrl.u32 %v18459_v17, 16 }
 0x443   : > { %11805 = vmatmul.mubr.msk.bf16.gmra.mrb[168].mxu0 %vm472_vm8, %v6762_v34  ;;  %11702 = vmatprep.mubr.msk.bf16.mxu1 %vm12233_vm6, %v20406_v19  ;;  %v6763_v34 = vrot.slane %v18254_v14, 4  ;;  %21241 = vst [vmem:[#allocation63_spill] sm:$0xff] %v18454_v1  ;;  %v18473_v1 = vadd.f32 %v18113_v47, %v18086_v52  ;;  %v6773_v47 = vrot.slane %v18424_v4, 4 }
 0x444   : > { %v6144_v24 = vrot.slane %v21217_v27, 4  ;;  %11808 = vmatprep.mubr.msk.bf16.mxu0 %vm12233_vm6, %v20406_v19  ;;  %v6186_v33 = vrot.slane %v20261_v50, 3 }
 0x445   : > { %v4715_v36 = vpop.f32.mrb[64].mxu1  ;;  %21242 = vst [vmem:[#allocation18_spill] sm:$0xff] %v18473_v1 }
 0x446   : > { %v18323_v9 = vpop.f32.mrb[64].mxu0  ;;  %v6145_v11 = vor.u32 %v6144_v24, %v6141_v40  ;;  %v18330_v32 = vadd.f32 %v4715_v36, %v21220_v42  ;;  %v11484_v0 = vpop.f32.mrb[65].mxu1  ;;  %v6764_v40 = vsel %vm1804_vm0, %v6761_v2, %v6763_v34  ;;  %v21222_v24 = vld [vmem:[#allocation22_spill] sm:$0xff]  ;;  %v6150_v42 = vrot.slane %v20247_v51, 3 }
 0x447   : > { %v11590_v21 = vpop.f32.mrb[65].mxu0  ;;  %v4718_v27 = vpop.f32.mrb[66].mxu1  ;;  %v21223_v0 = vshll.u32 %v18319_v61, 16  ;;  %v6765_v2 = vrot.slane %v18280_v18, 4  ;;  %v21228_v18 = vld [vmem:[#allocation93_spill] sm:$0xff] }
 0x448   : > { %v18327_v48 = vpop.f32.mrb[66].mxu0  ;;  %v18339_v21 = vadd.f32 %v4718_v27, %v21222_v24  ;;  %v11485_v43 = vpop.f32.mrb[67].mxu1  ;;  %v6146_v36 = vsel %vm2194_vm3, %v6136_v29, %v6145_v11 }
 0x449   : > { %v11591_v30 = vpop.f32.mrb[67].mxu0 }
 0x44a   : > { %v6153_v30 = vrot.slane %v21223_v0, 4  ;;  %11703 = vmatmul.mubr.msk.bf16.gmra.mrb[172].mxu1 %vm472_vm8, %v6146_v36  ;;  %v21226_v36 = vld [vmem:[#allocation90_spill] sm:$0xff] }
 0x44b   : > { %11809 = vmatmul.mubr.msk.bf16.gmra.mrb[172].mxu0 %vm472_vm8, %v6764_v40  ;;  %11706 = vmatprep.mubr.msk.bf16.mxu1 %vm12233_vm6, %v20406_v19 }
 0x44c   : > { %11812 = vmatprep.mubr.msk.bf16.mxu0 %vm12233_vm6, %v20406_v19  ;;  %v6154_v40 = vor.u32 %v6153_v30, %v6150_v42 }
 0x44d   : > { %v4723_v27 = vpop.f32.mrb[68].mxu1 }
 0x44e   : > { %v18358_v29 = vpop.f32.mrb[68].mxu0  ;;  %v18366_v0 = vadd.f32 %v4723_v27, %v21226_v36  ;;  %v11488_v51 = vpop.f32.mrb[69].mxu1  ;;  %v6155_v20 = vsel %vm2194_vm3, %v6145_v11, %v6154_v40  ;;  %v6159_v27 = vrot.slane %v20252_v59, 3  ;;  %v6767_v11 = vrot.slane %v18319_v61, 4  ;;  %v21234_v61 = vld [vmem:[#allocation42_spill] sm:$0xff] }
 0x44f   : > { %v11594_v43 = vpop.f32.mrb[69].mxu0  ;;  %v4726_v58 = vpop.f32.mrb[70].mxu1 }
 0x450   : > { %v18363_v24 = vpop.f32.mrb[70].mxu0  ;;  %v6766_v43 = vsel %vm1804_vm0, %v6763_v34, %v6765_v2  ;;  %v18374_v42 = vadd.f32 %v4726_v58, %v21228_v18  ;;  %v11489_v30 = vpop.f32.mrb[71].mxu1 }
 0x451   : > { %v11595_v14 = vpop.f32.mrb[71].mxu0 }
 0x452   : > { %v21229_v14 = vshll.u32 %v18354_v35, 16  ;;  %11707 = vmatmul.mubr.msk.bf16.gmra.mrb[176].mxu1 %vm472_vm8, %v6155_v20 }
 0x453   : > { %11813 = vmatmul.mubr.msk.bf16.gmra.mrb[176].mxu0 %vm472_vm8, %v6766_v43  ;;  %11710 = vmatprep.mubr.msk.bf16.mxu1 %vm12233_vm6, %v20406_v19  ;;  %v21232_v43 = vld [vmem:[#allocation87_spill] sm:$0xff] }
 0x454   : > { %v6162_v51 = vrot.slane %v21229_v14, 4  ;;  %11816 = vmatprep.mubr.msk.bf16.mxu0 %vm12233_vm6, %v20406_v19 }
 0x455   : > { %v4731_v58 = vpop.f32.mrb[72].mxu1 }
 0x456   : > { %v18393_v18 = vpop.f32.mrb[72].mxu0  ;;  %v6163_v36 = vor.u32 %v6162_v51, %v6159_v27  ;;  %v18401_v30 = vadd.f32 %v4731_v58, %v21232_v43  ;;  %v11492_v14 = vpop.f32.mrb[73].mxu1  ;;  %v6168_v58 = vrot.slane %v20255_v38, 3 }
 0x457   : > { %v11598_v34 = vpop.f32.mrb[73].mxu0  ;;  %v4734_v31 = vpop.f32.mrb[74].mxu1 }
 0x458   : > { %v18398_v20 = vpop.f32.mrb[74].mxu0  ;;  %v6768_v34 = vsel %vm1804_vm0, %v6765_v2, %v6767_v11  ;;  %v18409_v27 = vadd.f32 %v4734_v31, %v21234_v61  ;;  %v11493_v51 = vpop.f32.mrb[75].mxu1  ;;  %v6164_v53 = vsel %vm2194_vm3, %v6154_v40, %v6163_v36  ;;  %v6769_v2 = vrot.slane %v18354_v35, 4  ;;  %v21239_v35 = vld [vmem:[#allocation92_spill] sm:$0xff] }
 0x459   : > { %v11599_v59 = vpop.f32.mrb[75].mxu0 }
 0x45a   : > { %v21235_v59 = vshll.u32 %v18389_v45, 16  ;;  %11711 = vmatmul.mubr.msk.bf16.gmra.mrb[180].mxu1 %vm472_vm8, %v6164_v53 }
 0x45b   : > { %11817 = vmatmul.mubr.msk.bf16.gmra.mrb[180].mxu0 %vm472_vm8, %v6768_v34  ;;  %11714 = vmatprep.mubr.msk.bf16.mxu1 %vm12233_vm6, %v20406_v19  ;;  %v21238_v34 = vld [vmem:[#allocation51_spill] sm:$0xff] }
 0x45c   : > { %v6171_v43 = vrot.slane %v21235_v59, 4  ;;  %11820 = vmatprep.mubr.msk.bf16.mxu0 %vm12233_vm6, %v20406_v19 }
 0x45d   : > { %v4739_v31 = vpop.f32.mrb[76].mxu1 }
 0x45e   : > { %v18428_v61 = vpop.f32.mrb[76].mxu0  ;;  %v6172_v14 = vor.u32 %v6171_v43, %v6168_v58  ;;  %v18436_v51 = vadd.f32 %v4739_v31, %v21238_v34  ;;  %v11496_v59 = vpop.f32.mrb[77].mxu1  ;;  %v6177_v31 = vrot.slane %v20258_v28, 3 }
 0x45f   : > { %v11602_v40 = vpop.f32.mrb[77].mxu0  ;;  %v4742_v54 = vpop.f32.mrb[78].mxu1 }
 0x460   : > { %v18433_v53 = vpop.f32.mrb[78].mxu0  ;;  %v6770_v40 = vsel %vm1804_vm0, %v6767_v11, %v6769_v2  ;;  %v18444_v58 = vadd.f32 %v4742_v54, %v21239_v35  ;;  %v11497_v43 = vpop.f32.mrb[79].mxu1  ;;  %v6173_v37 = vsel %vm2194_vm3, %v6163_v36, %v6172_v14  ;;  %v6771_v11 = vrot.slane %v18389_v45, 4 }
 0x461   : > { %v11603_v38 = vpop.f32.mrb[79].mxu0 }
 0x462   : > { %v21240_v38 = vshll.u32 %v18424_v4, 16  ;;  %11715 = vmatmul.mubr.msk.bf16.gmra.mrb[184].mxu1 %vm472_vm8, %v6173_v37  ;;  %v6772_v45 = vsel %vm1804_vm0, %v6769_v2, %v6771_v11  ;;  %v18504_v4 = vadd.f32 %v18148_v12, %v18121_v55  ;;  %v18521_v55 = vld [vmem:[#allocation2 + $0xc0] sm:$0xff] }
 0x463   : > { %11821 = vmatmul.mubr.msk.bf16.gmra.mrb[184].mxu0 %vm472_vm8, %v6770_v40  ;;  %11718 = vmatprep.mubr.msk.bf16.mxu1 %vm12233_vm6, %v20406_v19  ;;  %21247 = vst [vmem:[#allocation46_spill] sm:$0xff] %v18521_v55 }
 0x464   : > { %v6180_v34 = vrot.slane %v21240_v38, 4  ;;  %11824 = vmatprep.mubr.msk.bf16.mxu0 %vm12233_vm6, %v20406_v19 }
 0x465   : > { %v4747_v54 = vpop.f32.mrb[80].mxu1 }
 0x466   : > { %v18463_v35 = vpop.f32.mrb[80].mxu0  ;;  %v6181_v59 = vor.u32 %v6180_v34, %v6177_v31  ;;  %v4860_v40 = vadd.f32 %v4747_v54, %v17916_v23  ;;  %v11500_v43 = vpop.f32.mrb[81].mxu1  ;;  %v21243_v23 = vshll.u32 %v18459_v17, 16 }
 0x467   : > { %v11606_v36 = vpop.f32.mrb[81].mxu0  ;;  %v4750_v28 = vpop.f32.mrb[82].mxu1  ;;  %v18485_v43 = vadd.f32 %v18118_v49, %v18094_v8 }
 0x468   : > { %v18468_v37 = vpop.f32.mrb[82].mxu0  ;;  %v4861_v36 = vadd.f32 %v4750_v28, %v17930_v3  ;;  %v11501_v31 = vpop.f32.mrb[83].mxu1  ;;  %v6182_v34 = vsel %vm2194_vm3, %v6172_v14, %v6181_v59  ;;  %v6189_v54 = vrot.slane %v21243_v23, 4  ;;  %v18490_v3 = vld [vmem:[#allocation2 + $0xb8] sm:$0xff] }
 0x469   : > { %v11607_v38 = vpop.f32.mrb[83].mxu0  ;;  %21244 = vst [vmem:[#allocation25_spill] sm:$0xff] %v18485_v43  ;;  %v20265_v8 = vshrl.u32 %v18490_v3, 16  ;;  %v20264_v49 = vshll.u32 %v18490_v3, 16  ;;  %v21245_v31 = vld [vmem:[#allocation103_spill] sm:$0xff] }
 0x46a   : > { %11719 = vmatmul.mubr.msk.bf16.gmra.mrb[188].mxu1 %vm472_vm8, %v6182_v34  ;;  %v6190_v28 = vor.u32 %v6189_v54, %v6186_v33 }
 0x46b   : > { %11825 = vmatmul.mubr.msk.bf16.gmra.mrb[188].mxu0 %vm472_vm8, %v6772_v45  ;;  %11722 = vmatprep.mubr.msk.bf16.mxu1 %vm12233_vm6, %v20406_v19 }
 0x46c   : > { %11828 = vmatprep.mubr.msk.bf16.mxu0 %vm12233_vm6, %v20406_v19 }
 0x46d   : > { %v4755_v14 = vpop.f32.mrb[84].mxu1 }
 0x46e   : > { %v5682_v52 = vpop.f32.mrb[84].mxu0  ;;  %v4862_v34 = vadd.f32 %v4755_v14, %v21245_v31  ;;  %v11504_v23 = vpop.f32.mrb[85].mxu1  ;;  %v6195_v14 = vrot.slane %v20265_v8, 3  ;;  %v18535_v8 = vadd.f32 %v18183_v63, %v18156_v60  ;;  %v18552_v60 = vld [vmem:[#allocation2 + $0xc8] sm:$0xff] }
 0x46f   : > { %v18495_v45 = vadd.f32 %v5682_v52, %v4860_v40  ;;  %v11610_v2 = vpop.f32.mrb[85].mxu0  ;;  %v4758_v1 = vpop.f32.mrb[86].mxu1  ;;  %v6774_v40 = vsel %vm1804_vm0, %v6771_v11, %v6773_v47  ;;  %v21246_v52 = vld [vmem:[#allocation127_spill] sm:$0xff]  ;;  %21249 = vst [vmem:[#allocation37_spill] sm:$0xff] %v18552_v60 }
 0x470   : > { %v5685_v38 = vpop.f32.mrb[86].mxu0  ;;  %v4863_v33 = vadd.f32 %v4758_v1, %v21246_v52  ;;  %v11505_v54 = vpop.f32.mrb[87].mxu1  ;;  %v6191_v2 = vsel %vm2194_vm3, %v6181_v59, %v6190_v28  ;;  %v6775_v1 = vrot.slane %v18459_v17, 4 }
 0x471   : > { %v18500_v50 = vadd.f32 %v5685_v38, %v4861_v36  ;;  %v11611_v43 = vpop.f32.mrb[87].mxu0  ;;  %v6198_v36 = vrot.slane %v20264_v49, 4 }
 0x472   : > { %v18516_v43 = vadd.f32 %v18153_v13, %v18129_v57  ;;  %11723 = vmatmul.mubr.msk.bf16.gmra.mrb[192].mxu1 %vm472_vm8, %v6191_v2  ;;  %v20267_v57 = vshrl.u32 %v18521_v55, 16  ;;  %v20266_v13 = vshll.u32 %v18521_v55, 16 }
 0x473   : > { %11829 = vmatmul.mubr.msk.bf16.gmra.mrb[192].mxu0 %vm472_vm8, %v6774_v40  ;;  %11726 = vmatprep.mubr.msk.bf16.mxu1 %vm12233_vm6, %v20406_v19  ;;  %v6199_v31 = vor.u32 %v6198_v36, %v6195_v14 }
 0x474   : > { %11832 = vmatprep.mubr.msk.bf16.mxu0 %vm12233_vm6, %v20406_v19 }
 0x475   : > { %v4763_v38 = vpop.f32.mrb[88].mxu1 }
 0x476   : > { %v5690_v12 = vpop.f32.mrb[88].mxu0  ;;  %v4864_v40 = vadd.f32 %v4763_v38, %v17985_v7  ;;  %v11508_v52 = vpop.f32.mrb[89].mxu1  ;;  %v6204_v7 = vrot.slane %v20267_v57, 3  ;;  %v18547_v38 = vadd.f32 %v18188_v46, %v18164_v56  ;;  %v20269_v56 = vshrl.u32 %v18552_v60, 16 }
 0x477   : > { %v18526_v11 = vadd.f32 %v5690_v12, %v4862_v34  ;;  %v11614_v59 = vpop.f32.mrb[89].mxu0  ;;  %v4766_v49 = vpop.f32.mrb[90].mxu1  ;;  %v6776_v34 = vsel %vm1804_vm0, %v6773_v47, %v6775_v1  ;;  %v21248_v12 = vld [vmem:[#allocation49_spill] sm:$0xff]  ;;  %v6777_v47 = vrot.slane %v18490_v3, 4  ;;  %v20268_v46 = vshll.u32 %v18552_v60, 16 }
 0x478   : > { %v5693_v23 = vpop.f32.mrb[90].mxu0  ;;  %v4865_v14 = vadd.f32 %v4766_v49, %v21248_v12  ;;  %v11509_v36 = vpop.f32.mrb[91].mxu1  ;;  %v6200_v59 = vsel %vm2194_vm3, %v6190_v28, %v6199_v31  ;;  %v18566_v57 = vadd.f32 %v18218_v6, %v18191_v16  ;;  %v6779_v6 = vrot.slane %v18521_v55, 4 }
 0x479   : > { %v18531_v54 = vadd.f32 %v5693_v23, %v4863_v33  ;;  %v11615_v2 = vpop.f32.mrb[91].mxu0  ;;  %v6207_v33 = vrot.slane %v20266_v13, 4 }
 0x47a   : > { %11727 = vmatmul.mubr.msk.bf16.gmra.mrb[196].mxu1 %vm472_vm8, %v6200_v59 }
 0x47b   : > { %11833 = vmatmul.mubr.msk.bf16.gmra.mrb[196].mxu0 %vm472_vm8, %v6776_v34  ;;  %11730 = vmatprep.mubr.msk.bf16.mxu1 %vm12233_vm6, %v20406_v19  ;;  %v6208_v52 = vor.u32 %v6207_v33, %v6204_v7 }
 0x47c   : > { %11836 = vmatprep.mubr.msk.bf16.mxu0 %vm12233_vm6, %v20406_v19 }
 0x47d   : > { %v4771_v23 = vpop.f32.mrb[92].mxu1 }
 0x47e   : > { %v5698_v63 = vpop.f32.mrb[92].mxu0  ;;  %v4866_v34 = vadd.f32 %v4771_v23, %v18020_v26  ;;  %v11512_v12 = vpop.f32.mrb[93].mxu1  ;;  %v6213_v26 = vrot.slane %v20269_v56, 3 }
 0x47f   : > { %v18557_v28 = vadd.f32 %v5698_v63, %v4864_v40  ;;  %v11618_v49 = vpop.f32.mrb[93].mxu0  ;;  %v4774_v13 = vpop.f32.mrb[94].mxu1  ;;  %v6778_v40 = vsel %vm1804_vm0, %v6775_v1, %v6777_v47  ;;  %v6209_v63 = vsel %vm2194_vm3, %v6199_v31, %v6208_v52 }
 0x480   : > { %v5701_v2 = vpop.f32.mrb[94].mxu0  ;;  %v4867_v7 = vadd.f32 %v4774_v13, %v18034_v25  ;;  %v11513_v33 = vpop.f32.mrb[95].mxu1  ;;  %v21252_v49 = vld [vmem:[#allocation116_spill] sm:$0xff] }
 0x481   : > { %21250 = vst [vmem:[#allocation58_spill] sm:$0xff] %v18557_v28  ;;  %v18562_v36 = vadd.f32 %v5701_v2, %v4865_v14  ;;  %v11619_v59 = vpop.f32.mrb[95].mxu0  ;;  %v6216_v14 = vrot.slane %v20268_v46, 4  ;;  %v18578_v23 = vadd.f32 %v21252_v49, %v18199_v39  ;;  %v18583_v25 = vld [vmem:[#allocation2 + $0xd0] sm:$0xff]  ;;  %v21258_v28 = vld [vmem:[#allocation66_spill] sm:$0xff] }
 0x482   : > { %11731 = vmatmul.mubr.msk.bf16.gmra.mrb[200].mxu1 %vm472_vm8, %v6209_v63  ;;  %21253 = vst [vmem:[#allocation16_spill] sm:$0xff] %v18583_v25  ;;  %v20273_v39 = vshrl.u32 %v18583_v25, 16  ;;  %v20272_v12 = vshll.u32 %v18583_v25, 16 }
 0x483   : > { %21251 = vst [vmem:[#allocation67_spill] sm:$0xff] %v18562_v36  ;;  %11837 = vmatmul.mubr.msk.bf16.gmra.mrb[200].mxu0 %vm472_vm8, %v6778_v40  ;;  %11734 = vmatprep.mubr.msk.bf16.mxu1 %vm12233_vm6, %v20406_v19  ;;  %v6217_v2 = vor.u32 %v6216_v14, %v6213_v26  ;;  %v21255_v40 = vld [vmem:[#allocation129_spill] sm:$0xff]  ;;  %v21257_v36 = vld [vmem:[#allocation115_spill] sm:$0xff] }
 0x484   : > { %11840 = vmatprep.mubr.msk.bf16.mxu0 %vm12233_vm6, %v20406_v19  ;;  %v18597_v55 = vadd.f32 %v21258_v28, %v21257_v36 }
 0x485   : > { %v4779_v13 = vpop.f32.mrb[96].mxu1 }
 0x486   : > { %v5706_v16 = vpop.f32.mrb[96].mxu0  ;;  %v4868_v33 = vadd.f32 %v4779_v13, %v21255_v40  ;;  %v11516_v63 = vpop.f32.mrb[97].mxu1  ;;  %v6222_v13 = vrot.slane %v20273_v39, 3 }
 0x487   : > { %v18588_v1 = vadd.f32 %v5706_v16, %v4866_v34  ;;  %v11622_v31 = vpop.f32.mrb[97].mxu0  ;;  %v4782_v56 = vpop.f32.mrb[98].mxu1  ;;  %v6780_v34 = vsel %vm1804_vm0, %v6777_v47, %v6779_v6  ;;  %v21259_v16 = vld [vmem:[#allocation104_spill] sm:$0xff]  ;;  %v18614_v47 = vld [vmem:[#allocation2 + $0xd8] sm:$0xff] }
 0x488   : > { %v5709_v59 = vpop.f32.mrb[98].mxu0  ;;  %v4869_v26 = vadd.f32 %v4782_v56, %v21259_v16  ;;  %v11517_v14 = vpop.f32.mrb[99].mxu1  ;;  %v6218_v31 = vsel %vm2194_vm3, %v6208_v52, %v6217_v2  ;;  %21261 = vst [vmem:[#allocation68_spill] sm:$0xff] %v18614_v47  ;;  %v6781_v52 = vrot.slane %v18552_v60, 4 }
 0x489   : > { %21254 = vst [vmem:[#allocation24_spill] sm:$0xff] %v18588_v1  ;;  %v18593_v49 = vadd.f32 %v5709_v59, %v4867_v7  ;;  %v11623_v46 = vpop.f32.mrb[99].mxu0  ;;  %v21260_v7 = vld [vmem:[#allocation118_spill] sm:$0xff]  ;;  %v21262_v14 = vld [vmem:[#allocation132_spill] sm:$0xff] }
 0x48a   : > { %v6225_v46 = vrot.slane %v20272_v12, 4  ;;  %v18609_v59 = vadd.f32 %v18256_v62, %v21260_v7  ;;  %11735 = vmatmul.mubr.msk.bf16.gmra.mrb[204].mxu1 %vm472_vm8, %v6218_v31  ;;  %v20277_v62 = vshrl.u32 %v18614_v47, 16  ;;  %v21264_v1 = vld [vmem:[#allocation122_spill] sm:$0xff] }
 0x48b   : > { %21256 = vst [vmem:[#allocation57_spill] sm:$0xff] %v18593_v49  ;;  %11841 = vmatmul.mubr.msk.bf16.gmra.mrb[204].mxu0 %vm472_vm8, %v6780_v34  ;;  %11738 = vmatprep.mubr.msk.bf16.mxu1 %vm12233_vm6, %v20406_v19  ;;  %v20276_v34 = vshll.u32 %v18614_v47, 16  ;;  %v18628_v60 = vadd.f32 %v21264_v1, %v18259_v15  ;;  %v18645_v15 = vld [vmem:[#allocation2 + $0xe0] sm:$0xff]  ;;  %v6783_v1 = vrot.slane %v18583_v25, 4  ;;  %v18659_v25 = vadd.f32 %v18323_v9, %v18296_v41  ;;  %v18676_v41 = vld [vmem:[#allocation2 + $0xe8] sm:$0xff] }
 0x48c   : > { %11844 = vmatprep.mubr.msk.bf16.mxu0 %vm12233_vm6, %v20406_v19  ;;  %v6226_v63 = vor.u32 %v6225_v46, %v6222_v13 }
 0x48d   : > { %v4787_v40 = vpop.f32.mrb[100].mxu1 }
 0x48e   : > { %v5714_v28 = vpop.f32.mrb[100].mxu0  ;;  %v4870_v31 = vadd.f32 %v4787_v40, %v21262_v14  ;;  %v11520_v7 = vpop.f32.mrb[101].mxu1  ;;  %v6231_v40 = vrot.slane %v20277_v62, 3 }
 0x48f   : > { %v18619_v56 = vadd.f32 %v5714_v28, %v4868_v33  ;;  %v11626_v36 = vpop.f32.mrb[101].mxu0  ;;  %v4790_v49 = vpop.f32.mrb[102].mxu1  ;;  %v6782_v33 = vsel %vm1804_vm0, %v6779_v6, %v6781_v52  ;;  %v21265_v28 = vld [vmem:[#allocation52_spill] sm:$0xff] }
 0x490   : > { %v5717_v16 = vpop.f32.mrb[102].mxu0  ;;  %v4871_v13 = vadd.f32 %v4790_v49, %v21265_v28  ;;  %v11521_v46 = vpop.f32.mrb[103].mxu1  ;;  %v6227_v36 = vsel %vm2194_vm3, %v6217_v2, %v6226_v63 }
 0x491   : > { %v18624_v12 = vadd.f32 %v5717_v16, %v4869_v26  ;;  %v11627_v39 = vpop.f32.mrb[103].mxu0  ;;  %v21266_v26 = vld [vmem:[#allocation50_spill] sm:$0xff]  ;;  %v21267_v46 = vld [vmem:[#allocation109_spill] sm:$0xff] }
 0x492   : > { %v6234_v39 = vrot.slane %v20276_v34, 4  ;;  %v18640_v16 = vadd.f32 %v18293_v22, %v21266_v26  ;;  %11739 = vmatmul.mubr.msk.bf16.gmra.mrb[208].mxu1 %vm472_vm8, %v6227_v36  ;;  %v20281_v22 = vshrl.u32 %v18645_v15, 16 }
 0x493   : > { %21263 = vst [vmem:[#allocation20_spill] sm:$0xff] %v18624_v12  ;;  %11845 = vmatmul.mubr.msk.bf16.gmra.mrb[208].mxu0 %vm472_vm8, %v6782_v33  ;;  %11742 = vmatprep.mubr.msk.bf16.mxu1 %vm12233_vm6, %v20406_v19  ;;  %v20280_v33 = vshll.u32 %v18645_v15, 16 }
 0x494   : > { %11848 = vmatprep.mubr.msk.bf16.mxu0 %vm12233_vm6, %v20406_v19  ;;  %v6235_v7 = vor.u32 %v6234_v39, %v6231_v40 }
 0x495   : > { %v4795_v14 = vpop.f32.mrb[104].mxu1 }
 0x496   : > { %v5722_v6 = vpop.f32.mrb[104].mxu0  ;;  %v4872_v36 = vadd.f32 %v4795_v14, %v21267_v46  ;;  %v11524_v26 = vpop.f32.mrb[105].mxu1  ;;  %v6240_v14 = vrot.slane %v20281_v22, 3 }
 0x497   : > { %v18650_v2 = vadd.f32 %v5722_v6, %v4870_v31  ;;  %v11630_v49 = vpop.f32.mrb[105].mxu0  ;;  %v4798_v12 = vpop.f32.mrb[106].mxu1  ;;  %v6784_v31 = vsel %vm1804_vm0, %v6781_v52, %v6783_v1  ;;  %v21269_v6 = vld [vmem:[#allocation111_spill] sm:$0xff] }
 0x498   : > { %v5725_v28 = vpop.f32.mrb[106].mxu0  ;;  %v4873_v40 = vadd.f32 %v4798_v12, %v21269_v6  ;;  %v11525_v39 = vpop.f32.mrb[107].mxu1  ;;  %v6236_v49 = vsel %vm2194_vm3, %v6226_v63, %v6235_v7  ;;  %v6785_v12 = vrot.slane %v18614_v47, 4  ;;  %v18690_v47 = vadd.f32 %v18358_v29, %v18330_v32 }
 0x499   : > { %v18655_v34 = vadd.f32 %v5725_v28, %v4871_v13  ;;  %v11631_v62 = vpop.f32.mrb[107].mxu0  ;;  %v18671_v13 = vadd.f32 %v18327_v48, %v18304_v10  ;;  %v20285_v10 = vshrl.u32 %v18676_v41, 16  ;;  %v20284_v48 = vshll.u32 %v18676_v41, 16 }
 0x49a   : > { %v6243_v62 = vrot.slane %v20280_v33, 4  ;;  %11743 = vmatmul.mubr.msk.bf16.gmra.mrb[212].mxu1 %vm472_vm8, %v6236_v49  ;;  %v18704_v32 = vadd.f32 %v18363_v24, %v18339_v21 }
 0x49b   : > { %21268 = vst [vmem:[#allocation8_spill] sm:$0xff] %v18655_v34  ;;  %11849 = vmatmul.mubr.msk.bf16.gmra.mrb[212].mxu0 %vm472_vm8, %v6784_v31  ;;  %11746 = vmatprep.mubr.msk.bf16.mxu1 %vm12233_vm6, %v20406_v19  ;;  %v21271_v31 = vld [vmem:[#allocation53_spill] sm:$0xff]  ;;  %v18721_v34 = vadd.f32 %v18393_v18, %v18366_v0 }
 0x49c   : > { %11852 = vmatprep.mubr.msk.bf16.mxu0 %vm12233_vm6, %v20406_v19  ;;  %v6244_v46 = vor.u32 %v6243_v62, %v6240_v14 }
 0x49d   : > { %v4803_v28 = vpop.f32.mrb[108].mxu1 }
 0x49e   : > { %v5730_v9 = vpop.f32.mrb[108].mxu0  ;;  %v4874_v6 = vadd.f32 %v4803_v28, %v21271_v31  ;;  %v11528_v39 = vpop.f32.mrb[109].mxu1  ;;  %v6245_v28 = vsel %vm2194_vm3, %v6235_v7, %v6244_v46 }
 0x49f   : > { %v18681_v52 = vadd.f32 %v5730_v9, %v4872_v36  ;;  %v11634_v63 = vpop.f32.mrb[109].mxu0  ;;  %v4806_v22 = vpop.f32.mrb[110].mxu1  ;;  %v6786_v36 = vsel %vm1804_vm0, %v6783_v1, %v6785_v12  ;;  %v21273_v9 = vld [vmem:[#allocation114_spill] sm:$0xff] }
 0x4a0   : > { %v5733_v26 = vpop.f32.mrb[110].mxu0  ;;  %v4875_v14 = vadd.f32 %v4806_v22, %v21273_v9  ;;  %v11529_v62 = vpop.f32.mrb[111].mxu1  ;;  %v18694_v63 = vld [vmem:[#allocation2 + $0xf0] sm:$0xf]  ;;  %v6787_v22 = vrot.slane %v18645_v15, 4 }
 0x4a1   : > { %21270 = vst [vmem:[#allocation61_spill] sm:$0xff] %v18681_v52  ;;  %v18686_v49 = vadd.f32 %v5733_v26, %v4873_v40  ;;  %v11635_v33 = vpop.f32.mrb[111].mxu0  ;;  %v6249_v40 = vrot.slane %v20285_v10, 3  ;;  %v6256_v29 = vshrl.u32 %v18694_v63, 16  ;;  %v6259_v1 = vshll.u32 %v18694_v63, 16 }
 0x4a2   : > { %v6252_v33 = vrot.slane %v20284_v48, 4  ;;  %11747 = vmatmul.mubr.msk.bf16.gmra.mrb[216].mxu1 %vm472_vm8, %v6245_v28 }
 0x4a3   : > { %21272 = vst [vmem:[#allocation70_spill] sm:$0xff] %v18686_v49  ;;  %11853 = vmatmul.mubr.msk.bf16.gmra.mrb[216].mxu0 %vm472_vm8, %v6786_v36  ;;  %11750 = vmatprep.mubr.msk.bf16.mxu1 %vm12233_vm6, %v20406_v19  ;;  %v21275_v36 = vld [vmem:[#allocation113_spill] sm:$0xff]  ;;  %v6258_v49 = vrot.slane %v6256_v29, 3  ;;  %v6261_v52 = vrot.slane %v6259_v1, 4  ;;  %v21277_v29 = vld [vmem:[#allocation59_spill] sm:$0xff] }
 0x4a4   : > { %11856 = vmatprep.mubr.msk.bf16.mxu0 %vm12233_vm6, %v20406_v19  ;;  %v6253_v24 = vor.u32 %v6252_v33, %v6249_v40 }
 0x4a5   : > { %v4811_v21 = vpop.f32.mrb[112].mxu1  ;;  %v6262_v0 = vor.u32 %v6261_v52, %v6258_v49  ;;  %v18745_v52 = vadd.f32 %v18428_v61, %v18401_v30 }
 0x4a6   : > { %v5738_v7 = vpop.f32.mrb[112].mxu0  ;;  %v4876_v9 = vadd.f32 %v4811_v21, %v21275_v36  ;;  %v11532_v62 = vpop.f32.mrb[113].mxu1  ;;  %v6254_v40 = vsel %vm2194_vm3, %v6244_v46, %v6253_v24  ;;  %v21278_v36 = vld [vmem:[#allocation119_spill] sm:$0xff] }
 0x4a7   : > { %v18714_v26 = vadd.f32 %v5738_v7, %v4874_v6  ;;  %v11638_v31 = vpop.f32.mrb[113].mxu0  ;;  %v4814_v10 = vpop.f32.mrb[114].mxu1  ;;  %v6788_v6 = vsel %vm1804_vm0, %v6785_v12, %v6787_v22  ;;  %v21276_v7 = vld [vmem:[#allocation56_spill] sm:$0xff]  ;;  %v6789_v12 = vrot.slane %v18676_v41, 4 }
 0x4a8   : > { %v5741_v39 = vpop.f32.mrb[114].mxu0  ;;  %v4877_v31 = vadd.f32 %v4814_v10, %v21276_v7 }
 0x4a9   : > { %21274 = vst [vmem:[#allocation40_spill] sm:$0xff] %v18714_v26  ;;  %v18717_v28 = vadd.f32 %v5741_v39, %v4875_v14  ;;  %v11639_v48 = vpop.f32.mrb[115].mxu0  ;;  %v11533_v26 = vpop.f32.mrb[115].mxu1  ;;  %v18729_v14 = vadd.f32 %v18398_v20, %v18374_v42  ;;  %v6263_v39 = vsel %vm2194_vm3, %v6253_v24, %v6262_v0  ;;  %v6790_v49 = vsel %vm1804_vm0, %v6787_v22, %v6789_v12 }
 0x4aa   : > { %11751 = vmatmul.mubr.msk.bf16.gmra.mrb[220].mxu1 %vm472_vm8, %v6254_v40  ;;  %v6791_v24 = vrot.slane %v18694_v63, 4  ;;  %v21279_v40 = vld [vmem:[#allocation60_spill] sm:$0xff]  ;;  %v18768_v63 = vadd.f32 %v18463_v35, %v18436_v51 }
 0x4ab   : > { %11857 = vmatmul.mubr.msk.bf16.gmra.mrb[220].mxu0 %vm472_vm8, %v6788_v6  ;;  %11754 = vmatprep.mubr.msk.bf16.mxu1 %vm12233_vm6, %v20406_v19  ;;  %v18752_v6 = vadd.f32 %v18433_v53, %v18409_v27 }
 0x4ac   : > { %11860 = vmatprep.mubr.msk.bf16.mxu0 %vm12233_vm6, %v20406_v19  ;;  %v6792_v53 = vsel %vm1804_vm0, %v6789_v12, %v6791_v24  ;;  %vm10062_vm0 = vcmask 195584  }
 0x4ad   : > { %v4819_v46 = vpop.f32.mrb[116].mxu1 }
 0x4ae   : > { %v5746_v18 = vpop.f32.mrb[116].mxu0  ;;  %v4878_v42 = vadd.f32 %v4819_v46, %v21277_v29  ;;  %v11536_v20 = vpop.f32.mrb[117].mxu1 }
 0x4af   : > { %v18737_v10 = vadd.f32 %v5746_v18, %v4876_v9  ;;  %v11642_v48 = vpop.f32.mrb[117].mxu0  ;;  %v4822_v21 = vpop.f32.mrb[118].mxu1  ;;  %v18774_v20 = vadd.f32 %v18468_v37, %v18444_v58 }
 0x4b0   : > { %v5749_v33 = vpop.f32.mrb[118].mxu0  ;;  %v4879_v9 = vadd.f32 %v4822_v21, %v21278_v36  ;;  %v11537_v62 = vpop.f32.mrb[119].mxu1 }
 0x4b1   : > { %v18740_v1 = vadd.f32 %v5749_v33, %v4877_v31  ;;  %v11643_v26 = vpop.f32.mrb[119].mxu0  ;;  %v21280_v33 = vld [vmem:[#allocation77_spill] sm:$0xff]  ;;  %v21282_v62 = vld [vmem:[#allocation124_spill] sm:$0xff] }
 0x4b2   : > { %11755 = vmatmul.mubr.msk.bf16.gmra.mrb[224].mxu1 %vm472_vm8, %v6263_v39  ;;  %v21281_v26 = vld [vmem:[#allocation137_spill] sm:$0xff] }
 0x4b3   : > { %11861 = vmatmul.mubr.msk.bf16.gmra.mrb[224].mxu0 %vm472_vm8, %v6790_v49  ;;  %11870 = vmatprep.mubr.msk.bf16.mxu1 %vm12233_vm6, %v20406_v19 }
 0x4b4   : > { %11864 = vmatprep.mubr.msk.bf16.mxu0 %vm12233_vm6, %v20406_v19 }
 0x4b5   : > { %v6382_v7 = vpop.f32.mrb[120].mxu1 }
 0x4b6   : > { %v5754_v30 = vpop.f32.mrb[120].mxu0  ;;  %v6597_v0 = vadd.f32 %v6382_v7, %v21279_v40  ;;  %v11652_v27 = vpop.f32.mrb[121].mxu1  ;;  %v21284_v7 = vld [vmem:[#allocation126_spill] sm:$0xff] }
 0x4b7   : > { %v18760_v61 = vadd.f32 %v5754_v30, %v4878_v42  ;;  %v11646_v22 = vpop.f32.mrb[121].mxu0  ;;  %v6385_v46 = vpop.f32.mrb[122].mxu1 }
 0x4b8   : > { %v5757_v31 = vpop.f32.mrb[122].mxu0  ;;  %v6598_v29 = vadd.f32 %v6385_v46, %v21280_v33  ;;  %v11653_v42 = vpop.f32.mrb[123].mxu1  ;;  %v21283_v22 = vld [vmem:[#allocation65_spill] sm:$0xff] }
 0x4b9   : > { %v18764_v18 = vadd.f32 %v5757_v31, %v4879_v9  ;;  %v11647_v48 = vpop.f32.mrb[123].mxu0  ;;  %v21285_v31 = vshrl.u32 %v21284_v7, 16 }
 0x4ba   : > { %11871 = vmatmul.mubr.msk.bf16.vlgmr.msra.gmra.mrb[228].mxu1 %vm472_vm8, %v21281_v26  ;;  %v21288_v26 = vld [vmem:[#allocation123_spill] sm:$0xff] }
 0x4bb   : > { %11865 = vmatmul.mubr.msk.bf16.gmra.mrb[228].mxu0 %vm472_vm8, %v6792_v53  ;;  %11874 = vmatprep.mubr.msk.bf16.mxu1 %vm12233_vm6, %v20406_v19  ;;  %v7479_v40 = vrot.slane %v21285_v31, 4  ;;  %v21287_v53 = vld [vmem:[#allocation4_spill] sm:$0xff] }
 0x4bc   : > { %11980 = vmatprep.mubr.msk.bf16.mxu0 %vm12233_vm6, %v20406_v19 }
 0x4bd   : > { %v6390_v21 = vpop.f32.mrb[124].mxu1 }
 0x4be   : > { %v6911_v51 = vpop.f32.mrb[124].mxu0  ;;  %v6599_v49 = vadd.f32 %v6390_v21, %v18300_v44  ;;  %v11656_v36 = vpop.f32.mrb[125].mxu1 }
 0x4bf   : > { %v18782_v35 = vadd.f32 %v6911_v51, %v6597_v0  ;;  %v11762_v12 = vpop.f32.mrb[125].mxu0  ;;  %v6393_v9 = vpop.f32.mrb[126].mxu1  ;;  %v21286_v0 = vshll.u32 %v21284_v7, 16  ;;  %v21292_v7 = vld [vmem:[#allocation99_spill] sm:$0xff] }
 0x4c0   : > { %v6914_v39 = vpop.f32.mrb[126].mxu0  ;;  %v6600_v24 = vadd.f32 %v6393_v9, %v21282_v62  ;;  %v11657_v30 = vpop.f32.mrb[127].mxu1  ;;  %v21293_v31 = vshrl.u32 %v21292_v7, 16 }
 0x4c1   : > { %v18785_v58 = vadd.f32 %v6914_v39, %v6598_v29  ;;  %v11763_v37 = vpop.f32.mrb[127].mxu0  ;;  %v7480_v27 = vrot.slane %v21286_v0, 5  ;;  %v21290_v30 = vld [vmem:[#allocation43_spill] sm:$0xff]  ;;  %v21294_v0 = vshll.u32 %v21292_v7, 16 }
 0x4c2   : > { %11875 = vmatmul.mubr.msk.bf16.gmra.mrb[232].mxu1 %vm472_vm8, %v21287_v53  ;;  %v21289_v37 = vld [vmem:[#allocation14_spill] sm:$0xff]  ;;  %v21297_v7 = vld [vmem:[#allocation55_spill] sm:$0xff] }
 0x4c3   : > { %11981 = vmatmul.mubr.msk.bf16.vlgmr.msra.gmra.mrb[232].mxu0 %vm477_vm5, %v21283_v22  ;;  %11878 = vmatprep.mubr.msk.bf16.mxu1 %vm12233_vm6, %v20406_v19  ;;  %v7481_v29 = vor.u32 %v7480_v27, %v7479_v40  ;;  %v21291_v22 = vld [vmem:[#allocation5_spill] sm:$0xff]  ;;  %v7483_v40 = vrot.slane %v21293_v31, 4  ;;  %v7484_v27 = vrot.slane %v21294_v0, 5  ;;  %v21298_v31 = vld [vmem:[#allocation128_spill] sm:$0xff] }
 0x4c4   : > { %11984 = vmatprep.mubr.msk.bf16.mxu0 %vm12233_vm6, %v20406_v19  ;;  %v21299_v0 = vshrl.u32 %v21298_v31, 16 }
 0x4c5   : > { %v6398_v33 = vpop.f32.mrb[128].mxu1 }
 0x4c6   : > { %v6919_v44 = vpop.f32.mrb[128].mxu0  ;;  %v6601_v51 = vadd.f32 %v6398_v33, %v21288_v26  ;;  %v11660_v12 = vpop.f32.mrb[129].mxu1  ;;  %v7485_v33 = vor.u32 %v7484_v27, %v7483_v40  ;;  %v21295_v26 = vld [vmem:[#allocation95_spill] sm:$0xff]  ;;  %v21300_v40 = vshll.u32 %v21298_v31, 16 }
 0x4c7   : > { %v18800_v48 = vadd.f32 %v6919_v44, %v6599_v49  ;;  %v11766_v46 = vpop.f32.mrb[129].mxu0  ;;  %v6401_v36 = vpop.f32.mrb[130].mxu1  ;;  %v7482_v49 = vsel %vm3063_vm12, %v21291_v22, %v7481_v29 }
 0x4c8   : > { %v6922_v42 = vpop.f32.mrb[130].mxu0  ;;  %v6602_v9 = vadd.f32 %v6401_v36, %v21289_v37  ;;  %v11661_v62 = vpop.f32.mrb[131].mxu1  ;;  %v7488_v27 = vrot.slane %v21300_v40, 5  ;;  %v21304_v40 = vld [vmem:[#allocation54_spill] sm:$0xff] }
 0x4c9   : > { %v18803_v21 = vadd.f32 %v6922_v42, %v6600_v24  ;;  %v11767_v39 = vpop.f32.mrb[131].mxu0 }
 0x4ca   : > { %11879 = vmatmul.mubr.msk.bf16.gmra.mrb[236].mxu1 %vm472_vm8, %v7482_v49 }
 0x4cb   : > { %11985 = vmatmul.mubr.msk.bf16.gmra.mrb[236].mxu0 %vm477_vm5, %v21290_v30  ;;  %11882 = vmatprep.mubr.msk.bf16.mxu1 %vm12233_vm6, %v20406_v19  ;;  %v21296_v30 = vld [vmem:[#allocation15_spill] sm:$0xff] }
 0x4cc   : > { %11988 = vmatprep.mubr.msk.bf16.mxu0 %vm12233_vm6, %v20406_v19 }
 0x4cd   : > { %v6406_v46 = vpop.f32.mrb[132].mxu1 }
 0x4ce   : > { %v6927_v24 = vpop.f32.mrb[132].mxu0  ;;  %v6603_v12 = vadd.f32 %v6406_v46, %v21295_v26  ;;  %v11664_v39 = vpop.f32.mrb[133].mxu1 }
 0x4cf   : > { %v18819_v53 = vadd.f32 %v6927_v24, %v6601_v51  ;;  %v11770_v44 = vpop.f32.mrb[133].mxu0  ;;  %v6409_v62 = vpop.f32.mrb[134].mxu1  ;;  %v7486_v51 = vsel %vm3063_vm12, %v7481_v29, %v7485_v33  ;;  %v7487_v24 = vrot.slane %v21299_v0, 4  ;;  %v21302_v39 = vld [vmem:[#allocation100_spill] sm:$0xff] }
 0x4d0   : > { %v6930_v42 = vpop.f32.mrb[134].mxu0  ;;  %v6604_v22 = vadd.f32 %v6409_v62, %v21296_v30  ;;  %v11665_v49 = vpop.f32.mrb[135].mxu1 }
 0x4d1   : > { %v18822_v36 = vadd.f32 %v6930_v42, %v6602_v9  ;;  %v11771_v37 = vpop.f32.mrb[135].mxu0  ;;  %v7489_v29 = vor.u32 %v7488_v27, %v7487_v24 }
 0x4d2   : > { %11883 = vmatmul.mubr.msk.bf16.gmra.mrb[240].mxu1 %vm472_vm8, %v7486_v51  ;;  %v21303_v51 = vld [vmem:[#allocation6_spill] sm:$0xff] }
 0x4d3   : > { %11989 = vmatmul.mubr.msk.bf16.gmra.mrb[240].mxu0 %vm477_vm5, %v21297_v7  ;;  %11886 = vmatprep.mubr.msk.bf16.mxu1 %vm12233_vm6, %v20406_v19 }
 0x4d4   : > { %11992 = vmatprep.mubr.msk.bf16.mxu0 %vm12233_vm6, %v20406_v19 }
 0x4d5   : > { %v6414_v42 = vpop.f32.mrb[136].mxu1 }
 0x4d6   : > { %v6935_v9 = vpop.f32.mrb[136].mxu0  ;;  %v6605_v37 = vadd.f32 %v6414_v42, %v21302_v39  ;;  %v11668_v62 = vpop.f32.mrb[137].mxu1 }
 0x4d7   : > { %v18837_v44 = vadd.f32 %v6935_v9, %v6603_v12  ;;  %v11774_v46 = vpop.f32.mrb[137].mxu0  ;;  %v6417_v7 = vpop.f32.mrb[138].mxu1  ;;  %v7490_v12 = vsel %vm3063_vm12, %v7485_v33, %v7489_v29  ;;  %v21305_v9 = vld [vmem:[#allocation108_spill] sm:$0xff] }
 0x4d8   : > { %v6938_v26 = vpop.f32.mrb[138].mxu0  ;;  %v6606_v31 = vadd.f32 %v6417_v7, %v21303_v51  ;;  %v11669_v0 = vpop.f32.mrb[139].mxu1  ;;  %v21306_v46 = vshrl.u32 %v21305_v9, 16  ;;  %v21307_v24 = vshll.u32 %v21305_v9, 16 }
 0x4d9   : > { %21301 = vst [vmem:[#allocation71_spill] sm:$0xff] %v18837_v44  ;;  %v18840_v30 = vadd.f32 %v6938_v26, %v6604_v22  ;;  %v11775_v49 = vpop.f32.mrb[139].mxu0 }
 0x4da   : > { %v7491_v44 = vrot.slane %v21306_v46, 4  ;;  %v7492_v27 = vrot.slane %v21307_v24, 5  ;;  %11887 = vmatmul.mubr.msk.bf16.gmra.mrb[244].mxu1 %vm472_vm8, %v7490_v12  ;;  %v21310_v12 = vld [vmem:[#allocation63_spill] sm:$0xff]  ;;  %v21311_v24 = vld [vmem:[#allocation21_spill] sm:$0xff] }
 0x4db   : > { %11993 = vmatmul.mubr.msk.bf16.gmra.mrb[244].mxu0 %vm477_vm5, %v21304_v40  ;;  %11890 = vmatprep.mubr.msk.bf16.mxu1 %vm12233_vm6, %v20406_v19 }
 0x4dc   : > { %11996 = vmatprep.mubr.msk.bf16.mxu0 %vm12233_vm6, %v20406_v19  ;;  %v7493_v33 = vor.u32 %v7492_v27, %v7491_v44 }
 0x4dd   : > { %v6422_v39 = vpop.f32.mrb[140].mxu1 }
 0x4de   : > { %v6943_v22 = vpop.f32.mrb[140].mxu0  ;;  %v6607_v49 = vadd.f32 %v6422_v39, %v18440_v5  ;;  %v11672_v7 = vpop.f32.mrb[141].mxu1 }
 0x4df   : > { %v18855_v42 = vadd.f32 %v6943_v22, %v6605_v37  ;;  %v11778_v26 = vpop.f32.mrb[141].mxu0  ;;  %v6425_v40 = vpop.f32.mrb[142].mxu1  ;;  %v7494_v37 = vsel %vm3063_vm12, %v7489_v29, %v7493_v33  ;;  %v21312_v22 = vld [vmem:[#allocation110_spill] sm:$0xff] }
 0x4e0   : > { %v6946_v62 = vpop.f32.mrb[142].mxu0  ;;  %v6608_v9 = vadd.f32 %v6425_v40, %v21310_v12  ;;  %v11673_v46 = vpop.f32.mrb[143].mxu1  ;;  %v21313_v26 = vshrl.u32 %v21312_v22, 16  ;;  %v21314_v44 = vshll.u32 %v21312_v22, 16  ;;  %v21317_v22 = vld [vmem:[#allocation25_spill] sm:$0xff] }
 0x4e1   : > { %21308 = vst [vmem:[#allocation26_spill] sm:$0xff] %v18855_v42  ;;  %v18858_v51 = vadd.f32 %v6946_v62, %v6606_v31  ;;  %v11779_v0 = vpop.f32.mrb[143].mxu0 }
 0x4e2   : > { %v7495_v42 = vrot.slane %v21313_v26, 4  ;;  %v7496_v27 = vrot.slane %v21314_v44, 5  ;;  %11891 = vmatmul.mubr.msk.bf16.gmra.mrb[248].mxu1 %vm472_vm8, %v7494_v37  ;;  %v21316_v0 = vld [vmem:[#allocation18_spill] sm:$0xff] }
 0x4e3   : > { %21309 = vst [vmem:[#allocation31_spill] sm:$0xff] %v18858_v51  ;;  %11997 = vmatmul.mubr.msk.bf16.gmra.mrb[248].mxu0 %vm477_vm5, %v21311_v24  ;;  %11894 = vmatprep.mubr.msk.bf16.mxu1 %vm12233_vm6, %v20406_v19  ;;  %v21318_v51 = vld [vmem:[#allocation36_spill] sm:$0xff] }
 0x4e4   : > { %12000 = vmatprep.mubr.msk.bf16.mxu0 %vm12233_vm6, %v20406_v19  ;;  %v7497_v29 = vor.u32 %v7496_v27, %v7495_v42 }
 0x4e5   : > { %v6430_v62 = vpop.f32.mrb[144].mxu1 }
 0x4e6   : > { %v6951_v5 = vpop.f32.mrb[144].mxu0  ;;  %v6609_v40 = vadd.f32 %v6430_v62, %v21316_v0  ;;  %v11676_v12 = vpop.f32.mrb[145].mxu1 }
 0x4e7   : > { %v18873_v31 = vadd.f32 %v6951_v5, %v6607_v49  ;;  %v11782_v39 = vpop.f32.mrb[145].mxu0  ;;  %v6433_v37 = vpop.f32.mrb[146].mxu1  ;;  %v7498_v49 = vsel %vm3063_vm12, %v7493_v33, %v7497_v29  ;;  %v21319_v5 = vld [vmem:[#allocation130_spill] sm:$0xff] }
 0x4e8   : > { %v6954_v7 = vpop.f32.mrb[146].mxu0  ;;  %v6610_v26 = vadd.f32 %v6433_v37, %v21317_v22  ;;  %v11677_v44 = vpop.f32.mrb[147].mxu1  ;;  %v21320_v39 = vshrl.u32 %v21319_v5, 16  ;;  %v21321_v42 = vshll.u32 %v21319_v5, 16 }
 0x4e9   : > { %21315 = vst [vmem:[#allocation134_spill] sm:$0xff] %v18873_v31  ;;  %v18876_v46 = vadd.f32 %v6954_v7, %v6608_v9  ;;  %v11783_v24 = vpop.f32.mrb[147].mxu0 }
 0x4ea   : > { %v7499_v31 = vrot.slane %v21320_v39, 4  ;;  %v7500_v27 = vrot.slane %v21321_v42, 5  ;;  %11895 = vmatmul.mubr.msk.bf16.gmra.mrb[252].mxu1 %vm472_vm8, %v7498_v49  ;;  %v21322_v39 = vld [vmem:[#allocation9_spill] sm:$0xff] }
 0x4eb   : > { %12001 = vmatmul.mubr.msk.bf16.gmra.mrb[252].mxu0 %vm477_vm5, %v21318_v51  ;;  %11898 = vmatprep.mubr.msk.bf16.mxu1 %vm12233_vm6, %v20406_v19  ;;  %v21323_v42 = vld [vmem:[#allocation133_spill] sm:$0xff] }
 0x4ec   : > { %12004 = vmatprep.mubr.msk.bf16.mxu0 %vm12233_vm6, %v20406_v19  ;;  %v7501_v33 = vor.u32 %v7500_v27, %v7499_v31  ;;  %v21325_v31 = vshll.u32 %v21323_v42, 16 }
 0x4ed   : > { %v6438_v7 = vpop.f32.mrb[148].mxu1 }
 0x4ee   : > { %v6959_v9 = vpop.f32.mrb[148].mxu0  ;;  %v6611_v12 = vadd.f32 %v6438_v7, %v18504_v4  ;;  %v11680_v24 = vpop.f32.mrb[149].mxu1  ;;  %v7504_v27 = vrot.slane %v21325_v31, 5  ;;  %v21327_v31 = vld [vmem:[#allocation106_spill] sm:$0xff] }
 0x4ef   : > { %v18891_v62 = vadd.f32 %v6959_v9, %v6609_v40  ;;  %v11786_v51 = vpop.f32.mrb[149].mxu0  ;;  %v6441_v44 = vpop.f32.mrb[150].mxu1  ;;  %v7502_v40 = vsel %vm3063_vm12, %v7497_v29, %v7501_v33  ;;  %v21324_v9 = vshrl.u32 %v21323_v42, 16 }
 0x4f0   : > { %v6962_v0 = vpop.f32.mrb[150].mxu0  ;;  %v6612_v49 = vadd.f32 %v6441_v44, %v18516_v43  ;;  %v11681_v5 = vpop.f32.mrb[151].mxu1 }
 0x4f1   : > { %v18894_v37 = vadd.f32 %v6962_v0, %v6610_v26  ;;  %v11787_v22 = vpop.f32.mrb[151].mxu0  ;;  %v7503_v51 = vrot.slane %v21324_v9, 4  ;;  %v21326_v9 = vld [vmem:[#allocation29_spill] sm:$0xff] }
 0x4f2   : > { %11899 = vmatmul.mubr.msk.bf16.gmra.mrb[0].mxu1 %vm472_vm8, %v7502_v40 }
 0x4f3   : > { %12005 = vmatmul.mubr.msk.bf16.gmra.mrb[0].mxu0 %vm477_vm5, %v21322_v39  ;;  %11902 = vmatprep.mubr.msk.bf16.mxu1 %vm12233_vm6, %v20406_v19  ;;  %v7505_v29 = vor.u32 %v7504_v27, %v7503_v51  ;;  %v21329_v51 = vshll.u32 %v21327_v31, 16 }
 0x4f4   : > { %12008 = vmatprep.mubr.msk.bf16.mxu0 %vm12233_vm6, %v20406_v19 }
 0x4f5   : > { %v6446_v7 = vpop.f32.mrb[152].mxu1  ;;  %v7508_v27 = vrot.slane %v21329_v51, 5  ;;  %v21331_v51 = vld [vmem:[#allocation112_spill] sm:$0xff] }
 0x4f6   : > { %v6967_v4 = vpop.f32.mrb[152].mxu0  ;;  %v6613_v24 = vadd.f32 %v6446_v7, %v18535_v8  ;;  %v11684_v22 = vpop.f32.mrb[153].mxu1 }
 0x4f7   : > { %v18909_v43 = vadd.f32 %v6967_v4, %v6611_v12  ;;  %v11790_v26 = vpop.f32.mrb[153].mxu0  ;;  %v6449_v39 = vpop.f32.mrb[154].mxu1  ;;  %v7506_v12 = vsel %vm3063_vm12, %v7501_v33, %v7505_v29  ;;  %v21328_v4 = vshrl.u32 %v21327_v31, 16 }
 0x4f8   : > { %v6970_v0 = vpop.f32.mrb[154].mxu0  ;;  %v6614_v40 = vadd.f32 %v6449_v39, %v18547_v38  ;;  %v11685_v42 = vpop.f32.mrb[155].mxu1 }
 0x4f9   : > { %v18912_v44 = vadd.f32 %v6970_v0, %v6612_v49  ;;  %v11791_v5 = vpop.f32.mrb[155].mxu0  ;;  %v7507_v26 = vrot.slane %v21328_v4, 4  ;;  %v21330_v4 = vld [vmem:[#allocation19_spill] sm:$0xff] }
 0x4fa   : > { %11903 = vmatmul.mubr.msk.bf16.gmra.mrb[4].mxu1 %vm472_vm8, %v7506_v12 }
 0x4fb   : > { %12009 = vmatmul.mubr.msk.bf16.gmra.mrb[4].mxu0 %vm477_vm5, %v21326_v9  ;;  %11906 = vmatprep.mubr.msk.bf16.mxu1 %vm12233_vm6, %v20406_v19  ;;  %v7509_v33 = vor.u32 %v7508_v27, %v7507_v26  ;;  %v21333_v26 = vshll.u32 %v21331_v51, 16 }
 0x4fc   : > { %12012 = vmatprep.mubr.msk.bf16.mxu0 %vm12233_vm6, %v20406_v19 }
 0x4fd   : > { %v6454_v7 = vpop.f32.mrb[156].mxu1  ;;  %v7512_v27 = vrot.slane %v21333_v26, 5  ;;  %v21335_v26 = vld [vmem:[#allocation117_spill] sm:$0xff] }
 0x4fe   : > { %v6975_v8 = vpop.f32.mrb[156].mxu0  ;;  %v6615_v22 = vadd.f32 %v6454_v7, %v18566_v57  ;;  %v11688_v5 = vpop.f32.mrb[157].mxu1 }
 0x4ff   : > { %v18927_v38 = vadd.f32 %v6975_v8, %v6613_v24  ;;  %v11794_v49 = vpop.f32.mrb[157].mxu0  ;;  %v6457_v9 = vpop.f32.mrb[158].mxu1  ;;  %v7510_v24 = vsel %vm3063_vm12, %v7505_v29, %v7509_v33  ;;  %v21332_v8 = vshrl.u32 %v21331_v51, 16 }
 0x500   : > { %v6978_v0 = vpop.f32.mrb[158].mxu0  ;;  %v6616_v12 = vadd.f32 %v6457_v9, %v18578_v23  ;;  %v11689_v31 = vpop.f32.mrb[159].mxu1 }
 0x501   : > { %v18930_v39 = vadd.f32 %v6978_v0, %v6614_v40  ;;  %v11795_v42 = vpop.f32.mrb[159].mxu0  ;;  %v7511_v49 = vrot.slane %v21332_v8, 4  ;;  %v21334_v8 = vld [vmem:[#allocation30_spill] sm:$0xff] }
 0x502   : > { %11907 = vmatmul.mubr.msk.bf16.gmra.mrb[8].mxu1 %vm472_vm8, %v7510_v24 }
 0x503   : > { %12013 = vmatmul.mubr.msk.bf16.gmra.mrb[8].mxu0 %vm477_vm5, %v21330_v4  ;;  %11910 = vmatprep.mubr.msk.bf16.mxu1 %vm12233_vm6, %v20406_v19  ;;  %v7513_v29 = vor.u32 %v7512_v27, %v7511_v49  ;;  %v21337_v49 = vshll.u32 %v21335_v26, 16 }
 0x504   : > { %12016 = vmatprep.mubr.msk.bf16.mxu0 %vm12233_vm6, %v20406_v19 }
 0x505   : > { %v6462_v7 = vpop.f32.mrb[160].mxu1  ;;  %v7516_v27 = vrot.slane %v21337_v49, 5 }
 0x506   : > { %v6983_v57 = vpop.f32.mrb[160].mxu0  ;;  %v6617_v5 = vadd.f32 %v6462_v7, %v18597_v55  ;;  %v11692_v42 = vpop.f32.mrb[161].mxu1 }
 0x507   : > { %v18945_v23 = vadd.f32 %v6983_v57, %v6615_v22  ;;  %v11798_v40 = vpop.f32.mrb[161].mxu0  ;;  %v6465_v4 = vpop.f32.mrb[162].mxu1  ;;  %v7514_v22 = vsel %vm3063_vm12, %v7509_v33, %v7513_v29  ;;  %v21336_v57 = vshrl.u32 %v21335_v26, 16 }
 0x508   : > { %v6986_v0 = vpop.f32.mrb[162].mxu0  ;;  %v6618_v24 = vadd.f32 %v6465_v4, %v18609_v59  ;;  %v11693_v51 = vpop.f32.mrb[163].mxu1 }
 0x509   : > { %v18948_v9 = vadd.f32 %v6986_v0, %v6616_v12  ;;  %v11799_v31 = vpop.f32.mrb[163].mxu0  ;;  %v7515_v40 = vrot.slane %v21336_v57, 4  ;;  %v21339_v57 = vld [vmem:[#allocation28_spill] sm:$0xff] }
 0x50a   : > { %11911 = vmatmul.mubr.msk.bf16.gmra.mrb[12].mxu1 %vm472_vm8, %v7514_v22 }
 0x50b   : > { %12017 = vmatmul.mubr.msk.bf16.gmra.mrb[12].mxu0 %vm477_vm5, %v21334_v8  ;;  %11914 = vmatprep.mubr.msk.bf16.mxu1 %vm12233_vm6, %v20406_v19  ;;  %v7517_v33 = vor.u32 %v7516_v27, %v7515_v40 }
 0x50c   : > { %12020 = vmatprep.mubr.msk.bf16.mxu0 %vm12233_vm6, %v20406_v19 }
 0x50d   : > { %v6470_v7 = vpop.f32.mrb[164].mxu1 }
 0x50e   : > { %v6991_v55 = vpop.f32.mrb[164].mxu0  ;;  %v6619_v42 = vadd.f32 %v6470_v7, %v18628_v60  ;;  %v11696_v31 = vpop.f32.mrb[165].mxu1  ;;  %v21340_v60 = vld [vmem:[#allocation12_spill] sm:$0xff] }
 0x50f   : > { %v18963_v59 = vadd.f32 %v6991_v55, %v6617_v5  ;;  %v11802_v12 = vpop.f32.mrb[165].mxu0  ;;  %v6473_v8 = vpop.f32.mrb[166].mxu1  ;;  %v7518_v5 = vsel %vm3063_vm12, %v7513_v29, %v7517_v33  ;;  %v21342_v49 = vshll.u32 %v21340_v60, 16 }
 0x510   : > { %v6994_v0 = vpop.f32.mrb[166].mxu0  ;;  %v6620_v22 = vadd.f32 %v6473_v8, %v18640_v16  ;;  %v11697_v26 = vpop.f32.mrb[167].mxu1 }
 0x511   : > { %v18966_v4 = vadd.f32 %v6994_v0, %v6618_v24  ;;  %v11803_v51 = vpop.f32.mrb[167].mxu0  ;;  %v21341_v24 = vshrl.u32 %v21340_v60, 16  ;;  %v7520_v16 = vrot.slane %v21342_v49, 5  ;;  %v21344_v60 = vld [vmem:[#allocation120_spill] sm:$0xff] }
 0x512   : > { %11915 = vmatmul.mubr.msk.bf16.gmra.mrb[16].mxu1 %vm472_vm8, %v7518_v5  ;;  %v21345_v49 = vshrl.u32 %v21344_v60, 16 }
 0x513   : > { %21338 = vst [vmem:[#allocation64_spill] sm:$0xff] %v18966_v4  ;;  %12021 = vmatmul.mubr.msk.bf16.gmra.mrb[16].mxu0 %vm477_vm5, %v21339_v57  ;;  %11918 = vmatprep.mubr.msk.bf16.mxu1 %vm12233_vm6, %v20406_v19  ;;  %v7519_v40 = vrot.slane %v21341_v24, 4  ;;  %v21343_v4 = vld [vmem:[#allocation39_spill] sm:$0xff] }
 0x514   : > { %12024 = vmatprep.mubr.msk.bf16.mxu0 %vm12233_vm6, %v20406_v19 }
 0x515   : > { %v6478_v7 = vpop.f32.mrb[168].mxu1  ;;  %v7521_v57 = vor.u32 %v7520_v16, %v7519_v40 }
 0x516   : > { %v6999_v27 = vpop.f32.mrb[168].mxu0  ;;  %v6621_v0 = vadd.f32 %v6478_v7, %v18659_v25  ;;  %v11700_v31 = vpop.f32.mrb[169].mxu1 }
 0x517   : > { %v18981_v55 = vadd.f32 %v6999_v27, %v6619_v42  ;;  %v11806_v12 = vpop.f32.mrb[169].mxu0  ;;  %v6481_v26 = vpop.f32.mrb[170].mxu1  ;;  %v7522_v42 = vsel %vm3063_vm12, %v7517_v33, %v7521_v57  ;;  %v7523_v27 = vrot.slane %v21345_v49, 4  ;;  %v21348_v49 = vld [vmem:[#allocation121_spill] sm:$0xff] }
 0x518   : > { %v7002_v29 = vpop.f32.mrb[170].mxu0  ;;  %v6622_v5 = vadd.f32 %v6481_v26, %v18671_v13  ;;  %v11701_v24 = vpop.f32.mrb[171].mxu1  ;;  %v21346_v12 = vshll.u32 %v21344_v60, 16  ;;  %v21347_v60 = vld [vmem:[#allocation73_spill] sm:$0xff] }
 0x519   : > { %v18984_v51 = vadd.f32 %v7002_v29, %v6620_v22  ;;  %v11807_v8 = vpop.f32.mrb[171].mxu0 }
 0x51a   : > { %v7524_v25 = vrot.slane %v21346_v12, 5  ;;  %11919 = vmatmul.mubr.msk.bf16.gmra.mrb[20].mxu1 %vm472_vm8, %v7522_v42  ;;  %v21349_v12 = vshrl.u32 %v21348_v49, 16 }
 0x51b   : > { %12025 = vmatmul.mubr.msk.bf16.gmra.mrb[20].mxu0 %vm477_vm5, %v21343_v4  ;;  %11922 = vmatprep.mubr.msk.bf16.mxu1 %vm12233_vm6, %v20406_v19 }
 0x51c   : > { %12028 = vmatprep.mubr.msk.bf16.mxu0 %vm12233_vm6, %v20406_v19  ;;  %v7525_v33 = vor.u32 %v7524_v25, %v7523_v27  ;;  %v21350_v27 = vshll.u32 %v21348_v49, 16  ;;  %v21351_v49 = vld [vmem:[#allocation72_spill] sm:$0xff] }
 0x51d   : > { %v6486_v40 = vpop.f32.mrb[172].mxu1 }
 0x51e   : > { %v7007_v13 = vpop.f32.mrb[172].mxu0  ;;  %v6623_v7 = vadd.f32 %v6486_v40, %v18690_v47  ;;  %v11704_v29 = vpop.f32.mrb[173].mxu1  ;;  %v7528_v25 = vrot.slane %v21350_v27, 5 }
 0x51f   : > { %v18999_v22 = vadd.f32 %v7007_v13, %v6621_v0  ;;  %v11810_v4 = vpop.f32.mrb[173].mxu0  ;;  %v6489_v26 = vpop.f32.mrb[174].mxu1  ;;  %v7526_v0 = vsel %vm3063_vm12, %v7521_v57, %v7525_v33  ;;  %v7527_v13 = vrot.slane %v21349_v12, 4  ;;  %v21352_v12 = vld [vmem:[#allocation86_spill] sm:$0xff] }
 0x520   : > { %v7010_v16 = vpop.f32.mrb[174].mxu0  ;;  %v6624_v24 = vadd.f32 %v6489_v26, %v18704_v32  ;;  %v11705_v42 = vpop.f32.mrb[175].mxu1  ;;  %v21353_v27 = vshrl.u32 %v21352_v12, 16 }
 0x521   : > { %v19002_v31 = vadd.f32 %v7010_v16, %v6622_v5  ;;  %v11811_v8 = vpop.f32.mrb[175].mxu0  ;;  %v7529_v57 = vor.u32 %v7528_v25, %v7527_v13  ;;  %v21354_v13 = vshll.u32 %v21352_v12, 16  ;;  %v21355_v12 = vld [vmem:[#allocation62_spill] sm:$0xff] }
 0x522   : > { %11923 = vmatmul.mubr.msk.bf16.gmra.mrb[24].mxu1 %vm472_vm8, %v7526_v0 }
 0x523   : > { %12029 = vmatmul.mubr.msk.bf16.gmra.mrb[24].mxu0 %vm477_vm5, %v21347_v60  ;;  %11926 = vmatprep.mubr.msk.bf16.mxu1 %vm12233_vm6, %v20406_v19  ;;  %v7532_v25 = vrot.slane %v21354_v13, 5 }
 0x524   : > { %12032 = vmatprep.mubr.msk.bf16.mxu0 %vm12233_vm6, %v20406_v19 }
 0x525   : > { %v6494_v4 = vpop.f32.mrb[176].mxu1 }
 0x526   : > { %v7015_v47 = vpop.f32.mrb[176].mxu0  ;;  %v6625_v16 = vadd.f32 %v6494_v4, %v18721_v34  ;;  %v11708_v29 = vpop.f32.mrb[177].mxu1 }
 0x527   : > { %v19017_v32 = vadd.f32 %v7015_v47, %v6623_v7  ;;  %v11814_v5 = vpop.f32.mrb[177].mxu0  ;;  %v6497_v42 = vpop.f32.mrb[178].mxu1  ;;  %v7530_v7 = vsel %vm3063_vm12, %v7525_v33, %v7529_v57  ;;  %v7531_v47 = vrot.slane %v21353_v27, 4  ;;  %v21356_v27 = vld [vmem:[#allocation47_spill] sm:$0xff] }
 0x528   : > { %v7018_v40 = vpop.f32.mrb[178].mxu0  ;;  %v6626_v60 = vadd.f32 %v6497_v42, %v18729_v14  ;;  %v11709_v0 = vpop.f32.mrb[179].mxu1  ;;  %v21357_v13 = vshrl.u32 %v21356_v27, 16 }
 0x529   : > { %v19020_v8 = vadd.f32 %v7018_v40, %v6624_v24  ;;  %v11815_v26 = vpop.f32.mrb[179].mxu0  ;;  %v7533_v33 = vor.u32 %v7532_v25, %v7531_v47  ;;  %v21358_v47 = vshll.u32 %v21356_v27, 16 }
 0x52a   : > { %11927 = vmatmul.mubr.msk.bf16.gmra.mrb[28].mxu1 %vm472_vm8, %v7530_v7 }
 0x52b   : > { %12033 = vmatmul.mubr.msk.bf16.gmra.mrb[28].mxu0 %vm477_vm5, %v21351_v49  ;;  %11930 = vmatprep.mubr.msk.bf16.mxu1 %vm12233_vm6, %v20406_v19  ;;  %v7536_v25 = vrot.slane %v21358_v47, 5  ;;  %v21360_v47 = vld [vmem:[#allocation32_spill] sm:$0xff] }
 0x52c   : > { %12036 = vmatprep.mubr.msk.bf16.mxu0 %vm12233_vm6, %v20406_v19 }
 0x52d   : > { %v6502_v5 = vpop.f32.mrb[180].mxu1 }
 0x52e   : > { %v7023_v34 = vpop.f32.mrb[180].mxu0  ;;  %v6627_v40 = vadd.f32 %v6502_v5, %v18745_v52  ;;  %v11712_v29 = vpop.f32.mrb[181].mxu1 }
 0x52f   : > { %v19035_v14 = vadd.f32 %v7023_v34, %v6625_v16  ;;  %v11818_v24 = vpop.f32.mrb[181].mxu0  ;;  %v6505_v0 = vpop.f32.mrb[182].mxu1  ;;  %v7534_v16 = vsel %vm3063_vm12, %v7529_v57, %v7533_v33  ;;  %v7535_v34 = vrot.slane %v21357_v13, 4 }
 0x530   : > { %v7026_v4 = vpop.f32.mrb[182].mxu0  ;;  %v6628_v49 = vadd.f32 %v6505_v0, %v18752_v6  ;;  %v11713_v7 = vpop.f32.mrb[183].mxu1 }
 0x531   : > { %v19038_v26 = vadd.f32 %v7026_v4, %v6626_v60  ;;  %v11819_v42 = vpop.f32.mrb[183].mxu0  ;;  %v19051_v52 = vpop.permute.xlu0 %9359  ;;  %v7537_v4 = vor.u32 %v7536_v25, %v7535_v34 }
 0x532   : > { %11931 = vmatmul.mubr.msk.bf16.gmra.mrb[32].mxu1 %vm472_vm8, %v7534_v16  ;;  %v19055_v6 = vpop.permute.xlu1 %9361 }
 0x533   : > { %12037 = vmatmul.mubr.msk.bf16.gmra.mrb[32].mxu0 %vm477_vm5, %v21355_v12  ;;  %11934 = vmatprep.mubr.msk.bf16.mxu1 %vm12233_vm6, %v20406_v19  ;;  %21359 = vst [vmem:[#allocation131_spill] sm:$0xff] %v19055_v6 }
 0x534   : > { %12040 = vmatprep.mubr.msk.bf16.mxu0 %vm12233_vm6, %v20406_v19 }
 0x535   : > { %v6510_v5 = vpop.f32.mrb[184].mxu1 }
 0x536   : > { %v7031_v60 = vpop.f32.mrb[184].mxu0  ;;  %v6629_v42 = vadd.f32 %v6510_v5, %v18768_v63  ;;  %v11716_v0 = vpop.f32.mrb[185].mxu1 }
 0x537   : > { %v19057_v57 = vadd.f32 %v7031_v60, %v6627_v40  ;;  %v11822_v24 = vpop.f32.mrb[185].mxu0  ;;  %v6513_v16 = vpop.f32.mrb[186].mxu1  ;;  %v7538_v40 = vsel %vm3063_vm12, %v7533_v33, %v7537_v4  ;;  %v21361_v60 = vld [vmem:[#allocation94_spill] sm:$0xff] }
 0x538   : > { %v7034_v29 = vpop.f32.mrb[186].mxu0  ;;  %v6630_v27 = vadd.f32 %v6513_v16, %v18774_v20  ;;  %v11717_v13 = vpop.f32.mrb[187].mxu1  ;;  %v21362_v24 = vshrl.u32 %v21361_v60, 16  ;;  %v21363_v34 = vshll.u32 %v21361_v60, 16 }
 0x539   : > { %v19060_v7 = vadd.f32 %v7034_v29, %v6628_v49  ;;  %v11823_v12 = vpop.f32.mrb[187].mxu0  ;;  %v19073_v63 = vpop.permute.xlu0 %9415 }
 0x53a   : > { %v7539_v6 = vrot.slane %v21362_v24, 4  ;;  %v7540_v25 = vrot.slane %v21363_v34, 5  ;;  %11935 = vmatmul.mubr.msk.bf16.gmra.mrb[36].mxu1 %vm472_vm8, %v7538_v40  ;;  %21364 = vst [vmem:[#allocation135_spill] sm:$0xff] %v19073_v63  ;;  %v19077_v20 = vpop.permute.xlu1 %9417  ;;  %v21366_v63 = vld [vmem:[#allocation79_spill] sm:$0xff] }
 0x53b   : > { %12041 = vmatmul.mubr.msk.bf16.gmra.mrb[36].mxu0 %vm477_vm5, %v21360_v47  ;;  %11938 = vmatprep.mubr.msk.bf16.mxu1 %vm12233_vm6, %v20406_v19  ;;  %21365 = vst [vmem:[#allocation11_spill] sm:$0xff] %v19077_v20  ;;  %v21371_v20 = vld [vmem:[#allocation10_spill] sm:$0xff] }
 0x53c   : > { %12044 = vmatprep.mubr.msk.bf16.mxu0 %vm12233_vm6, %v20406_v19  ;;  %v7541_v0 = vor.u32 %v7540_v25, %v7539_v6  ;;  %v21368_v6 = vshll.u32 %v18459_v17, 16 }
 0x53d   : > { %v6518_v29 = vpop.f32.mrb[188].mxu1 }
 0x53e   : > { %v7039_v49 = vpop.f32.mrb[188].mxu0  ;;  %v6631_v16 = vadd.f32 %v6518_v29, %v18495_v45  ;;  %v11720_v13 = vpop.f32.mrb[189].mxu1  ;;  %v7544_v25 = vrot.slane %v21368_v6, 5 }
 0x53f   : > { %v19079_v33 = vadd.f32 %v7039_v49, %v6629_v42  ;;  %v11826_v5 = vpop.f32.mrb[189].mxu0  ;;  %v6521_v60 = vpop.f32.mrb[190].mxu1  ;;  %v7542_v42 = vsel %vm3063_vm12, %v7537_v4, %v7541_v0  ;;  %v21367_v49 = vshrl.u32 %v18459_v17, 16 }
 0x540   : > { %v7042_v12 = vpop.f32.mrb[190].mxu0  ;;  %v6632_v24 = vadd.f32 %v6521_v60, %v18500_v50  ;;  %v11721_v34 = vpop.f32.mrb[191].mxu1 }
 0x541   : > { %v19082_v47 = vadd.f32 %v7042_v12, %v6630_v27  ;;  %v11827_v40 = vpop.f32.mrb[191].mxu0  ;;  %v7543_v5 = vrot.slane %v21367_v49, 4  ;;  %v19095_v45 = vpop.permute.xlu0 %9363 }
 0x542   : > { %11939 = vmatmul.mubr.msk.bf16.gmra.mrb[40].mxu1 %vm472_vm8, %v7542_v42  ;;  %v19099_v50 = vpop.permute.xlu1 %9365 }
 0x543   : > { %12045 = vmatmul.mubr.msk.bf16.gmra.mrb[40].mxu0 %vm477_vm5, %v21366_v63  ;;  %11942 = vmatprep.mubr.msk.bf16.mxu1 %vm12233_vm6, %v20406_v19  ;;  %v7545_v12 = vor.u32 %v7544_v25, %v7543_v5  ;;  %v21373_v5 = vshll.u32 %v18490_v3, 16 }
 0x544   : > { %12048 = vmatprep.mubr.msk.bf16.mxu0 %vm12233_vm6, %v20406_v19 }
 0x545   : > { %v6526_v29 = vpop.f32.mrb[192].mxu1  ;;  %v7548_v25 = vrot.slane %v21373_v5, 5  ;;  %v21379_v5 = vld [vmem:[#allocation67_spill] sm:$0xff] }
 0x546   : > { %v7047_v27 = vpop.f32.mrb[192].mxu0  ;;  %v6633_v13 = vadd.f32 %v6526_v29, %v18526_v11  ;;  %v11724_v40 = vpop.f32.mrb[193].mxu1 }
 0x547   : > { %v19101_v4 = vadd.f32 %v7047_v27, %v6631_v16  ;;  %v11830_v63 = vpop.f32.mrb[193].mxu0  ;;  %v6529_v42 = vpop.f32.mrb[194].mxu1  ;;  %v7546_v16 = vsel %vm3063_vm12, %v7541_v0, %v7545_v12  ;;  %v21372_v27 = vshrl.u32 %v18490_v3, 16  ;;  %v21377_v40 = vld [vmem:[#allocation58_spill] sm:$0xff] }
 0x548   : > { %v7050_v17 = vpop.f32.mrb[194].mxu0  ;;  %v6634_v49 = vadd.f32 %v6529_v42, %v18531_v54  ;;  %v11725_v6 = vpop.f32.mrb[195].mxu1 }
 0x549   : > { %21369 = vst [vmem:[#allocation136_spill] sm:$0xff] %v19101_v4  ;;  %v19104_v60 = vadd.f32 %v7050_v17, %v6632_v24  ;;  %v11831_v34 = vpop.f32.mrb[195].mxu0  ;;  %v7547_v63 = vrot.slane %v21372_v27, 4  ;;  %v19117_v11 = vpop.permute.xlu0 %9419  ;;  %v21380_v4 = vld [vmem:[#allocation69_spill] sm:$0xff] }
 0x54a   : > { %11943 = vmatmul.mubr.msk.bf16.gmra.mrb[44].mxu1 %vm472_vm8, %v7546_v16  ;;  %21374 = vst [vmem:[#allocation27_spill] sm:$0xff] %v19117_v11  ;;  %v19121_v54 = vpop.permute.xlu1 %9421 }
 0x54b   : > { %21370 = vst [vmem:[#allocation75_spill] sm:$0xff] %v19104_v60  ;;  %12049 = vmatmul.mubr.msk.bf16.gmra.mrb[44].mxu0 %vm477_vm5, %v21371_v20  ;;  %11946 = vmatprep.mubr.msk.bf16.mxu1 %vm12233_vm6, %v20406_v19  ;;  %21375 = vst [vmem:[#allocation33_spill] sm:$0xff] %v19121_v54  ;;  %v7549_v17 = vor.u32 %v7548_v25, %v7547_v63 }
 0x54c   : > { %12052 = vmatprep.mubr.msk.bf16.mxu0 %vm12233_vm6, %v20406_v19 }
 0x54d   : > { %v6534_v29 = vpop.f32.mrb[196].mxu1 }
 0x54e   : > { %v7055_v20 = vpop.f32.mrb[196].mxu0  ;;  %v6635_v34 = vadd.f32 %v6534_v29, %v21377_v40  ;;  %v11728_v42 = vpop.f32.mrb[197].mxu1 }
 0x54f   : > { %v19123_v0 = vadd.f32 %v7055_v20, %v6633_v13  ;;  %v11834_v24 = vpop.f32.mrb[197].mxu0  ;;  %v6537_v27 = vpop.f32.mrb[198].mxu1  ;;  %v7550_v13 = vsel %vm3063_vm12, %v7545_v12, %v7549_v17  ;;  %v21381_v20 = vld [vmem:[#allocation46_spill] sm:$0xff] }
 0x550   : > { %v7058_v3 = vpop.f32.mrb[198].mxu0  ;;  %v6636_v11 = vadd.f32 %v6537_v27, %v21379_v5  ;;  %v11729_v60 = vpop.f32.mrb[199].mxu1  ;;  %v21382_v24 = vshrl.u32 %v21381_v20, 16  ;;  %v21383_v63 = vshll.u32 %v21381_v20, 16 }
 0x551   : > { %21376 = vst [vmem:[#allocation76_spill] sm:$0xff] %v19123_v0  ;;  %v19126_v6 = vadd.f32 %v7058_v3, %v6634_v49  ;;  %v11835_v16 = vpop.f32.mrb[199].mxu0  ;;  %v19139_v49 = vpop.permute.xlu0 %9367 }
 0x552   : > { %v7551_v54 = vrot.slane %v21382_v24, 4  ;;  %v7552_v25 = vrot.slane %v21383_v63, 5  ;;  %11947 = vmatmul.mubr.msk.bf16.gmra.mrb[48].mxu1 %vm472_vm8, %v7550_v13  ;;  %21384 = vst [vmem:[#allocation82_spill] sm:$0xff] %v19139_v49  ;;  %v19143_v60 = vpop.permute.xlu1 %9369  ;;  %v21386_v16 = vld [vmem:[#allocation24_spill] sm:$0xff]  ;;  %v21388_v63 = vld [vmem:[#allocation57_spill] sm:$0xff] }
 0x553   : > { %21378 = vst [vmem:[#allocation80_spill] sm:$0xff] %v19126_v6  ;;  %12053 = vmatmul.mubr.msk.bf16.gmra.mrb[48].mxu0 %vm477_vm5, %v21380_v4  ;;  %11950 = vmatprep.mubr.msk.bf16.mxu1 %vm12233_vm6, %v20406_v19  ;;  %v21389_v49 = vld [vmem:[#allocation45_spill] sm:$0xff] }
 0x554   : > { %12056 = vmatprep.mubr.msk.bf16.mxu0 %vm12233_vm6, %v20406_v19  ;;  %v7553_v40 = vor.u32 %v7552_v25, %v7551_v54 }
 0x555   : > { %v6542_v3 = vpop.f32.mrb[200].mxu1 }
 0x556   : > { %v7063_v4 = vpop.f32.mrb[200].mxu0  ;;  %v6637_v27 = vadd.f32 %v6542_v3, %v21386_v16  ;;  %v11732_v5 = vpop.f32.mrb[201].mxu1 }
 0x557   : > { %v19145_v12 = vadd.f32 %v7063_v4, %v6635_v34  ;;  %v11838_v29 = vpop.f32.mrb[201].mxu0  ;;  %v6545_v24 = vpop.f32.mrb[202].mxu1  ;;  %v7554_v34 = vsel %vm3063_vm12, %v7549_v17, %v7553_v40  ;;  %v21390_v4 = vld [vmem:[#allocation37_spill] sm:$0xff] }
 0x558   : > { %v7066_v42 = vpop.f32.mrb[202].mxu0  ;;  %v6638_v6 = vadd.f32 %v6545_v24, %v21388_v63  ;;  %v11733_v0 = vpop.f32.mrb[203].mxu1  ;;  %v21391_v29 = vshrl.u32 %v21390_v4, 16  ;;  %v21392_v54 = vshll.u32 %v21390_v4, 16 }
 0x559   : > { %21385 = vst [vmem:[#allocation97_spill] sm:$0xff] %v19145_v12  ;;  %v19148_v13 = vadd.f32 %v7066_v42, %v6636_v11  ;;  %v11839_v20 = vpop.f32.mrb[203].mxu0  ;;  %v19161_v11 = vpop.permute.xlu0 %9423 }
 0x55a   : > { %v7555_v12 = vrot.slane %v21391_v29, 4  ;;  %v7556_v25 = vrot.slane %v21392_v54, 5  ;;  %11951 = vmatmul.mubr.msk.bf16.gmra.mrb[52].mxu1 %vm472_vm8, %v7554_v34  ;;  %21393 = vst [vmem:[#allocation74_spill] sm:$0xff] %v19161_v11  ;;  %v19165_v0 = vpop.permute.xlu1 %9425  ;;  %v21397_v29 = vld [vmem:[#allocation20_spill] sm:$0xff] }
 0x55b   : > { %21387 = vst [vmem:[#allocation89_spill] sm:$0xff] %v19148_v13  ;;  %12057 = vmatmul.mubr.msk.bf16.gmra.mrb[52].mxu0 %vm477_vm5, %v21389_v49  ;;  %11954 = vmatprep.mubr.msk.bf16.mxu1 %vm12233_vm6, %v20406_v19  ;;  %21394 = vst [vmem:[#allocation44_spill] sm:$0xff] %v19165_v0  ;;  %v21398_v13 = vld [vmem:[#allocation34_spill] sm:$0xff] }
 0x55c   : > { %12060 = vmatprep.mubr.msk.bf16.mxu0 %vm12233_vm6, %v20406_v19  ;;  %v7557_v16 = vor.u32 %v7556_v25, %v7555_v12 }
 0x55d   : > { %v6550_v42 = vpop.f32.mrb[204].mxu1 }
 0x55e   : > { %v7071_v49 = vpop.f32.mrb[204].mxu0  ;;  %v6639_v20 = vadd.f32 %v6550_v42, %v18619_v56  ;;  %v11736_v24 = vpop.f32.mrb[205].mxu1 }
 0x55f   : > { %v19167_v17 = vadd.f32 %v7071_v49, %v6637_v27  ;;  %v11842_v3 = vpop.f32.mrb[205].mxu0  ;;  %v6553_v4 = vpop.f32.mrb[206].mxu1  ;;  %v7558_v27 = vsel %vm3063_vm12, %v7553_v40, %v7557_v16  ;;  %v21399_v49 = vld [vmem:[#allocation16_spill] sm:$0xff] }
 0x560   : > { %v7074_v5 = vpop.f32.mrb[206].mxu0  ;;  %v6640_v54 = vadd.f32 %v6553_v4, %v21397_v29  ;;  %v11737_v11 = vpop.f32.mrb[207].mxu1  ;;  %v21400_v3 = vshrl.u32 %v21399_v49, 16  ;;  %v21401_v12 = vshll.u32 %v21399_v49, 16 }
 0x561   : > { %21395 = vst [vmem:[#allocation105_spill] sm:$0xff] %v19167_v17  ;;  %v19170_v63 = vadd.f32 %v7074_v5, %v6638_v6  ;;  %v11843_v34 = vpop.f32.mrb[207].mxu0  ;;  %v19183_v56 = vpop.permute.xlu0 %9371  ;;  %v21406_v17 = vld [vmem:[#allocation78_spill] sm:$0xff] }
 0x562   : > { %v7559_v0 = vrot.slane %v21400_v3, 4  ;;  %v7560_v25 = vrot.slane %v21401_v12, 5  ;;  %11955 = vmatmul.mubr.msk.bf16.gmra.mrb[56].mxu1 %vm472_vm8, %v7558_v27  ;;  %v19187_v6 = vpop.permute.xlu1 %9373  ;;  %v21405_v3 = vld [vmem:[#allocation8_spill] sm:$0xff] }
 0x563   : > { %21396 = vst [vmem:[#allocation7_spill] sm:$0xff] %v19170_v63  ;;  %12061 = vmatmul.mubr.msk.bf16.gmra.mrb[56].mxu0 %vm477_vm5, %v21398_v13  ;;  %11958 = vmatprep.mubr.msk.bf16.mxu1 %vm12233_vm6, %v20406_v19  ;;  %21402 = vst [vmem:[#allocation102_spill] sm:$0xff] %v19187_v6  ;;  %v21416_v6 = vld [vmem:[#allocation13_spill] sm:$0xff] }
 0x564   : > { %12064 = vmatprep.mubr.msk.bf16.mxu0 %vm12233_vm6, %v20406_v19  ;;  %v7561_v5 = vor.u32 %v7560_v25, %v7559_v0 }
 0x565   : > { %v6558_v42 = vpop.f32.mrb[208].mxu1 }
 0x566   : > { %v7079_v13 = vpop.f32.mrb[208].mxu0  ;;  %v6641_v34 = vadd.f32 %v6558_v42, %v18650_v2  ;;  %v11740_v4 = vpop.f32.mrb[209].mxu1 }
 0x567   : > { %v19189_v40 = vadd.f32 %v7079_v13, %v6639_v20  ;;  %v11846_v11 = vpop.f32.mrb[209].mxu0  ;;  %v6561_v49 = vpop.f32.mrb[210].mxu1  ;;  %v7562_v20 = vsel %vm3063_vm12, %v7557_v16, %v7561_v5  ;;  %v21407_v13 = vld [vmem:[#allocation68_spill] sm:$0xff] }
 0x568   : > { %v7082_v24 = vpop.f32.mrb[210].mxu0  ;;  %v6642_v12 = vadd.f32 %v6561_v49, %v21405_v3  ;;  %v11741_v63 = vpop.f32.mrb[211].mxu1  ;;  %v21408_v11 = vshrl.u32 %v21407_v13, 16  ;;  %v21409_v0 = vshll.u32 %v21407_v13, 16 }
 0x569   : > { %21403 = vst [vmem:[#allocation96_spill] sm:$0xff] %v19189_v40  ;;  %v19192_v29 = vadd.f32 %v7082_v24, %v6640_v54  ;;  %v11847_v27 = vpop.f32.mrb[211].mxu0  ;;  %v19205_v2 = vpop.permute.xlu0 %9427 }
 0x56a   : > { %v7563_v40 = vrot.slane %v21408_v11, 4  ;;  %v7564_v25 = vrot.slane %v21409_v0, 5  ;;  %11959 = vmatmul.mubr.msk.bf16.gmra.mrb[60].mxu1 %vm472_vm8, %v7562_v20  ;;  %21410 = vst [vmem:[#allocation83_spill] sm:$0xff] %v19205_v2  ;;  %v19209_v63 = vpop.permute.xlu1 %9429  ;;  %v21413_v27 = vld [vmem:[#allocation61_spill] sm:$0xff]  ;;  %v21415_v0 = vld [vmem:[#allocation70_spill] sm:$0xff] }
 0x56b   : > { %21404 = vst [vmem:[#allocation84_spill] sm:$0xff] %v19192_v29  ;;  %12065 = vmatmul.mubr.msk.bf16.gmra.mrb[60].mxu0 %vm477_vm5, %v21406_v17  ;;  %11962 = vmatprep.mubr.msk.bf16.mxu1 %vm12233_vm6, %v20406_v19  ;;  %21411 = vst [vmem:[#allocation98_spill] sm:$0xff] %v19209_v63 }
 0x56c   : > { %12068 = vmatprep.mubr.msk.bf16.mxu0 %vm12233_vm6, %v20406_v19  ;;  %v7565_v24 = vor.u32 %v7564_v25, %v7563_v40  ;;  %v21418_v40 = vshll.u32 %v18645_v15, 16 }
 0x56d   : > { %v6566_v42 = vpop.f32.mrb[212].mxu1 }
 0x56e   : > { %v7087_v17 = vpop.f32.mrb[212].mxu0  ;;  %v6643_v49 = vadd.f32 %v6566_v42, %v21413_v27  ;;  %v11744_v3 = vpop.f32.mrb[213].mxu1  ;;  %v7568_v25 = vrot.slane %v21418_v40, 5 }
 0x56f   : > { %v19211_v16 = vadd.f32 %v7087_v17, %v6641_v34  ;;  %v11850_v54 = vpop.f32.mrb[213].mxu0  ;;  %v6569_v11 = vpop.f32.mrb[214].mxu1  ;;  %v7566_v34 = vsel %vm3063_vm12, %v7561_v5, %v7565_v24  ;;  %v21417_v17 = vshrl.u32 %v18645_v15, 16  ;;  %v21420_v3 = vld [vmem:[#allocation40_spill] sm:$0xff] }
 0x570   : > { %v7090_v4 = vpop.f32.mrb[214].mxu0  ;;  %v6644_v2 = vadd.f32 %v6569_v11, %v21415_v0  ;;  %v11745_v29 = vpop.f32.mrb[215].mxu1 }
 0x571   : > { %21412 = vst [vmem:[#allocation101_spill] sm:$0xff] %v19211_v16  ;;  %v19214_v20 = vadd.f32 %v7090_v4, %v6642_v12  ;;  %v11851_v13 = vpop.f32.mrb[215].mxu0  ;;  %v7567_v54 = vrot.slane %v21417_v17, 4  ;;  %v19227_v12 = vpop.permute.xlu0 %9375  ;;  %v21422_v16 = vld [vmem:[#allocation17_spill] sm:$0xff] }
 0x572   : > { %11963 = vmatmul.mubr.msk.bf16.gmra.mrb[64].mxu1 %vm472_vm8, %v7566_v34  ;;  %v19231_v29 = vpop.permute.xlu1 %9377 }
 0x573   : > { %21414 = vst [vmem:[#allocation81_spill] sm:$0xff] %v19214_v20  ;;  %12069 = vmatmul.mubr.msk.bf16.gmra.mrb[64].mxu0 %vm477_vm5, %v21416_v6  ;;  %11966 = vmatprep.mubr.msk.bf16.mxu1 %vm12233_vm6, %v20406_v19  ;;  %v7569_v27 = vor.u32 %v7568_v25, %v7567_v54  ;;  %v7460_v20 = vld [vmem:[#allocation2 + $0xf0] sm:$0x1f]  ;;  %v21424_v25 = vshll.u32 %v18676_v41, 16 }
 0x574   : > { %12072 = vmatprep.mubr.msk.bf16.mxu0 %vm12233_vm6, %v20406_v19 }
 0x575   : > { %v6574_v4 = vpop.f32.mrb[216].mxu1 }
 0x576   : > { %v7095_v6 = vpop.f32.mrb[216].mxu0  ;;  %v6645_v13 = vadd.f32 %v6574_v4, %v21420_v3  ;;  %v11748_v11 = vpop.f32.mrb[217].mxu1 }
 0x577   : > { %v19233_v5 = vadd.f32 %v7095_v6, %v6643_v49  ;;  %v11854_v42 = vpop.f32.mrb[217].mxu0  ;;  %v6577_v17 = vpop.f32.mrb[218].mxu1  ;;  %v7570_v49 = vsel %vm3063_vm12, %v7565_v24, %v7569_v27  ;;  %v21423_v6 = vshrl.u32 %v18676_v41, 16 }
 0x578   : > { %v7098_v15 = vpop.f32.mrb[218].mxu0  ;;  %v6646_v40 = vadd.f32 %v6577_v17, %v18717_v28  ;;  %v11749_v63 = vpop.f32.mrb[219].mxu1  ;;  %v7572_v42 = vrot.slane %v21424_v25, 5  ;;  %v7576_v28 = vshrl.u32 %v7460_v20, 16 }
 0x579   : > { %21419 = vst [vmem:[#allocation48_spill] sm:$0xff] %v19233_v5  ;;  %v19236_v0 = vadd.f32 %v7098_v15, %v6644_v2  ;;  %v11855_v34 = vpop.f32.mrb[219].mxu0  ;;  %v7571_v54 = vrot.slane %v21423_v6, 4  ;;  %v19249_v2 = vpop.permute.xlu0 %9431  ;;  %v7579_v63 = vshll.u32 %v7460_v20, 16 }
 0x57a   : > { %11967 = vmatmul.mubr.msk.bf16.gmra.mrb[68].mxu1 %vm472_vm8, %v7570_v49  ;;  %21425 = vst [vmem:[#allocation38_spill] sm:$0xff] %v19249_v2  ;;  %v7578_v2 = vrot.slane %v7576_v28, 4 }
 0x57b   : > { %21421 = vst [vmem:[#allocation107_spill] sm:$0xff] %v19236_v0  ;;  %12073 = vmatmul.mubr.msk.bf16.gmra.mrb[68].mxu0 %vm477_vm5, %v21422_v16  ;;  %11970 = vmatprep.mubr.msk.bf16.mxu1 %vm12233_vm6, %v20406_v19  ;;  %v19253_v16 = vpop.permute.xlu1 %9433  ;;  %v7573_v3 = vor.u32 %v7572_v42, %v7571_v54  ;;  %v7581_v0 = vrot.slane %v7579_v63, 5 }
 0x57c   : > { %12076 = vmatprep.mubr.msk.bf16.mxu0 %vm12233_vm6, %v20406_v19  ;;  %21426 = vst [vmem:[#allocation125_spill] sm:$0xff] %v19253_v16  ;;  %v21427_v16 = vld [vmem:[#allocation88_spill] sm:$0xff] }
 0x57d   : > { %v6582_v41 = vpop.f32.mrb[220].mxu1 }
 0x57e   : > { %v7103_v24 = vpop.f32.mrb[220].mxu0  ;;  %v6647_v34 = vadd.f32 %v6582_v41, %v18737_v10  ;;  %v11752_v17 = vpop.f32.mrb[221].mxu1 }
 0x57f   : > { %v19255_v4 = vadd.f32 %v7103_v24, %v6645_v13  ;;  %v11858_v15 = vpop.f32.mrb[221].mxu0  ;;  %v6585_v25 = vpop.f32.mrb[222].mxu1  ;;  %v7574_v13 = vsel %vm3063_vm12, %v7569_v27, %v7573_v3 }
 0x580   : > { %v7106_v11 = vpop.f32.mrb[222].mxu0  ;;  %v6648_v20 = vadd.f32 %v6585_v25, %v18740_v1  ;;  %v11753_v5 = vpop.f32.mrb[223].mxu1 }
 0x581   : > { %v19258_v49 = vadd.f32 %v7106_v11, %v6646_v40  ;;  %v11859_v6 = vpop.f32.mrb[223].mxu0  ;;  %v19267_v10 = vpop.permute.xlu0 %9379  ;;  %v7582_v40 = vor.u32 %v7581_v0, %v7578_v2  ;;  %v21428_v2 = vld [vmem:[#allocation91_spill] sm:$0xff] }
 0x582   : > { %11971 = vmatmul.mubr.msk.bf16.gmra.mrb[72].mxu1 %vm472_vm8, %v7574_v13  ;;  %v19271_v54 = vpop.permute.xlu1 %9381 }
 0x583   : > { %12077 = vmatmul.mubr.msk.bf16.gmra.mrb[72].mxu0 %vm477_vm5, %v21427_v16  ;;  %11974 = vmatprep.mubr.msk.bf16.mxu1 %vm12233_vm6, %v20406_v19  ;;  %v7583_v11 = vsel %vm3063_vm12, %v7573_v3, %v7582_v40 }
 0x584   : > { %12080 = vmatprep.mubr.msk.bf16.mxu0 %vm12233_vm6, %v20406_v19 }
 0x585   : > { %v6590_v28 = vpop.f32.mrb[224].mxu1 }
 0x586   : > { %v7111_v1 = vpop.f32.mrb[224].mxu0  ;;  %v6649_v27 = vadd.f32 %v6590_v28, %v18760_v61  ;;  %v11756_v16 = vpop.f32.mrb[225].mxu1 }
 0x587   : > { %v19273_v5 = vadd.f32 %v7111_v1, %v6647_v34  ;;  %v11862_v42 = vpop.f32.mrb[225].mxu0  ;;  %v6593_v41 = vpop.f32.mrb[226].mxu1 }
 0x588   : > { %v7114_v63 = vpop.f32.mrb[226].mxu0  ;;  %v6650_v17 = vadd.f32 %v6593_v41, %v18764_v18  ;;  %v11757_v0 = vpop.f32.mrb[227].mxu1  ;;  %v19294_v18 = vld [vmem:[%s19929_s5] ss:$0 sm:$0xff] }
 0x589   : > { %v19276_v24 = vadd.f32 %v7114_v63, %v6648_v20  ;;  %v11863_v15 = vpop.f32.mrb[227].mxu0  ;;  %v19285_v34 = vpop.permute.xlu0 %9435 }
 0x58a   : > { %11975 = vmatmul.mubr.msk.bf16.gmra.mrb[76].mxu1 %vm472_vm8, %v7583_v11  ;;  %v19287_v61 = vpop.permute.xlu1 %9437  ;;  %v21429_v15 = vld [vmem:[#allocation35_spill] sm:$0xff] }
 0x58b   : > { %12081 = vmatmul.mubr.msk.bf16.gmra.mrb[76].mxu0 %vm477_vm5, %v21428_v2 }
 0x58c   : > { %12084 = vmatprep.mubr.msk.bf16.mxu0 %vm12233_vm6, %v20406_v19  ;;  %vm10007_vm6 = vcmask 162816  }
 0x58d   : > { %v7702_v3 = vpop.f32.mrb[228].mxu1 }
 0x58e   : > { %v7119_v6 = vpop.f32.mrb[228].mxu0  ;;  %v7917_v40 = vadd.f32 %v7702_v3, %v18782_v35  ;;  %v11872_v1 = vpop.f32.mrb[229].mxu1  ;;  %v19307_v35 = vld [vmem:[%s19931_s7] ss:$0 sm:$0xff] }
 0x58f   : > { %v19289_v25 = vadd.f32 %v7119_v6, %v6649_v27  ;;  %v11866_v20 = vpop.f32.mrb[229].mxu0  ;;  %v7705_v28 = vpop.f32.mrb[230].mxu1 }
 0x590   : > { %v7122_v13 = vpop.f32.mrb[230].mxu0  ;;  %v8118_v63 = vadd.f32 %v19294_v18, %v7917_v40  ;;  %v7918_v27 = vadd.f32 %v7705_v28, %v18785_v58  ;;  %v11873_v16 = vpop.f32.mrb[231].mxu1 }
 0x591   : > { %v19297_v42 = vadd.f32 %v7122_v13, %v6650_v17  ;;  %v11867_v19 = vpop.f32.mrb[231].mxu0  ;;  %v19309_v17 = vpop.permute.xlu0 %9383 }
 0x592   : > { %v8172_v41 = vmax.f32 %v8118_v63, 0.0  ;;  %v8119_v11 = vadd.f32 %v19294_v18, %v7918_v27  ;;  %v19311_v0 = vpop.permute.xlu1 %9385 }
 0x593   : > { %12085 = vmatmul.mubr.msk.bf16.gmra.mrb[80].mxu0 %vm477_vm5, %v21429_v15 }
 0x594   : > { %v8173_v2 = vmax.f32 %v8119_v11, 0.0  ;;  %9575 = vrot.lane.b32.xlu0 %v8172_v41, %s12236_s14 }
 0x595   : > { %v7710_v3 = vpop.f32.mrb[232].mxu1 }
 0x596   : > { %v9036_v6 = vpop.f32.mrb[232].mxu0  ;;  %v7919_v40 = vadd.f32 %v7710_v3, %v18800_v48  ;;  %v11876_v1 = vpop.f32.mrb[233].mxu1  ;;  %9577 = vrot.lane.b32.xlu1 %v8173_v2, %s12236_s14 }
 0x597   : > { %v9037_v58 = vadd.f32 %v19307_v35, %v9036_v6  ;;  %v11982_v20 = vpop.f32.mrb[233].mxu0  ;;  %v7713_v27 = vpop.f32.mrb[234].mxu1 }
 0x598   : > { %v9039_v13 = vpop.f32.mrb[234].mxu0  ;;  %v8120_v16 = vadd.f32 %v19294_v18, %v7919_v40  ;;  %v7920_v15 = vadd.f32 %v7713_v27, %v18803_v21  ;;  %v11877_v41 = vpop.f32.mrb[235].mxu1 }
 0x599   : > { %v9251_v19 = vmax.f32 %v9037_v58, 0.0  ;;  %v9040_v28 = vadd.f32 %v19307_v35, %v9039_v13  ;;  %v11983_v63 = vpop.f32.mrb[235].mxu0  ;;  %v19322_v20 = vpop.permute.xlu0 %9439 }
 0x59a   : > { %v8174_v6 = vmax.f32 %v8120_v16, 0.0  ;;  %v8121_v48 = vadd.f32 %v19294_v18, %v7920_v15  ;;  %21430 = vst [vmem:[#allocation23_spill] sm:$0xff] %v19322_v20  ;;  %v19325_v2 = vpop.permute.xlu1 %9441 }
 0x59b   : > { %v9252_v11 = vmax.f32 %v9040_v28, 0.0  ;;  %9791 = vrot.lane.b32.xlu0 %v9251_v19, %s12237_s15  ;;  %21431 = vst [vmem:[#allocation85_spill] sm:$0xff] %v19325_v2 }
 0x59c   : > { %v8175_v58 = vmax.f32 %v8121_v48, 0.0 }
 0x59d   : > { %9793 = vrot.lane.b32.xlu1 %v9252_v11, %s12237_s15  ;;  %v7718_v21 = vpop.f32.mrb[236].mxu1 }
 0x59e   : > { %v9044_v3 = vpop.f32.mrb[236].mxu0  ;;  %v7921_v19 = vadd.f32 %v7718_v21, %v18819_v53  ;;  %v11880_v28 = vpop.f32.mrb[237].mxu1 }
 0x59f   : > { %v9045_v13 = vadd.f32 %v19307_v35, %v9044_v3  ;;  %v11986_v40 = vpop.f32.mrb[237].mxu0  ;;  %9579 = vrot.lane.b32.xlu0 %v8174_v6, %s12236_s14  ;;  %v7721_v15 = vpop.f32.mrb[238].mxu1 }
 0x5a0   : > { %v9047_v1 = vpop.f32.mrb[238].mxu0  ;;  %v8122_v41 = vadd.f32 %v19294_v18, %v7921_v19  ;;  %v7922_v11 = vadd.f32 %v7721_v15, %v18822_v36  ;;  %v11881_v48 = vpop.f32.mrb[239].mxu1 }
 0x5a1   : > { %v9253_v63 = vmax.f32 %v9045_v13, 0.0  ;;  %v9048_v27 = vadd.f32 %v19307_v35, %v9047_v1  ;;  %v11987_v16 = vpop.f32.mrb[239].mxu0  ;;  %9581 = vrot.lane.b32.xlu1 %v8175_v58, %s12236_s14  ;;  %v19336_v53 = vpop.permute.xlu0 %9387 }
 0x5a2   : > { %v8176_v6 = vmax.f32 %v8122_v41, 0.0  ;;  %v8123_v40 = vadd.f32 %v19294_v18, %v7922_v11  ;;  %v19339_v13 = vpop.permute.xlu1 %9389 }
 0x5a3   : > { %v9254_v3 = vmax.f32 %v9048_v27, 0.0  ;;  %9795 = vrot.lane.b32.xlu0 %v9253_v63, %s12237_s15  ;;  %v21432_v27 = vld [vmem:[#allocation71_spill] sm:$0xff] }
 0x5a4   : > { %v8177_v21 = vmax.f32 %v8123_v40, 0.0 }
 0x5a5   : > { %9797 = vrot.lane.b32.xlu1 %v9254_v3, %s12237_s15  ;;  %v7726_v36 = vpop.f32.mrb[240].mxu1 }
 0x5a6   : > { %v9052_v58 = vpop.f32.mrb[240].mxu0  ;;  %v7923_v63 = vadd.f32 %v7726_v36, %v21432_v27  ;;  %v11884_v16 = vpop.f32.mrb[241].mxu1 }
 0x5a7   : > { %v9053_v1 = vadd.f32 %v19307_v35, %v9052_v58  ;;  %v11990_v19 = vpop.f32.mrb[241].mxu0  ;;  %9583 = vrot.lane.b32.xlu0 %v8176_v6, %s12236_s14  ;;  %v7729_v48 = vpop.f32.mrb[242].mxu1 }
 0x5a8   : > { %v9055_v28 = vpop.f32.mrb[242].mxu0  ;;  %v8124_v3 = vadd.f32 %v19294_v18, %v7923_v63  ;;  %v7924_v40 = vadd.f32 %v7729_v48, %v18840_v30  ;;  %v11885_v58 = vpop.f32.mrb[243].mxu1 }
 0x5a9   : > { %v9255_v15 = vmax.f32 %v9053_v1, 0.0  ;;  %v9056_v41 = vadd.f32 %v19307_v35, %v9055_v28  ;;  %v11991_v11 = vpop.f32.mrb[243].mxu0  ;;  %9585 = vrot.lane.b32.xlu1 %v8177_v21, %s12236_s14  ;;  %v19350_v36 = vpop.permute.xlu0 %9443 }
 0x5aa   : > { %v8178_v6 = vmax.f32 %v8124_v3, 0.0  ;;  %v8125_v2 = vadd.f32 %v19294_v18, %v7924_v40  ;;  %21433 = vst [vmem:[#allocation41_spill] sm:$0xff] %v19350_v36  ;;  %v19353_v1 = vpop.permute.xlu1 %9445 }
 0x5ab   : > { %v9256_v19 = vmax.f32 %v9056_v41, 0.0  ;;  %9799 = vrot.lane.b32.xlu0 %v9255_v15, %s12237_s15  ;;  %21434 = vst [vmem:[#allocation22_spill] sm:$0xff] %v19353_v1  ;;  %v21435_v41 = vld [vmem:[#allocation26_spill] sm:$0xff] }
 0x5ac   : > { %v8179_v28 = vmax.f32 %v8125_v2, 0.0 }
 0x5ad   : > { %9801 = vrot.lane.b32.xlu1 %v9256_v19, %s12237_s15  ;;  %v7734_v30 = vpop.f32.mrb[244].mxu1  ;;  %v21436_v19 = vld [vmem:[#allocation31_spill] sm:$0xff] }
 0x5ae   : > { %v9060_v21 = vpop.f32.mrb[244].mxu0  ;;  %v7925_v15 = vadd.f32 %v7734_v30, %v21435_v41  ;;  %v11888_v11 = vpop.f32.mrb[245].mxu1 }
 0x5af   : > { %v9061_v27 = vadd.f32 %v19307_v35, %v9060_v21  ;;  %v11994_v63 = vpop.f32.mrb[245].mxu0  ;;  %9587 = vrot.lane.b32.xlu0 %v8178_v6, %s12236_s14  ;;  %v7737_v58 = vpop.f32.mrb[246].mxu1 }
 0x5b0   : > { %v9063_v16 = vpop.f32.mrb[246].mxu0  ;;  %v8126_v2 = vadd.f32 %v19294_v18, %v7925_v15  ;;  %v7926_v1 = vadd.f32 %v7737_v58, %v21436_v19  ;;  %v11889_v21 = vpop.f32.mrb[247].mxu1 }
 0x5b1   : > { %v9257_v48 = vmax.f32 %v9061_v27, 0.0  ;;  %v9064_v3 = vadd.f32 %v19307_v35, %v9063_v16  ;;  %v11995_v40 = vpop.f32.mrb[247].mxu0  ;;  %9589 = vrot.lane.b32.xlu1 %v8179_v28, %s12236_s14  ;;  %v19364_v30 = vpop.permute.xlu0 %9391 }
 0x5b2   : > { %v8180_v6 = vmax.f32 %v8126_v2, 0.0  ;;  %v8127_v36 = vadd.f32 %v19294_v18, %v7926_v1  ;;  %v19367_v27 = vpop.permute.xlu1 %9393  ;;  %v21437_v40 = vld [vmem:[#allocation134_spill] sm:$0xff] }
 0x5b3   : > { %v9258_v63 = vmax.f32 %v9064_v3, 0.0  ;;  %9803 = vrot.lane.b32.xlu0 %v9257_v48, %s12237_s15 }
 0x5b4   : > { %v8181_v16 = vmax.f32 %v8127_v36, 0.0 }
 0x5b5   : > { %9805 = vrot.lane.b32.xlu1 %v9258_v63, %s12237_s15  ;;  %v7742_v11 = vpop.f32.mrb[248].mxu1 }
 0x5b6   : > { %v9068_v28 = vpop.f32.mrb[248].mxu0  ;;  %v7927_v48 = vadd.f32 %v7742_v11, %v21437_v40  ;;  %v11892_v58 = vpop.f32.mrb[249].mxu1 }
 0x5b7   : > { %v9069_v41 = vadd.f32 %v19307_v35, %v9068_v28  ;;  %v11998_v15 = vpop.f32.mrb[249].mxu0  ;;  %9591 = vrot.lane.b32.xlu0 %v8180_v6, %s12236_s14  ;;  %v7745_v21 = vpop.f32.mrb[250].mxu1 }
 0x5b8   : > { %v9071_v3 = vpop.f32.mrb[250].mxu0  ;;  %v8128_v36 = vadd.f32 %v19294_v18, %v7927_v48  ;;  %v7928_v63 = vadd.f32 %v7745_v21, %v18876_v46  ;;  %v11893_v28 = vpop.f32.mrb[251].mxu1 }
 0x5b9   : > { %v9259_v2 = vmax.f32 %v9069_v41, 0.0  ;;  %v9072_v1 = vadd.f32 %v19307_v35, %v9071_v3  ;;  %v11999_v19 = vpop.f32.mrb[251].mxu0  ;;  %9593 = vrot.lane.b32.xlu1 %v8181_v16, %s12236_s14  ;;  %v19378_v11 = vpop.permute.xlu0 %9447 }
 0x5ba   : > { %v8182_v6 = vmax.f32 %v8128_v36, 0.0  ;;  %v8129_v20 = vadd.f32 %v19294_v18, %v7928_v63  ;;  %v19381_v41 = vpop.permute.xlu1 %9449 }
 0x5bb   : > { %v9260_v15 = vmax.f32 %v9072_v1, 0.0  ;;  %9807 = vrot.lane.b32.xlu0 %v9259_v2, %s12237_s15 }
 0x5bc   : > { %v8183_v3 = vmax.f32 %v8129_v20, 0.0 }
 0x5bd   : > { %9809 = vrot.lane.b32.xlu1 %v9260_v15, %s12237_s15  ;;  %v7750_v46 = vpop.f32.mrb[252].mxu1 }
 0x5be   : > { %v9076_v16 = vpop.f32.mrb[252].mxu0  ;;  %v7929_v2 = vadd.f32 %v7750_v46, %v18891_v62  ;;  %v11896_v1 = vpop.f32.mrb[253].mxu1 }
 0x5bf   : > { %v9077_v40 = vadd.f32 %v19307_v35, %v9076_v16  ;;  %v12002_v48 = vpop.f32.mrb[253].mxu0  ;;  %9595 = vrot.lane.b32.xlu0 %v8182_v6, %s12236_s14  ;;  %v7753_v63 = vpop.f32.mrb[254].mxu1 }
 0x5c0   : > { %v9079_v58 = vpop.f32.mrb[254].mxu0  ;;  %v8130_v20 = vadd.f32 %v19294_v18, %v7929_v2  ;;  %v7930_v28 = vadd.f32 %v7753_v63, %v18894_v37  ;;  %v11897_v15 = vpop.f32.mrb[255].mxu1 }
 0x5c1   : > { %v9261_v19 = vmax.f32 %v9077_v40, 0.0  ;;  %v9080_v21 = vadd.f32 %v19307_v35, %v9079_v58  ;;  %v12003_v36 = vpop.f32.mrb[255].mxu0  ;;  %9597 = vrot.lane.b32.xlu1 %v8183_v3, %s12236_s14  ;;  %v19392_v62 = vpop.permute.xlu0 %9395 }
 0x5c2   : > { %v8184_v6 = vmax.f32 %v8130_v20, 0.0  ;;  %v8131_v48 = vadd.f32 %v19294_v18, %v7930_v28  ;;  %v19395_v40 = vpop.permute.xlu1 %9397 }
 0x5c3   : > { %v9262_v16 = vmax.f32 %v9080_v21, 0.0  ;;  %9811 = vrot.lane.b32.xlu0 %v9261_v19, %s12237_s15 }
 0x5c4   : > { %v8185_v46 = vmax.f32 %v8131_v48, 0.0 }
 0x5c5   : > { %9813 = vrot.lane.b32.xlu1 %v9262_v16, %s12237_s15  ;;  %v7758_v37 = vpop.f32.mrb[0].mxu1 }
 0x5c6   : > { %v9084_v3 = vpop.f32.mrb[0].mxu0  ;;  %v7931_v19 = vadd.f32 %v7758_v37, %v18909_v43  ;;  %v11900_v21 = vpop.f32.mrb[1].mxu1 }
 0x5c7   : > { %v9085_v58 = vadd.f32 %v19307_v35, %v9084_v3  ;;  %v12006_v2 = vpop.f32.mrb[1].mxu0  ;;  %9599 = vrot.lane.b32.xlu0 %v8184_v6, %s12236_s14  ;;  %v7761_v28 = vpop.f32.mrb[2].mxu1 }
 0x5c8   : > { %v9087_v1 = vpop.f32.mrb[2].mxu0  ;;  %v8132_v15 = vadd.f32 %v19294_v18, %v7931_v19  ;;  %v7932_v16 = vadd.f32 %v7761_v28, %v18912_v44  ;;  %v11901_v48 = vpop.f32.mrb[3].mxu1 }
 0x5c9   : > { %v9263_v36 = vmax.f32 %v9085_v58, 0.0  ;;  %v9088_v63 = vadd.f32 %v19307_v35, %v9087_v1  ;;  %v12007_v20 = vpop.f32.mrb[3].mxu0  ;;  %9601 = vrot.lane.b32.xlu1 %v8185_v46, %s12236_s14  ;;  %v19406_v43 = vpop.permute.xlu0 %9451 }
 0x5ca   : > { %v8186_v6 = vmax.f32 %v8132_v15, 0.0  ;;  %v8133_v2 = vadd.f32 %v19294_v18, %v7932_v16  ;;  %v19409_v58 = vpop.permute.xlu1 %9453 }
 0x5cb   : > { %v9264_v3 = vmax.f32 %v9088_v63, 0.0  ;;  %9815 = vrot.lane.b32.xlu0 %v9263_v36, %s12237_s15 }
 0x5cc   : > { %v8187_v37 = vmax.f32 %v8133_v2, 0.0 }
 0x5cd   : > { %9817 = vrot.lane.b32.xlu1 %v9264_v3, %s12237_s15  ;;  %v7766_v44 = vpop.f32.mrb[4].mxu1 }
 0x5ce   : > { %v9092_v46 = vpop.f32.mrb[4].mxu0  ;;  %v7933_v36 = vadd.f32 %v7766_v44, %v18927_v38  ;;  %v11904_v63 = vpop.f32.mrb[5].mxu1 }
 0x5cf   : > { %v9093_v1 = vadd.f32 %v19307_v35, %v9092_v46  ;;  %v12010_v19 = vpop.f32.mrb[5].mxu0  ;;  %9603 = vrot.lane.b32.xlu0 %v8186_v6, %s12236_s14  ;;  %v7769_v16 = vpop.f32.mrb[6].mxu1 }
 0x5d0   : > { %v9095_v21 = vpop.f32.mrb[6].mxu0  ;;  %v8134_v48 = vadd.f32 %v19294_v18, %v7933_v36  ;;  %v7934_v3 = vadd.f32 %v7769_v16, %v18930_v39  ;;  %v11905_v2 = vpop.f32.mrb[7].mxu1 }
 0x5d1   : > { %v9265_v20 = vmax.f32 %v9093_v1, 0.0  ;;  %v9096_v28 = vadd.f32 %v19307_v35, %v9095_v21  ;;  %v12011_v15 = vpop.f32.mrb[7].mxu0  ;;  %9605 = vrot.lane.b32.xlu1 %v8187_v37, %s12236_s14  ;;  %v19420_v38 = vpop.permute.xlu0 %9399 }
 0x5d2   : > { %v8188_v6 = vmax.f32 %v8134_v48, 0.0  ;;  %v8135_v19 = vadd.f32 %v19294_v18, %v7934_v3  ;;  %v19423_v1 = vpop.permute.xlu1 %9401 }
 0x5d3   : > { %v9266_v46 = vmax.f32 %v9096_v28, 0.0  ;;  %9819 = vrot.lane.b32.xlu0 %v9265_v20, %s12237_s15 }
 0x5d4   : > { %v8189_v44 = vmax.f32 %v8135_v19, 0.0 }
 0x5d5   : > { %9821 = vrot.lane.b32.xlu1 %v9266_v46, %s12237_s15  ;;  %v7774_v39 = vpop.f32.mrb[8].mxu1 }
 0x5d6   : > { %v9100_v37 = vpop.f32.mrb[8].mxu0  ;;  %v7935_v20 = vadd.f32 %v7774_v39, %v18945_v23  ;;  %v11908_v28 = vpop.f32.mrb[9].mxu1 }
 0x5d7   : > { %v9101_v21 = vadd.f32 %v19307_v35, %v9100_v37  ;;  %v12014_v36 = vpop.f32.mrb[9].mxu0  ;;  %9607 = vrot.lane.b32.xlu0 %v8188_v6, %s12236_s14  ;;  %v7777_v3 = vpop.f32.mrb[10].mxu1 }
 0x5d8   : > { %v9103_v63 = vpop.f32.mrb[10].mxu0  ;;  %v8136_v2 = vadd.f32 %v19294_v18, %v7935_v20  ;;  %v7936_v46 = vadd.f32 %v7777_v3, %v18948_v9  ;;  %v11909_v19 = vpop.f32.mrb[11].mxu1 }
 0x5d9   : > { %v9267_v15 = vmax.f32 %v9101_v21, 0.0  ;;  %v9104_v16 = vadd.f32 %v19307_v35, %v9103_v63  ;;  %v12015_v48 = vpop.f32.mrb[11].mxu0  ;;  %9609 = vrot.lane.b32.xlu1 %v8189_v44, %s12236_s14  ;;  %v19434_v23 = vpop.permute.xlu0 %9455 }
 0x5da   : > { %v8190_v6 = vmax.f32 %v8136_v2, 0.0  ;;  %v8137_v36 = vadd.f32 %v19294_v18, %v7936_v46  ;;  %v19437_v21 = vpop.permute.xlu1 %9457 }
 0x5db   : > { %v9268_v37 = vmax.f32 %v9104_v16, 0.0  ;;  %9823 = vrot.lane.b32.xlu0 %v9267_v15, %s12237_s15  ;;  %21438 = vst [vmem:[#allocation90_spill] sm:$0xff] %v19437_v21 }
 0x5dc   : > { %v8191_v39 = vmax.f32 %v8137_v36, 0.0 }
 0x5dd   : > { %9825 = vrot.lane.b32.xlu1 %v9268_v37, %s12237_s15  ;;  %v7782_v9 = vpop.f32.mrb[12].mxu1  ;;  %v21439_v37 = vld [vmem:[#allocation64_spill] sm:$0xff] }
 0x5de   : > { %v9108_v44 = vpop.f32.mrb[12].mxu0  ;;  %v7937_v15 = vadd.f32 %v7782_v9, %v18963_v59  ;;  %v11912_v16 = vpop.f32.mrb[13].mxu1 }
 0x5df   : > { %v9109_v63 = vadd.f32 %v19307_v35, %v9108_v44  ;;  %v12018_v20 = vpop.f32.mrb[13].mxu0  ;;  %9611 = vrot.lane.b32.xlu0 %v8190_v6, %s12236_s14  ;;  %v7785_v46 = vpop.f32.mrb[14].mxu1 }
 0x5e0   : > { %v9111_v28 = vpop.f32.mrb[14].mxu0  ;;  %v8138_v19 = vadd.f32 %v19294_v18, %v7937_v15  ;;  %v7938_v36 = vadd.f32 %v7785_v46, %v21439_v37  ;;  %v11913_v44 = vpop.f32.mrb[15].mxu1 }
 0x5e1   : > { %v9269_v48 = vmax.f32 %v9109_v63, 0.0  ;;  %v9112_v3 = vadd.f32 %v19307_v35, %v9111_v28  ;;  %v12019_v2 = vpop.f32.mrb[15].mxu0  ;;  %9613 = vrot.lane.b32.xlu1 %v8191_v39, %s12236_s14  ;;  %v19448_v59 = vpop.permute.xlu0 %9403 }
 0x5e2   : > { %v8192_v6 = vmax.f32 %v8138_v19, 0.0  ;;  %v8139_v21 = vadd.f32 %v19294_v18, %v7938_v36  ;;  %v19451_v63 = vpop.permute.xlu1 %9405 }
 0x5e3   : > { %v9270_v20 = vmax.f32 %v9112_v3, 0.0  ;;  %9827 = vrot.lane.b32.xlu0 %v9269_v48, %s12237_s15 }
 0x5e4   : > { %v8193_v9 = vmax.f32 %v8139_v21, 0.0 }
 0x5e5   : > { %9829 = vrot.lane.b32.xlu1 %v9270_v20, %s12237_s15  ;;  %v7790_v16 = vpop.f32.mrb[16].mxu1 }
 0x5e6   : > { %v9116_v39 = vpop.f32.mrb[16].mxu0  ;;  %v7939_v48 = vadd.f32 %v7790_v16, %v18981_v55  ;;  %v11916_v2 = vpop.f32.mrb[17].mxu1 }
 0x5e7   : > { %v9117_v28 = vadd.f32 %v19307_v35, %v9116_v39  ;;  %v12022_v15 = vpop.f32.mrb[17].mxu0  ;;  %9615 = vrot.lane.b32.xlu0 %v8192_v6, %s12236_s14  ;;  %v7793_v36 = vpop.f32.mrb[18].mxu1 }
 0x5e8   : > { %v9119_v3 = vpop.f32.mrb[18].mxu0  ;;  %v8140_v21 = vadd.f32 %v19294_v18, %v7939_v48  ;;  %v7940_v44 = vadd.f32 %v7793_v36, %v18984_v51  ;;  %v11917_v20 = vpop.f32.mrb[19].mxu1 }
 0x5e9   : > { %v9271_v46 = vmax.f32 %v9117_v28, 0.0  ;;  %v9120_v19 = vadd.f32 %v19307_v35, %v9119_v3  ;;  %v12023_v37 = vpop.f32.mrb[19].mxu0  ;;  %9617 = vrot.lane.b32.xlu1 %v8193_v9, %s12236_s14  ;;  %v19462_v55 = vpop.permute.xlu0 %9459 }
 0x5ea   : > { %v8194_v6 = vmax.f32 %v8140_v21, 0.0  ;;  %v8141_v15 = vadd.f32 %v19294_v18, %v7940_v44  ;;  %v19465_v28 = vpop.permute.xlu1 %9461 }
 0x5eb   : > { %v9272_v39 = vmax.f32 %v9120_v19, 0.0  ;;  %9831 = vrot.lane.b32.xlu0 %v9271_v46, %s12237_s15 }
 0x5ec   : > { %v8195_v16 = vmax.f32 %v8141_v15, 0.0 }
 0x5ed   : > { %9833 = vrot.lane.b32.xlu1 %v9272_v39, %s12237_s15  ;;  %v7798_v51 = vpop.f32.mrb[20].mxu1 }
 0x5ee   : > { %v9124_v9 = vpop.f32.mrb[20].mxu0  ;;  %v7941_v46 = vadd.f32 %v7798_v51, %v18999_v22  ;;  %v11920_v19 = vpop.f32.mrb[21].mxu1 }
 0x5ef   : > { %v9125_v3 = vadd.f32 %v19307_v35, %v9124_v9  ;;  %v12026_v48 = vpop.f32.mrb[21].mxu0  ;;  %9619 = vrot.lane.b32.xlu0 %v8194_v6, %s12236_s14  ;;  %v7801_v44 = vpop.f32.mrb[22].mxu1 }
 0x5f0   : > { %v9127_v2 = vpop.f32.mrb[22].mxu0  ;;  %v8142_v20 = vadd.f32 %v19294_v18, %v7941_v46  ;;  %v7942_v39 = vadd.f32 %v7801_v44, %v19002_v31  ;;  %v11921_v15 = vpop.f32.mrb[23].mxu1 }
 0x5f1   : > { %v9273_v37 = vmax.f32 %v9125_v3, 0.0  ;;  %v9128_v36 = vadd.f32 %v19307_v35, %v9127_v2  ;;  %v12027_v21 = vpop.f32.mrb[23].mxu0  ;;  %9621 = vrot.lane.b32.xlu1 %v8195_v16, %s12236_s14  ;;  %v19476_v22 = vpop.permute.xlu0 %9407 }
 0x5f2   : > { %v8196_v6 = vmax.f32 %v8142_v20, 0.0  ;;  %v8143_v48 = vadd.f32 %v19294_v18, %v7942_v39  ;;  %v19479_v3 = vpop.permute.xlu1 %9409 }
 0x5f3   : > { %v9274_v9 = vmax.f32 %v9128_v36, 0.0  ;;  %9835 = vrot.lane.b32.xlu0 %v9273_v37, %s12237_s15 }
 0x5f4   : > { %v8197_v51 = vmax.f32 %v8143_v48, 0.0 }
 0x5f5   : > { %9837 = vrot.lane.b32.xlu1 %v9274_v9, %s12237_s15  ;;  %v7806_v31 = vpop.f32.mrb[24].mxu1 }
 0x5f6   : > { %v9132_v16 = vpop.f32.mrb[24].mxu0  ;;  %v7943_v37 = vadd.f32 %v7806_v31, %v19017_v32  ;;  %v11924_v36 = vpop.f32.mrb[25].mxu1 }
 0x5f7   : > { %v9133_v2 = vadd.f32 %v19307_v35, %v9132_v16  ;;  %v12030_v46 = vpop.f32.mrb[25].mxu0  ;;  %9623 = vrot.lane.b32.xlu0 %v8196_v6, %s12236_s14  ;;  %v7809_v39 = vpop.f32.mrb[26].mxu1 }
 0x5f8   : > { %v9135_v19 = vpop.f32.mrb[26].mxu0  ;;  %v8144_v15 = vadd.f32 %v19294_v18, %v7943_v37  ;;  %v7944_v9 = vadd.f32 %v7809_v39, %v19020_v8  ;;  %v11925_v48 = vpop.f32.mrb[27].mxu1 }
 0x5f9   : > { %v9275_v21 = vmax.f32 %v9133_v2, 0.0  ;;  %v9136_v44 = vadd.f32 %v19307_v35, %v9135_v19  ;;  %v12031_v20 = vpop.f32.mrb[27].mxu0  ;;  %9625 = vrot.lane.b32.xlu1 %v8197_v51, %s12236_s14  ;;  %v19490_v32 = vpop.permute.xlu0 %9463 }
 0x5fa   : > { %v8198_v6 = vmax.f32 %v8144_v15, 0.0  ;;  %v8145_v46 = vadd.f32 %v19294_v18, %v7944_v9  ;;  %v19493_v2 = vpop.permute.xlu1 %9465 }
 0x5fb   : > { %v9276_v16 = vmax.f32 %v9136_v44, 0.0  ;;  %9839 = vrot.lane.b32.xlu0 %v9275_v21, %s12237_s15 }
 0x5fc   : > { %v8199_v31 = vmax.f32 %v8145_v46, 0.0 }
 0x5fd   : > { %9841 = vrot.lane.b32.xlu1 %v9276_v16, %s12237_s15  ;;  %v7814_v8 = vpop.f32.mrb[28].mxu1 }
 0x5fe   : > { %v9140_v51 = vpop.f32.mrb[28].mxu0  ;;  %v7945_v21 = vadd.f32 %v7814_v8, %v19035_v14  ;;  %v11928_v44 = vpop.f32.mrb[29].mxu1 }
 0x5ff   : > { %v9141_v19 = vadd.f32 %v19307_v35, %v9140_v51  ;;  %v12034_v37 = vpop.f32.mrb[29].mxu0  ;;  %9627 = vrot.lane.b32.xlu0 %v8198_v6, %s12236_s14  ;;  %v7817_v9 = vpop.f32.mrb[30].mxu1 }
 0x600   : > { %v9143_v36 = vpop.f32.mrb[30].mxu0  ;;  %v8146_v48 = vadd.f32 %v19294_v18, %v7945_v21  ;;  %v7946_v16 = vadd.f32 %v7817_v9, %v19038_v26  ;;  %v11929_v46 = vpop.f32.mrb[31].mxu1 }
 0x601   : > { %v9277_v20 = vmax.f32 %v9141_v19, 0.0  ;;  %v9144_v39 = vadd.f32 %v19307_v35, %v9143_v36  ;;  %v12035_v15 = vpop.f32.mrb[31].mxu0  ;;  %9629 = vrot.lane.b32.xlu1 %v8199_v31, %s12236_s14  ;;  %v19504_v37 = vpop.permute.xlu0 %9411 }
 0x602   : > { %v8200_v6 = vmax.f32 %v8146_v48, 0.0  ;;  %v8147_v14 = vadd.f32 %v19294_v18, %v7946_v16  ;;  %v19507_v19 = vpop.permute.xlu1 %9413 }
 0x603   : > { %v9278_v51 = vmax.f32 %v9144_v39, 0.0  ;;  %9843 = vrot.lane.b32.xlu0 %v9277_v20, %s12237_s15 }
 0x604   : > { %v8201_v31 = vmax.f32 %v8147_v14, 0.0 }
 0x605   : > { %9845 = vrot.lane.b32.xlu1 %v9278_v51, %s12237_s15  ;;  %v7822_v26 = vpop.f32.mrb[32].mxu1 }
 0x606   : > { %v9148_v8 = vpop.f32.mrb[32].mxu0  ;;  %v7947_v20 = vadd.f32 %v7822_v26, %v19057_v57  ;;  %v11932_v39 = vpop.f32.mrb[33].mxu1 }
 0x607   : > { %v9149_v36 = vadd.f32 %v19307_v35, %v9148_v8  ;;  %v12038_v21 = vpop.f32.mrb[33].mxu0  ;;  %9631 = vrot.lane.b32.xlu0 %v8200_v6, %s12236_s14  ;;  %v9576_v16 = vpop.permute.xlu0 %9575  ;;  %v21440_v39 = vld [vmem:[#allocation131_spill] sm:$0xff] }
 0x608   : > { %v9151_v44 = vpop.f32.mrb[34].mxu0  ;;  %v8148_v46 = vadd.f32 %v19294_v18, %v7947_v20  ;;  %v7825_v51 = vpop.f32.mrb[34].mxu1 }
 0x609   : > { %v9279_v15 = vmax.f32 %v9149_v36, 0.0  ;;  %v9152_v9 = vadd.f32 %v19307_v35, %v9151_v44  ;;  %v12039_v48 = vpop.f32.mrb[35].mxu0  ;;  %9633 = vrot.lane.b32.xlu1 %v8201_v31, %s12236_s14  ;;  %v9578_v14 = vpop.permute.xlu1 %9577  ;;  %v7948_v6 = vadd.f32 %v7825_v51, %v19060_v7  ;;  %v9953_v31 = vsel %vm477_vm5, %v19051_v52, %v9576_v16 }
 0x60a   : > { %v11933_v21 = vpop.f32.mrb[35].mxu1  ;;  %v8202_v57 = vmax.f32 %v8148_v46, 0.0 }
 0x60b   : > { %v9280_v8 = vmax.f32 %v9152_v9, 0.0  ;;  %9847 = vrot.lane.b32.xlu0 %v9279_v15, %s12237_s15  ;;  %v8149_v36 = vadd.f32 %v19294_v18, %v7948_v6  ;;  %v9954_v15 = vsel %vm477_vm5, %v21440_v39, %v9578_v14 }
 0x60d   : > { %v9792_v26 = vpop.permute.xlu0 %9791  ;;  %9849 = vrot.lane.b32.xlu1 %v9280_v8, %s12237_s15  ;;  %v8203_v20 = vmax.f32 %v8149_v36, 0.0  ;;  %v7830_v51 = vpop.f32.mrb[36].mxu1 }
 0x60e   : > { %v9156_v7 = vpop.f32.mrb[36].mxu0  ;;  %v10008_v44 = vsel %vm10007_vm6, %v9953_v31, %v9792_v26  ;;  %v7949_v14 = vadd.f32 %v7830_v51, %v19079_v33  ;;  %v11936_v31 = vpop.f32.mrb[37].mxu1 }
 0x60f   : > { %v9157_v9 = vadd.f32 %v19307_v35, %v9156_v7  ;;  %10063 = vst.msk [vmem:[%s19521_s18] sm:$0xff] %vm10062_vm0, %v10008_v44  ;;  %v12042_v48 = vpop.f32.mrb[37].mxu0  ;;  %v9794_v46 = vpop.permute.xlu1 %9793  ;;  %9635 = vrot.lane.b32.xlu0 %v8202_v57, %s12236_s14 }
 0x610   : > { %v9159_v52 = vpop.f32.mrb[38].mxu0  ;;  %v10009_v16 = vsel %vm10007_vm6, %v9954_v15, %v9794_v46  ;;  %v7833_v26 = vpop.f32.mrb[38].mxu1  ;;  %v8150_v57 = vadd.f32 %v19294_v18, %v7949_v14 }
 0x611   : > { %v9281_v8 = vmax.f32 %v9157_v9, 0.0  ;;  %v9160_v6 = vadd.f32 %v19307_v35, %v9159_v52  ;;  %10064 = vst.msk [vmem:[%s19521_s18 + $0x8] sm:$0xff] %vm10062_vm0, %v10009_v16  ;;  %v12043_v21 = vpop.f32.mrb[39].mxu0  ;;  %9637 = vrot.lane.b32.xlu1 %v8203_v20, %s12236_s14  ;;  %v9580_v36 = vpop.permute.xlu0 %9579  ;;  %v7950_v44 = vadd.f32 %v7833_v26, %v19082_v47  ;;  %v21441_v26 = vld [vmem:[#allocation136_spill] sm:$0xff] }
 0x612   : > { %v11937_v39 = vpop.f32.mrb[39].mxu1  ;;  %v8204_v9 = vmax.f32 %v8150_v57, 0.0  ;;  %v9955_v33 = vsel %vm477_vm5, %v19095_v45, %v9580_v36 }
 0x613   : > { %v9282_v7 = vmax.f32 %v9160_v6, 0.0  ;;  %v9582_v15 = vpop.permute.xlu1 %9581  ;;  %9851 = vrot.lane.b32.xlu0 %v9281_v8, %s12237_s15  ;;  %v8151_v48 = vadd.f32 %v19294_v18, %v7950_v44 }
 0x614   : > { %v9956_v47 = vsel %vm477_vm5, %v19099_v50, %v9582_v15 }
 0x615   : > { %9853 = vrot.lane.b32.xlu1 %v9282_v7, %s12237_s15  ;;  %v9796_v46 = vpop.permute.xlu0 %9795  ;;  %v8205_v52 = vmax.f32 %v8151_v48, 0.0  ;;  %v7838_v14 = vpop.f32.mrb[40].mxu1  ;;  %v21442_v48 = vld [vmem:[#allocation75_spill] sm:$0xff] }
 0x616   : > { %v9164_v20 = vpop.f32.mrb[40].mxu0  ;;  %v10010_v51 = vsel %vm10007_vm6, %v9955_v33, %v9796_v46  ;;  %v7951_v7 = vadd.f32 %v7838_v14, %v21441_v26  ;;  %v11940_v57 = vpop.f32.mrb[41].mxu1 }
 0x617   : > { %v9165_v16 = vadd.f32 %v19307_v35, %v9164_v20  ;;  %v12046_v8 = vpop.f32.mrb[41].mxu0  ;;  %v9798_v6 = vpop.permute.xlu1 %9797  ;;  %9639 = vrot.lane.b32.xlu0 %v8204_v9, %s12236_s14  ;;  %10065 = vst.msk [vmem:[%s19521_s18 + $0x10] sm:$0xff] %vm10062_vm0, %v10010_v51  ;;  %v21443_v51 = vld [vmem:[#allocation82_spill] sm:$0xff] }
 0x618   : > { %v9167_v21 = vpop.f32.mrb[42].mxu0  ;;  %v10011_v45 = vsel %vm10007_vm6, %v9956_v47, %v9798_v6  ;;  %v7841_v39 = vpop.f32.mrb[42].mxu1  ;;  %v8152_v9 = vadd.f32 %v19294_v18, %v7951_v7 }
 0x619   : > { %v9283_v31 = vmax.f32 %v9165_v16, 0.0  ;;  %v9168_v36 = vadd.f32 %v19307_v35, %v9167_v21  ;;  %10066 = vst.msk [vmem:[%s19521_s18 + $0x18] sm:$0xff] %vm10062_vm0, %v10011_v45  ;;  %v12047_v50 = vpop.f32.mrb[43].mxu0  ;;  %9641 = vrot.lane.b32.xlu1 %v8205_v52, %s12236_s14  ;;  %v9584_v44 = vpop.permute.xlu0 %9583  ;;  %v7952_v33 = vadd.f32 %v7841_v39, %v21442_v48 }
 0x61a   : > { %v11941_v20 = vpop.f32.mrb[43].mxu1  ;;  %v8206_v47 = vmax.f32 %v8152_v9, 0.0  ;;  %v9957_v52 = vsel %vm477_vm5, %v21443_v51, %v9584_v44 }
 0x61b   : > { %v9284_v15 = vmax.f32 %v9168_v36, 0.0  ;;  %v9586_v46 = vpop.permute.xlu1 %9585  ;;  %9855 = vrot.lane.b32.xlu0 %v9283_v31, %s12237_s15  ;;  %v8153_v16 = vadd.f32 %v19294_v18, %v7952_v33 }
 0x61c   : > { %v9958_v45 = vsel %vm477_vm5, %v19143_v60, %v9586_v46 }
 0x61d   : > { %9857 = vrot.lane.b32.xlu1 %v9284_v15, %s12237_s15  ;;  %v9800_v6 = vpop.permute.xlu0 %9799  ;;  %v8207_v21 = vmax.f32 %v8153_v16, 0.0  ;;  %v7846_v57 = vpop.f32.mrb[44].mxu1  ;;  %v21444_v15 = vld [vmem:[#allocation76_spill] sm:$0xff] }
 0x61e   : > { %v9172_v8 = vpop.f32.mrb[44].mxu0  ;;  %v10012_v36 = vsel %vm10007_vm6, %v9957_v52, %v9800_v6  ;;  %v7953_v9 = vadd.f32 %v7846_v57, %v21444_v15  ;;  %v11944_v48 = vpop.f32.mrb[45].mxu1  ;;  %v21445_v16 = vld [vmem:[#allocation80_spill] sm:$0xff] }
 0x61f   : > { %v9173_v14 = vadd.f32 %v19307_v35, %v9172_v8  ;;  %v12050_v31 = vpop.f32.mrb[45].mxu0  ;;  %v9802_v50 = vpop.permute.xlu1 %9801  ;;  %9643 = vrot.lane.b32.xlu0 %v8206_v47, %s12236_s14  ;;  %10067 = vst.msk [vmem:[%s19521_s18 + $0x20] sm:$0xff] %vm10062_vm0, %v10012_v36 }
 0x620   : > { %v9175_v26 = vpop.f32.mrb[46].mxu0  ;;  %v10013_v7 = vsel %vm10007_vm6, %v9958_v45, %v9802_v50  ;;  %v7849_v20 = vpop.f32.mrb[46].mxu1  ;;  %v8154_v47 = vadd.f32 %v19294_v18, %v7953_v9  ;;  %v21446_v50 = vld [vmem:[#allocation102_spill] sm:$0xff] }
 0x621   : > { %v9285_v44 = vmax.f32 %v9173_v14, 0.0  ;;  %v9176_v39 = vadd.f32 %v19307_v35, %v9175_v26  ;;  %10068 = vst.msk [vmem:[%s19521_s18 + $0x28] sm:$0xff] %vm10062_vm0, %v10013_v7  ;;  %v12051_v60 = vpop.f32.mrb[47].mxu0  ;;  %9645 = vrot.lane.b32.xlu1 %v8207_v21, %s12236_s14  ;;  %v9588_v33 = vpop.permute.xlu0 %9587  ;;  %v7954_v51 = vadd.f32 %v7849_v20, %v21445_v16  ;;  %v21447_v20 = vld [vmem:[#allocation97_spill] sm:$0xff] }
 0x622   : > { %v11945_v52 = vpop.f32.mrb[47].mxu1  ;;  %v8208_v6 = vmax.f32 %v8154_v47, 0.0  ;;  %v9959_v21 = vsel %vm477_vm5, %v19183_v56, %v9588_v33 }
 0x623   : > { %v9286_v46 = vmax.f32 %v9176_v39, 0.0  ;;  %v9590_v8 = vpop.permute.xlu1 %9589  ;;  %9859 = vrot.lane.b32.xlu0 %v9285_v44, %s12237_s15  ;;  %v8155_v45 = vadd.f32 %v19294_v18, %v7954_v51 }
 0x624   : > { %v9960_v26 = vsel %vm477_vm5, %v21446_v50, %v9590_v8 }
 0x625   : > { %9861 = vrot.lane.b32.xlu1 %v9286_v46, %s12237_s15  ;;  %v9804_v36 = vpop.permute.xlu0 %9803  ;;  %v8209_v31 = vmax.f32 %v8155_v45, 0.0  ;;  %v7854_v15 = vpop.f32.mrb[48].mxu1 }
 0x626   : > { %v9180_v14 = vpop.f32.mrb[48].mxu0  ;;  %v10014_v57 = vsel %vm10007_vm6, %v9959_v21, %v9804_v36  ;;  %v7955_v46 = vadd.f32 %v7854_v15, %v21447_v20  ;;  %v11948_v47 = vpop.f32.mrb[49].mxu1  ;;  %v21449_v20 = vld [vmem:[#allocation105_spill] sm:$0xff] }
 0x627   : > { %v9181_v7 = vadd.f32 %v19307_v35, %v9180_v14  ;;  %v12054_v44 = vpop.f32.mrb[49].mxu0  ;;  %v9806_v39 = vpop.permute.xlu1 %9805  ;;  %9647 = vrot.lane.b32.xlu0 %v8208_v6, %s12236_s14  ;;  %10069 = vst.msk [vmem:[%s19521_s18 + $0x30] sm:$0xff] %vm10062_vm0, %v10014_v57  ;;  %v21448_v6 = vld [vmem:[#allocation89_spill] sm:$0xff] }
 0x628   : > { %v9183_v60 = vpop.f32.mrb[50].mxu0  ;;  %v10015_v56 = vsel %vm10007_vm6, %v9960_v26, %v9806_v39  ;;  %v7857_v51 = vpop.f32.mrb[50].mxu1  ;;  %v8156_v8 = vadd.f32 %v19294_v18, %v7955_v46 }
 0x629   : > { %v9287_v9 = vmax.f32 %v9181_v7, 0.0  ;;  %v9184_v48 = vadd.f32 %v19307_v35, %v9183_v60  ;;  %10070 = vst.msk [vmem:[%s19521_s18 + $0x38] sm:$0xff] %vm10062_vm0, %v10015_v56  ;;  %v12055_v33 = vpop.f32.mrb[51].mxu0  ;;  %9649 = vrot.lane.b32.xlu1 %v8209_v31, %s12236_s14  ;;  %v9592_v16 = vpop.permute.xlu0 %9591  ;;  %v7956_v45 = vadd.f32 %v7857_v51, %v21448_v6 }
 0x62a   : > { %v11949_v21 = vpop.f32.mrb[51].mxu1  ;;  %v8210_v36 = vmax.f32 %v8156_v8, 0.0  ;;  %v9961_v31 = vsel %vm477_vm5, %v19227_v12, %v9592_v16  ;;  %v19623_v8 = vld [vmem:[%s19929_s5] ss:$0 sm:$0xff] }
 0x62b   : > { %v9288_v52 = vmax.f32 %v9184_v48, 0.0  ;;  %v9594_v14 = vpop.permute.xlu1 %9593  ;;  %9863 = vrot.lane.b32.xlu0 %v9287_v9, %s12237_s15  ;;  %v8157_v50 = vadd.f32 %v19294_v18, %v7956_v45  ;;  %v21450_v45 = vld [vmem:[#allocation7_spill] sm:$0xff] }
 0x62c   : > { %v9962_v44 = vsel %vm477_vm5, %v19231_v29, %v9594_v14 }
 0x62d   : > { %9865 = vrot.lane.b32.xlu1 %v9288_v52, %s12237_s15  ;;  %v9808_v7 = vpop.permute.xlu0 %9807  ;;  %v8211_v57 = vmax.f32 %v8157_v50, 0.0  ;;  %v7862_v9 = vpop.f32.mrb[52].mxu1 }
 0x62e   : > { %v9188_v26 = vpop.f32.mrb[52].mxu0  ;;  %v10016_v60 = vsel %vm10007_vm6, %v9961_v31, %v9808_v7  ;;  %v7957_v46 = vadd.f32 %v7862_v9, %v21449_v20  ;;  %v11952_v47 = vpop.f32.mrb[53].mxu1 }
 0x62f   : > { %v9189_v39 = vadd.f32 %v19307_v35, %v9188_v26  ;;  %v12058_v56 = vpop.f32.mrb[53].mxu0  ;;  %v9810_v15 = vpop.permute.xlu1 %9809  ;;  %9651 = vrot.lane.b32.xlu0 %v8210_v36, %s12236_s14  ;;  %10071 = vst.msk [vmem:[%s19521_s18 + $0x40] sm:$0xff] %vm10062_vm0, %v10016_v60 }
 0x630   : > { %v9191_v18 = vpop.f32.mrb[54].mxu0  ;;  %v10017_v12 = vsel %vm10007_vm6, %v9962_v44, %v9810_v15  ;;  %v7865_v51 = vpop.f32.mrb[54].mxu1  ;;  %v8158_v6 = vadd.f32 %v19623_v8, %v7957_v46 }
 0x631   : > { %v9289_v48 = vmax.f32 %v9189_v39, 0.0  ;;  %v9192_v33 = vadd.f32 %v19307_v35, %v9191_v18  ;;  %10072 = vst.msk [vmem:[%s19521_s18 + $0x48] sm:$0xff] %vm10062_vm0, %v10017_v12  ;;  %v12059_v29 = vpop.f32.mrb[55].mxu0  ;;  %9653 = vrot.lane.b32.xlu1 %v8211_v57, %s12236_s14  ;;  %v9596_v16 = vpop.permute.xlu0 %9595  ;;  %v7958_v35 = vadd.f32 %v7865_v51, %v21450_v45  ;;  %v19637_v39 = vld [vmem:[%s19931_s7] ss:$0 sm:$0xff] }
 0x632   : > { %v11953_v21 = vpop.f32.mrb[55].mxu1  ;;  %v8212_v36 = vmax.f32 %v8158_v6, 0.0  ;;  %v9963_v31 = vsel %vm477_vm5, %v19267_v10, %v9596_v16  ;;  %v21451_v29 = vld [vmem:[#allocation96_spill] sm:$0xff] }
 0x633   : > { %v9290_v52 = vmax.f32 %v9192_v33, 0.0  ;;  %v9598_v14 = vpop.permute.xlu1 %9597  ;;  %9867 = vrot.lane.b32.xlu0 %v9289_v48, %s12237_s15  ;;  %v8159_v50 = vadd.f32 %v19623_v8, %v7958_v35  ;;  %v21452_v6 = vld [vmem:[#allocation84_spill] sm:$0xff] }
 0x634   : > { %v9964_v44 = vsel %vm477_vm5, %v19271_v54, %v9598_v14 }
 0x635   : > { %9869 = vrot.lane.b32.xlu1 %v9290_v52, %s12237_s15  ;;  %v9812_v7 = vpop.permute.xlu0 %9811  ;;  %v8213_v57 = vmax.f32 %v8159_v50, 0.0  ;;  %v7870_v9 = vpop.f32.mrb[56].mxu1 }
 0x636   : > { %v9196_v26 = vpop.f32.mrb[56].mxu0  ;;  %v10018_v56 = vsel %vm10007_vm6, %v9963_v31, %v9812_v7  ;;  %v7959_v20 = vadd.f32 %v7870_v9, %v21451_v29  ;;  %v11956_v46 = vpop.f32.mrb[57].mxu1 }
 0x637   : > { %v9197_v60 = vadd.f32 %v19637_v39, %v9196_v26  ;;  %v12062_v15 = vpop.f32.mrb[57].mxu0  ;;  %v9814_v18 = vpop.permute.xlu1 %9813  ;;  %9655 = vrot.lane.b32.xlu0 %v8212_v36, %s12236_s14  ;;  %10073 = vst.msk [vmem:[%s19521_s18 + $0x50] sm:$0xff] %vm10062_vm0, %v10018_v56 }
 0x638   : > { %v9199_v10 = vpop.f32.mrb[58].mxu0  ;;  %v10019_v12 = vsel %vm10007_vm6, %v9964_v44, %v9814_v18  ;;  %v7873_v16 = vpop.f32.mrb[58].mxu1  ;;  %v8160_v52 = vadd.f32 %v19623_v8, %v7959_v20 }
 0x639   : > { %v9291_v54 = vmax.f32 %v9197_v60, 0.0  ;;  %v9200_v48 = vadd.f32 %v19637_v39, %v9199_v10  ;;  %10074 = vst.msk [vmem:[%s19521_s18 + $0x58] sm:$0xff] %vm10062_vm0, %v10019_v12  ;;  %v12063_v33 = vpop.f32.mrb[59].mxu0  ;;  %9657 = vrot.lane.b32.xlu1 %v8213_v57, %s12236_s14  ;;  %v9600_v47 = vpop.permute.xlu0 %9599  ;;  %v7960_v45 = vadd.f32 %v7873_v16, %v21452_v6  ;;  %v21454_v16 = vld [vmem:[#allocation81_spill] sm:$0xff] }
 0x63a   : > { %v11957_v35 = vpop.f32.mrb[59].mxu1  ;;  %v8214_v14 = vmax.f32 %v8160_v52, 0.0  ;;  %v9965_v50 = vsel %vm477_vm5, %v19309_v17, %v9600_v47 }
 0x63b   : > { %v9292_v51 = vmax.f32 %v9200_v48, 0.0  ;;  %v9602_v21 = vpop.permute.xlu1 %9601  ;;  %9871 = vrot.lane.b32.xlu0 %v9291_v54, %s12237_s15  ;;  %v8161_v36 = vadd.f32 %v19623_v8, %v7960_v45  ;;  %v21453_v54 = vld [vmem:[#allocation101_spill] sm:$0xff] }
 0x63c   : > { %v9966_v57 = vsel %vm477_vm5, %v19311_v0, %v9602_v21 }
 0x63d   : > { %9873 = vrot.lane.b32.xlu1 %v9292_v51, %s12237_s15  ;;  %v9816_v26 = vpop.permute.xlu0 %9815  ;;  %v8215_v7 = vmax.f32 %v8161_v36, 0.0  ;;  %v7878_v10 = vpop.f32.mrb[60].mxu1 }
 0x63e   : > { %v9204_v31 = vpop.f32.mrb[60].mxu0  ;;  %v10020_v60 = vsel %vm10007_vm6, %v9965_v50, %v9816_v26  ;;  %v7961_v48 = vadd.f32 %v7878_v10, %v21453_v54  ;;  %v11960_v33 = vpop.f32.mrb[61].mxu1 }
 0x63f   : > { %v9205_v44 = vadd.f32 %v19637_v39, %v9204_v31  ;;  %v12066_v56 = vpop.f32.mrb[61].mxu0  ;;  %v9818_v15 = vpop.permute.xlu1 %9817  ;;  %9659 = vrot.lane.b32.xlu0 %v8214_v14, %s12236_s14  ;;  %10075 = vst.msk [vmem:[%s19521_s18 + $0x60] sm:$0xff] %vm10062_vm0, %v10020_v60  ;;  %v21456_v33 = vld [vmem:[#allocation107_spill] sm:$0xff] }
 0x640   : > { %v9207_v18 = vpop.f32.mrb[62].mxu0  ;;  %v10021_v17 = vsel %vm10007_vm6, %v9966_v57, %v9818_v15  ;;  %v7881_v20 = vpop.f32.mrb[62].mxu1  ;;  %v8162_v47 = vadd.f32 %v19623_v8, %v7961_v48 }
 0x641   : > { %v9293_v12 = vmax.f32 %v9205_v44, 0.0  ;;  %v9208_v9 = vadd.f32 %v19637_v39, %v9207_v18  ;;  %10076 = vst.msk [vmem:[%s19521_s18 + $0x68] sm:$0xff] %vm10062_vm0, %v10021_v17  ;;  %v12067_v0 = vpop.f32.mrb[63].mxu0  ;;  %9661 = vrot.lane.b32.xlu1 %v8215_v7, %s12236_s14  ;;  %v9604_v29 = vpop.permute.xlu0 %9603  ;;  %v7962_v51 = vadd.f32 %v7881_v20, %v21454_v16  ;;  %v21455_v17 = vld [vmem:[#allocation48_spill] sm:$0xff] }
 0x642   : > { %v11961_v52 = vpop.f32.mrb[63].mxu1  ;;  %v8216_v45 = vmax.f32 %v8162_v47, 0.0  ;;  %v9967_v21 = vsel %vm477_vm5, %v19336_v53, %v9604_v29 }
 0x643   : > { %v9294_v46 = vmax.f32 %v9208_v9, 0.0  ;;  %v9606_v6 = vpop.permute.xlu1 %9605  ;;  %9875 = vrot.lane.b32.xlu0 %v9293_v12, %s12237_s15  ;;  %v8163_v35 = vadd.f32 %v19623_v8, %v7962_v51 }
 0x644   : > { %v9968_v31 = vsel %vm477_vm5, %v19339_v13, %v9606_v6 }
 0x645   : > { %9877 = vrot.lane.b32.xlu1 %v9294_v46, %s12237_s15  ;;  %v9820_v36 = vpop.permute.xlu0 %9819  ;;  %v8217_v50 = vmax.f32 %v8163_v35, 0.0  ;;  %v7886_v56 = vpop.f32.mrb[64].mxu1 }
 0x646   : > { %v9212_v14 = vpop.f32.mrb[64].mxu0  ;;  %v10022_v7 = vsel %vm10007_vm6, %v9967_v21, %v9820_v36  ;;  %v7963_v10 = vadd.f32 %v7886_v56, %v21455_v17  ;;  %v11964_v12 = vpop.f32.mrb[65].mxu1 }
 0x647   : > { %v9213_v26 = vadd.f32 %v19637_v39, %v9212_v14  ;;  %v12070_v57 = vpop.f32.mrb[65].mxu0  ;;  %v9822_v44 = vpop.permute.xlu1 %9821  ;;  %9663 = vrot.lane.b32.xlu0 %v8216_v45, %s12236_s14  ;;  %10077 = vst.msk [vmem:[%s19521_s18 + $0x70] sm:$0xff] %vm10062_vm0, %v10022_v7 }
 0x648   : > { %v9215_v60 = vpop.f32.mrb[66].mxu0  ;;  %v10023_v53 = vsel %vm10007_vm6, %v9968_v31, %v9822_v44  ;;  %v7889_v0 = vpop.f32.mrb[66].mxu1  ;;  %v8164_v48 = vadd.f32 %v19623_v8, %v7963_v10 }
 0x649   : > { %v9295_v15 = vmax.f32 %v9213_v26, 0.0  ;;  %v9216_v18 = vadd.f32 %v19637_v39, %v9215_v60  ;;  %10078 = vst.msk [vmem:[%s19521_s18 + $0x78] sm:$0xff] %vm10062_vm0, %v10023_v53  ;;  %v12071_v13 = vpop.f32.mrb[67].mxu0  ;;  %9665 = vrot.lane.b32.xlu1 %v8217_v50, %s12236_s14  ;;  %v9608_v9 = vpop.permute.xlu0 %9607  ;;  %v7964_v29 = vadd.f32 %v7889_v0, %v21456_v33 }
 0x64a   : > { %v11965_v20 = vpop.f32.mrb[67].mxu1  ;;  %v8218_v47 = vmax.f32 %v8164_v48, 0.0  ;;  %v9969_v51 = vsel %vm477_vm5, %v19364_v30, %v9608_v9 }
 0x64b   : > { %v9296_v54 = vmax.f32 %v9216_v18, 0.0  ;;  %v9610_v46 = vpop.permute.xlu1 %9609  ;;  %9879 = vrot.lane.b32.xlu0 %v9295_v15, %s12237_s15  ;;  %v8165_v16 = vadd.f32 %v19623_v8, %v7964_v29 }
 0x64c   : > { %v9970_v35 = vsel %vm477_vm5, %v19367_v27, %v9610_v46 }
 0x64d   : > { %9881 = vrot.lane.b32.xlu1 %v9296_v54, %s12237_s15  ;;  %v9824_v6 = vpop.permute.xlu0 %9823  ;;  %v8219_v45 = vmax.f32 %v8165_v16, 0.0  ;;  %v7894_v26 = vpop.f32.mrb[68].mxu1 }
 0x64e   : > { %v9220_v52 = vpop.f32.mrb[68].mxu0  ;;  %v10024_v14 = vsel %vm10007_vm6, %v9969_v51, %v9824_v6  ;;  %v7965_v44 = vadd.f32 %v7894_v26, %v19255_v4  ;;  %v11968_v60 = vpop.f32.mrb[69].mxu1 }
 0x64f   : > { %v9221_v21 = vadd.f32 %v19637_v39, %v9220_v52  ;;  %v12074_v36 = vpop.f32.mrb[69].mxu0  ;;  %v9826_v50 = vpop.permute.xlu1 %9825  ;;  %9667 = vrot.lane.b32.xlu0 %v8218_v47, %s12236_s14  ;;  %10079 = vst.msk [vmem:[%s19521_s18 + $0x80] sm:$0xff] %vm10062_vm0, %v10024_v14 }
 0x650   : > { %v9223_v31 = vpop.f32.mrb[70].mxu0  ;;  %v10025_v30 = vsel %vm10007_vm6, %v9970_v35, %v9826_v50  ;;  %v7897_v56 = vpop.f32.mrb[70].mxu1  ;;  %v8166_v18 = vadd.f32 %v19623_v8, %v7965_v44 }
 0x651   : > { %v9297_v7 = vmax.f32 %v9221_v21, 0.0  ;;  %v9224_v57 = vadd.f32 %v19637_v39, %v9223_v31  ;;  %10080 = vst.msk [vmem:[%s19521_s18 + $0x88] sm:$0xff] %vm10062_vm0, %v10025_v30  ;;  %v12075_v27 = vpop.f32.mrb[71].mxu0  ;;  %9669 = vrot.lane.b32.xlu1 %v8219_v45, %s12236_s14  ;;  %v9612_v53 = vpop.permute.xlu0 %9611  ;;  %v7966_v13 = vadd.f32 %v7897_v56, %v19258_v49 }
 0x652   : > { %v11969_v17 = vpop.f32.mrb[71].mxu1  ;;  %v8220_v12 = vmax.f32 %v8166_v18, 0.0  ;;  %v9971_v4 = vsel %vm477_vm5, %v19392_v62, %v9612_v53 }
 0x653   : > { %v9298_v15 = vmax.f32 %v9224_v57, 0.0  ;;  %v9614_v10 = vpop.permute.xlu1 %9613  ;;  %9883 = vrot.lane.b32.xlu0 %v9297_v7, %s12237_s15  ;;  %v8167_v9 = vadd.f32 %v19623_v8, %v7966_v13 }
 0x654   : > { %v9972_v49 = vsel %vm477_vm5, %v19395_v40, %v9614_v10 }
 0x655   : > { %9885 = vrot.lane.b32.xlu1 %v9298_v15, %s12237_s15  ;;  %v9828_v54 = vpop.permute.xlu0 %9827  ;;  %v8221_v48 = vmax.f32 %v8167_v9, 0.0  ;;  %v7902_v16 = vpop.f32.mrb[72].mxu1 }
 0x656   : > { %v9228_v0 = vpop.f32.mrb[72].mxu0  ;;  %v10026_v29 = vsel %vm10007_vm6, %v9971_v4, %v9828_v54  ;;  %v7967_v6 = vadd.f32 %v7902_v16, %v19273_v5  ;;  %v11972_v45 = vpop.f32.mrb[73].mxu1 }
 0x657   : > { %v9229_v33 = vadd.f32 %v19637_v39, %v9228_v0  ;;  %v12078_v20 = vpop.f32.mrb[73].mxu0  ;;  %v9830_v46 = vpop.permute.xlu1 %9829  ;;  %9671 = vrot.lane.b32.xlu0 %v8220_v12, %s12236_s14  ;;  %10081 = vst.msk [vmem:[%s19521_s18 + $0x90] sm:$0xff] %vm10062_vm0, %v10026_v29 }
 0x658   : > { %v9231_v47 = vpop.f32.mrb[74].mxu0  ;;  %v10027_v62 = vsel %vm10007_vm6, %v9972_v49, %v9830_v46  ;;  %v7905_v21 = vpop.f32.mrb[74].mxu1  ;;  %v8168_v36 = vadd.f32 %v19623_v8, %v7967_v6 }
 0x659   : > { %v9299_v51 = vmax.f32 %v9229_v33, 0.0  ;;  %v9232_v52 = vadd.f32 %v19637_v39, %v9231_v47  ;;  %10082 = vst.msk [vmem:[%s19521_s18 + $0x98] sm:$0xff] %vm10062_vm0, %v10027_v62  ;;  %v12079_v40 = vpop.f32.mrb[75].mxu0  ;;  %9673 = vrot.lane.b32.xlu1 %v8221_v48, %s12236_s14  ;;  %v9616_v35 = vpop.permute.xlu0 %9615  ;;  %v7968_v50 = vadd.f32 %v7905_v21, %v19276_v24 }
 0x65a   : > { %v11973_v31 = vpop.f32.mrb[75].mxu1  ;;  %v8222_v26 = vmax.f32 %v8168_v36, 0.0  ;;  %v9973_v5 = vsel %vm477_vm5, %v19420_v38, %v9616_v35 }
 0x65b   : > { %v9300_v14 = vmax.f32 %v9232_v52, 0.0  ;;  %v9618_v30 = vpop.permute.xlu1 %9617  ;;  %9887 = vrot.lane.b32.xlu0 %v9299_v51, %s12237_s15  ;;  %v8169_v7 = vadd.f32 %v19623_v8, %v7968_v50 }
 0x65c   : > { %v9974_v24 = vsel %vm477_vm5, %v19423_v1, %v9618_v30 }
 0x65d   : > { %9889 = vrot.lane.b32.xlu1 %v9300_v14, %s12237_s15  ;;  %v9832_v27 = vpop.permute.xlu0 %9831  ;;  %v8223_v44 = vmax.f32 %v8169_v7, 0.0  ;;  %v7910_v13 = vpop.f32.mrb[76].mxu1 }
 0x65e   : > { %v9236_v57 = vpop.f32.mrb[76].mxu0  ;;  %v10028_v53 = vsel %vm10007_vm6, %v9973_v5, %v9832_v27  ;;  %v7969_v12 = vadd.f32 %v7910_v13, %v19289_v25  ;;  %v11976_v9 = vpop.f32.mrb[77].mxu1 }
 0x65f   : > { %v9237_v60 = vadd.f32 %v19637_v39, %v9236_v57  ;;  %v12082_v56 = vpop.f32.mrb[77].mxu0  ;;  %v9834_v15 = vpop.permute.xlu1 %9833  ;;  %9675 = vrot.lane.b32.xlu0 %v8222_v26, %s12236_s14  ;;  %10083 = vst.msk [vmem:[%s19521_s18 + $0xa0] sm:$0xff] %vm10062_vm0, %v10028_v53  ;;  %v21459_v9 = vld [vmem:[#allocation27_spill] sm:$0xff] }
 0x660   : > { %v9239_v18 = vpop.f32.mrb[78].mxu0  ;;  %v10029_v38 = vsel %vm10007_vm6, %v9974_v24, %v9834_v15  ;;  %v7913_v0 = vpop.f32.mrb[78].mxu1  ;;  %v8170_v48 = vadd.f32 %v19623_v8, %v7969_v12  ;;  %v21457_v15 = vld [vmem:[#allocation135_spill] sm:$0xff] }
 0x661   : > { %v9301_v17 = vmax.f32 %v9237_v60, 0.0  ;;  %v9240_v10 = vadd.f32 %v19637_v39, %v9239_v18  ;;  %10084 = vst.msk [vmem:[%s19521_s18 + $0xa8] sm:$0xff] %vm10062_vm0, %v10029_v38  ;;  %v12083_v1 = vpop.f32.mrb[79].mxu0  ;;  %9677 = vrot.lane.b32.xlu1 %v8223_v44, %s12236_s14  ;;  %v9620_v4 = vpop.permute.xlu0 %9619  ;;  %v7970_v49 = vadd.f32 %v7913_v0, %v19297_v42  ;;  %v21458_v38 = vld [vmem:[#allocation11_spill] sm:$0xff] }
 0x662   : > { %v11977_v33 = vpop.f32.mrb[79].mxu1  ;;  %v8224_v20 = vmax.f32 %v8170_v48, 0.0  ;;  %v9975_v25 = vsel %vm477_vm5, %v19448_v59, %v9620_v4 }
 0x663   : > { %v9302_v54 = vmax.f32 %v9240_v10, 0.0  ;;  %v9622_v29 = vpop.permute.xlu1 %9621  ;;  %9891 = vrot.lane.b32.xlu0 %v9301_v17, %s12237_s15  ;;  %v8171_v46 = vadd.f32 %v19623_v8, %v7970_v49 }
 0x664   : > { %v9976_v42 = vsel %vm477_vm5, %v19451_v63, %v9622_v29 }
 0x665   : > { %9893 = vrot.lane.b32.xlu1 %v9302_v54, %s12237_s15  ;;  %v9836_v62 = vpop.permute.xlu0 %9835  ;;  %v8225_v16 = vmax.f32 %v8171_v46, 0.0  ;;  %v21460_v54 = vld [vmem:[#allocation33_spill] sm:$0xff] }
 0x666   : > { %v9244_v47 = vpop.f32.mrb[80].mxu0  ;;  %v10030_v52 = vsel %vm10007_vm6, %v9975_v25, %v9836_v62  ;;  %v21461_v25 = vld [vmem:[#allocation74_spill] sm:$0xff] }
 0x667   : > { %v9245_v51 = vadd.f32 %v19637_v39, %v9244_v47  ;;  %v12086_v40 = vpop.f32.mrb[81].mxu0  ;;  %v9838_v6 = vpop.permute.xlu1 %9837  ;;  %9679 = vrot.lane.b32.xlu0 %v8224_v20, %s12236_s14  ;;  %10085 = vst.msk [vmem:[%s19521_s18 + $0xb0] sm:$0xff] %vm10062_vm0, %v10030_v52 }
 0x668   : > { %v9247_v8 = vpop.f32.mrb[82].mxu0  ;;  %v10031_v45 = vsel %vm10007_vm6, %v9976_v42, %v9838_v6 }
 0x669   : > { %v9303_v59 = vmax.f32 %v9245_v51, 0.0  ;;  %v9248_v35 = vadd.f32 %v19637_v39, %v9247_v8  ;;  %10086 = vst.msk [vmem:[%s19521_s18 + $0xb8] sm:$0xff] %vm10062_vm0, %v10031_v45  ;;  %v12087_v63 = vpop.f32.mrb[83].mxu0  ;;  %9681 = vrot.lane.b32.xlu1 %v8225_v16, %s12236_s14  ;;  %v9624_v21 = vpop.permute.xlu0 %9623  ;;  %v21462_v16 = vld [vmem:[#allocation44_spill] sm:$0xff]  ;;  %v21463_v45 = vld [vmem:[#allocation83_spill] sm:$0xff] }
 0x66a   : > { %v9977_v50 = vsel %vm477_vm5, %v19476_v22, %v9624_v21  ;;  %v21464_v63 = vld [vmem:[#allocation98_spill] sm:$0xff] }
 0x66b   : > { %v9304_v14 = vmax.f32 %v9248_v35, 0.0  ;;  %v9626_v36 = vpop.permute.xlu1 %9625  ;;  %9895 = vrot.lane.b32.xlu0 %v9303_v59, %s12237_s15 }
 0x66c   : > { %v9978_v39 = vsel %vm477_vm5, %v19479_v3, %v9626_v36 }
 0x66d   : > { %9897 = vrot.lane.b32.xlu1 %v9304_v14, %s12237_s15  ;;  %v9840_v31 = vpop.permute.xlu0 %9839 }
 0x66e   : > { %v10032_v30 = vsel %vm10007_vm6, %v9977_v50, %v9840_v31 }
 0x66f   : > { %v9842_v26 = vpop.permute.xlu1 %9841  ;;  %10087 = vst.msk [vmem:[%s19521_s18 + $0xc0] sm:$0xff] %vm10062_vm0, %v10032_v30  ;;  %v21465_v30 = vld [vmem:[#allocation38_spill] sm:$0xff] }
 0x670   : > { %v10033_v7 = vsel %vm10007_vm6, %v9978_v39, %v9842_v26 }
 0x671   : > { %10088 = vst.msk [vmem:[%s19521_s18 + $0xc8] sm:$0xff] %vm10062_vm0, %v10033_v7  ;;  %v9628_v5 = vpop.permute.xlu0 %9627 }
 0x672   : > { %v9979_v22 = vsel %vm477_vm5, %v19504_v37, %v9628_v5  ;;  %v21466_v5 = vld [vmem:[#allocation125_spill] sm:$0xff] }
 0x673   : > { %v9630_v57 = vpop.permute.xlu1 %9629 }
 0x674   : > { %v9980_v3 = vsel %vm477_vm5, %v19507_v19, %v9630_v57 }
 0x675   : > { %v9844_v27 = vpop.permute.xlu0 %9843 }
 0x676   : > { %v10034_v44 = vsel %vm10007_vm6, %v9979_v22, %v9844_v27 }
 0x677   : > { %v9846_v24 = vpop.permute.xlu1 %9845  ;;  %10089 = vst.msk [vmem:[%s19521_s18 + $0xd0] sm:$0xff] %vm10062_vm0, %v10034_v44 }
 0x678   : > { %v10035_v60 = vsel %vm10007_vm6, %v9980_v3, %v9846_v24 }
 0x679   : > { %10090 = vst.msk [vmem:[%s19521_s18 + $0xd8] sm:$0xff] %vm10062_vm0, %v10035_v60  ;;  %v9632_v53 = vpop.permute.xlu0 %9631 }
 0x67a   : > { %v9981_v37 = vsel %vm477_vm5, %v21457_v15, %v9632_v53 }
 0x67b   : > { %v9634_v56 = vpop.permute.xlu1 %9633 }
 0x67c   : > { %v9982_v19 = vsel %vm477_vm5, %v21458_v38, %v9634_v56 }
 0x67d   : > { %v9848_v18 = vpop.permute.xlu0 %9847 }
 0x67e   : > { %v10036_v13 = vsel %vm10007_vm6, %v9981_v37, %v9848_v18 }
 0x67f   : > { %v9850_v17 = vpop.permute.xlu1 %9849  ;;  %10091 = vst.msk [vmem:[%s19521_s18 + $0xe0] sm:$0xff] %vm10062_vm0, %v10036_v13  ;;  %v21467_v13 = vld [vmem:[#allocation23_spill] sm:$0xff] }
 0x680   : > { %v10037_v10 = vsel %vm10007_vm6, %v9982_v19, %v9850_v17 }
 0x681   : > { %10092 = vst.msk [vmem:[%s19521_s18 + $0xe8] sm:$0xff] %vm10062_vm0, %v10037_v10  ;;  %v9636_v1 = vpop.permute.xlu0 %9635  ;;  %v21468_v10 = vld [vmem:[#allocation85_spill] sm:$0xff] }
 0x682   : > { %v9983_v4 = vsel %vm477_vm5, %v21459_v9, %v9636_v1 }
 0x683   : > { %v9638_v12 = vpop.permute.xlu1 %9637 }
 0x684   : > { %v9984_v48 = vsel %vm477_vm5, %v21460_v54, %v9638_v12  ;;  %v21469_v54 = vld [vmem:[#allocation41_spill] sm:$0xff] }
 0x685   : > { %v9852_v0 = vpop.permute.xlu0 %9851 }
 0x686   : > { %v10038_v49 = vsel %vm10007_vm6, %v9983_v4, %v9852_v0 }
 0x687   : > { %v9854_v33 = vpop.permute.xlu1 %9853  ;;  %10093 = vst.msk [vmem:[%s19521_s18 + $0xf0] sm:$0xff] %vm10062_vm0, %v10038_v49 }
 0x688   : > { %v10039_v29 = vsel %vm10007_vm6, %v9984_v48, %v9854_v33  ;;  %v21470_v33 = vld [vmem:[#allocation22_spill] sm:$0xff] }
 0x689   : > { %10094 = vst.msk [vmem:[%s19521_s18 + $0xf8] sm:$0xff] %vm10062_vm0, %v10039_v29  ;;  %v9640_v20 = vpop.permute.xlu0 %9639 }
 0x68a   : > { %v9985_v47 = vsel %vm477_vm5, %v21461_v25, %v9640_v20 }
 0x68b   : > { %v9642_v46 = vpop.permute.xlu1 %9641 }
 0x68c   : > { %v9986_v42 = vsel %vm477_vm5, %v21462_v16, %v9642_v46 }
 0x68d   : > { %v9856_v62 = vpop.permute.xlu0 %9855 }
 0x68e   : > { %v10040_v51 = vsel %vm10007_vm6, %v9985_v47, %v9856_v62 }
 0x68f   : > { %v9858_v52 = vpop.permute.xlu1 %9857  ;;  %10095 = vst.msk [vmem:[%s19521_s18 + $0x100] sm:$0xff] %vm10062_vm0, %v10040_v51 }
 0x690   : > { %v10041_v40 = vsel %vm10007_vm6, %v9986_v42, %v9858_v52 }
 0x691   : > { %10096 = vst.msk [vmem:[%s19521_s18 + $0x108] sm:$0xff] %vm10062_vm0, %v10041_v40  ;;  %v9644_v6 = vpop.permute.xlu0 %9643 }
 0x692   : > { %v9987_v59 = vsel %vm477_vm5, %v21463_v45, %v9644_v6 }
 0x693   : > { %v9646_v8 = vpop.permute.xlu1 %9645 }
 0x694   : > { %v9988_v21 = vsel %vm477_vm5, %v21464_v63, %v9646_v8 }
 0x695   : > { %v9860_v35 = vpop.permute.xlu0 %9859 }
 0x696   : > { %v10042_v14 = vsel %vm10007_vm6, %v9987_v59, %v9860_v35 }
 0x697   : > { %v9862_v36 = vpop.permute.xlu1 %9861  ;;  %10097 = vst.msk [vmem:[%s19521_s18 + $0x110] sm:$0xff] %vm10062_vm0, %v10042_v14 }
 0x698   : > { %v10043_v50 = vsel %vm10007_vm6, %v9988_v21, %v9862_v36 }
 0x699   : > { %10098 = vst.msk [vmem:[%s19521_s18 + $0x118] sm:$0xff] %vm10062_vm0, %v10043_v50  ;;  %v9648_v31 = vpop.permute.xlu0 %9647 }
 0x69a   : > { %v9989_v26 = vsel %vm477_vm5, %v21465_v30, %v9648_v31  ;;  %v21471_v31 = vld [vmem:[#allocation90_spill] sm:$0xff] }
 0x69b   : > { %v9650_v39 = vpop.permute.xlu1 %9649 }
 0x69c   : > { %v9990_v57 = vsel %vm477_vm5, %v21466_v5, %v9650_v39 }
 0x69d   : > { %v9864_v7 = vpop.permute.xlu0 %9863 }
 0x69e   : > { %v10044_v22 = vsel %vm10007_vm6, %v9989_v26, %v9864_v7 }
 0x69f   : > { %v9866_v27 = vpop.permute.xlu1 %9865  ;;  %10099 = vst.msk [vmem:[%s19521_s18 + $0x120] sm:$0xff] %vm10062_vm0, %v10044_v22 }
 0x6a0   : > { %v10045_v3 = vsel %vm10007_vm6, %v9990_v57, %v9866_v27 }
 0x6a1   : > { %10100 = vst.msk [vmem:[%s19521_s18 + $0x128] sm:$0xff] %vm10062_vm0, %v10045_v3  ;;  %v9652_v44 = vpop.permute.xlu0 %9651 }
 0x6a2   : > { %v9991_v60 = vsel %vm477_vm5, %v19285_v34, %v9652_v44 }
 0x6a3   : > { %v9654_v24 = vpop.permute.xlu1 %9653 }
 0x6a4   : > { %v9992_v56 = vsel %vm477_vm5, %v19287_v61, %v9654_v24 }
 0x6a5   : > { %v9868_v53 = vpop.permute.xlu0 %9867 }
 0x6a6   : > { %v10046_v15 = vsel %vm10007_vm6, %v9991_v60, %v9868_v53 }
 0x6a7   : > { %v9870_v37 = vpop.permute.xlu1 %9869  ;;  %10101 = vst.msk [vmem:[%s19521_s18 + $0x130] sm:$0xff] %vm10062_vm0, %v10046_v15 }
 0x6a8   : > { %v10047_v18 = vsel %vm10007_vm6, %v9992_v56, %v9870_v37 }
 0x6a9   : > { %10102 = vst.msk [vmem:[%s19521_s18 + $0x138] sm:$0xff] %vm10062_vm0, %v10047_v18  ;;  %v9656_v38 = vpop.permute.xlu0 %9655 }
 0x6aa   : > { %v9993_v34 = vsel %vm477_vm5, %v21467_v13, %v9656_v38 }
 0x6ab   : > { %v9658_v19 = vpop.permute.xlu1 %9657 }
 0x6ac   : > { %v9994_v61 = vsel %vm477_vm5, %v21468_v10, %v9658_v19 }
 0x6ad   : > { %v9872_v17 = vpop.permute.xlu0 %9871 }
 0x6ae   : > { %v10048_v1 = vsel %vm10007_vm6, %v9993_v34, %v9872_v17 }
 0x6af   : > { %v9874_v12 = vpop.permute.xlu1 %9873  ;;  %10103 = vst.msk [vmem:[%s19521_s18 + $0x140] sm:$0xff] %vm10062_vm0, %v10048_v1 }
 0x6b0   : > { %v10049_v9 = vsel %vm10007_vm6, %v9994_v61, %v9874_v12 }
 0x6b1   : > { %10104 = vst.msk [vmem:[%s19521_s18 + $0x148] sm:$0xff] %vm10062_vm0, %v10049_v9  ;;  %v9660_v4 = vpop.permute.xlu0 %9659 }
 0x6b2   : > { %v9995_v48 = vsel %vm477_vm5, %v21469_v54, %v9660_v4 }
 0x6b3   : > { %v9662_v0 = vpop.permute.xlu1 %9661 }
 0x6b4   : > { %v9996_v29 = vsel %vm477_vm5, %v21470_v33, %v9662_v0 }
 0x6b5   : > { %v9876_v49 = vpop.permute.xlu0 %9875 }
 0x6b6   : > { %v10050_v20 = vsel %vm10007_vm6, %v9995_v48, %v9876_v49 }
 0x6b7   : > { %v9878_v46 = vpop.permute.xlu1 %9877  ;;  %10105 = vst.msk [vmem:[%s19521_s18 + $0x150] sm:$0xff] %vm10062_vm0, %v10050_v20 }
 0x6b8   : > { %v10051_v25 = vsel %vm10007_vm6, %v9996_v29, %v9878_v46 }
 0x6b9   : > { %10106 = vst.msk [vmem:[%s19521_s18 + $0x158] sm:$0xff] %vm10062_vm0, %v10051_v25  ;;  %v9664_v47 = vpop.permute.xlu0 %9663 }
 0x6ba   : > { %v9997_v16 = vsel %vm477_vm5, %v19378_v11, %v9664_v47 }
 0x6bb   : > { %v9666_v62 = vpop.permute.xlu1 %9665 }
 0x6bc   : > { %v9998_v51 = vsel %vm477_vm5, %v19381_v41, %v9666_v62 }
 0x6bd   : > { %v9880_v42 = vpop.permute.xlu0 %9879 }
 0x6be   : > { %v10052_v52 = vsel %vm10007_vm6, %v9997_v16, %v9880_v42 }
 0x6bf   : > { %v9882_v40 = vpop.permute.xlu1 %9881  ;;  %10107 = vst.msk [vmem:[%s19521_s18 + $0x160] sm:$0xff] %vm10062_vm0, %v10052_v52 }
 0x6c0   : > { %v10053_v6 = vsel %vm10007_vm6, %v9998_v51, %v9882_v40 }
 0x6c1   : > { %10108 = vst.msk [vmem:[%s19521_s18 + $0x168] sm:$0xff] %vm10062_vm0, %v10053_v6  ;;  %v9668_v8 = vpop.permute.xlu0 %9667 }
 0x6c2   : > { %v9999_v11 = vsel %vm477_vm5, %v19406_v43, %v9668_v8 }
 0x6c3   : > { %v9670_v45 = vpop.permute.xlu1 %9669 }
 0x6c4   : > { %v10000_v41 = vsel %vm477_vm5, %v19409_v58, %v9670_v45 }
 0x6c5   : > { %v9884_v59 = vpop.permute.xlu0 %9883 }
 0x6c6   : > { %v10054_v35 = vsel %vm10007_vm6, %v9999_v11, %v9884_v59 }
 0x6c7   : > { %v9886_v63 = vpop.permute.xlu1 %9885  ;;  %10109 = vst.msk [vmem:[%s19521_s18 + $0x170] sm:$0xff] %vm10062_vm0, %v10054_v35 }
 0x6c8   : > { %v10055_v21 = vsel %vm10007_vm6, %v10000_v41, %v9886_v63 }
 0x6c9   : > { %10110 = vst.msk [vmem:[%s19521_s18 + $0x178] sm:$0xff] %vm10062_vm0, %v10055_v21  ;;  %v9672_v14 = vpop.permute.xlu0 %9671 }
 0x6ca   : > { %v10001_v43 = vsel %vm477_vm5, %v19434_v23, %v9672_v14 }
 0x6cb   : > { %v9674_v36 = vpop.permute.xlu1 %9673 }
 0x6cc   : > { %v10002_v58 = vsel %vm477_vm5, %v21471_v31, %v9674_v36 }
 0x6cd   : > { %v9888_v50 = vpop.permute.xlu0 %9887 }
 0x6ce   : > { %v10056_v39 = vsel %vm10007_vm6, %v10001_v43, %v9888_v50 }
 0x6cf   : > { %v9890_v30 = vpop.permute.xlu1 %9889  ;;  %10111 = vst.msk [vmem:[%s19521_s18 + $0x180] sm:$0xff] %vm10062_vm0, %v10056_v39 }
 0x6d0   : > { %v10057_v26 = vsel %vm10007_vm6, %v10002_v58, %v9890_v30 }
 0x6d1   : > { %10112 = vst.msk [vmem:[%s19521_s18 + $0x188] sm:$0xff] %vm10062_vm0, %v10057_v26  ;;  %v9676_v7 = vpop.permute.xlu0 %9675 }
 0x6d2   : > { %v10003_v23 = vsel %vm477_vm5, %v19462_v55, %v9676_v7 }
 0x6d3   : > { %v9678_v5 = vpop.permute.xlu1 %9677 }
 0x6d4   : > { %v10004_v22 = vsel %vm477_vm5, %v19465_v28, %v9678_v5 }
 0x6d5   : > { %v9892_v57 = vpop.permute.xlu0 %9891 }
 0x6d6   : > { %v10058_v27 = vsel %vm10007_vm6, %v10003_v23, %v9892_v57 }
 0x6d7   : > { %v9894_v3 = vpop.permute.xlu1 %9893  ;;  %10113 = vst.msk [vmem:[%s19521_s18 + $0x190] sm:$0xff] %vm10062_vm0, %v10058_v27 }
 0x6d8   : > { %v10059_v44 = vsel %vm10007_vm6, %v10004_v22, %v9894_v3 }
 0x6d9   : > { %10114 = vst.msk [vmem:[%s19521_s18 + $0x198] sm:$0xff] %vm10062_vm0, %v10059_v44  ;;  %v9680_v24 = vpop.permute.xlu0 %9679 }
 0x6da   : > { %v10005_v53 = vsel %vm477_vm5, %v19490_v32, %v9680_v24 }
 0x6db   : > { %v9682_v60 = vpop.permute.xlu1 %9681 }
 0x6dc   : > { %v10006_v56 = vsel %vm477_vm5, %v19493_v2, %v9682_v60 }
 0x6dd   : > { %v9896_v55 = vpop.permute.xlu0 %9895 }
 0x6de   : > { %v10060_v28 = vsel %vm10007_vm6, %v10005_v53, %v9896_v55 }
 0x6df   : > { %v9898_v15 = vpop.permute.xlu1 %9897  ;;  %10115 = vst.msk [vmem:[%s19521_s18 + $0x1a0] sm:$0xff] %vm10062_vm0, %v10060_v28 }
 0x6e0   : > { %v10061_v37 = vsel %vm10007_vm6, %v10006_v56, %v9898_v15 }
 0x6e1   : > { %10116 = vst.msk [vmem:[%s19521_s18 + $0x1a8] sm:$0xff] %vm10062_vm0, %v10061_v37 }
 0x6e2 PF: > { %s18_s27 = sadd.s32 1, %s12229_s27  }
 0x6e3   : > { %p15_p4 = scmp.ge.s32.totalorder %s18_s27, 4  }
 0x6e5   :  { %17 = sbr.rel (!%p15_p4) target bundleno = 1 (0x1), region = 90 }

</bundles_post_ra>
